<compile_context>
chip_gen: v7x
topology: tpu7x:2x2x1
jax: 0.10.0
libtpu: 0.0.40
codegen_flags: <defaults>
</compile_context>

<pallas_src>
import functools

import numpy as np
import jax
import jax.numpy as jnp
from jax.experimental import pallas as pl
from jax.experimental.pallas import tpu as pltpu

# ----------------------- small synthetic Swin config -----------------------
IMG_SIZE = 32
PATCH = 4
IN_CHANS = 3
EMBED_DIM = 32
DEPTHS = (2, 2)
NUM_HEADS = (2, 4)
WINDOW_SIZE = 4
MLP_RATIO = 4
EPS = 1e-5
NEG = -1e9          # "minus infinity" for out-of-window attention logits


# --------------------------- in-kernel helpers ------------------------------
def _ln(x, g, b, eps=EPS):
    x = x.astype(jnp.float32)
    mu = jnp.mean(x, axis=-1, keepdims=True)
    var = jnp.mean((x - mu) ** 2, axis=-1, keepdims=True)
    return (x - mu) * jax.lax.rsqrt(var + eps) * g + b


def _gelu(x):
    # TODO(synk): PyTorch nn.GELU default is exact erf-GELU; tanh approximation is used since
    # erf has no guaranteed Mosaic lowering.
    return 0.5 * x * (1.0 + jnp.tanh(0.7978845608028654 * (x + 0.044715 * x * x * x)))


def _bf16(x):
    return x.astype(jnp.bfloat16)


# ------------------------------ Pallas kernel --------------------------------
def _stage_kernel(x_ref, inw_ref, inb_ref, ing_ref, inbt_ref,
                  bias_ref,
                  n1g_ref, n1b_ref, wqkv_ref, bqkv_ref, wo_ref, bo_ref,
                  n2g_ref, n2b_ref, w1_ref, b1_ref, w2_ref, b2_ref,
                  fg_ref, fb_ref,
                  o_ref, attn_sc,
                  *, depth, heads, scale, front, pool):
    """One full Swin stage (front projection + `depth` blocks [+ final LN + pool]) for the
    rows owned by this grid step (whole batch, or half of it on v7x)."""
    xin = x_ref[...].astype(jnp.float32)

    # ----- front op: PatchEmbed (matmul -> LN)   or   PatchMerging (LN -> matmul) -----
    if front == "embed":
        y = jnp.dot(_bf16(xin), inw_ref[...],
                    preferred_element_type=jnp.float32) + inb_ref[...]
        x = _ln(y, ing_ref[...], inbt_ref[...])
    else:  # "merge"
        y = _ln(xin, ing_ref[...], inbt_ref[...])
        x = jnp.dot(_bf16(y), inw_ref[...],
                    preferred_element_type=jnp.float32) + inb_ref[...]

    M, C = x.shape
    d = C // heads

    # ------------------------- Swin blocks (statically unrolled) -------------------------
    for bi in range(depth):
        # W-MSA / SW-MSA: window membership + cyclic shift + rel-pos bias are all encoded in
        # the dense additive bias, so attention is one dense (M, M) matmul per head.
        h = _ln(x, n1g_ref[bi], n1b_ref[bi])
        qkv = jnp.dot(_bf16(h), wqkv_ref[bi],
                      preferred_element_type=jnp.float32) + bqkv_ref[bi]       # (M, 3C)
        q = qkv[:, :C] * scale
        k = qkv[:, C:2 * C]
        v = qkv[:, 2 * C:]
        for hh in range(heads):                                                # static unroll
            cs = slice(hh * d, (hh + 1) * d)
            s = jax.lax.dot_general(_bf16(q[:, cs]), _bf16(k[:, cs]),
                                    (((1,), (1,)), ((), ())),
                                    preferred_element_type=jnp.float32)        # (M, M)
            s = s + bias_ref[bi, hh]
            s = s - jnp.max(s, axis=-1, keepdims=True)
            p = jnp.exp(s)
            p = p * pl.reciprocal(jnp.sum(p, axis=-1, keepdims=True), approx=True)
            attn_sc[:, cs] = jnp.dot(_bf16(p), _bf16(v[:, cs]),
                                     preferred_element_type=jnp.float32)
        proj = jnp.dot(_bf16(attn_sc[...]), wo_ref[bi],
                       preferred_element_type=jnp.float32) + bo_ref[bi]
        x = x + proj                               # residual; drop_path == identity (eval)

        # MLP.
        m = _ln(x, n2g_ref[bi], n2b_ref[bi])
        m = _gelu(jnp.dot(_bf16(m), w1_ref[bi],
                          preferred_element_type=jnp.float32) + b1_ref[bi])
        m = jnp.dot(_bf16(m), w2_ref[bi],
                    preferred_element_type=jnp.float32) + b2_ref[bi]
        x = x + m

    # ----- tail: final LayerNorm + AdaptiveAvgPool1d(1) over the CHANNEL dim (last stage) -----
    if pool:
        y = _ln(x, fg_ref[...], fb_ref[...])
        o_ref[...] = jnp.mean(y, axis=-1, keepdims=True).astype(o_ref.dtype)
    else:
        o_ref[...] = x.astype(o_ref.dtype)


# ------------------------------ host-side helpers ----------------------------
@functools.lru_cache(maxsize=None)
def _grid_steps(n_imgs):
    """v7x has 2 TensorCores fed only via 'parallel' grid axes; on v5e/v6e an extra grid step
    is pure per-step overhead, so use a single step there."""
    try:
        kind = jax.devices()[0].device_kind.lower()
    except Exception:
        kind = ""
    return 2 if ("v7" in kind and n_imgs % 2 == 0) else 1


@functools.lru_cache(maxsize=None)
def _dense_attn_layout(H, W, ws, shift, imgs):
    """Static (numpy) layout for dense masked attention over imgs*H*W tokens kept in ORIGINAL
    row order: per-pair intra-window rel-pos index, SW-MSA region mask, window membership."""
    hh, ww = np.meshgrid(np.arange(H), np.arange(W), indexing="ij")
    si = (hh - shift) % H                      # coordinate after the cyclic shift (roll -shift)
    sj = (ww - shift) % W
    win = (si // ws) * (W // ws) + (sj // ws)
    intra = (si % ws) * ws + (sj % ws)
    if shift > 0:
        def reg(c, size):                      # the 3 regions of the official img_mask slices
            return np.where(c < size - ws, 0, np.where(c < size - shift, 1, 2))
        region = reg(si, H) * 3 + reg(sj, W)
    else:
        region = np.zeros_like(si)
    win, intra, region = win.reshape(-1), intra.reshape(-1), region.reshape(-1)
    N = ws * ws
    pair_idx = (intra[:, None] * N + intra[None, :]).astype(np.int32)          # (L, L)
    add = np.where(region[:, None] == region[None, :], 0.0, -100.0).astype(np.float32)
    same_win = win[:, None] == win[None, :]
    if imgs > 1:                               # block-diagonal across the images of one step
        pair_idx = np.tile(pair_idx, (imgs, imgs))
        add = np.tile(add, (imgs, imgs))
        same_win = np.kron(np.eye(imgs, dtype=bool), same_win)
    return pair_idx, add, same_win


def relative_position_bias(table, ws, heads):
    coords = np.stack(np.meshgrid(np.arange(ws), np.arange(ws), indexing="ij"))
    cf = coords.reshape(2, -1)
    rel = (cf[:, :, None] - cf[:, None, :]).transpose(1, 2, 0).astype(np.int32)
    rel[:, :, 0] += ws - 1
    rel[:, :, 1] += ws - 1
    rel[:, :, 0] *= 2 * ws - 1
    idx = rel.sum(-1).reshape(-1)                              # (N*N,)
    bias = table[idx].reshape(ws * ws, ws * ws, heads)
    return jnp.transpose(bias, (2, 0, 1))                      # (heads, N, N)


def dense_bias(rel_table, heads, H, W, ws, shift, imgs):
    """(heads, imgs*L, imgs*L) additive bias: rel-pos bias inside each (shifted) window,
    -100 for same-window/different-region (SW-MSA mask), -1e9 off-window/off-image."""
    N = ws * ws
    pair_idx, add, same_win = _dense_attn_layout(H, W, ws, shift, imgs)
    rel = relative_position_bias(rel_table, ws, heads).reshape(heads, N * N)
    dense = rel[:, pair_idx] + jnp.asarray(add)[None]
    return jnp.where(jnp.asarray(same_win)[None], dense, NEG)


# ------------------------------ stage wrapper --------------------------------
def run_stage(x_rows, in_w, in_b, in_g, in_bt, blocks, heads, res, ws, *, front, final=None):
    H, W = res
    L = H * W
    Cin, C = in_w.shape
    n_imgs = x_rows.shape[0] // L
    steps = _grid_steps(n_imgs)
    G = n_imgs // steps                    # images per grid step
    M = G * L                              # rows per grid step
    depth = len(blocks)
    hidden = blocks[0]["fc1_w"].shape[1]
    bf16 = jnp.bfloat16

    in_w = in_w.astype(bf16)
    in_b = (jnp.zeros((C,), jnp.float32) if in_b is None else in_b).reshape(1, C)
    Cln = C if front == "embed" else Cin   # dim the front LayerNorm acts on
    in_g = in_g.reshape(1, Cln)
    in_bt = in_bt.reshape(1, Cln)

    # Per-block params stacked along a leading `depth` axis; MXU operands in bf16.
    n1g = jnp.stack([b["norm1_g"].reshape(1, C) for b in blocks])
    n1b = jnp.stack([b["norm1_b"].reshape(1, C) for b in blocks])
    wqkv = jnp.stack([b["qkv_w"] for b in blocks]).astype(bf16)
    bqkv = jnp.stack([b["qkv_b"].reshape(1, 3 * C) for b in blocks])
    wo = jnp.stack([b["proj_w"] for b in blocks]).astype(bf16)
    bo = jnp.stack([b["proj_b"].reshape(1, C) for b in blocks])
    n2g = jnp.stack([b["norm2_g"].reshape(1, C) for b in blocks])
    n2b = jnp.stack([b["norm2_b"].reshape(1, C) for b in blocks])
    w1 = jnp.stack([b["fc1_w"] for b in blocks]).astype(bf16)
    b1 = jnp.stack([b["fc1_b"].reshape(1, hidden) for b in blocks])
    w2 = jnp.stack([b["fc2_w"] for b in blocks]).astype(bf16)
    b2 = jnp.stack([b["fc2_b"].reshape(1, C) for b in blocks])

    shifts = [0 if (bi % 2 == 0 or min(res) <= ws) else ws // 2 for bi in range(depth)]
    bias = jnp.stack([dense_bias(blocks[bi]["rel_table"], heads, H, W, ws, shifts[bi], G)
                      for bi in range(depth)])                    # (depth, heads, M, M)

    pool = final is not None
    if pool:
        fg = final[0].reshape(1, C)
        fb = final[1].reshape(1, C)
    else:
        fg = jnp.zeros((1, C), jnp.float32)
        fb = jnp.zeros((1, C), jnp.float32)
    out_dim = 1 if pool else C

    kernel = functools.partial(_stage_kernel, depth=depth, heads=heads,
                               scale=(C // heads) ** -0.5, front=front, pool=pool)
    row = lambda s: (s, 0)
    c2 = lambda s: (0, 0)
    c3 = lambda s: (0, 0, 0)
    c4 = lambda s: (0, 0, 0, 0)

    out = pl.pallas_call(
        kernel,
        out_shape=jax.ShapeDtypeStruct((n_imgs * L, out_dim), x_rows.dtype),
        grid=(steps,),
        in_specs=[
            pl.BlockSpec((M, Cin), row),                                     # activations
            pl.BlockSpec((Cin, C), c2), pl.BlockSpec((1, C), c2),            # front proj W, b
            pl.BlockSpec((1, Cln), c2), pl.BlockSpec((1, Cln), c2),          # front LN g, b
            pl.BlockSpec((depth, heads, M, M), c4),                          # attn bias + mask
            pl.BlockSpec((depth, 1, C), c3), pl.BlockSpec((depth, 1, C), c3),            # norm1
            pl.BlockSpec((depth, C, 3 * C), c3), pl.BlockSpec((depth, 1, 3 * C), c3),    # qkv
            pl.BlockSpec((depth, C, C), c3), pl.BlockSpec((depth, 1, C), c3),            # proj
            pl.BlockSpec((depth, 1, C), c3), pl.BlockSpec((depth, 1, C), c3),            # norm2
            pl.BlockSpec((depth, C, hidden), c3), pl.BlockSpec((depth, 1, hidden), c3),  # fc1
            pl.BlockSpec((depth, hidden, C), c3), pl.BlockSpec((depth, 1, C), c3),       # fc2
            pl.BlockSpec((1, C), c2), pl.BlockSpec((1, C), c2),              # final LN g, b
        ],
        out_specs=pl.BlockSpec((M, out_dim), row),
        scratch_shapes=[pltpu.VMEM((M, C), jnp.float32)],
        compiler_params=pltpu.CompilerParams(dimension_semantics=("parallel",)),
    )(x_rows, in_w, in_b, in_g, in_bt, bias,
      n1g, n1b, wqkv, bqkv, wo, bo, n2g, n2b, w1, b1, w2, b2, fg, fb)
    return out


# ------------------------------ forward pass ---------------------------------
def swin_forward(params, x):
    # x: (B, 3, H, W)  NCHW
    B, Cin, H, W = x.shape
    P = PATCH
    # PatchEmbed im2col (tiny XLA relayout, ~12 KB/img): Conv2d(3,C,k=P,s=P) flattened per
    # patch; the matmul + LayerNorm themselves run inside the stage-1 kernel.
    # NOTE: a real PyTorch conv weight (out,in,kh,kw) must be permuted to (in*kh*kw, out).
    xp = x.reshape(B, Cin, H // P, P, W // P, P).transpose(0, 2, 4, 1, 3, 5)
    rows = xp.reshape(B * (H // P) * (W // P), Cin * P * P)
    res = (H // P, W // P)
    dim = EMBED_DIM
    # pos_drop: Dropout(p=0.0) -> identity

    pe = params["patch_embed"]
    in_w, in_b, in_g, in_bt = pe["proj_w"], pe["proj_b"], pe["norm_g"], pe["norm_b"]
    front = "embed"

    n_stages = len(params["layers"])
    for li, layer in enumerate(params["layers"]):
        heads = NUM_HEADS[li]
        ws = min(WINDOW_SIZE, min(res))
        last = li == n_stages - 1
        final = (params["norm_g"], params["norm_b"]) if last else None
        rows = run_stage(rows, in_w, in_b, in_g, in_bt, layer["blocks"],
                         heads, res, ws, front=front, final=final)
        if not last:
            # PatchMerging space-to-depth gather (tiny XLA relayout); its LayerNorm and the
            # 4C -> 2C reduction matmul are fused into the next stage's kernel front.
            Hc, Wc = res
            yb = rows.reshape(B, Hc, Wc, dim)
            rows = jnp.concatenate(
                [yb[:, 0::2, 0::2, :], yb[:, 1::2, 0::2, :],
                 yb[:, 0::2, 1::2, :], yb[:, 1::2, 1::2, :]], axis=-1,
            ).reshape(B * (Hc // 2) * (Wc // 2), 4 * dim)
            ds = layer["downsample"]
            in_w, in_b, in_g, in_bt = ds["red_w"], None, ds["norm_g"], ds["norm_b"]
            front = "merge"
            res = (Hc // 2, Wc // 2)
            dim *= 2

    # down2 == LayerNorm(C) + AdaptiveAvgPool1d(1) over the CHANNEL dim + squeeze(2);
    # it is fused into the last stage kernel, so `rows` is already (B*L, 1).
    return rows.reshape(B, res[0] * res[1])


# ------------------------------ parameter init ------------------------------
def init_params(key):
    keys = iter(jax.random.split(key, 128))

    def w(shape, std=0.02):
        return std * jax.random.normal(next(keys), shape, dtype=jnp.float32)

    def g(shape):
        return 1.0 + 0.02 * jax.random.normal(next(keys), shape, dtype=jnp.float32)

    params = {
        "patch_embed": dict(
            proj_w=w((IN_CHANS * PATCH * PATCH, EMBED_DIM)),
            proj_b=w((EMBED_DIM,)),
            norm_g=g((EMBED_DIM,)),
            norm_b=w((EMBED_DIM,)),
        )
    }
    layers = []
    res = (IMG_SIZE // PATCH, IMG_SIZE // PATCH)
    dim = EMBED_DIM
    for li, (depth, heads) in enumerate(zip(DEPTHS, NUM_HEADS)):
        ws = min(WINDOW_SIZE, min(res))
        blocks = []
        for _ in range(depth):
            hidden = dim * MLP_RATIO
            blocks.append(dict(
                norm1_g=g((dim,)), norm1_b=w((dim,)),
                qkv_w=w((dim, 3 * dim)), qkv_b=w((3 * dim,)),
                proj_w=w((dim, dim)), proj_b=w((dim,)),
                rel_table=w(((2 * ws - 1) ** 2, heads)),
                norm2_g=g((dim,)), norm2_b=w((dim,)),
                fc1_w=w((dim, hidden)), fc1_b=w((hidden,)),
                fc2_w=w((hidden, dim)), fc2_b=w((dim,)),
            ))
        layer = {"blocks": blocks}
        if li < len(DEPTHS) - 1:
            layer["downsample"] = dict(
                norm_g=g((4 * dim,)), norm_b=w((4 * dim,)),
                red_w=w((4 * dim, 2 * dim)),
            )
            dim *= 2
            res = (res[0] // 2, res[1] // 2)
        layers.append(layer)
    params["layers"] = layers
    params["norm_g"] = g((dim,))
    params["norm_b"] = w((dim,))
    return params


# ----------------------------------- main ------------------------------------
if __name__ == "__main__":
    key = jax.random.PRNGKey(0)
    pkey, xkey = jax.random.split(key)
    params = init_params(pkey)
    x = jax.random.normal(xkey, (2, IN_CHANS, IMG_SIZE, IMG_SIZE), dtype=jnp.float32)

    fwd = jax.jit(swin_forward)
    out = fwd(params, x)
    jax.block_until_ready(out)

    L_final = (IMG_SIZE // PATCH // 2) ** 2
    assert out.shape == (2, L_final), out.shape
    assert jnp.all(jnp.isfinite(out))
    print("KERNEL_OK")
</pallas_src>

<mosaic_0001>
module attributes {stable_mosaic.version = 11 : i64} {
  func.func @_stage_kernel(%arg0: i32, %arg1: memref<128x48xf32, #tpu.memory_space<vmem>>, %arg2: memref<48x32xbf16, #tpu.memory_space<vmem>>, %arg3: memref<1x32xf32, #tpu.memory_space<vmem>>, %arg4: memref<1x32xf32, #tpu.memory_space<vmem>>, %arg5: memref<1x32xf32, #tpu.memory_space<vmem>>, %arg6: memref<2x2x128x128xf32, #tpu.memory_space<vmem>>, %arg7: memref<2x1x32xf32, #tpu.memory_space<vmem>>, %arg8: memref<2x1x32xf32, #tpu.memory_space<vmem>>, %arg9: memref<2x32x96xbf16, #tpu.memory_space<vmem>>, %arg10: memref<2x1x96xf32, #tpu.memory_space<vmem>>, %arg11: memref<2x32x32xbf16, #tpu.memory_space<vmem>>, %arg12: memref<2x1x32xf32, #tpu.memory_space<vmem>>, %arg13: memref<2x1x32xf32, #tpu.memory_space<vmem>>, %arg14: memref<2x1x32xf32, #tpu.memory_space<vmem>>, %arg15: memref<2x32x128xbf16, #tpu.memory_space<vmem>>, %arg16: memref<2x1x128xf32, #tpu.memory_space<vmem>>, %arg17: memref<2x128x32xbf16, #tpu.memory_space<vmem>>, %arg18: memref<2x1x32xf32, #tpu.memory_space<vmem>>, %arg19: memref<1x32xf32, #tpu.memory_space<vmem>>, %arg20: memref<1x32xf32, #tpu.memory_space<vmem>>, %arg21: memref<128x32xf32, #tpu.memory_space<vmem>>, %arg22: memref<128x32xf32, #tpu.memory_space<vmem>>) attributes {dimension_semantics = [#tpu.dimension_semantics<parallel>], iteration_bounds = array<i64: 1>, scalar_prefetch = 0 : i64, scratch_operands = 1 : i64, tpu.core_type = #tpu.core_type<tc>, window_params = [{transform_indices = @transform_0, window_bounds = array<i64: 128, 48>}, {pipeline_mode = #tpu.pipeline_mode<synchronous>, transform_indices = @transform_1, window_bounds = array<i64: 48, 32>}, {pipeline_mode = #tpu.pipeline_mode<synchronous>, transform_indices = @transform_2, window_bounds = array<i64: 1, 32>}, {pipeline_mode = #tpu.pipeline_mode<synchronous>, transform_indices = @transform_3, window_bounds = array<i64: 1, 32>}, {pipeline_mode = #tpu.pipeline_mode<synchronous>, transform_indices = @transform_4, window_bounds = array<i64: 1, 32>}, {pipeline_mode = #tpu.pipeline_mode<synchronous>, transform_indices = @transform_5, window_bounds = array<i64: 2, 2, 128, 128>}, {pipeline_mode = #tpu.pipeline_mode<synchronous>, transform_indices = @transform_6, window_bounds = array<i64: 2, 1, 32>}, {pipeline_mode = #tpu.pipeline_mode<synchronous>, transform_indices = @transform_7, window_bounds = array<i64: 2, 1, 32>}, {pipeline_mode = #tpu.pipeline_mode<synchronous>, transform_indices = @transform_8, window_bounds = array<i64: 2, 32, 96>}, {pipeline_mode = #tpu.pipeline_mode<synchronous>, transform_indices = @transform_9, window_bounds = array<i64: 2, 1, 96>}, {pipeline_mode = #tpu.pipeline_mode<synchronous>, transform_indices = @transform_10, window_bounds = array<i64: 2, 32, 32>}, {pipeline_mode = #tpu.pipeline_mode<synchronous>, transform_indices = @transform_11, window_bounds = array<i64: 2, 1, 32>}, {pipeline_mode = #tpu.pipeline_mode<synchronous>, transform_indices = @transform_12, window_bounds = array<i64: 2, 1, 32>}, {pipeline_mode = #tpu.pipeline_mode<synchronous>, transform_indices = @transform_13, window_bounds = array<i64: 2, 1, 32>}, {pipeline_mode = #tpu.pipeline_mode<synchronous>, transform_indices = @transform_14, window_bounds = array<i64: 2, 32, 128>}, {pipeline_mode = #tpu.pipeline_mode<synchronous>, transform_indices = @transform_15, window_bounds = array<i64: 2, 1, 128>}, {pipeline_mode = #tpu.pipeline_mode<synchronous>, transform_indices = @transform_16, window_bounds = array<i64: 2, 128, 32>}, {pipeline_mode = #tpu.pipeline_mode<synchronous>, transform_indices = @transform_17, window_bounds = array<i64: 2, 1, 32>}, {pipeline_mode = #tpu.pipeline_mode<synchronous>, transform_indices = @transform_18, window_bounds = array<i64: 1, 32>}, {pipeline_mode = #tpu.pipeline_mode<synchronous>, transform_indices = @transform_19, window_bounds = array<i64: 1, 32>}, {transform_indices = @transform_20, window_bounds = array<i64: 128, 32>}]} {
    %c0 = arith.constant 0 : index
    %c0_0 = arith.constant 0 : index
    %0 = vector.load %arg1[%c0, %c0_0] : memref<128x48xf32, #tpu.memory_space<vmem>>, vector<128x48xf32>
    %1 = arith.truncf %0 : vector<128x48xf32> to vector<128x48xbf16>
    %c0_1 = arith.constant 0 : index
    %c0_2 = arith.constant 0 : index
    %2 = vector.load %arg2[%c0_1, %c0_2] : memref<48x32xbf16, #tpu.memory_space<vmem>>, vector<48x32xbf16>
    %cst = arith.constant dense<0.000000e+00> : vector<128x32xf32>
    %3 = tpu.matmul %1, %2, %cst {dimension_numbers = #tpu.dot_dimension_numbers<[1], [0], [0], [1], [0, 0, 1, 1], [], []>} : vector<128x48xbf16>, vector<48x32xbf16>, vector<128x32xf32> -> vector<128x32xf32>
    %c0_3 = arith.constant 0 : index
    %c0_4 = arith.constant 0 : index
    %4 = vector.load %arg3[%c0_3, %c0_4] : memref<1x32xf32, #tpu.memory_space<vmem>>, vector<1x32xf32>
    %5 = vector.broadcast %4 : vector<1x32xf32> to vector<128x32xf32>
    %6 = arith.addf %3, %5 : vector<128x32xf32>
    %c0_5 = arith.constant 0 : index
    %c0_6 = arith.constant 0 : index
    %7 = vector.load %arg4[%c0_5, %c0_6] : memref<1x32xf32, #tpu.memory_space<vmem>>, vector<1x32xf32>
    %c0_7 = arith.constant 0 : index
    %c0_8 = arith.constant 0 : index
    %8 = vector.load %arg5[%c0_7, %c0_8] : memref<1x32xf32, #tpu.memory_space<vmem>>, vector<1x32xf32>
    %cst_9 = arith.constant dense<0.000000e+00> : vector<128xf32>
    %9 = vector.multi_reduction <add>, %6, %cst_9 [1] : vector<128x32xf32> to vector<128xf32>
    %10 = vector.shape_cast %9 : vector<128xf32> to vector<128x1xf32>
    %cst_10 = arith.constant 3.200000e+01 : f32
    %11 = vector.broadcast %cst_10 : f32 to vector<128x1xf32>
    %12 = arith.divf %10, %11 : vector<128x1xf32>
    %13 = vector.broadcast %12 : vector<128x1xf32> to vector<128x32xf32>
    %14 = arith.subf %6, %13 : vector<128x32xf32>
    %15 = arith.mulf %14, %14 : vector<128x32xf32>
    %cst_11 = arith.constant dense<0.000000e+00> : vector<128xf32>
    %16 = vector.multi_reduction <add>, %15, %cst_11 [1] : vector<128x32xf32> to vector<128xf32>
    %17 = vector.shape_cast %16 : vector<128xf32> to vector<128x1xf32>
    %cst_12 = arith.constant 3.200000e+01 : f32
    %18 = vector.broadcast %cst_12 : f32 to vector<128x1xf32>
    %19 = arith.divf %17, %18 : vector<128x1xf32>
    %20 = vector.broadcast %12 : vector<128x1xf32> to vector<128x32xf32>
    %21 = arith.subf %6, %20 : vector<128x32xf32>
    %cst_13 = arith.constant 9.99999974E-6 : f32
    %22 = vector.broadcast %cst_13 : f32 to vector<128x1xf32>
    %23 = arith.addf %19, %22 : vector<128x1xf32>
    %24 = math.rsqrt %23 : vector<128x1xf32>
    %25 = vector.broadcast %24 : vector<128x1xf32> to vector<128x32xf32>
    %26 = arith.mulf %21, %25 : vector<128x32xf32>
    %27 = vector.broadcast %7 : vector<1x32xf32> to vector<128x32xf32>
    %28 = arith.mulf %26, %27 : vector<128x32xf32>
    %29 = vector.broadcast %8 : vector<1x32xf32> to vector<128x32xf32>
    %30 = arith.addf %28, %29 : vector<128x32xf32>
    %c0_14 = arith.constant 0 : index
    %c0_15 = arith.constant 0 : index
    %c0_16 = arith.constant 0 : index
    %31 = vector.load %arg7[%c0_14, %c0_15, %c0_16] : memref<2x1x32xf32, #tpu.memory_space<vmem>>, vector<1x1x32xf32>
    %32 = vector.shape_cast %31 : vector<1x1x32xf32> to vector<1x32xf32>
    %c0_17 = arith.constant 0 : index
    %c0_18 = arith.constant 0 : index
    %c0_19 = arith.constant 0 : index
    %33 = vector.load %arg8[%c0_17, %c0_18, %c0_19] : memref<2x1x32xf32, #tpu.memory_space<vmem>>, vector<1x1x32xf32>
    %34 = vector.shape_cast %33 : vector<1x1x32xf32> to vector<1x32xf32>
    %cst_20 = arith.constant dense<0.000000e+00> : vector<128xf32>
    %35 = vector.multi_reduction <add>, %30, %cst_20 [1] : vector<128x32xf32> to vector<128xf32>
    %36 = vector.shape_cast %35 : vector<128xf32> to vector<128x1xf32>
    %cst_21 = arith.constant 3.200000e+01 : f32
    %37 = vector.broadcast %cst_21 : f32 to vector<128x1xf32>
    %38 = arith.divf %36, %37 : vector<128x1xf32>
    %39 = vector.broadcast %38 : vector<128x1xf32> to vector<128x32xf32>
    %40 = arith.subf %30, %39 : vector<128x32xf32>
    %41 = arith.mulf %40, %40 : vector<128x32xf32>
    %cst_22 = arith.constant dense<0.000000e+00> : vector<128xf32>
    %42 = vector.multi_reduction <add>, %41, %cst_22 [1] : vector<128x32xf32> to vector<128xf32>
    %43 = vector.shape_cast %42 : vector<128xf32> to vector<128x1xf32>
    %cst_23 = arith.constant 3.200000e+01 : f32
    %44 = vector.broadcast %cst_23 : f32 to vector<128x1xf32>
    %45 = arith.divf %43, %44 : vector<128x1xf32>
    %46 = vector.broadcast %38 : vector<128x1xf32> to vector<128x32xf32>
    %47 = arith.subf %30, %46 : vector<128x32xf32>
    %cst_24 = arith.constant 9.99999974E-6 : f32
    %48 = vector.broadcast %cst_24 : f32 to vector<128x1xf32>
    %49 = arith.addf %45, %48 : vector<128x1xf32>
    %50 = math.rsqrt %49 : vector<128x1xf32>
    %51 = vector.broadcast %50 : vector<128x1xf32> to vector<128x32xf32>
    %52 = arith.mulf %47, %51 : vector<128x32xf32>
    %53 = vector.broadcast %32 : vector<1x32xf32> to vector<128x32xf32>
    %54 = arith.mulf %52, %53 : vector<128x32xf32>
    %55 = vector.broadcast %34 : vector<1x32xf32> to vector<128x32xf32>
    %56 = arith.addf %54, %55 : vector<128x32xf32>
    %57 = arith.truncf %56 : vector<128x32xf32> to vector<128x32xbf16>
    %c0_25 = arith.constant 0 : index
    %c0_26 = arith.constant 0 : index
    %c0_27 = arith.constant 0 : index
    %58 = vector.load %arg9[%c0_25, %c0_26, %c0_27] : memref<2x32x96xbf16, #tpu.memory_space<vmem>>, vector<1x32x96xbf16>
    %59 = vector.shape_cast %58 : vector<1x32x96xbf16> to vector<32x96xbf16>
    %cst_28 = arith.constant dense<0.000000e+00> : vector<128x96xf32>
    %60 = tpu.matmul %57, %59, %cst_28 {dimension_numbers = #tpu.dot_dimension_numbers<[1], [0], [0], [1], [0, 0, 1, 1], [], []>} : vector<128x32xbf16>, vector<32x96xbf16>, vector<128x96xf32> -> vector<128x96xf32>
    %c0_29 = arith.constant 0 : index
    %c0_30 = arith.constant 0 : index
    %c0_31 = arith.constant 0 : index
    %61 = vector.load %arg10[%c0_29, %c0_30, %c0_31] : memref<2x1x96xf32, #tpu.memory_space<vmem>>, vector<1x1x96xf32>
    %62 = vector.shape_cast %61 : vector<1x1x96xf32> to vector<1x96xf32>
    %63 = vector.broadcast %62 : vector<1x96xf32> to vector<128x96xf32>
    %64 = arith.addf %60, %63 : vector<128x96xf32>
    %65 = vector.extract_strided_slice %64 {offsets = [0, 0], sizes = [128, 32], strides = [1, 1]} : vector<128x96xf32> to vector<128x32xf32>
    %cst_32 = arith.constant 2.500000e-01 : f32
    %66 = vector.broadcast %cst_32 : f32 to vector<128x32xf32>
    %67 = arith.mulf %65, %66 : vector<128x32xf32>
    %68 = vector.extract_strided_slice %64 {offsets = [0, 32], sizes = [128, 32], strides = [1, 1]} : vector<128x96xf32> to vector<128x32xf32>
    %69 = vector.extract_strided_slice %64 {offsets = [0, 64], sizes = [128, 32], strides = [1, 1]} : vector<128x96xf32> to vector<128x32xf32>
    %70 = vector.extract_strided_slice %67 {offsets = [0, 0], sizes = [128, 16], strides = [1, 1]} : vector<128x32xf32> to vector<128x16xf32>
    %71 = arith.truncf %70 : vector<128x16xf32> to vector<128x16xbf16>
    %72 = vector.extract_strided_slice %68 {offsets = [0, 0], sizes = [128, 16], strides = [1, 1]} : vector<128x32xf32> to vector<128x16xf32>
    %73 = arith.truncf %72 : vector<128x16xf32> to vector<128x16xbf16>
    %cst_33 = arith.constant dense<0.000000e+00> : vector<128x128xf32>
    %74 = tpu.matmul %71, %73, %cst_33 {dimension_numbers = #tpu.dot_dimension_numbers<[1], [1], [0], [0], [0, 0, 1, 0], [], []>} : vector<128x16xbf16>, vector<128x16xbf16>, vector<128x128xf32> -> vector<128x128xf32>
    %c0_34 = arith.constant 0 : index
    %c0_35 = arith.constant 0 : index
    %c0_36 = arith.constant 0 : index
    %c0_37 = arith.constant 0 : index
    %75 = vector.load %arg6[%c0_34, %c0_35, %c0_36, %c0_37] : memref<2x2x128x128xf32, #tpu.memory_space<vmem>>, vector<1x1x128x128xf32>
    %76 = vector.shape_cast %75 : vector<1x1x128x128xf32> to vector<128x128xf32>
    %77 = arith.addf %74, %76 : vector<128x128xf32>
    %cst_38 = arith.constant dense<0xFF800000> : vector<128xf32>
    %78 = vector.multi_reduction <maximumf>, %77, %cst_38 [1] : vector<128x128xf32> to vector<128xf32>
    %79 = vector.shape_cast %78 : vector<128xf32> to vector<128x1xf32>
    %80 = vector.broadcast %79 : vector<128x1xf32> to vector<128x128xf32>
    %81 = arith.subf %77, %80 : vector<128x128xf32>
    %82 = math.exp %81 : vector<128x128xf32>
    %cst_39 = arith.constant dense<0.000000e+00> : vector<128xf32>
    %83 = vector.multi_reduction <add>, %82, %cst_39 [1] : vector<128x128xf32> to vector<128xf32>
    %84 = vector.shape_cast %83 : vector<128xf32> to vector<128x1xf32>
    %85 = tpu.reciprocal %84 {approx = true} : vector<128x1xf32> -> vector<128x1xf32>
    %86 = vector.broadcast %85 : vector<128x1xf32> to vector<128x128xf32>
    %87 = arith.mulf %82, %86 : vector<128x128xf32>
    %88 = arith.truncf %87 : vector<128x128xf32> to vector<128x128xbf16>
    %89 = vector.extract_strided_slice %69 {offsets = [0, 0], sizes = [128, 16], strides = [1, 1]} : vector<128x32xf32> to vector<128x16xf32>
    %90 = arith.truncf %89 : vector<128x16xf32> to vector<128x16xbf16>
    %cst_40 = arith.constant dense<0.000000e+00> : vector<128x16xf32>
    %91 = tpu.matmul %88, %90, %cst_40 {dimension_numbers = #tpu.dot_dimension_numbers<[1], [0], [0], [1], [0, 0, 1, 1], [], []>} : vector<128x128xbf16>, vector<128x16xbf16>, vector<128x16xf32> -> vector<128x16xf32>
    %c0_41 = arith.constant 0 : index
    %c0_42 = arith.constant 0 : index
    %92 = vector.load %arg22[%c0_41, %c0_42] : memref<128x32xf32, #tpu.memory_space<vmem>>, vector<128x16xf32>
    tpu.vector_store %arg22[%c0_41, %c0_42], %91 {strides = array<i32>} : memref<128x32xf32, #tpu.memory_space<vmem>>, vector<128x16xf32>,
    %93 = vector.extract_strided_slice %67 {offsets = [0, 16], sizes = [128, 16], strides = [1, 1]} : vector<128x32xf32> to vector<128x16xf32>
    %94 = arith.truncf %93 : vector<128x16xf32> to vector<128x16xbf16>
    %95 = vector.extract_strided_slice %68 {offsets = [0, 16], sizes = [128, 16], strides = [1, 1]} : vector<128x32xf32> to vector<128x16xf32>
    %96 = arith.truncf %95 : vector<128x16xf32> to vector<128x16xbf16>
    %cst_43 = arith.constant dense<0.000000e+00> : vector<128x128xf32>
    %97 = tpu.matmul %94, %96, %cst_43 {dimension_numbers = #tpu.dot_dimension_numbers<[1], [1], [0], [0], [0, 0, 1, 0], [], []>} : vector<128x16xbf16>, vector<128x16xbf16>, vector<128x128xf32> -> vector<128x128xf32>
    %c0_44 = arith.constant 0 : index
    %c1 = arith.constant 1 : index
    %c0_45 = arith.constant 0 : index
    %c0_46 = arith.constant 0 : index
    %98 = vector.load %arg6[%c0_44, %c1, %c0_45, %c0_46] : memref<2x2x128x128xf32, #tpu.memory_space<vmem>>, vector<1x1x128x128xf32>
    %99 = vector.shape_cast %98 : vector<1x1x128x128xf32> to vector<128x128xf32>
    %100 = arith.addf %97, %99 : vector<128x128xf32>
    %cst_47 = arith.constant dense<0xFF800000> : vector<128xf32>
    %101 = vector.multi_reduction <maximumf>, %100, %cst_47 [1] : vector<128x128xf32> to vector<128xf32>
    %102 = vector.shape_cast %101 : vector<128xf32> to vector<128x1xf32>
    %103 = vector.broadcast %102 : vector<128x1xf32> to vector<128x128xf32>
    %104 = arith.subf %100, %103 : vector<128x128xf32>
    %105 = math.exp %104 : vector<128x128xf32>
    %cst_48 = arith.constant dense<0.000000e+00> : vector<128xf32>
    %106 = vector.multi_reduction <add>, %105, %cst_48 [1] : vector<128x128xf32> to vector<128xf32>
    %107 = vector.shape_cast %106 : vector<128xf32> to vector<128x1xf32>
    %108 = tpu.reciprocal %107 {approx = true} : vector<128x1xf32> -> vector<128x1xf32>
    %109 = vector.broadcast %108 : vector<128x1xf32> to vector<128x128xf32>
    %110 = arith.mulf %105, %109 : vector<128x128xf32>
    %111 = arith.truncf %110 : vector<128x128xf32> to vector<128x128xbf16>
    %112 = vector.extract_strided_slice %69 {offsets = [0, 16], sizes = [128, 16], strides = [1, 1]} : vector<128x32xf32> to vector<128x16xf32>
    %113 = arith.truncf %112 : vector<128x16xf32> to vector<128x16xbf16>
    %cst_49 = arith.constant dense<0.000000e+00> : vector<128x16xf32>
    %114 = tpu.matmul %111, %113, %cst_49 {dimension_numbers = #tpu.dot_dimension_numbers<[1], [0], [0], [1], [0, 0, 1, 1], [], []>} : vector<128x128xbf16>, vector<128x16xbf16>, vector<128x16xf32> -> vector<128x16xf32>
    %c0_50 = arith.constant 0 : index
    %c16 = arith.constant 16 : index
    %115 = vector.load %arg22[%c0_50, %c16] : memref<128x32xf32, #tpu.memory_space<vmem>>, vector<128x16xf32>
    tpu.vector_store %arg22[%c0_50, %c16], %114 {strides = array<i32>} : memref<128x32xf32, #tpu.memory_space<vmem>>, vector<128x16xf32>,
    %c0_51 = arith.constant 0 : index
    %c0_52 = arith.constant 0 : index
    %116 = vector.load %arg22[%c0_51, %c0_52] : memref<128x32xf32, #tpu.memory_space<vmem>>, vector<128x32xf32>
    %117 = arith.truncf %116 : vector<128x32xf32> to vector<128x32xbf16>
    %c0_53 = arith.constant 0 : index
    %c0_54 = arith.constant 0 : index
    %c0_55 = arith.constant 0 : index
    %118 = vector.load %arg11[%c0_53, %c0_54, %c0_55] : memref<2x32x32xbf16, #tpu.memory_space<vmem>>, vector<1x32x32xbf16>
    %119 = vector.shape_cast %118 : vector<1x32x32xbf16> to vector<32x32xbf16>
    %cst_56 = arith.constant dense<0.000000e+00> : vector<128x32xf32>
    %120 = tpu.matmul %117, %119, %cst_56 {dimension_numbers = #tpu.dot_dimension_numbers<[1], [0], [0], [1], [0, 0, 1, 1], [], []>} : vector<128x32xbf16>, vector<32x32xbf16>, vector<128x32xf32> -> vector<128x32xf32>
    %c0_57 = arith.constant 0 : index
    %c0_58 = arith.constant 0 : index
    %c0_59 = arith.constant 0 : index
    %121 = vector.load %arg12[%c0_57, %c0_58, %c0_59] : memref<2x1x32xf32, #tpu.memory_space<vmem>>, vector<1x1x32xf32>
    %122 = vector.shape_cast %121 : vector<1x1x32xf32> to vector<1x32xf32>
    %123 = vector.broadcast %122 : vector<1x32xf32> to vector<128x32xf32>
    %124 = arith.addf %120, %123 : vector<128x32xf32>
    %125 = arith.addf %30, %124 : vector<128x32xf32>
    %c0_60 = arith.constant 0 : index
    %c0_61 = arith.constant 0 : index
    %c0_62 = arith.constant 0 : index
    %126 = vector.load %arg13[%c0_60, %c0_61, %c0_62] : memref<2x1x32xf32, #tpu.memory_space<vmem>>, vector<1x1x32xf32>
    %127 = vector.shape_cast %126 : vector<1x1x32xf32> to vector<1x32xf32>
    %c0_63 = arith.constant 0 : index
    %c0_64 = arith.constant 0 : index
    %c0_65 = arith.constant 0 : index
    %128 = vector.load %arg14[%c0_63, %c0_64, %c0_65] : memref<2x1x32xf32, #tpu.memory_space<vmem>>, vector<1x1x32xf32>
    %129 = vector.shape_cast %128 : vector<1x1x32xf32> to vector<1x32xf32>
    %cst_66 = arith.constant dense<0.000000e+00> : vector<128xf32>
    %130 = vector.multi_reduction <add>, %125, %cst_66 [1] : vector<128x32xf32> to vector<128xf32>
    %131 = vector.shape_cast %130 : vector<128xf32> to vector<128x1xf32>
    %cst_67 = arith.constant 3.200000e+01 : f32
    %132 = vector.broadcast %cst_67 : f32 to vector<128x1xf32>
    %133 = arith.divf %131, %132 : vector<128x1xf32>
    %134 = vector.broadcast %133 : vector<128x1xf32> to vector<128x32xf32>
    %135 = arith.subf %125, %134 : vector<128x32xf32>
    %136 = arith.mulf %135, %135 : vector<128x32xf32>
    %cst_68 = arith.constant dense<0.000000e+00> : vector<128xf32>
    %137 = vector.multi_reduction <add>, %136, %cst_68 [1] : vector<128x32xf32> to vector<128xf32>
    %138 = vector.shape_cast %137 : vector<128xf32> to vector<128x1xf32>
    %cst_69 = arith.constant 3.200000e+01 : f32
    %139 = vector.broadcast %cst_69 : f32 to vector<128x1xf32>
    %140 = arith.divf %138, %139 : vector<128x1xf32>
    %141 = vector.broadcast %133 : vector<128x1xf32> to vector<128x32xf32>
    %142 = arith.subf %125, %141 : vector<128x32xf32>
    %cst_70 = arith.constant 9.99999974E-6 : f32
    %143 = vector.broadcast %cst_70 : f32 to vector<128x1xf32>
    %144 = arith.addf %140, %143 : vector<128x1xf32>
    %145 = math.rsqrt %144 : vector<128x1xf32>
    %146 = vector.broadcast %145 : vector<128x1xf32> to vector<128x32xf32>
    %147 = arith.mulf %142, %146 : vector<128x32xf32>
    %148 = vector.broadcast %127 : vector<1x32xf32> to vector<128x32xf32>
    %149 = arith.mulf %147, %148 : vector<128x32xf32>
    %150 = vector.broadcast %129 : vector<1x32xf32> to vector<128x32xf32>
    %151 = arith.addf %149, %150 : vector<128x32xf32>
    %152 = arith.truncf %151 : vector<128x32xf32> to vector<128x32xbf16>
    %c0_71 = arith.constant 0 : index
    %c0_72 = arith.constant 0 : index
    %c0_73 = arith.constant 0 : index
    %153 = vector.load %arg15[%c0_71, %c0_72, %c0_73] : memref<2x32x128xbf16, #tpu.memory_space<vmem>>, vector<1x32x128xbf16>
    %154 = vector.shape_cast %153 : vector<1x32x128xbf16> to vector<32x128xbf16>
    %cst_74 = arith.constant dense<0.000000e+00> : vector<128x128xf32>
    %155 = tpu.matmul %152, %154, %cst_74 {dimension_numbers = #tpu.dot_dimension_numbers<[1], [0], [0], [1], [0, 0, 1, 1], [], []>} : vector<128x32xbf16>, vector<32x128xbf16>, vector<128x128xf32> -> vector<128x128xf32>
    %c0_75 = arith.constant 0 : index
    %c0_76 = arith.constant 0 : index
    %c0_77 = arith.constant 0 : index
    %156 = vector.load %arg16[%c0_75, %c0_76, %c0_77] : memref<2x1x128xf32, #tpu.memory_space<vmem>>, vector<1x1x128xf32>
    %157 = vector.shape_cast %156 : vector<1x1x128xf32> to vector<1x128xf32>
    %158 = vector.broadcast %157 : vector<1x128xf32> to vector<128x128xf32>
    %159 = arith.addf %155, %158 : vector<128x128xf32>
    %cst_78 = arith.constant 5.000000e-01 : f32
    %160 = vector.broadcast %cst_78 : f32 to vector<128x128xf32>
    %161 = arith.mulf %160, %159 : vector<128x128xf32>
    %cst_79 = arith.constant 4.471500e-02 : f32
    %162 = vector.broadcast %cst_79 : f32 to vector<128x128xf32>
    %163 = arith.mulf %162, %159 : vector<128x128xf32>
    %164 = arith.mulf %163, %159 : vector<128x128xf32>
    %165 = arith.mulf %164, %159 : vector<128x128xf32>
    %166 = arith.addf %159, %165 : vector<128x128xf32>
    %cst_80 = arith.constant 0.797884583 : f32
    %167 = vector.broadcast %cst_80 : f32 to vector<128x128xf32>
    %168 = arith.mulf %167, %166 : vector<128x128xf32>
    %169 = math.tanh %168 : vector<128x128xf32>
    %cst_81 = arith.constant 1.000000e+00 : f32
    %170 = vector.broadcast %cst_81 : f32 to vector<128x128xf32>
    %171 = arith.addf %170, %169 : vector<128x128xf32>
    %172 = arith.mulf %161, %171 : vector<128x128xf32>
    %173 = arith.truncf %172 : vector<128x128xf32> to vector<128x128xbf16>
    %c0_82 = arith.constant 0 : index
    %c0_83 = arith.constant 0 : index
    %c0_84 = arith.constant 0 : index
    %174 = vector.load %arg17[%c0_82, %c0_83, %c0_84] : memref<2x128x32xbf16, #tpu.memory_space<vmem>>, vector<1x128x32xbf16>
    %175 = vector.shape_cast %174 : vector<1x128x32xbf16> to vector<128x32xbf16>
    %cst_85 = arith.constant dense<0.000000e+00> : vector<128x32xf32>
    %176 = tpu.matmul %173, %175, %cst_85 {dimension_numbers = #tpu.dot_dimension_numbers<[1], [0], [0], [1], [0, 0, 1, 1], [], []>} : vector<128x128xbf16>, vector<128x32xbf16>, vector<128x32xf32> -> vector<128x32xf32>
    %c0_86 = arith.constant 0 : index
    %c0_87 = arith.constant 0 : index
    %c0_88 = arith.constant 0 : index
    %177 = vector.load %arg18[%c0_86, %c0_87, %c0_88] : memref<2x1x32xf32, #tpu.memory_space<vmem>>, vector<1x1x32xf32>
    %178 = vector.shape_cast %177 : vector<1x1x32xf32> to vector<1x32xf32>
    %179 = vector.broadcast %178 : vector<1x32xf32> to vector<128x32xf32>
    %180 = arith.addf %176, %179 : vector<128x32xf32>
    %181 = arith.addf %125, %180 : vector<128x32xf32>
    %c1_89 = arith.constant 1 : index
    %c0_90 = arith.constant 0 : index
    %c0_91 = arith.constant 0 : index
    %182 = vector.load %arg7[%c1_89, %c0_90, %c0_91] : memref<2x1x32xf32, #tpu.memory_space<vmem>>, vector<1x1x32xf32>
    %183 = vector.shape_cast %182 : vector<1x1x32xf32> to vector<1x32xf32>
    %c1_92 = arith.constant 1 : index
    %c0_93 = arith.constant 0 : index
    %c0_94 = arith.constant 0 : index
    %184 = vector.load %arg8[%c1_92, %c0_93, %c0_94] : memref<2x1x32xf32, #tpu.memory_space<vmem>>, vector<1x1x32xf32>
    %185 = vector.shape_cast %184 : vector<1x1x32xf32> to vector<1x32xf32>
    %cst_95 = arith.constant dense<0.000000e+00> : vector<128xf32>
    %186 = vector.multi_reduction <add>, %181, %cst_95 [1] : vector<128x32xf32> to vector<128xf32>
    %187 = vector.shape_cast %186 : vector<128xf32> to vector<128x1xf32>
    %cst_96 = arith.constant 3.200000e+01 : f32
    %188 = vector.broadcast %cst_96 : f32 to vector<128x1xf32>
    %189 = arith.divf %187, %188 : vector<128x1xf32>
    %190 = vector.broadcast %189 : vector<128x1xf32> to vector<128x32xf32>
    %191 = arith.subf %181, %190 : vector<128x32xf32>
    %192 = arith.mulf %191, %191 : vector<128x32xf32>
    %cst_97 = arith.constant dense<0.000000e+00> : vector<128xf32>
    %193 = vector.multi_reduction <add>, %192, %cst_97 [1] : vector<128x32xf32> to vector<128xf32>
    %194 = vector.shape_cast %193 : vector<128xf32> to vector<128x1xf32>
    %cst_98 = arith.constant 3.200000e+01 : f32
    %195 = vector.broadcast %cst_98 : f32 to vector<128x1xf32>
    %196 = arith.divf %194, %195 : vector<128x1xf32>
    %197 = vector.broadcast %189 : vector<128x1xf32> to vector<128x32xf32>
    %198 = arith.subf %181, %197 : vector<128x32xf32>
    %cst_99 = arith.constant 9.99999974E-6 : f32
    %199 = vector.broadcast %cst_99 : f32 to vector<128x1xf32>
    %200 = arith.addf %196, %199 : vector<128x1xf32>
    %201 = math.rsqrt %200 : vector<128x1xf32>
    %202 = vector.broadcast %201 : vector<128x1xf32> to vector<128x32xf32>
    %203 = arith.mulf %198, %202 : vector<128x32xf32>
    %204 = vector.broadcast %183 : vector<1x32xf32> to vector<128x32xf32>
    %205 = arith.mulf %203, %204 : vector<128x32xf32>
    %206 = vector.broadcast %185 : vector<1x32xf32> to vector<128x32xf32>
    %207 = arith.addf %205, %206 : vector<128x32xf32>
    %208 = arith.truncf %207 : vector<128x32xf32> to vector<128x32xbf16>
    %c1_100 = arith.constant 1 : index
    %c0_101 = arith.constant 0 : index
    %c0_102 = arith.constant 0 : index
    %209 = vector.load %arg9[%c1_100, %c0_101, %c0_102] : memref<2x32x96xbf16, #tpu.memory_space<vmem>>, vector<1x32x96xbf16>
    %210 = vector.shape_cast %209 : vector<1x32x96xbf16> to vector<32x96xbf16>
    %cst_103 = arith.constant dense<0.000000e+00> : vector<128x96xf32>
    %211 = tpu.matmul %208, %210, %cst_103 {dimension_numbers = #tpu.dot_dimension_numbers<[1], [0], [0], [1], [0, 0, 1, 1], [], []>} : vector<128x32xbf16>, vector<32x96xbf16>, vector<128x96xf32> -> vector<128x96xf32>
    %c1_104 = arith.constant 1 : index
    %c0_105 = arith.constant 0 : index
    %c0_106 = arith.constant 0 : index
    %212 = vector.load %arg10[%c1_104, %c0_105, %c0_106] : memref<2x1x96xf32, #tpu.memory_space<vmem>>, vector<1x1x96xf32>
    %213 = vector.shape_cast %212 : vector<1x1x96xf32> to vector<1x96xf32>
    %214 = vector.broadcast %213 : vector<1x96xf32> to vector<128x96xf32>
    %215 = arith.addf %211, %214 : vector<128x96xf32>
    %216 = vector.extract_strided_slice %215 {offsets = [0, 0], sizes = [128, 32], strides = [1, 1]} : vector<128x96xf32> to vector<128x32xf32>
    %cst_107 = arith.constant 2.500000e-01 : f32
    %217 = vector.broadcast %cst_107 : f32 to vector<128x32xf32>
    %218 = arith.mulf %216, %217 : vector<128x32xf32>
    %219 = vector.extract_strided_slice %215 {offsets = [0, 32], sizes = [128, 32], strides = [1, 1]} : vector<128x96xf32> to vector<128x32xf32>
    %220 = vector.extract_strided_slice %215 {offsets = [0, 64], sizes = [128, 32], strides = [1, 1]} : vector<128x96xf32> to vector<128x32xf32>
    %221 = vector.extract_strided_slice %218 {offsets = [0, 0], sizes = [128, 16], strides = [1, 1]} : vector<128x32xf32> to vector<128x16xf32>
    %222 = arith.truncf %221 : vector<128x16xf32> to vector<128x16xbf16>
    %223 = vector.extract_strided_slice %219 {offsets = [0, 0], sizes = [128, 16], strides = [1, 1]} : vector<128x32xf32> to vector<128x16xf32>
    %224 = arith.truncf %223 : vector<128x16xf32> to vector<128x16xbf16>
    %cst_108 = arith.constant dense<0.000000e+00> : vector<128x128xf32>
    %225 = tpu.matmul %222, %224, %cst_108 {dimension_numbers = #tpu.dot_dimension_numbers<[1], [1], [0], [0], [0, 0, 1, 0], [], []>} : vector<128x16xbf16>, vector<128x16xbf16>, vector<128x128xf32> -> vector<128x128xf32>
    %c1_109 = arith.constant 1 : index
    %c0_110 = arith.constant 0 : index
    %c0_111 = arith.constant 0 : index
    %c0_112 = arith.constant 0 : index
    %226 = vector.load %arg6[%c1_109, %c0_110, %c0_111, %c0_112] : memref<2x2x128x128xf32, #tpu.memory_space<vmem>>, vector<1x1x128x128xf32>
    %227 = vector.shape_cast %226 : vector<1x1x128x128xf32> to vector<128x128xf32>
    %228 = arith.addf %225, %227 : vector<128x128xf32>
    %cst_113 = arith.constant dense<0xFF800000> : vector<128xf32>
    %229 = vector.multi_reduction <maximumf>, %228, %cst_113 [1] : vector<128x128xf32> to vector<128xf32>
    %230 = vector.shape_cast %229 : vector<128xf32> to vector<128x1xf32>
    %231 = vector.broadcast %230 : vector<128x1xf32> to vector<128x128xf32>
    %232 = arith.subf %228, %231 : vector<128x128xf32>
    %233 = math.exp %232 : vector<128x128xf32>
    %cst_114 = arith.constant dense<0.000000e+00> : vector<128xf32>
    %234 = vector.multi_reduction <add>, %233, %cst_114 [1] : vector<128x128xf32> to vector<128xf32>
    %235 = vector.shape_cast %234 : vector<128xf32> to vector<128x1xf32>
    %236 = tpu.reciprocal %235 {approx = true} : vector<128x1xf32> -> vector<128x1xf32>
    %237 = vector.broadcast %236 : vector<128x1xf32> to vector<128x128xf32>
    %238 = arith.mulf %233, %237 : vector<128x128xf32>
    %239 = arith.truncf %238 : vector<128x128xf32> to vector<128x128xbf16>
    %240 = vector.extract_strided_slice %220 {offsets = [0, 0], sizes = [128, 16], strides = [1, 1]} : vector<128x32xf32> to vector<128x16xf32>
    %241 = arith.truncf %240 : vector<128x16xf32> to vector<128x16xbf16>
    %cst_115 = arith.constant dense<0.000000e+00> : vector<128x16xf32>
    %242 = tpu.matmul %239, %241, %cst_115 {dimension_numbers = #tpu.dot_dimension_numbers<[1], [0], [0], [1], [0, 0, 1, 1], [], []>} : vector<128x128xbf16>, vector<128x16xbf16>, vector<128x16xf32> -> vector<128x16xf32>
    %c0_116 = arith.constant 0 : index
    %c0_117 = arith.constant 0 : index
    %243 = vector.load %arg22[%c0_116, %c0_117] : memref<128x32xf32, #tpu.memory_space<vmem>>, vector<128x16xf32>
    tpu.vector_store %arg22[%c0_116, %c0_117], %242 {strides = array<i32>} : memref<128x32xf32, #tpu.memory_space<vmem>>, vector<128x16xf32>,
    %244 = vector.extract_strided_slice %218 {offsets = [0, 16], sizes = [128, 16], strides = [1, 1]} : vector<128x32xf32> to vector<128x16xf32>
    %245 = arith.truncf %244 : vector<128x16xf32> to vector<128x16xbf16>
    %246 = vector.extract_strided_slice %219 {offsets = [0, 16], sizes = [128, 16], strides = [1, 1]} : vector<128x32xf32> to vector<128x16xf32>
    %247 = arith.truncf %246 : vector<128x16xf32> to vector<128x16xbf16>
    %cst_118 = arith.constant dense<0.000000e+00> : vector<128x128xf32>
    %248 = tpu.matmul %245, %247, %cst_118 {dimension_numbers = #tpu.dot_dimension_numbers<[1], [1], [0], [0], [0, 0, 1, 0], [], []>} : vector<128x16xbf16>, vector<128x16xbf16>, vector<128x128xf32> -> vector<128x128xf32>
    %c1_119 = arith.constant 1 : index
    %c1_120 = arith.constant 1 : index
    %c0_121 = arith.constant 0 : index
    %c0_122 = arith.constant 0 : index
    %249 = vector.load %arg6[%c1_119, %c1_120, %c0_121, %c0_122] : memref<2x2x128x128xf32, #tpu.memory_space<vmem>>, vector<1x1x128x128xf32>
    %250 = vector.shape_cast %249 : vector<1x1x128x128xf32> to vector<128x128xf32>
    %251 = arith.addf %248, %250 : vector<128x128xf32>
    %cst_123 = arith.constant dense<0xFF800000> : vector<128xf32>
    %252 = vector.multi_reduction <maximumf>, %251, %cst_123 [1] : vector<128x128xf32> to vector<128xf32>
    %253 = vector.shape_cast %252 : vector<128xf32> to vector<128x1xf32>
    %254 = vector.broadcast %253 : vector<128x1xf32> to vector<128x128xf32>
    %255 = arith.subf %251, %254 : vector<128x128xf32>
    %256 = math.exp %255 : vector<128x128xf32>
    %cst_124 = arith.constant dense<0.000000e+00> : vector<128xf32>
    %257 = vector.multi_reduction <add>, %256, %cst_124 [1] : vector<128x128xf32> to vector<128xf32>
    %258 = vector.shape_cast %257 : vector<128xf32> to vector<128x1xf32>
    %259 = tpu.reciprocal %258 {approx = true} : vector<128x1xf32> -> vector<128x1xf32>
    %260 = vector.broadcast %259 : vector<128x1xf32> to vector<128x128xf32>
    %261 = arith.mulf %256, %260 : vector<128x128xf32>
    %262 = arith.truncf %261 : vector<128x128xf32> to vector<128x128xbf16>
    %263 = vector.extract_strided_slice %220 {offsets = [0, 16], sizes = [128, 16], strides = [1, 1]} : vector<128x32xf32> to vector<128x16xf32>
    %264 = arith.truncf %263 : vector<128x16xf32> to vector<128x16xbf16>
    %cst_125 = arith.constant dense<0.000000e+00> : vector<128x16xf32>
    %265 = tpu.matmul %262, %264, %cst_125 {dimension_numbers = #tpu.dot_dimension_numbers<[1], [0], [0], [1], [0, 0, 1, 1], [], []>} : vector<128x128xbf16>, vector<128x16xbf16>, vector<128x16xf32> -> vector<128x16xf32>
    %c0_126 = arith.constant 0 : index
    %c16_127 = arith.constant 16 : index
    %266 = vector.load %arg22[%c0_126, %c16_127] : memref<128x32xf32, #tpu.memory_space<vmem>>, vector<128x16xf32>
    tpu.vector_store %arg22[%c0_126, %c16_127], %265 {strides = array<i32>} : memref<128x32xf32, #tpu.memory_space<vmem>>, vector<128x16xf32>,
    %c0_128 = arith.constant 0 : index
    %c0_129 = arith.constant 0 : index
    %267 = vector.load %arg22[%c0_128, %c0_129] : memref<128x32xf32, #tpu.memory_space<vmem>>, vector<128x32xf32>
    %268 = arith.truncf %267 : vector<128x32xf32> to vector<128x32xbf16>
    %c1_130 = arith.constant 1 : index
    %c0_131 = arith.constant 0 : index
    %c0_132 = arith.constant 0 : index
    %269 = vector.load %arg11[%c1_130, %c0_131, %c0_132] : memref<2x32x32xbf16, #tpu.memory_space<vmem>>, vector<1x32x32xbf16>
    %270 = vector.shape_cast %269 : vector<1x32x32xbf16> to vector<32x32xbf16>
    %cst_133 = arith.constant dense<0.000000e+00> : vector<128x32xf32>
    %271 = tpu.matmul %268, %270, %cst_133 {dimension_numbers = #tpu.dot_dimension_numbers<[1], [0], [0], [1], [0, 0, 1, 1], [], []>} : vector<128x32xbf16>, vector<32x32xbf16>, vector<128x32xf32> -> vector<128x32xf32>
    %c1_134 = arith.constant 1 : index
    %c0_135 = arith.constant 0 : index
    %c0_136 = arith.constant 0 : index
    %272 = vector.load %arg12[%c1_134, %c0_135, %c0_136] : memref<2x1x32xf32, #tpu.memory_space<vmem>>, vector<1x1x32xf32>
    %273 = vector.shape_cast %272 : vector<1x1x32xf32> to vector<1x32xf32>
    %274 = vector.broadcast %273 : vector<1x32xf32> to vector<128x32xf32>
    %275 = arith.addf %271, %274 : vector<128x32xf32>
    %276 = arith.addf %181, %275 : vector<128x32xf32>
    %c1_137 = arith.constant 1 : index
    %c0_138 = arith.constant 0 : index
    %c0_139 = arith.constant 0 : index
    %277 = vector.load %arg13[%c1_137, %c0_138, %c0_139] : memref<2x1x32xf32, #tpu.memory_space<vmem>>, vector<1x1x32xf32>
    %278 = vector.shape_cast %277 : vector<1x1x32xf32> to vector<1x32xf32>
    %c1_140 = arith.constant 1 : index
    %c0_141 = arith.constant 0 : index
    %c0_142 = arith.constant 0 : index
    %279 = vector.load %arg14[%c1_140, %c0_141, %c0_142] : memref<2x1x32xf32, #tpu.memory_space<vmem>>, vector<1x1x32xf32>
    %280 = vector.shape_cast %279 : vector<1x1x32xf32> to vector<1x32xf32>
    %cst_143 = arith.constant dense<0.000000e+00> : vector<128xf32>
    %281 = vector.multi_reduction <add>, %276, %cst_143 [1] : vector<128x32xf32> to vector<128xf32>
    %282 = vector.shape_cast %281 : vector<128xf32> to vector<128x1xf32>
    %cst_144 = arith.constant 3.200000e+01 : f32
    %283 = vector.broadcast %cst_144 : f32 to vector<128x1xf32>
    %284 = arith.divf %282, %283 : vector<128x1xf32>
    %285 = vector.broadcast %284 : vector<128x1xf32> to vector<128x32xf32>
    %286 = arith.subf %276, %285 : vector<128x32xf32>
    %287 = arith.mulf %286, %286 : vector<128x32xf32>
    %cst_145 = arith.constant dense<0.000000e+00> : vector<128xf32>
    %288 = vector.multi_reduction <add>, %287, %cst_145 [1] : vector<128x32xf32> to vector<128xf32>
    %289 = vector.shape_cast %288 : vector<128xf32> to vector<128x1xf32>
    %cst_146 = arith.constant 3.200000e+01 : f32
    %290 = vector.broadcast %cst_146 : f32 to vector<128x1xf32>
    %291 = arith.divf %289, %290 : vector<128x1xf32>
    %292 = vector.broadcast %284 : vector<128x1xf32> to vector<128x32xf32>
    %293 = arith.subf %276, %292 : vector<128x32xf32>
    %cst_147 = arith.constant 9.99999974E-6 : f32
    %294 = vector.broadcast %cst_147 : f32 to vector<128x1xf32>
    %295 = arith.addf %291, %294 : vector<128x1xf32>
    %296 = math.rsqrt %295 : vector<128x1xf32>
    %297 = vector.broadcast %296 : vector<128x1xf32> to vector<128x32xf32>
    %298 = arith.mulf %293, %297 : vector<128x32xf32>
    %299 = vector.broadcast %278 : vector<1x32xf32> to vector<128x32xf32>
    %300 = arith.mulf %298, %299 : vector<128x32xf32>
    %301 = vector.broadcast %280 : vector<1x32xf32> to vector<128x32xf32>
    %302 = arith.addf %300, %301 : vector<128x32xf32>
    %303 = arith.truncf %302 : vector<128x32xf32> to vector<128x32xbf16>
    %c1_148 = arith.constant 1 : index
    %c0_149 = arith.constant 0 : index
    %c0_150 = arith.constant 0 : index
    %304 = vector.load %arg15[%c1_148, %c0_149, %c0_150] : memref<2x32x128xbf16, #tpu.memory_space<vmem>>, vector<1x32x128xbf16>
    %305 = vector.shape_cast %304 : vector<1x32x128xbf16> to vector<32x128xbf16>
    %cst_151 = arith.constant dense<0.000000e+00> : vector<128x128xf32>
    %306 = tpu.matmul %303, %305, %cst_151 {dimension_numbers = #tpu.dot_dimension_numbers<[1], [0], [0], [1], [0, 0, 1, 1], [], []>} : vector<128x32xbf16>, vector<32x128xbf16>, vector<128x128xf32> -> vector<128x128xf32>
    %c1_152 = arith.constant 1 : index
    %c0_153 = arith.constant 0 : index
    %c0_154 = arith.constant 0 : index
    %307 = vector.load %arg16[%c1_152, %c0_153, %c0_154] : memref<2x1x128xf32, #tpu.memory_space<vmem>>, vector<1x1x128xf32>
    %308 = vector.shape_cast %307 : vector<1x1x128xf32> to vector<1x128xf32>
    %309 = vector.broadcast %308 : vector<1x128xf32> to vector<128x128xf32>
    %310 = arith.addf %306, %309 : vector<128x128xf32>
    %cst_155 = arith.constant 5.000000e-01 : f32
    %311 = vector.broadcast %cst_155 : f32 to vector<128x128xf32>
    %312 = arith.mulf %311, %310 : vector<128x128xf32>
    %cst_156 = arith.constant 4.471500e-02 : f32
    %313 = vector.broadcast %cst_156 : f32 to vector<128x128xf32>
    %314 = arith.mulf %313, %310 : vector<128x128xf32>
    %315 = arith.mulf %314, %310 : vector<128x128xf32>
    %316 = arith.mulf %315, %310 : vector<128x128xf32>
    %317 = arith.addf %310, %316 : vector<128x128xf32>
    %cst_157 = arith.constant 0.797884583 : f32
    %318 = vector.broadcast %cst_157 : f32 to vector<128x128xf32>
    %319 = arith.mulf %318, %317 : vector<128x128xf32>
    %320 = math.tanh %319 : vector<128x128xf32>
    %cst_158 = arith.constant 1.000000e+00 : f32
    %321 = vector.broadcast %cst_158 : f32 to vector<128x128xf32>
    %322 = arith.addf %321, %320 : vector<128x128xf32>
    %323 = arith.mulf %312, %322 : vector<128x128xf32>
    %324 = arith.truncf %323 : vector<128x128xf32> to vector<128x128xbf16>
    %c1_159 = arith.constant 1 : index
    %c0_160 = arith.constant 0 : index
    %c0_161 = arith.constant 0 : index
    %325 = vector.load %arg17[%c1_159, %c0_160, %c0_161] : memref<2x128x32xbf16, #tpu.memory_space<vmem>>, vector<1x128x32xbf16>
    %326 = vector.shape_cast %325 : vector<1x128x32xbf16> to vector<128x32xbf16>
    %cst_162 = arith.constant dense<0.000000e+00> : vector<128x32xf32>
    %327 = tpu.matmul %324, %326, %cst_162 {dimension_numbers = #tpu.dot_dimension_numbers<[1], [0], [0], [1], [0, 0, 1, 1], [], []>} : vector<128x128xbf16>, vector<128x32xbf16>, vector<128x32xf32> -> vector<128x32xf32>
    %c1_163 = arith.constant 1 : index
    %c0_164 = arith.constant 0 : index
    %c0_165 = arith.constant 0 : index
    %328 = vector.load %arg18[%c1_163, %c0_164, %c0_165] : memref<2x1x32xf32, #tpu.memory_space<vmem>>, vector<1x1x32xf32>
    %329 = vector.shape_cast %328 : vector<1x1x32xf32> to vector<1x32xf32>
    %330 = vector.broadcast %329 : vector<1x32xf32> to vector<128x32xf32>
    %331 = arith.addf %327, %330 : vector<128x32xf32>
    %332 = arith.addf %276, %331 : vector<128x32xf32>
    %c0_166 = arith.constant 0 : index
    %c0_167 = arith.constant 0 : index
    %333 = vector.load %arg21[%c0_166, %c0_167] : memref<128x32xf32, #tpu.memory_space<vmem>>, vector<128x32xf32>
    tpu.vector_store %arg21[%c0_166, %c0_167], %332 {strides = array<i32>} : memref<128x32xf32, #tpu.memory_space<vmem>>, vector<128x32xf32>,
    return
  }
  func.func @transform_0(%arg0: i32) -> (i32, i32) {
    %c0_i32 = arith.constant 0 : i32
    %c0_i32_0 = arith.constant 0 : i32
    return %arg0, %c0_i32 : i32, i32
  }
  func.func @transform_1(%arg0: i32) -> (i32, i32) {
    %c0_i32 = arith.constant 0 : i32
    %c0_i32_0 = arith.constant 0 : i32
    %c0_i32_1 = arith.constant 0 : i32
    return %c0_i32, %c0_i32_0 : i32, i32
  }
  func.func @transform_2(%arg0: i32) -> (i32, i32) {
    %c0_i32 = arith.constant 0 : i32
    %c0_i32_0 = arith.constant 0 : i32
    %c0_i32_1 = arith.constant 0 : i32
    return %c0_i32, %c0_i32_0 : i32, i32
  }
  func.func @transform_3(%arg0: i32) -> (i32, i32) {
    %c0_i32 = arith.constant 0 : i32
    %c0_i32_0 = arith.constant 0 : i32
    %c0_i32_1 = arith.constant 0 : i32
    return %c0_i32, %c0_i32_0 : i32, i32
  }
  func.func @transform_4(%arg0: i32) -> (i32, i32) {
    %c0_i32 = arith.constant 0 : i32
    %c0_i32_0 = arith.constant 0 : i32
    %c0_i32_1 = arith.constant 0 : i32
    return %c0_i32, %c0_i32_0 : i32, i32
  }
  func.func @transform_5(%arg0: i32) -> (i32, i32, i32, i32) {
    %c0_i32 = arith.constant 0 : i32
    %c0_i32_0 = arith.constant 0 : i32
    %c0_i32_1 = arith.constant 0 : i32
    %c0_i32_2 = arith.constant 0 : i32
    %c0_i32_3 = arith.constant 0 : i32
    return %c0_i32, %c0_i32_0, %c0_i32_1, %c0_i32_2 : i32, i32, i32, i32
  }
  func.func @transform_6(%arg0: i32) -> (i32, i32, i32) {
    %c0_i32 = arith.constant 0 : i32
    %c0_i32_0 = arith.constant 0 : i32
    %c0_i32_1 = arith.constant 0 : i32
    %c0_i32_2 = arith.constant 0 : i32
    return %c0_i32, %c0_i32_0, %c0_i32_1 : i32, i32, i32
  }
  func.func @transform_7(%arg0: i32) -> (i32, i32, i32) {
    %c0_i32 = arith.constant 0 : i32
    %c0_i32_0 = arith.constant 0 : i32
    %c0_i32_1 = arith.constant 0 : i32
    %c0_i32_2 = arith.constant 0 : i32
    return %c0_i32, %c0_i32_0, %c0_i32_1 : i32, i32, i32
  }
  func.func @transform_8(%arg0: i32) -> (i32, i32, i32) {
    %c0_i32 = arith.constant 0 : i32
    %c0_i32_0 = arith.constant 0 : i32
    %c0_i32_1 = arith.constant 0 : i32
    %c0_i32_2 = arith.constant 0 : i32
    return %c0_i32, %c0_i32_0, %c0_i32_1 : i32, i32, i32
  }
  func.func @transform_9(%arg0: i32) -> (i32, i32, i32) {
    %c0_i32 = arith.constant 0 : i32
    %c0_i32_0 = arith.constant 0 : i32
    %c0_i32_1 = arith.constant 0 : i32
    %c0_i32_2 = arith.constant 0 : i32
    return %c0_i32, %c0_i32_0, %c0_i32_1 : i32, i32, i32
  }
  func.func @transform_10(%arg0: i32) -> (i32, i32, i32) {
    %c0_i32 = arith.constant 0 : i32
    %c0_i32_0 = arith.constant 0 : i32
    %c0_i32_1 = arith.constant 0 : i32
    %c0_i32_2 = arith.constant 0 : i32
    return %c0_i32, %c0_i32_0, %c0_i32_1 : i32, i32, i32
  }
  func.func @transform_11(%arg0: i32) -> (i32, i32, i32) {
    %c0_i32 = arith.constant 0 : i32
    %c0_i32_0 = arith.constant 0 : i32
    %c0_i32_1 = arith.constant 0 : i32
    %c0_i32_2 = arith.constant 0 : i32
    return %c0_i32, %c0_i32_0, %c0_i32_1 : i32, i32, i32
  }
  func.func @transform_12(%arg0: i32) -> (i32, i32, i32) {
    %c0_i32 = arith.constant 0 : i32
    %c0_i32_0 = arith.constant 0 : i32
    %c0_i32_1 = arith.constant 0 : i32
    %c0_i32_2 = arith.constant 0 : i32
    return %c0_i32, %c0_i32_0, %c0_i32_1 : i32, i32, i32
  }
  func.func @transform_13(%arg0: i32) -> (i32, i32, i32) {
    %c0_i32 = arith.constant 0 : i32
    %c0_i32_0 = arith.constant 0 : i32
    %c0_i32_1 = arith.constant 0 : i32
    %c0_i32_2 = arith.constant 0 : i32
    return %c0_i32, %c0_i32_0, %c0_i32_1 : i32, i32, i32
  }
  func.func @transform_14(%arg0: i32) -> (i32, i32, i32) {
    %c0_i32 = arith.constant 0 : i32
    %c0_i32_0 = arith.constant 0 : i32
    %c0_i32_1 = arith.constant 0 : i32
    %c0_i32_2 = arith.constant 0 : i32
    return %c0_i32, %c0_i32_0, %c0_i32_1 : i32, i32, i32
  }
  func.func @transform_15(%arg0: i32) -> (i32, i32, i32) {
    %c0_i32 = arith.constant 0 : i32
    %c0_i32_0 = arith.constant 0 : i32
    %c0_i32_1 = arith.constant 0 : i32
    %c0_i32_2 = arith.constant 0 : i32
    return %c0_i32, %c0_i32_0, %c0_i32_1 : i32, i32, i32
  }
  func.func @transform_16(%arg0: i32) -> (i32, i32, i32) {
    %c0_i32 = arith.constant 0 : i32
    %c0_i32_0 = arith.constant 0 : i32
    %c0_i32_1 = arith.constant 0 : i32
    %c0_i32_2 = arith.constant 0 : i32
    return %c0_i32, %c0_i32_0, %c0_i32_1 : i32, i32, i32
  }
  func.func @transform_17(%arg0: i32) -> (i32, i32, i32) {
    %c0_i32 = arith.constant 0 : i32
    %c0_i32_0 = arith.constant 0 : i32
    %c0_i32_1 = arith.constant 0 : i32
    %c0_i32_2 = arith.constant 0 : i32
    return %c0_i32, %c0_i32_0, %c0_i32_1 : i32, i32, i32
  }
  func.func @transform_18(%arg0: i32) -> (i32, i32) {
    %c0_i32 = arith.constant 0 : i32
    %c0_i32_0 = arith.constant 0 : i32
    %c0_i32_1 = arith.constant 0 : i32
    return %c0_i32, %c0_i32_0 : i32, i32
  }
  func.func @transform_19(%arg0: i32) -> (i32, i32) {
    %c0_i32 = arith.constant 0 : i32
    %c0_i32_0 = arith.constant 0 : i32
    %c0_i32_1 = arith.constant 0 : i32
    return %c0_i32, %c0_i32_0 : i32, i32
  }
  func.func @transform_20(%arg0: i32) -> (i32, i32) {
    %c0_i32 = arith.constant 0 : i32
    %c0_i32_0 = arith.constant 0 : i32
    return %arg0, %c0_i32 : i32, i32
  }
}

module attributes {stable_mosaic.version = 11 : i64} {
  func.func @_stage_kernel(%arg0: i32, %arg1: memref<32x128xf32, #tpu.memory_space<vmem>>, %arg2: memref<128x64xbf16, #tpu.memory_space<vmem>>, %arg3: memref<1x64xf32, #tpu.memory_space<vmem>>, %arg4: memref<1x128xf32, #tpu.memory_space<vmem>>, %arg5: memref<1x128xf32, #tpu.memory_space<vmem>>, %arg6: memref<2x4x32x32xf32, #tpu.memory_space<vmem>>, %arg7: memref<2x1x64xf32, #tpu.memory_space<vmem>>, %arg8: memref<2x1x64xf32, #tpu.memory_space<vmem>>, %arg9: memref<2x64x192xbf16, #tpu.memory_space<vmem>>, %arg10: memref<2x1x192xf32, #tpu.memory_space<vmem>>, %arg11: memref<2x64x64xbf16, #tpu.memory_space<vmem>>, %arg12: memref<2x1x64xf32, #tpu.memory_space<vmem>>, %arg13: memref<2x1x64xf32, #tpu.memory_space<vmem>>, %arg14: memref<2x1x64xf32, #tpu.memory_space<vmem>>, %arg15: memref<2x64x256xbf16, #tpu.memory_space<vmem>>, %arg16: memref<2x1x256xf32, #tpu.memory_space<vmem>>, %arg17: memref<2x256x64xbf16, #tpu.memory_space<vmem>>, %arg18: memref<2x1x64xf32, #tpu.memory_space<vmem>>, %arg19: memref<1x64xf32, #tpu.memory_space<vmem>>, %arg20: memref<1x64xf32, #tpu.memory_space<vmem>>, %arg21: memref<32x1xf32, #tpu.memory_space<vmem>>, %arg22: memref<32x64xf32, #tpu.memory_space<vmem>>) attributes {dimension_semantics = [#tpu.dimension_semantics<parallel>], iteration_bounds = array<i64: 1>, scalar_prefetch = 0 : i64, scratch_operands = 1 : i64, tpu.core_type = #tpu.core_type<tc>, window_params = [{transform_indices = @transform_0, window_bounds = array<i64: 32, 128>}, {pipeline_mode = #tpu.pipeline_mode<synchronous>, transform_indices = @transform_1, window_bounds = array<i64: 128, 64>}, {pipeline_mode = #tpu.pipeline_mode<synchronous>, transform_indices = @transform_2, window_bounds = array<i64: 1, 64>}, {pipeline_mode = #tpu.pipeline_mode<synchronous>, transform_indices = @transform_3, window_bounds = array<i64: 1, 128>}, {pipeline_mode = #tpu.pipeline_mode<synchronous>, transform_indices = @transform_4, window_bounds = array<i64: 1, 128>}, {pipeline_mode = #tpu.pipeline_mode<synchronous>, transform_indices = @transform_5, window_bounds = array<i64: 2, 4, 32, 32>}, {pipeline_mode = #tpu.pipeline_mode<synchronous>, transform_indices = @transform_6, window_bounds = array<i64: 2, 1, 64>}, {pipeline_mode = #tpu.pipeline_mode<synchronous>, transform_indices = @transform_7, window_bounds = array<i64: 2, 1, 64>}, {pipeline_mode = #tpu.pipeline_mode<synchronous>, transform_indices = @transform_8, window_bounds = array<i64: 2, 64, 192>}, {pipeline_mode = #tpu.pipeline_mode<synchronous>, transform_indices = @transform_9, window_bounds = array<i64: 2, 1, 192>}, {pipeline_mode = #tpu.pipeline_mode<synchronous>, transform_indices = @transform_10, window_bounds = array<i64: 2, 64, 64>}, {pipeline_mode = #tpu.pipeline_mode<synchronous>, transform_indices = @transform_11, window_bounds = array<i64: 2, 1, 64>}, {pipeline_mode = #tpu.pipeline_mode<synchronous>, transform_indices = @transform_12, window_bounds = array<i64: 2, 1, 64>}, {pipeline_mode = #tpu.pipeline_mode<synchronous>, transform_indices = @transform_13, window_bounds = array<i64: 2, 1, 64>}, {pipeline_mode = #tpu.pipeline_mode<synchronous>, transform_indices = @transform_14, window_bounds = array<i64: 2, 64, 256>}, {pipeline_mode = #tpu.pipeline_mode<synchronous>, transform_indices = @transform_15, window_bounds = array<i64: 2, 1, 256>}, {pipeline_mode = #tpu.pipeline_mode<synchronous>, transform_indices = @transform_16, window_bounds = array<i64: 2, 256, 64>}, {pipeline_mode = #tpu.pipeline_mode<synchronous>, transform_indices = @transform_17, window_bounds = array<i64: 2, 1, 64>}, {pipeline_mode = #tpu.pipeline_mode<synchronous>, transform_indices = @transform_18, window_bounds = array<i64: 1, 64>}, {pipeline_mode = #tpu.pipeline_mode<synchronous>, transform_indices = @transform_19, window_bounds = array<i64: 1, 64>}, {transform_indices = @transform_20, window_bounds = array<i64: 32, 1>}]} {
    %c0 = arith.constant 0 : index
    %c0_0 = arith.constant 0 : index
    %0 = vector.load %arg1[%c0, %c0_0] : memref<32x128xf32, #tpu.memory_space<vmem>>, vector<32x128xf32>
    %c0_1 = arith.constant 0 : index
    %c0_2 = arith.constant 0 : index
    %1 = vector.load %arg4[%c0_1, %c0_2] : memref<1x128xf32, #tpu.memory_space<vmem>>, vector<1x128xf32>
    %c0_3 = arith.constant 0 : index
    %c0_4 = arith.constant 0 : index
    %2 = vector.load %arg5[%c0_3, %c0_4] : memref<1x128xf32, #tpu.memory_space<vmem>>, vector<1x128xf32>
    %cst = arith.constant dense<0.000000e+00> : vector<32xf32>
    %3 = vector.multi_reduction <add>, %0, %cst [1] : vector<32x128xf32> to vector<32xf32>
    %4 = vector.shape_cast %3 : vector<32xf32> to vector<32x1xf32>
    %cst_5 = arith.constant 1.280000e+02 : f32
    %5 = vector.broadcast %cst_5 : f32 to vector<32x1xf32>
    %6 = arith.divf %4, %5 : vector<32x1xf32>
    %7 = vector.broadcast %6 : vector<32x1xf32> to vector<32x128xf32>
    %8 = arith.subf %0, %7 : vector<32x128xf32>
    %9 = arith.mulf %8, %8 : vector<32x128xf32>
    %cst_6 = arith.constant dense<0.000000e+00> : vector<32xf32>
    %10 = vector.multi_reduction <add>, %9, %cst_6 [1] : vector<32x128xf32> to vector<32xf32>
    %11 = vector.shape_cast %10 : vector<32xf32> to vector<32x1xf32>
    %cst_7 = arith.constant 1.280000e+02 : f32
    %12 = vector.broadcast %cst_7 : f32 to vector<32x1xf32>
    %13 = arith.divf %11, %12 : vector<32x1xf32>
    %14 = vector.broadcast %6 : vector<32x1xf32> to vector<32x128xf32>
    %15 = arith.subf %0, %14 : vector<32x128xf32>
    %cst_8 = arith.constant 9.99999974E-6 : f32
    %16 = vector.broadcast %cst_8 : f32 to vector<32x1xf32>
    %17 = arith.addf %13, %16 : vector<32x1xf32>
    %18 = math.rsqrt %17 : vector<32x1xf32>
    %19 = vector.broadcast %18 : vector<32x1xf32> to vector<32x128xf32>
    %20 = arith.mulf %15, %19 : vector<32x128xf32>
    %21 = vector.broadcast %1 : vector<1x128xf32> to vector<32x128xf32>
    %22 = arith.mulf %20, %21 : vector<32x128xf32>
    %23 = vector.broadcast %2 : vector<1x128xf32> to vector<32x128xf32>
    %24 = arith.addf %22, %23 : vector<32x128xf32>
    %25 = arith.truncf %24 : vector<32x128xf32> to vector<32x128xbf16>
    %c0_9 = arith.constant 0 : index
    %c0_10 = arith.constant 0 : index
    %26 = vector.load %arg2[%c0_9, %c0_10] : memref<128x64xbf16, #tpu.memory_space<vmem>>, vector<128x64xbf16>
    %cst_11 = arith.constant dense<0.000000e+00> : vector<32x64xf32>
    %27 = tpu.matmul %25, %26, %cst_11 {dimension_numbers = #tpu.dot_dimension_numbers<[1], [0], [0], [1], [0, 0, 1, 1], [], []>} : vector<32x128xbf16>, vector<128x64xbf16>, vector<32x64xf32> -> vector<32x64xf32>
    %c0_12 = arith.constant 0 : index
    %c0_13 = arith.constant 0 : index
    %28 = vector.load %arg3[%c0_12, %c0_13] : memref<1x64xf32, #tpu.memory_space<vmem>>, vector<1x64xf32>
    %29 = vector.broadcast %28 : vector<1x64xf32> to vector<32x64xf32>
    %30 = arith.addf %27, %29 : vector<32x64xf32>
    %c0_14 = arith.constant 0 : index
    %c0_15 = arith.constant 0 : index
    %c0_16 = arith.constant 0 : index
    %31 = vector.load %arg7[%c0_14, %c0_15, %c0_16] : memref<2x1x64xf32, #tpu.memory_space<vmem>>, vector<1x1x64xf32>
    %32 = vector.shape_cast %31 : vector<1x1x64xf32> to vector<1x64xf32>
    %c0_17 = arith.constant 0 : index
    %c0_18 = arith.constant 0 : index
    %c0_19 = arith.constant 0 : index
    %33 = vector.load %arg8[%c0_17, %c0_18, %c0_19] : memref<2x1x64xf32, #tpu.memory_space<vmem>>, vector<1x1x64xf32>
    %34 = vector.shape_cast %33 : vector<1x1x64xf32> to vector<1x64xf32>
    %cst_20 = arith.constant dense<0.000000e+00> : vector<32xf32>
    %35 = vector.multi_reduction <add>, %30, %cst_20 [1] : vector<32x64xf32> to vector<32xf32>
    %36 = vector.shape_cast %35 : vector<32xf32> to vector<32x1xf32>
    %cst_21 = arith.constant 6.400000e+01 : f32
    %37 = vector.broadcast %cst_21 : f32 to vector<32x1xf32>
    %38 = arith.divf %36, %37 : vector<32x1xf32>
    %39 = vector.broadcast %38 : vector<32x1xf32> to vector<32x64xf32>
    %40 = arith.subf %30, %39 : vector<32x64xf32>
    %41 = arith.mulf %40, %40 : vector<32x64xf32>
    %cst_22 = arith.constant dense<0.000000e+00> : vector<32xf32>
    %42 = vector.multi_reduction <add>, %41, %cst_22 [1] : vector<32x64xf32> to vector<32xf32>
    %43 = vector.shape_cast %42 : vector<32xf32> to vector<32x1xf32>
    %cst_23 = arith.constant 6.400000e+01 : f32
    %44 = vector.broadcast %cst_23 : f32 to vector<32x1xf32>
    %45 = arith.divf %43, %44 : vector<32x1xf32>
    %46 = vector.broadcast %38 : vector<32x1xf32> to vector<32x64xf32>
    %47 = arith.subf %30, %46 : vector<32x64xf32>
    %cst_24 = arith.constant 9.99999974E-6 : f32
    %48 = vector.broadcast %cst_24 : f32 to vector<32x1xf32>
    %49 = arith.addf %45, %48 : vector<32x1xf32>
    %50 = math.rsqrt %49 : vector<32x1xf32>
    %51 = vector.broadcast %50 : vector<32x1xf32> to vector<32x64xf32>
    %52 = arith.mulf %47, %51 : vector<32x64xf32>
    %53 = vector.broadcast %32 : vector<1x64xf32> to vector<32x64xf32>
    %54 = arith.mulf %52, %53 : vector<32x64xf32>
    %55 = vector.broadcast %34 : vector<1x64xf32> to vector<32x64xf32>
    %56 = arith.addf %54, %55 : vector<32x64xf32>
    %57 = arith.truncf %56 : vector<32x64xf32> to vector<32x64xbf16>
    %c0_25 = arith.constant 0 : index
    %c0_26 = arith.constant 0 : index
    %c0_27 = arith.constant 0 : index
    %58 = vector.load %arg9[%c0_25, %c0_26, %c0_27] : memref<2x64x192xbf16, #tpu.memory_space<vmem>>, vector<1x64x192xbf16>
    %59 = vector.shape_cast %58 : vector<1x64x192xbf16> to vector<64x192xbf16>
    %cst_28 = arith.constant dense<0.000000e+00> : vector<32x192xf32>
    %60 = tpu.matmul %57, %59, %cst_28 {dimension_numbers = #tpu.dot_dimension_numbers<[1], [0], [0], [1], [0, 0, 1, 1], [], []>} : vector<32x64xbf16>, vector<64x192xbf16>, vector<32x192xf32> -> vector<32x192xf32>
    %c0_29 = arith.constant 0 : index
    %c0_30 = arith.constant 0 : index
    %c0_31 = arith.constant 0 : index
    %61 = vector.load %arg10[%c0_29, %c0_30, %c0_31] : memref<2x1x192xf32, #tpu.memory_space<vmem>>, vector<1x1x192xf32>
    %62 = vector.shape_cast %61 : vector<1x1x192xf32> to vector<1x192xf32>
    %63 = vector.broadcast %62 : vector<1x192xf32> to vector<32x192xf32>
    %64 = arith.addf %60, %63 : vector<32x192xf32>
    %65 = vector.extract_strided_slice %64 {offsets = [0, 0], sizes = [32, 64], strides = [1, 1]} : vector<32x192xf32> to vector<32x64xf32>
    %cst_32 = arith.constant 2.500000e-01 : f32
    %66 = vector.broadcast %cst_32 : f32 to vector<32x64xf32>
    %67 = arith.mulf %65, %66 : vector<32x64xf32>
    %68 = vector.extract_strided_slice %64 {offsets = [0, 64], sizes = [32, 64], strides = [1, 1]} : vector<32x192xf32> to vector<32x64xf32>
    %69 = vector.extract_strided_slice %64 {offsets = [0, 128], sizes = [32, 64], strides = [1, 1]} : vector<32x192xf32> to vector<32x64xf32>
    %70 = vector.extract_strided_slice %67 {offsets = [0, 0], sizes = [32, 16], strides = [1, 1]} : vector<32x64xf32> to vector<32x16xf32>
    %71 = arith.truncf %70 : vector<32x16xf32> to vector<32x16xbf16>
    %72 = vector.extract_strided_slice %68 {offsets = [0, 0], sizes = [32, 16], strides = [1, 1]} : vector<32x64xf32> to vector<32x16xf32>
    %73 = arith.truncf %72 : vector<32x16xf32> to vector<32x16xbf16>
    %cst_33 = arith.constant dense<0.000000e+00> : vector<32x32xf32>
    %74 = tpu.matmul %71, %73, %cst_33 {dimension_numbers = #tpu.dot_dimension_numbers<[1], [1], [0], [0], [0, 0, 1, 0], [], []>} : vector<32x16xbf16>, vector<32x16xbf16>, vector<32x32xf32> -> vector<32x32xf32>
    %c0_34 = arith.constant 0 : index
    %c0_35 = arith.constant 0 : index
    %c0_36 = arith.constant 0 : index
    %c0_37 = arith.constant 0 : index
    %75 = vector.load %arg6[%c0_34, %c0_35, %c0_36, %c0_37] : memref<2x4x32x32xf32, #tpu.memory_space<vmem>>, vector<1x1x32x32xf32>
    %76 = vector.shape_cast %75 : vector<1x1x32x32xf32> to vector<32x32xf32>
    %77 = arith.addf %74, %76 : vector<32x32xf32>
    %cst_38 = arith.constant dense<0xFF800000> : vector<32xf32>
    %78 = vector.multi_reduction <maximumf>, %77, %cst_38 [1] : vector<32x32xf32> to vector<32xf32>
    %79 = vector.shape_cast %78 : vector<32xf32> to vector<32x1xf32>
    %80 = vector.broadcast %79 : vector<32x1xf32> to vector<32x32xf32>
    %81 = arith.subf %77, %80 : vector<32x32xf32>
    %82 = math.exp %81 : vector<32x32xf32>
    %cst_39 = arith.constant dense<0.000000e+00> : vector<32xf32>
    %83 = vector.multi_reduction <add>, %82, %cst_39 [1] : vector<32x32xf32> to vector<32xf32>
    %84 = vector.shape_cast %83 : vector<32xf32> to vector<32x1xf32>
    %85 = tpu.reciprocal %84 {approx = true} : vector<32x1xf32> -> vector<32x1xf32>
    %86 = vector.broadcast %85 : vector<32x1xf32> to vector<32x32xf32>
    %87 = arith.mulf %82, %86 : vector<32x32xf32>
    %88 = arith.truncf %87 : vector<32x32xf32> to vector<32x32xbf16>
    %89 = vector.extract_strided_slice %69 {offsets = [0, 0], sizes = [32, 16], strides = [1, 1]} : vector<32x64xf32> to vector<32x16xf32>
    %90 = arith.truncf %89 : vector<32x16xf32> to vector<32x16xbf16>
    %cst_40 = arith.constant dense<0.000000e+00> : vector<32x16xf32>
    %91 = tpu.matmul %88, %90, %cst_40 {dimension_numbers = #tpu.dot_dimension_numbers<[1], [0], [0], [1], [0, 0, 1, 1], [], []>} : vector<32x32xbf16>, vector<32x16xbf16>, vector<32x16xf32> -> vector<32x16xf32>
    %c0_41 = arith.constant 0 : index
    %c0_42 = arith.constant 0 : index
    %92 = vector.load %arg22[%c0_41, %c0_42] : memref<32x64xf32, #tpu.memory_space<vmem>>, vector<32x16xf32>
    tpu.vector_store %arg22[%c0_41, %c0_42], %91 {strides = array<i32>} : memref<32x64xf32, #tpu.memory_space<vmem>>, vector<32x16xf32>,
    %93 = vector.extract_strided_slice %67 {offsets = [0, 16], sizes = [32, 16], strides = [1, 1]} : vector<32x64xf32> to vector<32x16xf32>
    %94 = arith.truncf %93 : vector<32x16xf32> to vector<32x16xbf16>
    %95 = vector.extract_strided_slice %68 {offsets = [0, 16], sizes = [32, 16], strides = [1, 1]} : vector<32x64xf32> to vector<32x16xf32>
    %96 = arith.truncf %95 : vector<32x16xf32> to vector<32x16xbf16>
    %cst_43 = arith.constant dense<0.000000e+00> : vector<32x32xf32>
    %97 = tpu.matmul %94, %96, %cst_43 {dimension_numbers = #tpu.dot_dimension_numbers<[1], [1], [0], [0], [0, 0, 1, 0], [], []>} : vector<32x16xbf16>, vector<32x16xbf16>, vector<32x32xf32> -> vector<32x32xf32>
    %c0_44 = arith.constant 0 : index
    %c1 = arith.constant 1 : index
    %c0_45 = arith.constant 0 : index
    %c0_46 = arith.constant 0 : index
    %98 = vector.load %arg6[%c0_44, %c1, %c0_45, %c0_46] : memref<2x4x32x32xf32, #tpu.memory_space<vmem>>, vector<1x1x32x32xf32>
    %99 = vector.shape_cast %98 : vector<1x1x32x32xf32> to vector<32x32xf32>
    %100 = arith.addf %97, %99 : vector<32x32xf32>
    %cst_47 = arith.constant dense<0xFF800000> : vector<32xf32>
    %101 = vector.multi_reduction <maximumf>, %100, %cst_47 [1] : vector<32x32xf32> to vector<32xf32>
    %102 = vector.shape_cast %101 : vector<32xf32> to vector<32x1xf32>
    %103 = vector.broadcast %102 : vector<32x1xf32> to vector<32x32xf32>
    %104 = arith.subf %100, %103 : vector<32x32xf32>
    %105 = math.exp %104 : vector<32x32xf32>
    %cst_48 = arith.constant dense<0.000000e+00> : vector<32xf32>
    %106 = vector.multi_reduction <add>, %105, %cst_48 [1] : vector<32x32xf32> to vector<32xf32>
    %107 = vector.shape_cast %106 : vector<32xf32> to vector<32x1xf32>
    %108 = tpu.reciprocal %107 {approx = true} : vector<32x1xf32> -> vector<32x1xf32>
    %109 = vector.broadcast %108 : vector<32x1xf32> to vector<32x32xf32>
    %110 = arith.mulf %105, %109 : vector<32x32xf32>
    %111 = arith.truncf %110 : vector<32x32xf32> to vector<32x32xbf16>
    %112 = vector.extract_strided_slice %69 {offsets = [0, 16], sizes = [32, 16], strides = [1, 1]} : vector<32x64xf32> to vector<32x16xf32>
    %113 = arith.truncf %112 : vector<32x16xf32> to vector<32x16xbf16>
    %cst_49 = arith.constant dense<0.000000e+00> : vector<32x16xf32>
    %114 = tpu.matmul %111, %113, %cst_49 {dimension_numbers = #tpu.dot_dimension_numbers<[1], [0], [0], [1], [0, 0, 1, 1], [], []>} : vector<32x32xbf16>, vector<32x16xbf16>, vector<32x16xf32> -> vector<32x16xf32>
    %c0_50 = arith.constant 0 : index
    %c16 = arith.constant 16 : index
    %115 = vector.load %arg22[%c0_50, %c16] : memref<32x64xf32, #tpu.memory_space<vmem>>, vector<32x16xf32>
    tpu.vector_store %arg22[%c0_50, %c16], %114 {strides = array<i32>} : memref<32x64xf32, #tpu.memory_space<vmem>>, vector<32x16xf32>,
    %116 = vector.extract_strided_slice %67 {offsets = [0, 32], sizes = [32, 16], strides = [1, 1]} : vector<32x64xf32> to vector<32x16xf32>
    %117 = arith.truncf %116 : vector<32x16xf32> to vector<32x16xbf16>
    %118 = vector.extract_strided_slice %68 {offsets = [0, 32], sizes = [32, 16], strides = [1, 1]} : vector<32x64xf32> to vector<32x16xf32>
    %119 = arith.truncf %118 : vector<32x16xf32> to vector<32x16xbf16>
    %cst_51 = arith.constant dense<0.000000e+00> : vector<32x32xf32>
    %120 = tpu.matmul %117, %119, %cst_51 {dimension_numbers = #tpu.dot_dimension_numbers<[1], [1], [0], [0], [0, 0, 1, 0], [], []>} : vector<32x16xbf16>, vector<32x16xbf16>, vector<32x32xf32> -> vector<32x32xf32>
    %c0_52 = arith.constant 0 : index
    %c2 = arith.constant 2 : index
    %c0_53 = arith.constant 0 : index
    %c0_54 = arith.constant 0 : index
    %121 = vector.load %arg6[%c0_52, %c2, %c0_53, %c0_54] : memref<2x4x32x32xf32, #tpu.memory_space<vmem>>, vector<1x1x32x32xf32>
    %122 = vector.shape_cast %121 : vector<1x1x32x32xf32> to vector<32x32xf32>
    %123 = arith.addf %120, %122 : vector<32x32xf32>
    %cst_55 = arith.constant dense<0xFF800000> : vector<32xf32>
    %124 = vector.multi_reduction <maximumf>, %123, %cst_55 [1] : vector<32x32xf32> to vector<32xf32>
    %125 = vector.shape_cast %124 : vector<32xf32> to vector<32x1xf32>
    %126 = vector.broadcast %125 : vector<32x1xf32> to vector<32x32xf32>
    %127 = arith.subf %123, %126 : vector<32x32xf32>
    %128 = math.exp %127 : vector<32x32xf32>
    %cst_56 = arith.constant dense<0.000000e+00> : vector<32xf32>
    %129 = vector.multi_reduction <add>, %128, %cst_56 [1] : vector<32x32xf32> to vector<32xf32>
    %130 = vector.shape_cast %129 : vector<32xf32> to vector<32x1xf32>
    %131 = tpu.reciprocal %130 {approx = true} : vector<32x1xf32> -> vector<32x1xf32>
    %132 = vector.broadcast %131 : vector<32x1xf32> to vector<32x32xf32>
    %133 = arith.mulf %128, %132 : vector<32x32xf32>
    %134 = arith.truncf %133 : vector<32x32xf32> to vector<32x32xbf16>
    %135 = vector.extract_strided_slice %69 {offsets = [0, 32], sizes = [32, 16], strides = [1, 1]} : vector<32x64xf32> to vector<32x16xf32>
    %136 = arith.truncf %135 : vector<32x16xf32> to vector<32x16xbf16>
    %cst_57 = arith.constant dense<0.000000e+00> : vector<32x16xf32>
    %137 = tpu.matmul %134, %136, %cst_57 {dimension_numbers = #tpu.dot_dimension_numbers<[1], [0], [0], [1], [0, 0, 1, 1], [], []>} : vector<32x32xbf16>, vector<32x16xbf16>, vector<32x16xf32> -> vector<32x16xf32>
    %c0_58 = arith.constant 0 : index
    %c32 = arith.constant 32 : index
    %138 = vector.load %arg22[%c0_58, %c32] : memref<32x64xf32, #tpu.memory_space<vmem>>, vector<32x16xf32>
    tpu.vector_store %arg22[%c0_58, %c32], %137 {strides = array<i32>} : memref<32x64xf32, #tpu.memory_space<vmem>>, vector<32x16xf32>,
    %139 = vector.extract_strided_slice %67 {offsets = [0, 48], sizes = [32, 16], strides = [1, 1]} : vector<32x64xf32> to vector<32x16xf32>
    %140 = arith.truncf %139 : vector<32x16xf32> to vector<32x16xbf16>
    %141 = vector.extract_strided_slice %68 {offsets = [0, 48], sizes = [32, 16], strides = [1, 1]} : vector<32x64xf32> to vector<32x16xf32>
    %142 = arith.truncf %141 : vector<32x16xf32> to vector<32x16xbf16>
    %cst_59 = arith.constant dense<0.000000e+00> : vector<32x32xf32>
    %143 = tpu.matmul %140, %142, %cst_59 {dimension_numbers = #tpu.dot_dimension_numbers<[1], [1], [0], [0], [0, 0, 1, 0], [], []>} : vector<32x16xbf16>, vector<32x16xbf16>, vector<32x32xf32> -> vector<32x32xf32>
    %c0_60 = arith.constant 0 : index
    %c3 = arith.constant 3 : index
    %c0_61 = arith.constant 0 : index
    %c0_62 = arith.constant 0 : index
    %144 = vector.load %arg6[%c0_60, %c3, %c0_61, %c0_62] : memref<2x4x32x32xf32, #tpu.memory_space<vmem>>, vector<1x1x32x32xf32>
    %145 = vector.shape_cast %144 : vector<1x1x32x32xf32> to vector<32x32xf32>
    %146 = arith.addf %143, %145 : vector<32x32xf32>
    %cst_63 = arith.constant dense<0xFF800000> : vector<32xf32>
    %147 = vector.multi_reduction <maximumf>, %146, %cst_63 [1] : vector<32x32xf32> to vector<32xf32>
    %148 = vector.shape_cast %147 : vector<32xf32> to vector<32x1xf32>
    %149 = vector.broadcast %148 : vector<32x1xf32> to vector<32x32xf32>
    %150 = arith.subf %146, %149 : vector<32x32xf32>
    %151 = math.exp %150 : vector<32x32xf32>
    %cst_64 = arith.constant dense<0.000000e+00> : vector<32xf32>
    %152 = vector.multi_reduction <add>, %151, %cst_64 [1] : vector<32x32xf32> to vector<32xf32>
    %153 = vector.shape_cast %152 : vector<32xf32> to vector<32x1xf32>
    %154 = tpu.reciprocal %153 {approx = true} : vector<32x1xf32> -> vector<32x1xf32>
    %155 = vector.broadcast %154 : vector<32x1xf32> to vector<32x32xf32>
    %156 = arith.mulf %151, %155 : vector<32x32xf32>
    %157 = arith.truncf %156 : vector<32x32xf32> to vector<32x32xbf16>
    %158 = vector.extract_strided_slice %69 {offsets = [0, 48], sizes = [32, 16], strides = [1, 1]} : vector<32x64xf32> to vector<32x16xf32>
    %159 = arith.truncf %158 : vector<32x16xf32> to vector<32x16xbf16>
    %cst_65 = arith.constant dense<0.000000e+00> : vector<32x16xf32>
    %160 = tpu.matmul %157, %159, %cst_65 {dimension_numbers = #tpu.dot_dimension_numbers<[1], [0], [0], [1], [0, 0, 1, 1], [], []>} : vector<32x32xbf16>, vector<32x16xbf16>, vector<32x16xf32> -> vector<32x16xf32>
    %c0_66 = arith.constant 0 : index
    %c48 = arith.constant 48 : index
    %161 = vector.load %arg22[%c0_66, %c48] : memref<32x64xf32, #tpu.memory_space<vmem>>, vector<32x16xf32>
    tpu.vector_store %arg22[%c0_66, %c48], %160 {strides = array<i32>} : memref<32x64xf32, #tpu.memory_space<vmem>>, vector<32x16xf32>,
    %c0_67 = arith.constant 0 : index
    %c0_68 = arith.constant 0 : index
    %162 = vector.load %arg22[%c0_67, %c0_68] : memref<32x64xf32, #tpu.memory_space<vmem>>, vector<32x64xf32>
    %163 = arith.truncf %162 : vector<32x64xf32> to vector<32x64xbf16>
    %c0_69 = arith.constant 0 : index
    %c0_70 = arith.constant 0 : index
    %c0_71 = arith.constant 0 : index
    %164 = vector.load %arg11[%c0_69, %c0_70, %c0_71] : memref<2x64x64xbf16, #tpu.memory_space<vmem>>, vector<1x64x64xbf16>
    %165 = vector.shape_cast %164 : vector<1x64x64xbf16> to vector<64x64xbf16>
    %cst_72 = arith.constant dense<0.000000e+00> : vector<32x64xf32>
    %166 = tpu.matmul %163, %165, %cst_72 {dimension_numbers = #tpu.dot_dimension_numbers<[1], [0], [0], [1], [0, 0, 1, 1], [], []>} : vector<32x64xbf16>, vector<64x64xbf16>, vector<32x64xf32> -> vector<32x64xf32>
    %c0_73 = arith.constant 0 : index
    %c0_74 = arith.constant 0 : index
    %c0_75 = arith.constant 0 : index
    %167 = vector.load %arg12[%c0_73, %c0_74, %c0_75] : memref<2x1x64xf32, #tpu.memory_space<vmem>>, vector<1x1x64xf32>
    %168 = vector.shape_cast %167 : vector<1x1x64xf32> to vector<1x64xf32>
    %169 = vector.broadcast %168 : vector<1x64xf32> to vector<32x64xf32>
    %170 = arith.addf %166, %169 : vector<32x64xf32>
    %171 = arith.addf %30, %170 : vector<32x64xf32>
    %c0_76 = arith.constant 0 : index
    %c0_77 = arith.constant 0 : index
    %c0_78 = arith.constant 0 : index
    %172 = vector.load %arg13[%c0_76, %c0_77, %c0_78] : memref<2x1x64xf32, #tpu.memory_space<vmem>>, vector<1x1x64xf32>
    %173 = vector.shape_cast %172 : vector<1x1x64xf32> to vector<1x64xf32>
    %c0_79 = arith.constant 0 : index
    %c0_80 = arith.constant 0 : index
    %c0_81 = arith.constant 0 : index
    %174 = vector.load %arg14[%c0_79, %c0_80, %c0_81] : memref<2x1x64xf32, #tpu.memory_space<vmem>>, vector<1x1x64xf32>
    %175 = vector.shape_cast %174 : vector<1x1x64xf32> to vector<1x64xf32>
    %cst_82 = arith.constant dense<0.000000e+00> : vector<32xf32>
    %176 = vector.multi_reduction <add>, %171, %cst_82 [1] : vector<32x64xf32> to vector<32xf32>
    %177 = vector.shape_cast %176 : vector<32xf32> to vector<32x1xf32>
    %cst_83 = arith.constant 6.400000e+01 : f32
    %178 = vector.broadcast %cst_83 : f32 to vector<32x1xf32>
    %179 = arith.divf %177, %178 : vector<32x1xf32>
    %180 = vector.broadcast %179 : vector<32x1xf32> to vector<32x64xf32>
    %181 = arith.subf %171, %180 : vector<32x64xf32>
    %182 = arith.mulf %181, %181 : vector<32x64xf32>
    %cst_84 = arith.constant dense<0.000000e+00> : vector<32xf32>
    %183 = vector.multi_reduction <add>, %182, %cst_84 [1] : vector<32x64xf32> to vector<32xf32>
    %184 = vector.shape_cast %183 : vector<32xf32> to vector<32x1xf32>
    %cst_85 = arith.constant 6.400000e+01 : f32
    %185 = vector.broadcast %cst_85 : f32 to vector<32x1xf32>
    %186 = arith.divf %184, %185 : vector<32x1xf32>
    %187 = vector.broadcast %179 : vector<32x1xf32> to vector<32x64xf32>
    %188 = arith.subf %171, %187 : vector<32x64xf32>
    %cst_86 = arith.constant 9.99999974E-6 : f32
    %189 = vector.broadcast %cst_86 : f32 to vector<32x1xf32>
    %190 = arith.addf %186, %189 : vector<32x1xf32>
    %191 = math.rsqrt %190 : vector<32x1xf32>
    %192 = vector.broadcast %191 : vector<32x1xf32> to vector<32x64xf32>
    %193 = arith.mulf %188, %192 : vector<32x64xf32>
    %194 = vector.broadcast %173 : vector<1x64xf32> to vector<32x64xf32>
    %195 = arith.mulf %193, %194 : vector<32x64xf32>
    %196 = vector.broadcast %175 : vector<1x64xf32> to vector<32x64xf32>
    %197 = arith.addf %195, %196 : vector<32x64xf32>
    %198 = arith.truncf %197 : vector<32x64xf32> to vector<32x64xbf16>
    %c0_87 = arith.constant 0 : index
    %c0_88 = arith.constant 0 : index
    %c0_89 = arith.constant 0 : index
    %199 = vector.load %arg15[%c0_87, %c0_88, %c0_89] : memref<2x64x256xbf16, #tpu.memory_space<vmem>>, vector<1x64x256xbf16>
    %200 = vector.shape_cast %199 : vector<1x64x256xbf16> to vector<64x256xbf16>
    %cst_90 = arith.constant dense<0.000000e+00> : vector<32x256xf32>
    %201 = tpu.matmul %198, %200, %cst_90 {dimension_numbers = #tpu.dot_dimension_numbers<[1], [0], [0], [1], [0, 0, 1, 1], [], []>} : vector<32x64xbf16>, vector<64x256xbf16>, vector<32x256xf32> -> vector<32x256xf32>
    %c0_91 = arith.constant 0 : index
    %c0_92 = arith.constant 0 : index
    %c0_93 = arith.constant 0 : index
    %202 = vector.load %arg16[%c0_91, %c0_92, %c0_93] : memref<2x1x256xf32, #tpu.memory_space<vmem>>, vector<1x1x256xf32>
    %203 = vector.shape_cast %202 : vector<1x1x256xf32> to vector<1x256xf32>
    %204 = vector.broadcast %203 : vector<1x256xf32> to vector<32x256xf32>
    %205 = arith.addf %201, %204 : vector<32x256xf32>
    %cst_94 = arith.constant 5.000000e-01 : f32
    %206 = vector.broadcast %cst_94 : f32 to vector<32x256xf32>
    %207 = arith.mulf %206, %205 : vector<32x256xf32>
    %cst_95 = arith.constant 4.471500e-02 : f32
    %208 = vector.broadcast %cst_95 : f32 to vector<32x256xf32>
    %209 = arith.mulf %208, %205 : vector<32x256xf32>
    %210 = arith.mulf %209, %205 : vector<32x256xf32>
    %211 = arith.mulf %210, %205 : vector<32x256xf32>
    %212 = arith.addf %205, %211 : vector<32x256xf32>
    %cst_96 = arith.constant 0.797884583 : f32
    %213 = vector.broadcast %cst_96 : f32 to vector<32x256xf32>
    %214 = arith.mulf %213, %212 : vector<32x256xf32>
    %215 = math.tanh %214 : vector<32x256xf32>
    %cst_97 = arith.constant 1.000000e+00 : f32
    %216 = vector.broadcast %cst_97 : f32 to vector<32x256xf32>
    %217 = arith.addf %216, %215 : vector<32x256xf32>
    %218 = arith.mulf %207, %217 : vector<32x256xf32>
    %219 = arith.truncf %218 : vector<32x256xf32> to vector<32x256xbf16>
    %c0_98 = arith.constant 0 : index
    %c0_99 = arith.constant 0 : index
    %c0_100 = arith.constant 0 : index
    %220 = vector.load %arg17[%c0_98, %c0_99, %c0_100] : memref<2x256x64xbf16, #tpu.memory_space<vmem>>, vector<1x256x64xbf16>
    %221 = vector.shape_cast %220 : vector<1x256x64xbf16> to vector<256x64xbf16>
    %cst_101 = arith.constant dense<0.000000e+00> : vector<32x64xf32>
    %222 = tpu.matmul %219, %221, %cst_101 {dimension_numbers = #tpu.dot_dimension_numbers<[1], [0], [0], [1], [0, 0, 1, 1], [], []>} : vector<32x256xbf16>, vector<256x64xbf16>, vector<32x64xf32> -> vector<32x64xf32>
    %c0_102 = arith.constant 0 : index
    %c0_103 = arith.constant 0 : index
    %c0_104 = arith.constant 0 : index
    %223 = vector.load %arg18[%c0_102, %c0_103, %c0_104] : memref<2x1x64xf32, #tpu.memory_space<vmem>>, vector<1x1x64xf32>
    %224 = vector.shape_cast %223 : vector<1x1x64xf32> to vector<1x64xf32>
    %225 = vector.broadcast %224 : vector<1x64xf32> to vector<32x64xf32>
    %226 = arith.addf %222, %225 : vector<32x64xf32>
    %227 = arith.addf %171, %226 : vector<32x64xf32>
    %c1_105 = arith.constant 1 : index
    %c0_106 = arith.constant 0 : index
    %c0_107 = arith.constant 0 : index
    %228 = vector.load %arg7[%c1_105, %c0_106, %c0_107] : memref<2x1x64xf32, #tpu.memory_space<vmem>>, vector<1x1x64xf32>
    %229 = vector.shape_cast %228 : vector<1x1x64xf32> to vector<1x64xf32>
    %c1_108 = arith.constant 1 : index
    %c0_109 = arith.constant 0 : index
    %c0_110 = arith.constant 0 : index
    %230 = vector.load %arg8[%c1_108, %c0_109, %c0_110] : memref<2x1x64xf32, #tpu.memory_space<vmem>>, vector<1x1x64xf32>
    %231 = vector.shape_cast %230 : vector<1x1x64xf32> to vector<1x64xf32>
    %cst_111 = arith.constant dense<0.000000e+00> : vector<32xf32>
    %232 = vector.multi_reduction <add>, %227, %cst_111 [1] : vector<32x64xf32> to vector<32xf32>
    %233 = vector.shape_cast %232 : vector<32xf32> to vector<32x1xf32>
    %cst_112 = arith.constant 6.400000e+01 : f32
    %234 = vector.broadcast %cst_112 : f32 to vector<32x1xf32>
    %235 = arith.divf %233, %234 : vector<32x1xf32>
    %236 = vector.broadcast %235 : vector<32x1xf32> to vector<32x64xf32>
    %237 = arith.subf %227, %236 : vector<32x64xf32>
    %238 = arith.mulf %237, %237 : vector<32x64xf32>
    %cst_113 = arith.constant dense<0.000000e+00> : vector<32xf32>
    %239 = vector.multi_reduction <add>, %238, %cst_113 [1] : vector<32x64xf32> to vector<32xf32>
    %240 = vector.shape_cast %239 : vector<32xf32> to vector<32x1xf32>
    %cst_114 = arith.constant 6.400000e+01 : f32
    %241 = vector.broadcast %cst_114 : f32 to vector<32x1xf32>
    %242 = arith.divf %240, %241 : vector<32x1xf32>
    %243 = vector.broadcast %235 : vector<32x1xf32> to vector<32x64xf32>
    %244 = arith.subf %227, %243 : vector<32x64xf32>
    %cst_115 = arith.constant 9.99999974E-6 : f32
    %245 = vector.broadcast %cst_115 : f32 to vector<32x1xf32>
    %246 = arith.addf %242, %245 : vector<32x1xf32>
    %247 = math.rsqrt %246 : vector<32x1xf32>
    %248 = vector.broadcast %247 : vector<32x1xf32> to vector<32x64xf32>
    %249 = arith.mulf %244, %248 : vector<32x64xf32>
    %250 = vector.broadcast %229 : vector<1x64xf32> to vector<32x64xf32>
    %251 = arith.mulf %249, %250 : vector<32x64xf32>
    %252 = vector.broadcast %231 : vector<1x64xf32> to vector<32x64xf32>
    %253 = arith.addf %251, %252 : vector<32x64xf32>
    %254 = arith.truncf %253 : vector<32x64xf32> to vector<32x64xbf16>
    %c1_116 = arith.constant 1 : index
    %c0_117 = arith.constant 0 : index
    %c0_118 = arith.constant 0 : index
    %255 = vector.load %arg9[%c1_116, %c0_117, %c0_118] : memref<2x64x192xbf16, #tpu.memory_space<vmem>>, vector<1x64x192xbf16>
    %256 = vector.shape_cast %255 : vector<1x64x192xbf16> to vector<64x192xbf16>
    %cst_119 = arith.constant dense<0.000000e+00> : vector<32x192xf32>
    %257 = tpu.matmul %254, %256, %cst_119 {dimension_numbers = #tpu.dot_dimension_numbers<[1], [0], [0], [1], [0, 0, 1, 1], [], []>} : vector<32x64xbf16>, vector<64x192xbf16>, vector<32x192xf32> -> vector<32x192xf32>
    %c1_120 = arith.constant 1 : index
    %c0_121 = arith.constant 0 : index
    %c0_122 = arith.constant 0 : index
    %258 = vector.load %arg10[%c1_120, %c0_121, %c0_122] : memref<2x1x192xf32, #tpu.memory_space<vmem>>, vector<1x1x192xf32>
    %259 = vector.shape_cast %258 : vector<1x1x192xf32> to vector<1x192xf32>
    %260 = vector.broadcast %259 : vector<1x192xf32> to vector<32x192xf32>
    %261 = arith.addf %257, %260 : vector<32x192xf32>
    %262 = vector.extract_strided_slice %261 {offsets = [0, 0], sizes = [32, 64], strides = [1, 1]} : vector<32x192xf32> to vector<32x64xf32>
    %cst_123 = arith.constant 2.500000e-01 : f32
    %263 = vector.broadcast %cst_123 : f32 to vector<32x64xf32>
    %264 = arith.mulf %262, %263 : vector<32x64xf32>
    %265 = vector.extract_strided_slice %261 {offsets = [0, 64], sizes = [32, 64], strides = [1, 1]} : vector<32x192xf32> to vector<32x64xf32>
    %266 = vector.extract_strided_slice %261 {offsets = [0, 128], sizes = [32, 64], strides = [1, 1]} : vector<32x192xf32> to vector<32x64xf32>
    %267 = vector.extract_strided_slice %264 {offsets = [0, 0], sizes = [32, 16], strides = [1, 1]} : vector<32x64xf32> to vector<32x16xf32>
    %268 = arith.truncf %267 : vector<32x16xf32> to vector<32x16xbf16>
    %269 = vector.extract_strided_slice %265 {offsets = [0, 0], sizes = [32, 16], strides = [1, 1]} : vector<32x64xf32> to vector<32x16xf32>
    %270 = arith.truncf %269 : vector<32x16xf32> to vector<32x16xbf16>
    %cst_124 = arith.constant dense<0.000000e+00> : vector<32x32xf32>
    %271 = tpu.matmul %268, %270, %cst_124 {dimension_numbers = #tpu.dot_dimension_numbers<[1], [1], [0], [0], [0, 0, 1, 0], [], []>} : vector<32x16xbf16>, vector<32x16xbf16>, vector<32x32xf32> -> vector<32x32xf32>
    %c1_125 = arith.constant 1 : index
    %c0_126 = arith.constant 0 : index
    %c0_127 = arith.constant 0 : index
    %c0_128 = arith.constant 0 : index
    %272 = vector.load %arg6[%c1_125, %c0_126, %c0_127, %c0_128] : memref<2x4x32x32xf32, #tpu.memory_space<vmem>>, vector<1x1x32x32xf32>
    %273 = vector.shape_cast %272 : vector<1x1x32x32xf32> to vector<32x32xf32>
    %274 = arith.addf %271, %273 : vector<32x32xf32>
    %cst_129 = arith.constant dense<0xFF800000> : vector<32xf32>
    %275 = vector.multi_reduction <maximumf>, %274, %cst_129 [1] : vector<32x32xf32> to vector<32xf32>
    %276 = vector.shape_cast %275 : vector<32xf32> to vector<32x1xf32>
    %277 = vector.broadcast %276 : vector<32x1xf32> to vector<32x32xf32>
    %278 = arith.subf %274, %277 : vector<32x32xf32>
    %279 = math.exp %278 : vector<32x32xf32>
    %cst_130 = arith.constant dense<0.000000e+00> : vector<32xf32>
    %280 = vector.multi_reduction <add>, %279, %cst_130 [1] : vector<32x32xf32> to vector<32xf32>
    %281 = vector.shape_cast %280 : vector<32xf32> to vector<32x1xf32>
    %282 = tpu.reciprocal %281 {approx = true} : vector<32x1xf32> -> vector<32x1xf32>
    %283 = vector.broadcast %282 : vector<32x1xf32> to vector<32x32xf32>
    %284 = arith.mulf %279, %283 : vector<32x32xf32>
    %285 = arith.truncf %284 : vector<32x32xf32> to vector<32x32xbf16>
    %286 = vector.extract_strided_slice %266 {offsets = [0, 0], sizes = [32, 16], strides = [1, 1]} : vector<32x64xf32> to vector<32x16xf32>
    %287 = arith.truncf %286 : vector<32x16xf32> to vector<32x16xbf16>
    %cst_131 = arith.constant dense<0.000000e+00> : vector<32x16xf32>
    %288 = tpu.matmul %285, %287, %cst_131 {dimension_numbers = #tpu.dot_dimension_numbers<[1], [0], [0], [1], [0, 0, 1, 1], [], []>} : vector<32x32xbf16>, vector<32x16xbf16>, vector<32x16xf32> -> vector<32x16xf32>
    %c0_132 = arith.constant 0 : index
    %c0_133 = arith.constant 0 : index
    %289 = vector.load %arg22[%c0_132, %c0_133] : memref<32x64xf32, #tpu.memory_space<vmem>>, vector<32x16xf32>
    tpu.vector_store %arg22[%c0_132, %c0_133], %288 {strides = array<i32>} : memref<32x64xf32, #tpu.memory_space<vmem>>, vector<32x16xf32>,
    %290 = vector.extract_strided_slice %264 {offsets = [0, 16], sizes = [32, 16], strides = [1, 1]} : vector<32x64xf32> to vector<32x16xf32>
    %291 = arith.truncf %290 : vector<32x16xf32> to vector<32x16xbf16>
    %292 = vector.extract_strided_slice %265 {offsets = [0, 16], sizes = [32, 16], strides = [1, 1]} : vector<32x64xf32> to vector<32x16xf32>
    %293 = arith.truncf %292 : vector<32x16xf32> to vector<32x16xbf16>
    %cst_134 = arith.constant dense<0.000000e+00> : vector<32x32xf32>
    %294 = tpu.matmul %291, %293, %cst_134 {dimension_numbers = #tpu.dot_dimension_numbers<[1], [1], [0], [0], [0, 0, 1, 0], [], []>} : vector<32x16xbf16>, vector<32x16xbf16>, vector<32x32xf32> -> vector<32x32xf32>
    %c1_135 = arith.constant 1 : index
    %c1_136 = arith.constant 1 : index
    %c0_137 = arith.constant 0 : index
    %c0_138 = arith.constant 0 : index
    %295 = vector.load %arg6[%c1_135, %c1_136, %c0_137, %c0_138] : memref<2x4x32x32xf32, #tpu.memory_space<vmem>>, vector<1x1x32x32xf32>
    %296 = vector.shape_cast %295 : vector<1x1x32x32xf32> to vector<32x32xf32>
    %297 = arith.addf %294, %296 : vector<32x32xf32>
    %cst_139 = arith.constant dense<0xFF800000> : vector<32xf32>
    %298 = vector.multi_reduction <maximumf>, %297, %cst_139 [1] : vector<32x32xf32> to vector<32xf32>
    %299 = vector.shape_cast %298 : vector<32xf32> to vector<32x1xf32>
    %300 = vector.broadcast %299 : vector<32x1xf32> to vector<32x32xf32>
    %301 = arith.subf %297, %300 : vector<32x32xf32>
    %302 = math.exp %301 : vector<32x32xf32>
    %cst_140 = arith.constant dense<0.000000e+00> : vector<32xf32>
    %303 = vector.multi_reduction <add>, %302, %cst_140 [1] : vector<32x32xf32> to vector<32xf32>
    %304 = vector.shape_cast %303 : vector<32xf32> to vector<32x1xf32>
    %305 = tpu.reciprocal %304 {approx = true} : vector<32x1xf32> -> vector<32x1xf32>
    %306 = vector.broadcast %305 : vector<32x1xf32> to vector<32x32xf32>
    %307 = arith.mulf %302, %306 : vector<32x32xf32>
    %308 = arith.truncf %307 : vector<32x32xf32> to vector<32x32xbf16>
    %309 = vector.extract_strided_slice %266 {offsets = [0, 16], sizes = [32, 16], strides = [1, 1]} : vector<32x64xf32> to vector<32x16xf32>
    %310 = arith.truncf %309 : vector<32x16xf32> to vector<32x16xbf16>
    %cst_141 = arith.constant dense<0.000000e+00> : vector<32x16xf32>
    %311 = tpu.matmul %308, %310, %cst_141 {dimension_numbers = #tpu.dot_dimension_numbers<[1], [0], [0], [1], [0, 0, 1, 1], [], []>} : vector<32x32xbf16>, vector<32x16xbf16>, vector<32x16xf32> -> vector<32x16xf32>
    %c0_142 = arith.constant 0 : index
    %c16_143 = arith.constant 16 : index
    %312 = vector.load %arg22[%c0_142, %c16_143] : memref<32x64xf32, #tpu.memory_space<vmem>>, vector<32x16xf32>
    tpu.vector_store %arg22[%c0_142, %c16_143], %311 {strides = array<i32>} : memref<32x64xf32, #tpu.memory_space<vmem>>, vector<32x16xf32>,
    %313 = vector.extract_strided_slice %264 {offsets = [0, 32], sizes = [32, 16], strides = [1, 1]} : vector<32x64xf32> to vector<32x16xf32>
    %314 = arith.truncf %313 : vector<32x16xf32> to vector<32x16xbf16>
    %315 = vector.extract_strided_slice %265 {offsets = [0, 32], sizes = [32, 16], strides = [1, 1]} : vector<32x64xf32> to vector<32x16xf32>
    %316 = arith.truncf %315 : vector<32x16xf32> to vector<32x16xbf16>
    %cst_144 = arith.constant dense<0.000000e+00> : vector<32x32xf32>
    %317 = tpu.matmul %314, %316, %cst_144 {dimension_numbers = #tpu.dot_dimension_numbers<[1], [1], [0], [0], [0, 0, 1, 0], [], []>} : vector<32x16xbf16>, vector<32x16xbf16>, vector<32x32xf32> -> vector<32x32xf32>
    %c1_145 = arith.constant 1 : index
    %c2_146 = arith.constant 2 : index
    %c0_147 = arith.constant 0 : index
    %c0_148 = arith.constant 0 : index
    %318 = vector.load %arg6[%c1_145, %c2_146, %c0_147, %c0_148] : memref<2x4x32x32xf32, #tpu.memory_space<vmem>>, vector<1x1x32x32xf32>
    %319 = vector.shape_cast %318 : vector<1x1x32x32xf32> to vector<32x32xf32>
    %320 = arith.addf %317, %319 : vector<32x32xf32>
    %cst_149 = arith.constant dense<0xFF800000> : vector<32xf32>
    %321 = vector.multi_reduction <maximumf>, %320, %cst_149 [1] : vector<32x32xf32> to vector<32xf32>
    %322 = vector.shape_cast %321 : vector<32xf32> to vector<32x1xf32>
    %323 = vector.broadcast %322 : vector<32x1xf32> to vector<32x32xf32>
    %324 = arith.subf %320, %323 : vector<32x32xf32>
    %325 = math.exp %324 : vector<32x32xf32>
    %cst_150 = arith.constant dense<0.000000e+00> : vector<32xf32>
    %326 = vector.multi_reduction <add>, %325, %cst_150 [1] : vector<32x32xf32> to vector<32xf32>
    %327 = vector.shape_cast %326 : vector<32xf32> to vector<32x1xf32>
    %328 = tpu.reciprocal %327 {approx = true} : vector<32x1xf32> -> vector<32x1xf32>
    %329 = vector.broadcast %328 : vector<32x1xf32> to vector<32x32xf32>
    %330 = arith.mulf %325, %329 : vector<32x32xf32>
    %331 = arith.truncf %330 : vector<32x32xf32> to vector<32x32xbf16>
    %332 = vector.extract_strided_slice %266 {offsets = [0, 32], sizes = [32, 16], strides = [1, 1]} : vector<32x64xf32> to vector<32x16xf32>
    %333 = arith.truncf %332 : vector<32x16xf32> to vector<32x16xbf16>
    %cst_151 = arith.constant dense<0.000000e+00> : vector<32x16xf32>
    %334 = tpu.matmul %331, %333, %cst_151 {dimension_numbers = #tpu.dot_dimension_numbers<[1], [0], [0], [1], [0, 0, 1, 1], [], []>} : vector<32x32xbf16>, vector<32x16xbf16>, vector<32x16xf32> -> vector<32x16xf32>
    %c0_152 = arith.constant 0 : index
    %c32_153 = arith.constant 32 : index
    %335 = vector.load %arg22[%c0_152, %c32_153] : memref<32x64xf32, #tpu.memory_space<vmem>>, vector<32x16xf32>
    tpu.vector_store %arg22[%c0_152, %c32_153], %334 {strides = array<i32>} : memref<32x64xf32, #tpu.memory_space<vmem>>, vector<32x16xf32>,
    %336 = vector.extract_strided_slice %264 {offsets = [0, 48], sizes = [32, 16], strides = [1, 1]} : vector<32x64xf32> to vector<32x16xf32>
    %337 = arith.truncf %336 : vector<32x16xf32> to vector<32x16xbf16>
    %338 = vector.extract_strided_slice %265 {offsets = [0, 48], sizes = [32, 16], strides = [1, 1]} : vector<32x64xf32> to vector<32x16xf32>
    %339 = arith.truncf %338 : vector<32x16xf32> to vector<32x16xbf16>
    %cst_154 = arith.constant dense<0.000000e+00> : vector<32x32xf32>
    %340 = tpu.matmul %337, %339, %cst_154 {dimension_numbers = #tpu.dot_dimension_numbers<[1], [1], [0], [0], [0, 0, 1, 0], [], []>} : vector<32x16xbf16>, vector<32x16xbf16>, vector<32x32xf32> -> vector<32x32xf32>
    %c1_155 = arith.constant 1 : index
    %c3_156 = arith.constant 3 : index
    %c0_157 = arith.constant 0 : index
    %c0_158 = arith.constant 0 : index
    %341 = vector.load %arg6[%c1_155, %c3_156, %c0_157, %c0_158] : memref<2x4x32x32xf32, #tpu.memory_space<vmem>>, vector<1x1x32x32xf32>
    %342 = vector.shape_cast %341 : vector<1x1x32x32xf32> to vector<32x32xf32>
    %343 = arith.addf %340, %342 : vector<32x32xf32>
    %cst_159 = arith.constant dense<0xFF800000> : vector<32xf32>
    %344 = vector.multi_reduction <maximumf>, %343, %cst_159 [1] : vector<32x32xf32> to vector<32xf32>
    %345 = vector.shape_cast %344 : vector<32xf32> to vector<32x1xf32>
    %346 = vector.broadcast %345 : vector<32x1xf32> to vector<32x32xf32>
    %347 = arith.subf %343, %346 : vector<32x32xf32>
    %348 = math.exp %347 : vector<32x32xf32>
    %cst_160 = arith.constant dense<0.000000e+00> : vector<32xf32>
    %349 = vector.multi_reduction <add>, %348, %cst_160 [1] : vector<32x32xf32> to vector<32xf32>
    %350 = vector.shape_cast %349 : vector<32xf32> to vector<32x1xf32>
    %351 = tpu.reciprocal %350 {approx = true} : vector<32x1xf32> -> vector<32x1xf32>
    %352 = vector.broadcast %351 : vector<32x1xf32> to vector<32x32xf32>
    %353 = arith.mulf %348, %352 : vector<32x32xf32>
    %354 = arith.truncf %353 : vector<32x32xf32> to vector<32x32xbf16>
    %355 = vector.extract_strided_slice %266 {offsets = [0, 48], sizes = [32, 16], strides = [1, 1]} : vector<32x64xf32> to vector<32x16xf32>
    %356 = arith.truncf %355 : vector<32x16xf32> to vector<32x16xbf16>
    %cst_161 = arith.constant dense<0.000000e+00> : vector<32x16xf32>
    %357 = tpu.matmul %354, %356, %cst_161 {dimension_numbers = #tpu.dot_dimension_numbers<[1], [0], [0], [1], [0, 0, 1, 1], [], []>} : vector<32x32xbf16>, vector<32x16xbf16>, vector<32x16xf32> -> vector<32x16xf32>
    %c0_162 = arith.constant 0 : index
    %c48_163 = arith.constant 48 : index
    %358 = vector.load %arg22[%c0_162, %c48_163] : memref<32x64xf32, #tpu.memory_space<vmem>>, vector<32x16xf32>
    tpu.vector_store %arg22[%c0_162, %c48_163], %357 {strides = array<i32>} : memref<32x64xf32, #tpu.memory_space<vmem>>, vector<32x16xf32>,
    %c0_164 = arith.constant 0 : index
    %c0_165 = arith.constant 0 : index
    %359 = vector.load %arg22[%c0_164, %c0_165] : memref<32x64xf32, #tpu.memory_space<vmem>>, vector<32x64xf32>
    %360 = arith.truncf %359 : vector<32x64xf32> to vector<32x64xbf16>
    %c1_166 = arith.constant 1 : index
    %c0_167 = arith.constant 0 : index
    %c0_168 = arith.constant 0 : index
    %361 = vector.load %arg11[%c1_166, %c0_167, %c0_168] : memref<2x64x64xbf16, #tpu.memory_space<vmem>>, vector<1x64x64xbf16>
    %362 = vector.shape_cast %361 : vector<1x64x64xbf16> to vector<64x64xbf16>
    %cst_169 = arith.constant dense<0.000000e+00> : vector<32x64xf32>
    %363 = tpu.matmul %360, %362, %cst_169 {dimension_numbers = #tpu.dot_dimension_numbers<[1], [0], [0], [1], [0, 0, 1, 1], [], []>} : vector<32x64xbf16>, vector<64x64xbf16>, vector<32x64xf32> -> vector<32x64xf32>
    %c1_170 = arith.constant 1 : index
    %c0_171 = arith.constant 0 : index
    %c0_172 = arith.constant 0 : index
    %364 = vector.load %arg12[%c1_170, %c0_171, %c0_172] : memref<2x1x64xf32, #tpu.memory_space<vmem>>, vector<1x1x64xf32>
    %365 = vector.shape_cast %364 : vector<1x1x64xf32> to vector<1x64xf32>
    %366 = vector.broadcast %365 : vector<1x64xf32> to vector<32x64xf32>
    %367 = arith.addf %363, %366 : vector<32x64xf32>
    %368 = arith.addf %227, %367 : vector<32x64xf32>
    %c1_173 = arith.constant 1 : index
    %c0_174 = arith.constant 0 : index
    %c0_175 = arith.constant 0 : index
    %369 = vector.load %arg13[%c1_173, %c0_174, %c0_175] : memref<2x1x64xf32, #tpu.memory_space<vmem>>, vector<1x1x64xf32>
    %370 = vector.shape_cast %369 : vector<1x1x64xf32> to vector<1x64xf32>
    %c1_176 = arith.constant 1 : index
    %c0_177 = arith.constant 0 : index
    %c0_178 = arith.constant 0 : index
    %371 = vector.load %arg14[%c1_176, %c0_177, %c0_178] : memref<2x1x64xf32, #tpu.memory_space<vmem>>, vector<1x1x64xf32>
    %372 = vector.shape_cast %371 : vector<1x1x64xf32> to vector<1x64xf32>
    %cst_179 = arith.constant dense<0.000000e+00> : vector<32xf32>
    %373 = vector.multi_reduction <add>, %368, %cst_179 [1] : vector<32x64xf32> to vector<32xf32>
    %374 = vector.shape_cast %373 : vector<32xf32> to vector<32x1xf32>
    %cst_180 = arith.constant 6.400000e+01 : f32
    %375 = vector.broadcast %cst_180 : f32 to vector<32x1xf32>
    %376 = arith.divf %374, %375 : vector<32x1xf32>
    %377 = vector.broadcast %376 : vector<32x1xf32> to vector<32x64xf32>
    %378 = arith.subf %368, %377 : vector<32x64xf32>
    %379 = arith.mulf %378, %378 : vector<32x64xf32>
    %cst_181 = arith.constant dense<0.000000e+00> : vector<32xf32>
    %380 = vector.multi_reduction <add>, %379, %cst_181 [1] : vector<32x64xf32> to vector<32xf32>
    %381 = vector.shape_cast %380 : vector<32xf32> to vector<32x1xf32>
    %cst_182 = arith.constant 6.400000e+01 : f32
    %382 = vector.broadcast %cst_182 : f32 to vector<32x1xf32>
    %383 = arith.divf %381, %382 : vector<32x1xf32>
    %384 = vector.broadcast %376 : vector<32x1xf32> to vector<32x64xf32>
    %385 = arith.subf %368, %384 : vector<32x64xf32>
    %cst_183 = arith.constant 9.99999974E-6 : f32
    %386 = vector.broadcast %cst_183 : f32 to vector<32x1xf32>
    %387 = arith.addf %383, %386 : vector<32x1xf32>
    %388 = math.rsqrt %387 : vector<32x1xf32>
    %389 = vector.broadcast %388 : vector<32x1xf32> to vector<32x64xf32>
    %390 = arith.mulf %385, %389 : vector<32x64xf32>
    %391 = vector.broadcast %370 : vector<1x64xf32> to vector<32x64xf32>
    %392 = arith.mulf %390, %391 : vector<32x64xf32>
    %393 = vector.broadcast %372 : vector<1x64xf32> to vector<32x64xf32>
    %394 = arith.addf %392, %393 : vector<32x64xf32>
    %395 = arith.truncf %394 : vector<32x64xf32> to vector<32x64xbf16>
    %c1_184 = arith.constant 1 : index
    %c0_185 = arith.constant 0 : index
    %c0_186 = arith.constant 0 : index
    %396 = vector.load %arg15[%c1_184, %c0_185, %c0_186] : memref<2x64x256xbf16, #tpu.memory_space<vmem>>, vector<1x64x256xbf16>
    %397 = vector.shape_cast %396 : vector<1x64x256xbf16> to vector<64x256xbf16>
    %cst_187 = arith.constant dense<0.000000e+00> : vector<32x256xf32>
    %398 = tpu.matmul %395, %397, %cst_187 {dimension_numbers = #tpu.dot_dimension_numbers<[1], [0], [0], [1], [0, 0, 1, 1], [], []>} : vector<32x64xbf16>, vector<64x256xbf16>, vector<32x256xf32> -> vector<32x256xf32>
    %c1_188 = arith.constant 1 : index
    %c0_189 = arith.constant 0 : index
    %c0_190 = arith.constant 0 : index
    %399 = vector.load %arg16[%c1_188, %c0_189, %c0_190] : memref<2x1x256xf32, #tpu.memory_space<vmem>>, vector<1x1x256xf32>
    %400 = vector.shape_cast %399 : vector<1x1x256xf32> to vector<1x256xf32>
    %401 = vector.broadcast %400 : vector<1x256xf32> to vector<32x256xf32>
    %402 = arith.addf %398, %401 : vector<32x256xf32>
    %cst_191 = arith.constant 5.000000e-01 : f32
    %403 = vector.broadcast %cst_191 : f32 to vector<32x256xf32>
    %404 = arith.mulf %403, %402 : vector<32x256xf32>
    %cst_192 = arith.constant 4.471500e-02 : f32
    %405 = vector.broadcast %cst_192 : f32 to vector<32x256xf32>
    %406 = arith.mulf %405, %402 : vector<32x256xf32>
    %407 = arith.mulf %406, %402 : vector<32x256xf32>
    %408 = arith.mulf %407, %402 : vector<32x256xf32>
    %409 = arith.addf %402, %408 : vector<32x256xf32>
    %cst_193 = arith.constant 0.797884583 : f32
    %410 = vector.broadcast %cst_193 : f32 to vector<32x256xf32>
    %411 = arith.mulf %410, %409 : vector<32x256xf32>
    %412 = math.tanh %411 : vector<32x256xf32>
    %cst_194 = arith.constant 1.000000e+00 : f32
    %413 = vector.broadcast %cst_194 : f32 to vector<32x256xf32>
    %414 = arith.addf %413, %412 : vector<32x256xf32>
    %415 = arith.mulf %404, %414 : vector<32x256xf32>
    %416 = arith.truncf %415 : vector<32x256xf32> to vector<32x256xbf16>
    %c1_195 = arith.constant 1 : index
    %c0_196 = arith.constant 0 : index
    %c0_197 = arith.constant 0 : index
    %417 = vector.load %arg17[%c1_195, %c0_196, %c0_197] : memref<2x256x64xbf16, #tpu.memory_space<vmem>>, vector<1x256x64xbf16>
    %418 = vector.shape_cast %417 : vector<1x256x64xbf16> to vector<256x64xbf16>
    %cst_198 = arith.constant dense<0.000000e+00> : vector<32x64xf32>
    %419 = tpu.matmul %416, %418, %cst_198 {dimension_numbers = #tpu.dot_dimension_numbers<[1], [0], [0], [1], [0, 0, 1, 1], [], []>} : vector<32x256xbf16>, vector<256x64xbf16>, vector<32x64xf32> -> vector<32x64xf32>
    %c1_199 = arith.constant 1 : index
    %c0_200 = arith.constant 0 : index
    %c0_201 = arith.constant 0 : index
    %420 = vector.load %arg18[%c1_199, %c0_200, %c0_201] : memref<2x1x64xf32, #tpu.memory_space<vmem>>, vector<1x1x64xf32>
    %421 = vector.shape_cast %420 : vector<1x1x64xf32> to vector<1x64xf32>
    %422 = vector.broadcast %421 : vector<1x64xf32> to vector<32x64xf32>
    %423 = arith.addf %419, %422 : vector<32x64xf32>
    %424 = arith.addf %368, %423 : vector<32x64xf32>
    %c0_202 = arith.constant 0 : index
    %c0_203 = arith.constant 0 : index
    %425 = vector.load %arg19[%c0_202, %c0_203] : memref<1x64xf32, #tpu.memory_space<vmem>>, vector<1x64xf32>
    %c0_204 = arith.constant 0 : index
    %c0_205 = arith.constant 0 : index
    %426 = vector.load %arg20[%c0_204, %c0_205] : memref<1x64xf32, #tpu.memory_space<vmem>>, vector<1x64xf32>
    %cst_206 = arith.constant dense<0.000000e+00> : vector<32xf32>
    %427 = vector.multi_reduction <add>, %424, %cst_206 [1] : vector<32x64xf32> to vector<32xf32>
    %428 = vector.shape_cast %427 : vector<32xf32> to vector<32x1xf32>
    %cst_207 = arith.constant 6.400000e+01 : f32
    %429 = vector.broadcast %cst_207 : f32 to vector<32x1xf32>
    %430 = arith.divf %428, %429 : vector<32x1xf32>
    %431 = vector.broadcast %430 : vector<32x1xf32> to vector<32x64xf32>
    %432 = arith.subf %424, %431 : vector<32x64xf32>
    %433 = arith.mulf %432, %432 : vector<32x64xf32>
    %cst_208 = arith.constant dense<0.000000e+00> : vector<32xf32>
    %434 = vector.multi_reduction <add>, %433, %cst_208 [1] : vector<32x64xf32> to vector<32xf32>
    %435 = vector.shape_cast %434 : vector<32xf32> to vector<32x1xf32>
    %cst_209 = arith.constant 6.400000e+01 : f32
    %436 = vector.broadcast %cst_209 : f32 to vector<32x1xf32>
    %437 = arith.divf %435, %436 : vector<32x1xf32>
    %438 = vector.broadcast %430 : vector<32x1xf32> to vector<32x64xf32>
    %439 = arith.subf %424, %438 : vector<32x64xf32>
    %cst_210 = arith.constant 9.99999974E-6 : f32
    %440 = vector.broadcast %cst_210 : f32 to vector<32x1xf32>
    %441 = arith.addf %437, %440 : vector<32x1xf32>
    %442 = math.rsqrt %441 : vector<32x1xf32>
    %443 = vector.broadcast %442 : vector<32x1xf32> to vector<32x64xf32>
    %444 = arith.mulf %439, %443 : vector<32x64xf32>
    %445 = vector.broadcast %425 : vector<1x64xf32> to vector<32x64xf32>
    %446 = arith.mulf %444, %445 : vector<32x64xf32>
    %447 = vector.broadcast %426 : vector<1x64xf32> to vector<32x64xf32>
    %448 = arith.addf %446, %447 : vector<32x64xf32>
    %cst_211 = arith.constant dense<0.000000e+00> : vector<32xf32>
    %449 = vector.multi_reduction <add>, %448, %cst_211 [1] : vector<32x64xf32> to vector<32xf32>
    %450 = vector.shape_cast %449 : vector<32xf32> to vector<32x1xf32>
    %cst_212 = arith.constant 6.400000e+01 : f32
    %451 = vector.broadcast %cst_212 : f32 to vector<32x1xf32>
    %452 = arith.divf %450, %451 : vector<32x1xf32>
    %c0_213 = arith.constant 0 : index
    %c0_214 = arith.constant 0 : index
    %453 = vector.load %arg21[%c0_213, %c0_214] : memref<32x1xf32, #tpu.memory_space<vmem>>, vector<32x1xf32>
    tpu.vector_store %arg21[%c0_213, %c0_214], %452 {strides = array<i32>} : memref<32x1xf32, #tpu.memory_space<vmem>>, vector<32x1xf32>,
    return
  }
  func.func @transform_0(%arg0: i32) -> (i32, i32) {
    %c0_i32 = arith.constant 0 : i32
    %c0_i32_0 = arith.constant 0 : i32
    return %arg0, %c0_i32 : i32, i32
  }
  func.func @transform_1(%arg0: i32) -> (i32, i32) {
    %c0_i32 = arith.constant 0 : i32
    %c0_i32_0 = arith.constant 0 : i32
    %c0_i32_1 = arith.constant 0 : i32
    return %c0_i32, %c0_i32_0 : i32, i32
  }
  func.func @transform_2(%arg0: i32) -> (i32, i32) {
    %c0_i32 = arith.constant 0 : i32
    %c0_i32_0 = arith.constant 0 : i32
    %c0_i32_1 = arith.constant 0 : i32
    return %c0_i32, %c0_i32_0 : i32, i32
  }
  func.func @transform_3(%arg0: i32) -> (i32, i32) {
    %c0_i32 = arith.constant 0 : i32
    %c0_i32_0 = arith.constant 0 : i32
    %c0_i32_1 = arith.constant 0 : i32
    return %c0_i32, %c0_i32_0 : i32, i32
  }
  func.func @transform_4(%arg0: i32) -> (i32, i32) {
    %c0_i32 = arith.constant 0 : i32
    %c0_i32_0 = arith.constant 0 : i32
    %c0_i32_1 = arith.constant 0 : i32
    return %c0_i32, %c0_i32_0 : i32, i32
  }
  func.func @transform_5(%arg0: i32) -> (i32, i32, i32, i32) {
    %c0_i32 = arith.constant 0 : i32
    %c0_i32_0 = arith.constant 0 : i32
    %c0_i32_1 = arith.constant 0 : i32
    %c0_i32_2 = arith.constant 0 : i32
    %c0_i32_3 = arith.constant 0 : i32
    return %c0_i32, %c0_i32_0, %c0_i32_1, %c0_i32_2 : i32, i32, i32, i32
  }
  func.func @transform_6(%arg0: i32) -> (i32, i32, i32) {
    %c0_i32 = arith.constant 0 : i32
    %c0_i32_0 = arith.constant 0 : i32
    %c0_i32_1 = arith.constant 0 : i32
    %c0_i32_2 = arith.constant 0 : i32
    return %c0_i32, %c0_i32_0, %c0_i32_1 : i32, i32, i32
  }
  func.func @transform_7(%arg0: i32) -> (i32, i32, i32) {
    %c0_i32 = arith.constant 0 : i32
    %c0_i32_0 = arith.constant 0 : i32
    %c0_i32_1 = arith.constant 0 : i32
    %c0_i32_2 = arith.constant 0 : i32
    return %c0_i32, %c0_i32_0, %c0_i32_1 : i32, i32, i32
  }
  func.func @transform_8(%arg0: i32) -> (i32, i32, i32) {
    %c0_i32 = arith.constant 0 : i32
    %c0_i32_0 = arith.constant 0 : i32
    %c0_i32_1 = arith.constant 0 : i32
    %c0_i32_2 = arith.constant 0 : i32
    return %c0_i32, %c0_i32_0, %c0_i32_1 : i32, i32, i32
  }
  func.func @transform_9(%arg0: i32) -> (i32, i32, i32) {
    %c0_i32 = arith.constant 0 : i32
    %c0_i32_0 = arith.constant 0 : i32
    %c0_i32_1 = arith.constant 0 : i32
    %c0_i32_2 = arith.constant 0 : i32
    return %c0_i32, %c0_i32_0, %c0_i32_1 : i32, i32, i32
  }
  func.func @transform_10(%arg0: i32) -> (i32, i32, i32) {
    %c0_i32 = arith.constant 0 : i32
    %c0_i32_0 = arith.constant 0 : i32
    %c0_i32_1 = arith.constant 0 : i32
    %c0_i32_2 = arith.constant 0 : i32
    return %c0_i32, %c0_i32_0, %c0_i32_1 : i32, i32, i32
  }
  func.func @transform_11(%arg0: i32) -> (i32, i32, i32) {
    %c0_i32 = arith.constant 0 : i32
    %c0_i32_0 = arith.constant 0 : i32
    %c0_i32_1 = arith.constant 0 : i32
    %c0_i32_2 = arith.constant 0 : i32
    return %c0_i32, %c0_i32_0, %c0_i32_1 : i32, i32, i32
  }
  func.func @transform_12(%arg0: i32) -> (i32, i32, i32) {
    %c0_i32 = arith.constant 0 : i32
    %c0_i32_0 = arith.constant 0 : i32
    %c0_i32_1 = arith.constant 0 : i32
    %c0_i32_2 = arith.constant 0 : i32
    return %c0_i32, %c0_i32_0, %c0_i32_1 : i32, i32, i32
  }
  func.func @transform_13(%arg0: i32) -> (i32, i32, i32) {
    %c0_i32 = arith.constant 0 : i32
    %c0_i32_0 = arith.constant 0 : i32
    %c0_i32_1 = arith.constant 0 : i32
    %c0_i32_2 = arith.constant 0 : i32
    return %c0_i32, %c0_i32_0, %c0_i32_1 : i32, i32, i32
  }
  func.func @transform_14(%arg0: i32) -> (i32, i32, i32) {
    %c0_i32 = arith.constant 0 : i32
    %c0_i32_0 = arith.constant 0 : i32
    %c0_i32_1 = arith.constant 0 : i32
    %c0_i32_2 = arith.constant 0 : i32
    return %c0_i32, %c0_i32_0, %c0_i32_1 : i32, i32, i32
  }
  func.func @transform_15(%arg0: i32) -> (i32, i32, i32) {
    %c0_i32 = arith.constant 0 : i32
    %c0_i32_0 = arith.constant 0 : i32
    %c0_i32_1 = arith.constant 0 : i32
    %c0_i32_2 = arith.constant 0 : i32
    return %c0_i32, %c0_i32_0, %c0_i32_1 : i32, i32, i32
  }
  func.func @transform_16(%arg0: i32) -> (i32, i32, i32) {
    %c0_i32 = arith.constant 0 : i32
    %c0_i32_0 = arith.constant 0 : i32
    %c0_i32_1 = arith.constant 0 : i32
    %c0_i32_2 = arith.constant 0 : i32
    return %c0_i32, %c0_i32_0, %c0_i32_1 : i32, i32, i32
  }
  func.func @transform_17(%arg0: i32) -> (i32, i32, i32) {
    %c0_i32 = arith.constant 0 : i32
    %c0_i32_0 = arith.constant 0 : i32
    %c0_i32_1 = arith.constant 0 : i32
    %c0_i32_2 = arith.constant 0 : i32
    return %c0_i32, %c0_i32_0, %c0_i32_1 : i32, i32, i32
  }
  func.func @transform_18(%arg0: i32) -> (i32, i32) {
    %c0_i32 = arith.constant 0 : i32
    %c0_i32_0 = arith.constant 0 : i32
    %c0_i32_1 = arith.constant 0 : i32
    return %c0_i32, %c0_i32_0 : i32, i32
  }
  func.func @transform_19(%arg0: i32) -> (i32, i32) {
    %c0_i32 = arith.constant 0 : i32
    %c0_i32_0 = arith.constant 0 : i32
    %c0_i32_1 = arith.constant 0 : i32
    return %c0_i32, %c0_i32_0 : i32, i32
  }
  func.func @transform_20(%arg0: i32) -> (i32, i32) {
    %c0_i32 = arith.constant 0 : i32
    %c0_i32_0 = arith.constant 0 : i32
    return %arg0, %c0_i32 : i32, i32
  }
}

</mosaic_0001>

<bundles_post_ra>
// kernel: swin_forward.2
= control target key start
LH: loop header
LB: loop body
LE: loop exit
PB: predicated region body
PF: predicated region fallthrough
CT: control target
= control target key end

     0   :  { %vm121_vm0 = vcmask 392192   ;;  %vm245_vm1 = vcmask 261120   ;;  %s6800_s30 = smov 96   ;;  %vm977_vm2 = vcmask 130048   ;;  %s6805_s19 = smov 16   ;;  %vm1951_vm3 = vcmask 261248   ;;  %s9800_s1 = inlined_call_operand.vmem [shape: bf16[48,32], index: 1, kind: input, shape index: {}]   ;;  %s9801_s18 = inlined_call_operand.vmem [shape: f32[1,32], index: 18, kind: input, shape index: {}, may-alias: {18,19}]   ;;  %s9802_s19 = inlined_call_operand.vmem [shape: f32[1,32], index: 19, kind: input, shape index: {}, may-alias: {18,19}]   ;;  %s9803_s0 = inlined_call_operand.vmem [shape: f32[128,48], index: 0, kind: input, shape index: {}]   ;;  %s9804_s2 = inlined_call_operand.vmem [shape: f32[1,32], index: 2, kind: input, shape index: {}]   ;;  %s9805_s3 = inlined_call_operand.vmem [shape: f32[1,32], index: 3, kind: input, shape index: {}]   ;;  %s9806_s4 = inlined_call_operand.vmem [shape: f32[1,32], index: 4, kind: input, shape index: {}]   ;;  %s9807_s8 = inlined_call_operand.vmem [shape: bf16[2,32,96], index: 8, kind: input, shape index: {}]   ;;  %s9808_s6 = inlined_call_operand.vmem [shape: f32[2,1,32], index: 6, kind: input, shape index: {}]   ;;  %s9809_s7 = inlined_call_operand.vmem [shape: f32[2,1,32], index: 7, kind: input, shape index: {}]   ;;  %s9810_s9 = inlined_call_operand.vmem [shape: f32[2,1,96], index: 9, kind: input, shape index: {}]   ;;  %s9811_s5 = inlined_call_operand.vmem [shape: f32[2,2,128,128], index: 5, kind: input, shape index: {}]   ;;  %s9812_s10 = inlined_call_operand.vmem [shape: bf16[2,32,32], index: 10, kind: input, shape index: {}]   ;;  %s9813_s11 = inlined_call_operand.vmem [shape: f32[2,1,32], index: 11, kind: input, shape index: {}]   ;;  %s9814_s14 = inlined_call_operand.vmem [shape: bf16[2,32,128], index: 14, kind: input, shape index: {}]   ;;  %s9815_s12 = inlined_call_operand.vmem [shape: f32[2,1,32], index: 12, kind: input, shape index: {}]   ;;  %s9816_s13 = inlined_call_operand.vmem [shape: f32[2,1,32], index: 13, kind: input, shape index: {}]   ;;  %s9817_s16 = inlined_call_operand.vmem [shape: bf16[2,128,32], index: 16, kind: input, shape index: {}]   ;;  %s9818_s15 = inlined_call_operand.vmem [shape: f32[2,1,128], index: 15, kind: input, shape index: {}]   ;;  %s9819_s17 = inlined_call_operand.vmem [shape: f32[2,1,32], index: 17, kind: input, shape index: {}]   ;;  %s9820_s20 = inlined_call_operand.vmem [shape: f32[128,32], index: 20, kind: output, shape index: {}]  }
   0x1   :  { %9831 = sst [smem:[#allocation7_spill]] %s9800_s1  ;;  %s6801_s1 = smov 64  }
   0x2   :  { %9832 = sst [smem:[#allocation8_spill]] %s9803_s0  ;;  %s9834_s23 = sld [smem:[#allocation7_spill]] }
   0x3   :  { %9833 = sst [smem:[#allocation9_spill]] %s9804_s2  ;;  %s9835_s26 = sld [smem:[#allocation8_spill]] }
   0x4   :  { %s9836_s21 = sld [smem:[#allocation9_spill]] }
   0x8   :  { %v6289_v0 = vld [vmem:[%s9834_s23] sm:$0xff]   ;;  %v6290_v1 = vld [vmem:[%s9834_s23 + $0x8] sm:$0xff]   ;;  %v6291_v4 = vld [vmem:[%s9834_s23 + $0x10] sm:$0xff]  }
   0x9   :  { %5773 = vmatprep.subr.bf16.mxu0 %v6289_v0  ;;  %v66_v2 = vld [vmem:[%s9835_s26] sm:$0xff]  ;;  %v67_v3 = vld [vmem:[%s9835_s26 + $0x8] sm:$0xff]  ;;  %v68_v6 = vld [vmem:[%s9835_s26 + $0x10] sm:$0xff] }
   0xa   :  { %5774 = vmatpush3.bf16.msra.mxu0 %v6289_v0  ;;  %v82_v5 = vpack.c.bf16 %v67_v3, %v66_v2  ;;  %v69_v7 = vld [vmem:[%s9835_s26 + $0x18] sm:$0xff]  ;;  %v70_v8 = vld [vmem:[%s9835_s26 + $0x20] sm:$0xff]  ;;  %v71_v9 = vld [vmem:[%s9835_s26 + $0x28] sm:$0xff] }
   0xb   :  { %5775 = vmatprep.subr.bf16.mxu0 %v6290_v1  ;;  %v83_v10 = vpack.c.bf16 %v69_v7, %v68_v6  ;;  %v84_v11 = vpack.c.bf16 %v71_v9, %v70_v8  ;;  %v72_v12 = vld [vmem:[%s9835_s26 + $0x30] sm:$0xff]  ;;  %v73_v13 = vld [vmem:[%s9835_s26 + $0x38] sm:$0xff]  ;;  %v74_v14 = vld [vmem:[%s9835_s26 + $0x40] sm:$0xff] }
   0xc   :  { %5779 = vmatprep.mubr.msk.bf16.mxu0 %vm121_vm0, %v82_v5  ;;  %v75_v15 = vld [vmem:[%s9835_s26 + $0x48] sm:$0xff]  ;;  %v85_v16 = vpack.c.bf16 %v73_v13, %v72_v12  ;;  %v76_v18 = vld [vmem:[%s9835_s26 + $0x50] sm:$0xff]  ;;  %v77_v19 = vld [vmem:[%s9835_s26 + $0x58] sm:$0xff] }
   0xd   :  { %v86_v17 = vpack.c.bf16 %v75_v15, %v74_v14  ;;  %v78_v20 = vld [vmem:[%s9835_s26 + $0x60] sm:$0xff]  ;;  %v79_v21 = vld [vmem:[%s9835_s26 + $0x68] sm:$0xff]  ;;  %v87_v22 = vpack.c.bf16 %v77_v19, %v76_v18  ;;  %v80_v24 = vld [vmem:[%s9835_s26 + $0x70] sm:$0xff] }
   0xe   :  { %5776 = vmatpush3.bf16.msra.mxu0 %v6290_v1  ;;  %v88_v23 = vpack.c.bf16 %v79_v21, %v78_v20  ;;  %v81_v25 = vld [vmem:[%s9835_s26 + $0x78] sm:$0xff]  ;;  %v5320_v27 = vld [vmem:[%s9836_s21] ss:$0 sm:$0xff]  ;;  %s6802_s21 = smov 80  }
   0xf   :  { %5777 = vmatprep.subr.bf16.mxu0 %v6291_v4  ;;  %v89_v26 = vpack.c.bf16 %v81_v25, %v80_v24 }
  0x12   :  { %5778 = vmatpush3.bf16.msra.mxu0 %v6291_v4 }
  0x15   :  { %5780 = vmatmul.mubr.msk.bf16.vlgmr.msra.gmra.mrb[0].mxu0 %vm121_vm0, %v83_v10 }
  0x16   :  { %5783 = vmatprep.mubr.msk.bf16.mxu0 %vm121_vm0, %v84_v11 }
  0x1d   :  { %5784 = vmatmul.mubr.msk.bf16.gmra.mrb[4].mxu0 %vm121_vm0, %v85_v16 }
  0x1e   :  { %5787 = vmatprep.mubr.msk.bf16.mxu0 %vm121_vm0, %v86_v17 }
  0x25   :  { %5788 = vmatmul.mubr.msk.bf16.gmra.mrb[8].mxu0 %vm121_vm0, %v87_v22 }
  0x26   :  { %5791 = vmatprep.mubr.msk.bf16.mxu0 %vm121_vm0, %v88_v23 }
  0x2d   :  { %5792 = vmatmul.mubr.msk.bf16.gmra.mrb[12].mxu0 %vm121_vm0, %v89_v26 }
  0xe8   :  { %v5781_v28 = vpop.f32.mrb[0].mxu0 }
  0xe9   :  { %v6979_v29 = vadd.f32 %v5781_v28, %v5320_v27  ;;  %v180_v30 = vpop.f32.mrb[1].mxu0 }
  0xea   :  { %v6981_v31 = vadd.f32 %v5320_v27, %v180_v30  ;;  %v5782_v32 = vpop.f32.mrb[2].mxu0 }
  0xeb   :  { %v6983_v33 = vadd.f32 %v5782_v32, %v5320_v27  ;;  %v183_v34 = vpop.f32.mrb[3].mxu0  ;;  %v252_v35 = vsel %vm245_vm1, %v6979_v29, 0.0 }
  0xec   :  { %v6987_v36 = vadd.f32 %v5320_v27, %v183_v34  ;;  %253 = vadd.xlane.f32.xlu1 %v252_v35  ;;  %v246_v37 = vsel %vm245_vm1, %v6981_v31, 0.0 }
  0xed   :  { %247 = vadd.xlane.f32.xlu0 %v246_v37  ;;  %v255_v38 = vsel %vm245_vm1, %v6983_v33, 0.0 }
  0xee   :  { %v249_v40 = vsel %vm245_vm1, %v6987_v36, 0.0 }
  0xf0   :  { %256 = vadd.xlane.f32.xlu1 %v255_v38  ;;  %v5785_v39 = vpop.f32.mrb[4].mxu0 }
  0xf1   :  { %v196_v41 = vpop.f32.mrb[5].mxu0  ;;  %250 = vadd.xlane.f32.xlu0 %v249_v40  ;;  %v6995_v42 = vadd.f32 %v5785_v39, %v5320_v27 }
  0xf2   :  { %v6997_v43 = vadd.f32 %v5320_v27, %v196_v41  ;;  %v5786_v44 = vpop.f32.mrb[6].mxu0 }
  0xf3   :  { %v199_v45 = vpop.f32.mrb[7].mxu0  ;;  %v6999_v46 = vadd.f32 %v5786_v44, %v5320_v27  ;;  %v264_v50 = vsel %vm245_vm1, %v6995_v42, 0.0 }
  0xf4   :  { %v7001_v47 = vadd.f32 %v5320_v27, %v199_v45  ;;  %v258_v48 = vsel %vm245_vm1, %v6997_v43, 0.0 }
  0xf5   :  { %259 = vadd.xlane.f32.xlu0 %v258_v48  ;;  %v267_v52 = vsel %vm245_vm1, %v6999_v46, 0.0 }
  0xf6   :  { %v261_v49 = vsel %vm245_vm1, %v7001_v47, 0.0 }
  0xf7   :  { %262 = vadd.xlane.f32.xlu1 %v261_v49 }
  0xf8   :  { %v5789_v51 = vpop.f32.mrb[8].mxu0 }
  0xf9   :  { %v212_v53 = vpop.f32.mrb[9].mxu0  ;;  %265 = vadd.xlane.f32.xlu0 %v264_v50  ;;  %v7011_v54 = vadd.f32 %v5789_v51, %v5320_v27 }
  0xfa   :  { %v7013_v55 = vadd.f32 %v5320_v27, %v212_v53  ;;  %v5790_v56 = vpop.f32.mrb[10].mxu0 }
  0xfb   :  { %v215_v57 = vpop.f32.mrb[11].mxu0  ;;  %268 = vadd.xlane.f32.xlu1 %v267_v52  ;;  %v7015_v58 = vadd.f32 %v5790_v56, %v5320_v27  ;;  %v276_v62 = vsel %vm245_vm1, %v7011_v54, 0.0 }
  0xfc   :  { %v7017_v59 = vadd.f32 %v5320_v27, %v215_v57  ;;  %v270_v60 = vsel %vm245_vm1, %v7013_v55, 0.0 }
  0xfd   :  { %271 = vadd.xlane.f32.xlu0 %v270_v60  ;;  %v279_v0 = vsel %vm245_vm1, %v7015_v58, 0.0 }
  0xfe   :  { %v273_v61 = vsel %vm245_vm1, %v7017_v59, 0.0 }
  0xff   :  { %274 = vadd.xlane.f32.xlu1 %v273_v61 }
 0x100   :  { %v5793_v63 = vpop.f32.mrb[12].mxu0 }
 0x101   :  { %v228_v1 = vpop.f32.mrb[13].mxu0  ;;  %277 = vadd.xlane.f32.xlu0 %v276_v62  ;;  %v7027_v2 = vadd.f32 %v5793_v63, %v5320_v27 }
 0x102   :  { %v7029_v3 = vadd.f32 %v5320_v27, %v228_v1  ;;  %v5794_v4 = vpop.f32.mrb[14].mxu0 }
 0x103   :  { %v231_v5 = vpop.f32.mrb[15].mxu0  ;;  %280 = vadd.xlane.f32.xlu1 %v279_v0  ;;  %v7031_v6 = vadd.f32 %v5794_v4, %v5320_v27  ;;  %v288_v10 = vsel %vm245_vm1, %v7027_v2, 0.0 }
 0x104   :  { %v7033_v7 = vadd.f32 %v5320_v27, %v231_v5  ;;  %v282_v8 = vsel %vm245_vm1, %v7029_v3, 0.0 }
 0x105   :  { %283 = vadd.xlane.f32.xlu0 %v282_v8  ;;  %v291_v11 = vsel %vm245_vm1, %v7031_v6, 0.0 }
 0x106   :  { %v285_v9 = vsel %vm245_vm1, %v7033_v7, 0.0 }
 0x107   :  { %286 = vadd.xlane.f32.xlu1 %v285_v9 }
 0x109   :  { %289 = vadd.xlane.f32.xlu0 %v288_v10 }
 0x10b   :  { %292 = vadd.xlane.f32.xlu1 %v291_v11 }
 0x179   :  { %v254_v12 = vpop.xlane.xlu1 %253 }
 0x17a   :  { %v297_v13 = vmul.f32 0.03125, %v254_v12  ;;  %v248_v14 = vpop.xlane.xlu0 %247 }
 0x17b   :  { %v295_v15 = vmul.f32 0.03125, %v248_v14 }
 0x17c   :  { %v7044_v16 = vsub.f32 %v6979_v29, %v297_v13 }
 0x17d   :  { %v7047_v17 = vsub.f32 %v6981_v31, %v295_v15  ;;  %v257_v18 = vpop.xlane.xlu1 %256 }
 0x17e   :  { %v298_v19 = vmul.f32 0.03125, %v257_v18  ;;  %v251_v20 = vpop.xlane.xlu0 %250  ;;  %v329_v26 = vmul.f32 %v7044_v16, %v7044_v16 }
 0x17f   :  { %v296_v21 = vmul.f32 0.03125, %v251_v20  ;;  %v327_v22 = vmul.f32 %v7047_v17, %v7047_v17 }
 0x180   :  { %v7052_v23 = vsub.f32 %v6983_v33, %v298_v19  ;;  %v349_v34 = vsel %vm245_vm1, %v329_v26, 0.0 }
 0x181   :  { %v7055_v24 = vsub.f32 %v6987_v36, %v296_v21  ;;  %v343_v25 = vsel %vm245_vm1, %v327_v22, 0.0 }
 0x182   :  { %344 = vadd.xlane.f32.xlu0 %v343_v25  ;;  %v260_v27 = vpop.xlane.xlu0 %259  ;;  %v330_v31 = vmul.f32 %v7052_v23, %v7052_v23 }
 0x183   :  { %v299_v28 = vmul.f32 0.03125, %v260_v27  ;;  %v328_v29 = vmul.f32 %v7055_v24, %v7055_v24 }
 0x184   :  { %v263_v30 = vpop.xlane.xlu1 %262  ;;  %v352_v41 = vsel %vm245_vm1, %v330_v31, 0.0 }
 0x185   :  { %v7065_v32 = vsub.f32 %v6997_v43, %v299_v28  ;;  %v300_v33 = vmul.f32 0.03125, %v263_v30  ;;  %v346_v35 = vsel %vm245_vm1, %v328_v29, 0.0 }
 0x186   :  { %350 = vadd.xlane.f32.xlu0 %v349_v34  ;;  %347 = vadd.xlane.f32.xlu1 %v346_v35  ;;  %v266_v36 = vpop.xlane.xlu0 %265 }
 0x187   :  { %v7070_v37 = vsub.f32 %v7001_v47, %v300_v33  ;;  %v301_v38 = vmul.f32 0.03125, %v266_v36  ;;  %v331_v39 = vmul.f32 %v7065_v32, %v7065_v32 }
 0x188   :  { %v269_v40 = vpop.xlane.xlu1 %268 }
 0x189   :  { %v7076_v43 = vsub.f32 %v6995_v42, %v301_v38  ;;  %v302_v44 = vmul.f32 0.03125, %v269_v40  ;;  %v355_v45 = vsel %vm245_vm1, %v331_v39, 0.0  ;;  %v332_v48 = vmul.f32 %v7070_v37, %v7070_v37 }
 0x18a   :  { %353 = vadd.xlane.f32.xlu1 %v352_v41  ;;  %356 = vadd.xlane.f32.xlu0 %v355_v45  ;;  %v272_v47 = vpop.xlane.xlu0 %271 }
 0x18b   :  { %v7082_v49 = vsub.f32 %v6999_v46, %v302_v44  ;;  %v303_v50 = vmul.f32 0.03125, %v272_v47  ;;  %v333_v51 = vmul.f32 %v7076_v43, %v7076_v43  ;;  %v358_v42 = vsel %vm245_vm1, %v332_v48, 0.0 }
 0x18c   :  { %v275_v52 = vpop.xlane.xlu1 %274 }
 0x18d   :  { %v7088_v53 = vsub.f32 %v7013_v55, %v303_v50  ;;  %v304_v56 = vmul.f32 0.03125, %v275_v52  ;;  %v361_v57 = vsel %vm245_vm1, %v333_v51, 0.0  ;;  %v334_v60 = vmul.f32 %v7082_v49, %v7082_v49 }
 0x18e   :  { %359 = vadd.xlane.f32.xlu1 %v358_v42  ;;  %362 = vadd.xlane.f32.xlu0 %v361_v57  ;;  %v278_v46 = vpop.xlane.xlu0 %277 }
 0x18f   :  { %v7094_v61 = vsub.f32 %v7017_v59, %v304_v56  ;;  %v305_v62 = vmul.f32 0.03125, %v278_v46  ;;  %v335_v63 = vmul.f32 %v7088_v53, %v7088_v53  ;;  %v364_v55 = vsel %vm245_vm1, %v334_v60, 0.0 }
 0x190   :  { %v281_v0 = vpop.xlane.xlu1 %280 }
 0x191   :  { %v7100_v1 = vsub.f32 %v7011_v54, %v305_v62  ;;  %v306_v4 = vmul.f32 0.03125, %v281_v0  ;;  %v367_v5 = vsel %vm245_vm1, %v335_v63, 0.0  ;;  %v336_v8 = vmul.f32 %v7094_v61, %v7094_v61  ;;  %v7142_v0 = vld [vmem:[%s9805_s3] ss:$0 sm:$0xff]  ;;  %s6803_s3 = smov 112  }
 0x192   :  { %365 = vadd.xlane.f32.xlu1 %v364_v55  ;;  %368 = vadd.xlane.f32.xlu0 %v367_v5  ;;  %v284_v59 = vpop.xlane.xlu0 %283 }
 0x193   :  { %v7106_v9 = vsub.f32 %v7015_v58, %v306_v4  ;;  %v307_v10 = vmul.f32 0.03125, %v284_v59  ;;  %v337_v11 = vmul.f32 %v7100_v1, %v7100_v1  ;;  %v370_v54 = vsel %vm245_vm1, %v336_v8, 0.0 }
 0x194   :  { %v287_v12 = vpop.xlane.xlu1 %286 }
 0x195   :  { %v7112_v13 = vsub.f32 %v7029_v3, %v307_v10  ;;  %v308_v14 = vmul.f32 0.03125, %v287_v12  ;;  %v373_v15 = vsel %vm245_vm1, %v337_v11, 0.0  ;;  %v338_v18 = vmul.f32 %v7106_v9, %v7106_v9  ;;  %v7148_v10 = vld [vmem:[%s9806_s4] ss:$0 sm:$0xff]  ;;  %s6804_s4 = smov 48  }
 0x196   :  { %371 = vadd.xlane.f32.xlu1 %v370_v54  ;;  %374 = vadd.xlane.f32.xlu0 %v373_v15  ;;  %v290_v58 = vpop.xlane.xlu0 %289 }
 0x197   :  { %v7118_v19 = vsub.f32 %v7033_v7, %v308_v14  ;;  %v309_v20 = vmul.f32 0.03125, %v290_v58  ;;  %v339_v21 = vmul.f32 %v7112_v13, %v7112_v13  ;;  %v376_v3 = vsel %vm245_vm1, %v338_v18, 0.0 }
 0x198   :  { %v293_v22 = vpop.xlane.xlu1 %292 }
 0x199   :  { %v7124_v25 = vsub.f32 %v7027_v2, %v309_v20  ;;  %v310_v26 = vmul.f32 0.03125, %v293_v22  ;;  %v379_v27 = vsel %vm245_vm1, %v339_v21, 0.0  ;;  %v340_v28 = vmul.f32 %v7118_v19, %v7118_v19 }
 0x19a   :  { %377 = vadd.xlane.f32.xlu1 %v376_v3  ;;  %380 = vadd.xlane.f32.xlu0 %v379_v27 }
 0x19b   :  { %v7130_v7 = vsub.f32 %v7031_v6, %v310_v26  ;;  %v341_v29 = vmul.f32 %v7124_v25, %v7124_v25  ;;  %v382_v30 = vsel %vm245_vm1, %v340_v28, 0.0 }
 0x19d   :  { %v385_v31 = vsel %vm245_vm1, %v341_v29, 0.0  ;;  %v342_v2 = vmul.f32 %v7130_v7, %v7130_v7 }
 0x19e   :  { %383 = vadd.xlane.f32.xlu1 %v382_v30  ;;  %386 = vadd.xlane.f32.xlu0 %v385_v31 }
 0x19f   :  { %v388_v33 = vsel %vm245_vm1, %v342_v2, 0.0 }
 0x1a2   :  { %389 = vadd.xlane.f32.xlu1 %v388_v33 }
 0x20f   :  { %v345_v34 = vpop.xlane.xlu0 %344 }
 0x210   :  { %v391_v35 = vmul.f32 0.03125, %v345_v34 }
 0x212   :  { %v407_v36 = vadd.f32 1e-05, %v391_v35 }
 0x213   :  { %v348_v6 = vpop.xlane.xlu1 %347  ;;  %v351_v38 = vpop.xlane.xlu0 %350 }
 0x214   :  { %6320 = vrsqrt.f32 %v407_v36  ;;  %v392_v39 = vmul.f32 0.03125, %v348_v6  ;;  %v393_v40 = vmul.f32 0.03125, %v351_v38 }
 0x216   :  { %v408_v41 = vadd.f32 1e-05, %v392_v39  ;;  %v409_v44 = vadd.f32 1e-05, %v393_v40 }
 0x217   :  { %v354_v45 = vpop.xlane.xlu1 %353  ;;  %v357_v48 = vpop.xlane.xlu0 %356 }
 0x218   :  { %6322 = vrsqrt.f32 %v408_v41  ;;  %v394_v47 = vmul.f32 0.03125, %v354_v45  ;;  %v395_v50 = vmul.f32 0.03125, %v357_v48 }
 0x219   :  { %6324 = vrsqrt.f32 %v409_v44 }
 0x21a   :  { %v410_v51 = vadd.f32 1e-05, %v394_v47  ;;  %v411_v52 = vadd.f32 1e-05, %v395_v50 }
 0x21b   :  { %v360_v42 = vpop.xlane.xlu1 %359  ;;  %v363_v56 = vpop.xlane.xlu0 %362 }
 0x21c   :  { %6326 = vrsqrt.f32 %v410_v51  ;;  %v396_v57 = vmul.f32 0.03125, %v360_v42  ;;  %v397_v60 = vmul.f32 0.03125, %v363_v56 }
 0x21d   :  { %6328 = vrsqrt.f32 %v411_v52 }
 0x21e   :  { %v6321_v46 = vpop.eup %6320  ;;  %v412_v62 = vadd.f32 1e-05, %v396_v57  ;;  %v413_v63 = vadd.f32 1e-05, %v397_v60 }
 0x21f   :  { %v366_v55 = vpop.xlane.xlu1 %365  ;;  %v369_v4 = vpop.xlane.xlu0 %368  ;;  %v439_v5 = vmul.f32 %v6321_v46, %v7047_v17 }
 0x220   :  { %6330 = vrsqrt.f32 %v412_v62  ;;  %v398_v8 = vmul.f32 0.03125, %v366_v55  ;;  %v399_v59 = vmul.f32 0.03125, %v369_v4 }
 0x221   :  { %6332 = vrsqrt.f32 %v413_v63  ;;  %v461_v11 = vmul.f32 %v7142_v0, %v439_v5 }
 0x222   :  { %v6323_v12 = vpop.eup %6322  ;;  %v414_v54 = vadd.f32 1e-05, %v398_v8  ;;  %v415_v14 = vadd.f32 1e-05, %v399_v59 }
 0x223   :  { %v6325_v15 = vpop.eup %6324  ;;  %v372_v18 = vpop.xlane.xlu1 %371  ;;  %v7152_v20 = vadd.f32 %v7148_v10, %v461_v11  ;;  %v440_v17 = vmul.f32 %v6323_v12, %v7055_v24 }
 0x224   :  { %v375_v58 = vpop.xlane.xlu0 %374  ;;  %6334 = vrsqrt.f32 %v414_v54  ;;  %v400_v21 = vmul.f32 0.03125, %v372_v18  ;;  %v441_v3 = vmul.f32 %v6325_v15, %v7044_v16 }
 0x225   :  { %v401_v22 = vmul.f32 0.03125, %v375_v58  ;;  %6336 = vrsqrt.f32 %v415_v14  ;;  %v501_v26 = vsel %vm245_vm1, %v7152_v20, 0.0  ;;  %v462_v27 = vmul.f32 %v7142_v0, %v440_v17 }
 0x226   :  { %v6327_v28 = vpop.eup %6326  ;;  %v416_v29 = vadd.f32 1e-05, %v400_v21  ;;  %502 = vadd.xlane.f32.xlu0 %v501_v26  ;;  %v463_v31 = vmul.f32 %v7142_v0, %v441_v3 }
 0x227   :  { %v417_v30 = vadd.f32 1e-05, %v401_v22  ;;  %v6329_v2 = vpop.eup %6328  ;;  %v378_v33 = vpop.xlane.xlu1 %377  ;;  %v7161_v34 = vadd.f32 %v7148_v10, %v462_v27  ;;  %v442_v16 = vmul.f32 %v6327_v28, %v7052_v23 }
 0x228   :  { %v381_v24 = vpop.xlane.xlu0 %380  ;;  %6338 = vrsqrt.f32 %v416_v29  ;;  %v402_v35 = vmul.f32 0.03125, %v378_v33  ;;  %v7165_v6 = vadd.f32 %v7148_v10, %v463_v31  ;;  %v443_v40 = vmul.f32 %v6329_v2, %v7065_v32 }
 0x229   :  { %v403_v36 = vmul.f32 0.03125, %v381_v24  ;;  %6340 = vrsqrt.f32 %v417_v30  ;;  %v504_v38 = vsel %vm245_vm1, %v7161_v34, 0.0  ;;  %v464_v39 = vmul.f32 %v7142_v0, %v442_v16 }
 0x22a   :  { %v6331_v41 = vpop.eup %6330  ;;  %v418_v44 = vadd.f32 1e-05, %v402_v35  ;;  %505 = vadd.xlane.f32.xlu1 %v504_v38  ;;  %v507_v23 = vsel %vm245_vm1, %v7165_v6, 0.0  ;;  %v465_v52 = vmul.f32 %v7142_v0, %v443_v40 }
 0x22b   :  { %v419_v45 = vadd.f32 1e-05, %v403_v36  ;;  %v6333_v48 = vpop.eup %6332  ;;  %508 = vadd.xlane.f32.xlu0 %v507_v23  ;;  %v384_v47 = vpop.xlane.xlu1 %383  ;;  %v7174_v51 = vadd.f32 %v7148_v10, %v464_v39  ;;  %v444_v42 = vmul.f32 %v6331_v41, %v7070_v37 }
 0x22c   :  { %v387_v50 = vpop.xlane.xlu0 %386  ;;  %6342 = vrsqrt.f32 %v418_v44  ;;  %v404_v32 = vmul.f32 0.03125, %v384_v47  ;;  %v445_v57 = vmul.f32 %v6333_v48, %v7076_v43  ;;  %v7182_v46 = vadd.f32 %v7148_v10, %v465_v52 }
 0x22d   :  { %v405_v56 = vmul.f32 0.03125, %v387_v50  ;;  %6344 = vrsqrt.f32 %v419_v45  ;;  %v510_v60 = vsel %vm245_vm1, %v7174_v51, 0.0  ;;  %v466_v62 = vmul.f32 %v7142_v0, %v444_v42 }
 0x22e   :  { %v6335_v63 = vpop.eup %6334  ;;  %v420_v55 = vadd.f32 1e-05, %v404_v32  ;;  %511 = vadd.xlane.f32.xlu1 %v510_v60  ;;  %v467_v37 = vmul.f32 %v7142_v0, %v445_v57  ;;  %v513_v8 = vsel %vm245_vm1, %v7182_v46, 0.0 }
 0x22f   :  { %v421_v4 = vadd.f32 1e-05, %v405_v56  ;;  %v6337_v5 = vpop.eup %6336  ;;  %v390_v43 = vpop.xlane.xlu1 %389  ;;  %v7189_v59 = vadd.f32 %v7148_v10, %v466_v62  ;;  %v446_v11 = vmul.f32 %v6335_v63, %v7082_v49  ;;  %514 = vadd.xlane.f32.xlu0 %v513_v8 }
 0x230   :  { %6346 = vrsqrt.f32 %v420_v55  ;;  %v406_v12 = vmul.f32 0.03125, %v390_v43  ;;  %v7193_v54 = vadd.f32 %v7148_v10, %v467_v37  ;;  %v447_v14 = vmul.f32 %v6337_v5, %v7088_v53 }
 0x231   :  { %6348 = vrsqrt.f32 %v421_v4  ;;  %v516_v15 = vsel %vm245_vm1, %v7189_v59, 0.0  ;;  %v468_v18 = vmul.f32 %v7142_v0, %v446_v11 }
 0x232   :  { %v6339_v58 = vpop.eup %6338  ;;  %v422_v17 = vadd.f32 1e-05, %v406_v12  ;;  %517 = vadd.xlane.f32.xlu1 %v516_v15  ;;  %v519_v49 = vsel %vm245_vm1, %v7193_v54, 0.0  ;;  %v469_v21 = vmul.f32 %v7142_v0, %v447_v14 }
 0x233   :  { %v6341_v22 = vpop.eup %6340  ;;  %v7203_v3 = vadd.f32 %v7148_v10, %v468_v18  ;;  %v448_v53 = vmul.f32 %v6339_v58, %v7094_v61  ;;  %520 = vadd.xlane.f32.xlu0 %v519_v49 }
 0x234   :  { %6350 = vrsqrt.f32 %v422_v17  ;;  %v7207_v26 = vadd.f32 %v7148_v10, %v469_v21  ;;  %v449_v27 = vmul.f32 %v6341_v22, %v7100_v1 }
 0x235   :  { %v522_v28 = vsel %vm245_vm1, %v7203_v3, 0.0  ;;  %v470_v29 = vmul.f32 %v7142_v0, %v448_v53 }
 0x236   :  { %v6343_v30 = vpop.eup %6342  ;;  %523 = vadd.xlane.f32.xlu1 %v522_v28  ;;  %v525_v31 = vsel %vm245_vm1, %v7207_v26, 0.0  ;;  %v471_v2 = vmul.f32 %v7142_v0, %v449_v27 }
 0x237   :  { %v6345_v61 = vpop.eup %6344  ;;  %v7217_v33 = vadd.f32 %v7148_v10, %v470_v29  ;;  %v450_v24 = vmul.f32 %v6343_v30, %v7106_v9  ;;  %526 = vadd.xlane.f32.xlu0 %v525_v31 }
 0x238   :  { %v7221_v1 = vadd.f32 %v7148_v10, %v471_v2  ;;  %v451_v16 = vmul.f32 %v6345_v61, %v7112_v13 }
 0x239   :  { %v528_v35 = vsel %vm245_vm1, %v7217_v33, 0.0  ;;  %v472_v36 = vmul.f32 %v7142_v0, %v450_v24 }
 0x23a   :  { %v6347_v38 = vpop.eup %6346  ;;  %529 = vadd.xlane.f32.xlu1 %v528_v35  ;;  %v531_v39 = vsel %vm245_vm1, %v7221_v1, 0.0  ;;  %v473_v40 = vmul.f32 %v7142_v0, %v451_v16 }
 0x23b   :  { %v6349_v41 = vpop.eup %6348  ;;  %v7231_v9 = vadd.f32 %v7148_v10, %v472_v36  ;;  %v452_v44 = vmul.f32 %v6347_v38, %v7118_v19  ;;  %532 = vadd.xlane.f32.xlu0 %v531_v39 }
 0x23c   :  { %v7235_v13 = vadd.f32 %v7148_v10, %v473_v40  ;;  %v453_v45 = vmul.f32 %v6349_v41, %v7124_v25 }
 0x23d   :  { %v534_v23 = vsel %vm245_vm1, %v7231_v9, 0.0  ;;  %v474_v48 = vmul.f32 %v7142_v0, %v452_v44 }
 0x23e   :  { %9837 = vst [vmem:[#allocation3_spill] sm:$0xff] %v7235_v13  ;;  %v6351_v47 = vpop.eup %6350  ;;  %535 = vadd.xlane.f32.xlu1 %v534_v23  ;;  %v537_v50 = vsel %vm245_vm1, %v7235_v13, 0.0  ;;  %v475_v52 = vmul.f32 %v7142_v0, %v453_v45 }
 0x23f   :  { %v7245_v19 = vadd.f32 %v7148_v10, %v474_v48  ;;  %v454_v42 = vmul.f32 %v6351_v47, %v7130_v7  ;;  %538 = vadd.xlane.f32.xlu0 %v537_v50 }
 0x240   :  { %v7249_v25 = vadd.f32 %v7148_v10, %v475_v52 }
 0x241   :  { %9838 = vst [vmem:[#allocation4_spill] sm:$0xff] %v7245_v19  ;;  %v540_v32 = vsel %vm245_vm1, %v7245_v19, 0.0  ;;  %v476_v56 = vmul.f32 %v7142_v0, %v454_v42 }
 0x242   :  { %9839 = vst [vmem:[#allocation5_spill] sm:$0xff] %v7249_v25  ;;  %541 = vadd.xlane.f32.xlu1 %v540_v32  ;;  %v543_v57 = vsel %vm245_vm1, %v7249_v25, 0.0 }
 0x243   :  { %v7257_v60 = vadd.f32 %v7148_v10, %v476_v56  ;;  %544 = vadd.xlane.f32.xlu0 %v543_v57 }
 0x245   :  { %9840 = vst [vmem:[#allocation6_spill] sm:$0xff] %v7257_v60  ;;  %v546_v7 = vsel %vm245_vm1, %v7257_v60, 0.0 }
 0x246   :  { %547 = vadd.xlane.f32.xlu1 %v546_v7 }
 0x2b3   :  { %v503_v62 = vpop.xlane.xlu0 %502 }
 0x2b4   :  { %v549_v63 = vmul.f32 0.03125, %v503_v62 }
 0x2b6   :  { %v7262_v55 = vsub.f32 %v7152_v20, %v549_v63 }
 0x2b7   :  { %v506_v4 = vpop.xlane.xlu1 %505 }
 0x2b8   :  { %v550_v37 = vmul.f32 0.03125, %v506_v4  ;;  %v509_v0 = vpop.xlane.xlu0 %508  ;;  %v581_v5 = vmul.f32 %v7262_v55, %v7262_v55 }
 0x2b9   :  { %v551_v8 = vmul.f32 0.03125, %v509_v0 }
 0x2ba   :  { %v7267_v10 = vsub.f32 %v7161_v34, %v550_v37  ;;  %v597_v43 = vsel %vm245_vm1, %v581_v5, 0.0 }
 0x2bb   :  { %v7271_v11 = vsub.f32 %v7165_v6, %v551_v8  ;;  %v512_v12 = vpop.xlane.xlu1 %511  ;;  %598 = vadd.xlane.f32.xlu0 %v597_v43 }
 0x2bc   :  { %v552_v14 = vmul.f32 0.03125, %v512_v12  ;;  %v582_v15 = vmul.f32 %v7267_v10, %v7267_v10  ;;  %v515_v18 = vpop.xlane.xlu0 %514 }
 0x2bd   :  { %v583_v58 = vmul.f32 %v7271_v11, %v7271_v11  ;;  %v553_v49 = vmul.f32 0.03125, %v515_v18 }
 0x2be   :  { %v7278_v17 = vsub.f32 %v7174_v51, %v552_v14  ;;  %v600_v21 = vsel %vm245_vm1, %v582_v15, 0.0 }
 0x2bf   :  { %601 = vadd.xlane.f32.xlu1 %v600_v21  ;;  %v518_v22 = vpop.xlane.xlu1 %517  ;;  %v603_v53 = vsel %vm245_vm1, %v583_v58, 0.0  ;;  %v7283_v27 = vsub.f32 %v7182_v46, %v553_v49 }
 0x2c0   :  { %v554_v28 = vmul.f32 0.03125, %v518_v22  ;;  %604 = vadd.xlane.f32.xlu0 %v603_v53  ;;  %v584_v29 = vmul.f32 %v7278_v17, %v7278_v17  ;;  %v521_v30 = vpop.xlane.xlu0 %520 }
 0x2c1   :  { %v555_v2 = vmul.f32 0.03125, %v521_v30  ;;  %v585_v24 = vmul.f32 %v7283_v27, %v7283_v27 }
 0x2c2   :  { %v7288_v31 = vsub.f32 %v7189_v59, %v554_v28  ;;  %v606_v61 = vsel %vm245_vm1, %v584_v29, 0.0 }
 0x2c3   :  { %607 = vadd.xlane.f32.xlu1 %v606_v61  ;;  %v524_v16 = vpop.xlane.xlu1 %523  ;;  %v7294_v35 = vsub.f32 %v7193_v54, %v555_v2  ;;  %v609_v38 = vsel %vm245_vm1, %v585_v24, 0.0 }
 0x2c4   :  { %v556_v36 = vmul.f32 0.03125, %v524_v16  ;;  %v586_v39 = vmul.f32 %v7288_v31, %v7288_v31  ;;  %610 = vadd.xlane.f32.xlu0 %v609_v38  ;;  %v527_v40 = vpop.xlane.xlu0 %526 }
 0x2c5   :  { %v557_v44 = vmul.f32 0.03125, %v527_v40  ;;  %v587_v23 = vmul.f32 %v7294_v35, %v7294_v35 }
 0x2c6   :  { %v7300_v41 = vsub.f32 %v7203_v3, %v556_v36  ;;  %v612_v45 = vsel %vm245_vm1, %v586_v39, 0.0 }
 0x2c7   :  { %613 = vadd.xlane.f32.xlu1 %v612_v45  ;;  %v530_v48 = vpop.xlane.xlu1 %529  ;;  %v7306_v47 = vsub.f32 %v7207_v26, %v557_v44  ;;  %v615_v52 = vsel %vm245_vm1, %v587_v23, 0.0 }
 0x2c8   :  { %v558_v50 = vmul.f32 0.03125, %v530_v48  ;;  %v588_v42 = vmul.f32 %v7300_v41, %v7300_v41  ;;  %616 = vadd.xlane.f32.xlu0 %v615_v52  ;;  %v533_v32 = vpop.xlane.xlu0 %532  ;;  %v6293_v52 = vld [vmem:[%s9807_s8 + $0x8] sm:$0xff]  }
 0x2c9   :  { %v559_v57 = vmul.f32 0.03125, %v533_v32  ;;  %v589_v62 = vmul.f32 %v7306_v47, %v7306_v47 }
 0x2ca   :  { %v7312_v56 = vsub.f32 %v7217_v33, %v558_v50  ;;  %v618_v7 = vsel %vm245_vm1, %v588_v42, 0.0  ;;  %v6292_v50 = vld [vmem:[%s9807_s8] sm:$0xff]  }
 0x2cb   :  { %619 = vadd.xlane.f32.xlu1 %v618_v7  ;;  %v536_v63 = vpop.xlane.xlu1 %535  ;;  %v7318_v4 = vsub.f32 %v7221_v1, %v559_v57  ;;  %v621_v0 = vsel %vm245_vm1, %v589_v62, 0.0  ;;  %5795 = vmatprep.subr.bf16.mxu1 %v6292_v50 }
 0x2cc   :  { %v560_v37 = vmul.f32 0.03125, %v536_v63  ;;  %v590_v5 = vmul.f32 %v7312_v56, %v7312_v56  ;;  %622 = vadd.xlane.f32.xlu0 %v621_v0  ;;  %v539_v8 = vpop.xlane.xlu0 %538  ;;  %5796 = vmatpush3.bf16.msra.mxu1 %v6292_v50 }
 0x2cd   :  { %v561_v12 = vmul.f32 0.03125, %v539_v8  ;;  %v591_v15 = vmul.f32 %v7318_v4, %v7318_v4  ;;  %5797 = vmatprep.subr.bf16.mxu1 %v6293_v52 }
 0x2ce   :  { %v7324_v43 = vsub.f32 %v7231_v9, %v560_v37  ;;  %v624_v14 = vsel %vm245_vm1, %v590_v5, 0.0 }
 0x2cf   :  { %625 = vadd.xlane.f32.xlu1 %v624_v14  ;;  %v542_v18 = vpop.xlane.xlu1 %541  ;;  %v7330_v58 = vsub.f32 %v7235_v13, %v561_v12  ;;  %v627_v21 = vsel %vm245_vm1, %v591_v15, 0.0 }
 0x2d0   :  { %v562_v49 = vmul.f32 0.03125, %v542_v18  ;;  %v592_v22 = vmul.f32 %v7324_v43, %v7324_v43  ;;  %628 = vadd.xlane.f32.xlu0 %v627_v21  ;;  %v545_v53 = vpop.xlane.xlu0 %544  ;;  %5798 = vmatpush3.bf16.msra.mxu1 %v6293_v52 }
 0x2d1   :  { %v563_v29 = vmul.f32 0.03125, %v545_v53  ;;  %v593_v2 = vmul.f32 %v7330_v58, %v7330_v58 }
 0x2d2   :  { %v7336_v28 = vsub.f32 %v7245_v19, %v562_v49  ;;  %v630_v30 = vsel %vm245_vm1, %v592_v22, 0.0 }
 0x2d3   :  { %631 = vadd.xlane.f32.xlu1 %v630_v30  ;;  %v548_v61 = vpop.xlane.xlu1 %547  ;;  %v7342_v24 = vsub.f32 %v7249_v25, %v563_v29  ;;  %v633_v36 = vsel %vm245_vm1, %v593_v2, 0.0 }
 0x2d4   :  { %v564_v16 = vmul.f32 0.03125, %v548_v61  ;;  %v594_v38 = vmul.f32 %v7336_v28, %v7336_v28  ;;  %634 = vadd.xlane.f32.xlu0 %v633_v36 }
 0x2d5   :  { %v595_v44 = vmul.f32 %v7342_v24, %v7342_v24 }
 0x2d6   :  { %v7348_v39 = vsub.f32 %v7257_v60, %v564_v16  ;;  %v636_v40 = vsel %vm245_vm1, %v594_v38, 0.0 }
 0x2d7   :  { %637 = vadd.xlane.f32.xlu1 %v636_v40  ;;  %v639_v45 = vsel %vm245_vm1, %v595_v44, 0.0  ;;  %v7367_v40 = vld [vmem:[%s9808_s6] ss:$0 sm:$0xff] }
 0x2d8   :  { %v596_v23 = vmul.f32 %v7348_v39, %v7348_v39  ;;  %640 = vadd.xlane.f32.xlu0 %v639_v45 }
 0x2da   :  { %v642_v48 = vsel %vm245_vm1, %v596_v23, 0.0 }
 0x2db   :  { %643 = vadd.xlane.f32.xlu1 %v642_v48 }
 0x348   :  { %v599_v42 = vpop.xlane.xlu0 %598 }
 0x349   :  { %v645_v32 = vmul.f32 0.03125, %v599_v42 }
 0x34b   :  { %v661_v57 = vadd.f32 1e-05, %v645_v32 }
 0x34c   :  { %v602_v7 = vpop.xlane.xlu1 %601 }
 0x34d   :  { %6352 = vrsqrt.f32 %v661_v57  ;;  %v646_v62 = vmul.f32 0.03125, %v602_v7  ;;  %v605_v63 = vpop.xlane.xlu0 %604  ;;  %v7374_v7 = vld [vmem:[%s9809_s7] ss:$0 sm:$0xff] }
 0x34e   :  { %v647_v37 = vmul.f32 0.03125, %v605_v63 }
 0x34f   :  { %v662_v0 = vadd.f32 1e-05, %v646_v62 }
 0x350   :  { %v663_v5 = vadd.f32 1e-05, %v647_v37  ;;  %v608_v8 = vpop.xlane.xlu1 %607 }
 0x351   :  { %6354 = vrsqrt.f32 %v662_v0  ;;  %v648_v12 = vmul.f32 0.03125, %v608_v8  ;;  %v611_v14 = vpop.xlane.xlu0 %610 }
 0x352   :  { %6356 = vrsqrt.f32 %v663_v5  ;;  %v649_v18 = vmul.f32 0.03125, %v611_v14 }
 0x353   :  { %v664_v15 = vadd.f32 1e-05, %v648_v12 }
 0x354   :  { %v614_v49 = vpop.xlane.xlu1 %613  ;;  %v665_v21 = vadd.f32 1e-05, %v649_v18 }
 0x355   :  { %6358 = vrsqrt.f32 %v664_v15  ;;  %v650_v22 = vmul.f32 0.03125, %v614_v49  ;;  %v617_v53 = vpop.xlane.xlu0 %616 }
 0x356   :  { %6360 = vrsqrt.f32 %v665_v21  ;;  %v651_v2 = vmul.f32 0.03125, %v617_v53 }
 0x357   :  { %v6353_v29 = vpop.eup %6352  ;;  %v666_v30 = vadd.f32 1e-05, %v650_v22 }
 0x358   :  { %v620_v61 = vpop.xlane.xlu1 %619  ;;  %v693_v16 = vmul.f32 %v6353_v29, %v7262_v55  ;;  %v667_v36 = vadd.f32 1e-05, %v651_v2 }
 0x359   :  { %6362 = vrsqrt.f32 %v666_v30  ;;  %v652_v38 = vmul.f32 0.03125, %v620_v61  ;;  %v623_v44 = vpop.xlane.xlu0 %622 }
 0x35a   :  { %6364 = vrsqrt.f32 %v667_v36  ;;  %v653_v48 = vmul.f32 0.03125, %v623_v44  ;;  %v715_v32 = vmul.f32 %v7367_v40, %v693_v16 }
 0x35b   :  { %v6355_v45 = vpop.eup %6354  ;;  %v668_v23 = vadd.f32 1e-05, %v652_v38 }
 0x35c   :  { %v6357_v50 = vpop.eup %6356  ;;  %v626_v52 = vpop.xlane.xlu1 %625  ;;  %v694_v42 = vmul.f32 %v6355_v45, %v7267_v10  ;;  %v669_v55 = vadd.f32 1e-05, %v653_v48  ;;  %v737_v12 = vadd.f32 %v7374_v7, %v715_v32 }
 0x35d   :  { %6366 = vrsqrt.f32 %v668_v23  ;;  %v654_v57 = vmul.f32 0.03125, %v626_v52  ;;  %v695_v62 = vmul.f32 %v6357_v50, %v7271_v11  ;;  %v629_v63 = vpop.xlane.xlu0 %628 }
 0x35e   :  { %v716_v37 = vmul.f32 %v7367_v40, %v694_v42  ;;  %6368 = vrsqrt.f32 %v669_v55  ;;  %v655_v8 = vmul.f32 0.03125, %v629_v63 }
 0x35f   :  { %v6359_v0 = vpop.eup %6358  ;;  %v670_v5 = vadd.f32 1e-05, %v654_v57  ;;  %v717_v18 = vmul.f32 %v7367_v40, %v695_v62 }
 0x360   :  { %v632_v10 = vpop.xlane.xlu1 %631  ;;  %v738_v14 = vadd.f32 %v7374_v7, %v716_v37  ;;  %v696_v15 = vmul.f32 %v6359_v0, %v7278_v17  ;;  %v6361_v49 = vpop.eup %6360  ;;  %v671_v21 = vadd.f32 1e-05, %v655_v8 }
 0x361   :  { %6370 = vrsqrt.f32 %v670_v5  ;;  %v656_v11 = vmul.f32 0.03125, %v632_v10  ;;  %v635_v22 = vpop.xlane.xlu0 %634  ;;  %v697_v30 = vmul.f32 %v6361_v49, %v7283_v27  ;;  %v739_v17 = vadd.f32 %v7374_v7, %v717_v18 }
 0x362   :  { %v753_v53 = vpack.c.bf16 %v738_v14, %v737_v12  ;;  %v718_v29 = vmul.f32 %v7367_v40, %v696_v15  ;;  %6372 = vrsqrt.f32 %v671_v21  ;;  %v657_v16 = vmul.f32 0.03125, %v635_v22 }
 0x363   :  { %v6363_v2 = vpop.eup %6362  ;;  %v672_v61 = vadd.f32 1e-05, %v656_v11  ;;  %v719_v45 = vmul.f32 %v7367_v40, %v697_v30 }
 0x364   :  { %v638_v36 = vpop.xlane.xlu1 %637  ;;  %5799 = vmatprep.mubr.msk.bf16.mxu1 %vm245_vm1, %v753_v53  ;;  %v740_v38 = vadd.f32 %v7374_v7, %v718_v29  ;;  %v698_v44 = vmul.f32 %v6363_v2, %v7288_v31  ;;  %v6365_v23 = vpop.eup %6364  ;;  %v673_v48 = vadd.f32 1e-05, %v657_v16 }
 0x365   :  { %6374 = vrsqrt.f32 %v672_v61  ;;  %v658_v50 = vmul.f32 0.03125, %v638_v36  ;;  %v641_v27 = vpop.xlane.xlu0 %640  ;;  %v699_v32 = vmul.f32 %v6365_v23, %v7294_v35  ;;  %v741_v31 = vadd.f32 %v7374_v7, %v719_v45 }
 0x366   :  { %v754_v52 = vpack.c.bf16 %v740_v38, %v739_v17  ;;  %v720_v42 = vmul.f32 %v7367_v40, %v698_v44  ;;  %6376 = vrsqrt.f32 %v673_v48  ;;  %v659_v62 = vmul.f32 0.03125, %v641_v27 }
 0x367   :  { %v6367_v55 = vpop.eup %6366  ;;  %v674_v57 = vadd.f32 1e-05, %v658_v50  ;;  %v721_v5 = vmul.f32 %v7367_v40, %v699_v32 }
 0x368   :  { %v644_v63 = vpop.xlane.xlu1 %643  ;;  %5800 = vmatmul.mubr.msk.bf16.vlgmr.msra.gmra.mrb[0].mxu1 %vm245_vm1, %v754_v52  ;;  %v742_v37 = vadd.f32 %v7374_v7, %v720_v42  ;;  %v700_v0 = vmul.f32 %v6367_v55, %v7300_v41  ;;  %v6369_v8 = vpop.eup %6368  ;;  %v675_v10 = vadd.f32 1e-05, %v659_v62 }
 0x369   :  { %6378 = vrsqrt.f32 %v674_v57  ;;  %v660_v12 = vmul.f32 0.03125, %v644_v63  ;;  %v701_v15 = vmul.f32 %v6369_v8, %v7306_v47  ;;  %v743_v21 = vadd.f32 %v7374_v7, %v721_v5  ;;  %v7432_v5 = vld [vmem:[%s9810_s9] ss:$0 sm:$0xff] }
 0x36a   :  { %v755_v35 = vpack.c.bf16 %v742_v37, %v741_v31  ;;  %v722_v14 = vmul.f32 %v7367_v40, %v700_v0  ;;  %6380 = vrsqrt.f32 %v675_v10 }
 0x36b   :  { %v6371_v18 = vpop.eup %6370  ;;  %v676_v49 = vadd.f32 1e-05, %v660_v12  ;;  %v723_v22 = vmul.f32 %v7367_v40, %v701_v15 }
 0x36c   :  { %5803 = vmatprep.mubr.msk.bf16.mxu1 %vm245_vm1, %v755_v35  ;;  %v744_v41 = vadd.f32 %v7374_v7, %v722_v14  ;;  %v702_v11 = vmul.f32 %v6371_v18, %v7312_v56  ;;  %v6373_v53 = vpop.eup %6372 }
 0x36d   :  { %6382 = vrsqrt.f32 %v676_v49  ;;  %v703_v47 = vmul.f32 %v6373_v53, %v7318_v4  ;;  %v745_v61 = vadd.f32 %v7374_v7, %v723_v22 }
 0x36e   :  { %v756_v29 = vpack.c.bf16 %v744_v41, %v743_v21  ;;  %v724_v30 = vmul.f32 %v7367_v40, %v702_v11 }
 0x36f   :  { %v6375_v2 = vpop.eup %6374  ;;  %v725_v56 = vmul.f32 %v7367_v40, %v703_v47 }
 0x370   :  { %5804 = vmatmul.mubr.msk.bf16.gmra.mrb[4].mxu1 %vm245_vm1, %v756_v29  ;;  %v746_v16 = vadd.f32 %v7374_v7, %v724_v30  ;;  %v704_v36 = vmul.f32 %v6375_v2, %v7324_v43  ;;  %v6377_v17 = vpop.eup %6376 }
 0x371   :  { %v705_v45 = vmul.f32 %v6377_v17, %v7330_v58  ;;  %v747_v4 = vadd.f32 %v7374_v7, %v725_v56 }
 0x372   :  { %v757_v38 = vpack.c.bf16 %v746_v16, %v745_v61  ;;  %v726_v44 = vmul.f32 %v7367_v40, %v704_v36 }
 0x373   :  { %v6379_v23 = vpop.eup %6378  ;;  %v727_v27 = vmul.f32 %v7367_v40, %v705_v45 }
 0x374   :  { %5807 = vmatprep.mubr.msk.bf16.mxu1 %vm245_vm1, %v757_v38  ;;  %v748_v48 = vadd.f32 %v7374_v7, %v726_v44  ;;  %v706_v50 = vmul.f32 %v6379_v23, %v7336_v28  ;;  %v6381_v43 = vpop.eup %6380 }
 0x375   :  { %v707_v32 = vmul.f32 %v6381_v43, %v7342_v24  ;;  %v749_v58 = vadd.f32 %v7374_v7, %v727_v27 }
 0x376   :  { %v758_v52 = vpack.c.bf16 %v748_v48, %v747_v4  ;;  %v728_v42 = vmul.f32 %v7367_v40, %v706_v50 }
 0x377   :  { %v6383_v55 = vpop.eup %6382  ;;  %v729_v63 = vmul.f32 %v7367_v40, %v707_v32 }
 0x378   :  { %5808 = vmatmul.mubr.msk.bf16.gmra.mrb[8].mxu1 %vm245_vm1, %v758_v52  ;;  %v750_v57 = vadd.f32 %v7374_v7, %v728_v42  ;;  %v708_v62 = vmul.f32 %v6383_v55, %v7348_v39 }
 0x379   :  { %v751_v37 = vadd.f32 %v7374_v7, %v729_v63 }
 0x37a   :  { %v759_v28 = vpack.c.bf16 %v750_v57, %v749_v58  ;;  %v730_v31 = vmul.f32 %v7367_v40, %v708_v62 }
 0x37c   :  { %5811 = vmatprep.mubr.msk.bf16.mxu1 %vm245_vm1, %v759_v28  ;;  %v752_v24 = vadd.f32 %v7374_v7, %v730_v31 }
 0x37e   :  { %v760_v0 = vpack.c.bf16 %v752_v24, %v751_v37 }
 0x380   :  { %5812 = vmatmul.mubr.msk.bf16.gmra.mrb[12].mxu1 %vm245_vm1, %v760_v0 }
 0x43b   :  { %v5801_v39 = vpop.f32.mrb[0].mxu1 }
 0x43c   :  { %v851_v8 = vadd.f32 %v5801_v39, %v7432_v5  ;;  %v842_v10 = vpop.f32.mrb[1].mxu1 }
 0x43d   :  { %v843_v40 = vadd.f32 %v7432_v5, %v842_v10  ;;  %v5802_v12 = vpop.f32.mrb[2].mxu1 }
 0x43e   :  { %v854_v35 = vadd.f32 %v5802_v12, %v7432_v5  ;;  %v845_v14 = vpop.f32.mrb[3].mxu1  ;;  %v907_v15 = vmul.f32 0.25, %v851_v8 }
 0x43f   :  { %v846_v7 = vadd.f32 %v7432_v5, %v845_v14  ;;  %v905_v21 = vmul.f32 0.25, %v843_v40 }
 0x440   :  { %v908_v18 = vmul.f32 0.25, %v854_v35  ;;  %v7438_v49 = vpack.c.bf16 %v854_v35, %v851_v8 }
 0x441   :  { %v906_v41 = vmul.f32 0.25, %v846_v7  ;;  %v7440_v11 = vpack.c.bf16 %v846_v7, %v843_v40 }
 0x442   :  { %v7442_v22 = vpack.c.bf16 %v908_v18, %v907_v15  ;;  %963 = vrot.lane.b32.xlu1 %v7438_v49, %s6800_s30 }
 0x443   :  { %v7446_v53 = vpack.c.bf16 %v906_v41, %v905_v21  ;;  %961 = vrot.lane.b32.xlu0 %v7440_v11, %s6800_s30  ;;  %v5805_v29 = vpop.f32.mrb[4].mxu1 }
 0x444   :  { %v867_v30 = vadd.f32 %v5805_v29, %v7432_v5  ;;  %v858_v47 = vpop.f32.mrb[5].mxu1 }
 0x445   :  { %v859_v2 = vadd.f32 %v7432_v5, %v858_v47  ;;  %v5806_v61 = vpop.f32.mrb[6].mxu1  ;;  %5831 = vmatprep.mubr.msk.bf16.mxu1 %vm977_vm2, %v7446_v53 }
 0x446   :  { %v870_v16 = vadd.f32 %v5806_v61, %v7432_v5  ;;  %v861_v36 = vpop.f32.mrb[7].mxu1  ;;  %v911_v17 = vmul.f32 0.25, %v867_v30 }
 0x447   :  { %v862_v56 = vadd.f32 %v7432_v5, %v861_v36  ;;  %v909_v45 = vmul.f32 0.25, %v859_v2 }
 0x448   :  { %v912_v38 = vmul.f32 0.25, %v870_v16  ;;  %v7456_v44 = vpack.c.bf16 %v870_v16, %v867_v30 }
 0x449   :  { %v910_v23 = vmul.f32 0.25, %v862_v56  ;;  %v7458_v4 = vpack.c.bf16 %v862_v56, %v859_v2 }
 0x44a   :  { %v7460_v48 = vpack.c.bf16 %v912_v38, %v911_v17 }
 0x44b   :  { %v7462_v50 = vpack.c.bf16 %v910_v23, %v909_v45  ;;  %965 = vrot.lane.b32.xlu1 %v7458_v4, %s6800_s30  ;;  %v5809_v27 = vpop.f32.mrb[8].mxu1 }
 0x44c   :  { %v883_v43 = vadd.f32 %v5809_v27, %v7432_v5  ;;  %v874_v52 = vpop.f32.mrb[9].mxu1 }
 0x44d   :  { %v875_v42 = vadd.f32 %v7432_v5, %v874_v52  ;;  %v5810_v32 = vpop.f32.mrb[10].mxu1 }
 0x44e   :  { %v886_v55 = vadd.f32 %v5810_v32, %v7432_v5  ;;  %v877_v58 = vpop.f32.mrb[11].mxu1  ;;  %v915_v62 = vmul.f32 0.25, %v883_v43 }
 0x44f   :  { %v878_v57 = vadd.f32 %v7432_v5, %v877_v58  ;;  %967 = vrot.lane.b32.xlu1 %v7456_v44, %s6800_s30  ;;  %v913_v31 = vmul.f32 0.25, %v875_v42 }
 0x450   :  { %v916_v63 = vmul.f32 0.25, %v886_v55  ;;  %v7472_v28 = vpack.c.bf16 %v886_v55, %v883_v43 }
 0x451   :  { %v914_v37 = vmul.f32 0.25, %v878_v57  ;;  %v7474_v24 = vpack.c.bf16 %v878_v57, %v875_v42 }
 0x452   :  { %v7476_v0 = vpack.c.bf16 %v916_v63, %v915_v62 }
 0x453   :  { %v7478_v39 = vpack.c.bf16 %v914_v37, %v913_v31  ;;  %971 = vrot.lane.b32.xlu1 %v7472_v28, %s6800_s30  ;;  %969 = vrot.lane.b32.xlu0 %v7474_v24, %s6800_s30  ;;  %v5813_v8 = vpop.f32.mrb[12].mxu1 }
 0x454   :  { %v899_v10 = vadd.f32 %v5813_v8, %v7432_v5  ;;  %v890_v40 = vpop.f32.mrb[13].mxu1 }
 0x455   :  { %v891_v12 = vadd.f32 %v7432_v5, %v890_v40  ;;  %v5814_v35 = vpop.f32.mrb[14].mxu1 }
 0x456   :  { %v902_v14 = vadd.f32 %v5814_v35, %v7432_v5  ;;  %v893_v7 = vpop.f32.mrb[15].mxu1  ;;  %v919_v18 = vmul.f32 0.25, %v899_v10 }
 0x457   :  { %v894_v15 = vadd.f32 %v7432_v5, %v893_v7  ;;  %v917_v29 = vmul.f32 0.25, %v891_v12 }
 0x458   :  { %v920_v21 = vmul.f32 0.25, %v902_v14  ;;  %v7488_v41 = vpack.c.bf16 %v902_v14, %v899_v10  ;;  %v939_v14 = vld [vmem:[%s9811_s5 + $0x10] sm:$0xff] }
 0x459   :  { %v918_v30 = vmul.f32 0.25, %v894_v15  ;;  %v7490_v47 = vpack.c.bf16 %v894_v15, %v891_v12 }
 0x45a   :  { %v7492_v2 = vpack.c.bf16 %v920_v21, %v919_v18  ;;  %975 = vrot.lane.b32.xlu1 %v7488_v41, %s6800_s30  ;;  %v938_v21 = vld [vmem:[%s9811_s5 + $0x8] sm:$0xff] }
 0x45b   :  { %v7496_v61 = vpack.c.bf16 %v918_v30, %v917_v29  ;;  %973 = vrot.lane.b32.xlu0 %v7490_v47, %s6800_s30  ;;  %v937_v29 = vld [vmem:[%s9811_s5] sm:$0xff] }
 0x45e   :  { %1277 = vrot.lane.b32.xlu1 %v7438_v49, %s6801_s1 }
 0x45f   :  { %1275 = vrot.lane.b32.xlu0 %v7440_v11, %s6801_s1 }
 0x462   :  { %1281 = vrot.lane.b32.xlu1 %v7456_v44, %s6801_s1 }
 0x463   :  { %1279 = vrot.lane.b32.xlu0 %v7458_v4, %s6801_s1 }
 0x466   :  { %1285 = vrot.lane.b32.xlu1 %v7472_v28, %s6801_s1 }
 0x467   :  { %1283 = vrot.lane.b32.xlu0 %v7474_v24, %s6801_s1 }
 0x46a   :  { %1289 = vrot.lane.b32.xlu1 %v7488_v41, %s6801_s1 }
 0x46b   :  { %1453 = vrot.lane.b32.xlu0 %v7440_v11, %s6802_s21 }
 0x46e   :  { %1455 = vrot.lane.b32.xlu1 %v7438_v49, %s6802_s21 }
 0x46f   :  { %1287 = vrot.lane.b32.xlu0 %v7490_v47, %s6801_s1 }
 0x4b4   :  { %v964_v36 = vpop.permute.xlu1 %963 }
 0x4b5   :  { %v962_v5 = vpop.permute.xlu0 %961  ;;  %v1006_v17 = vsel %vm977_vm2, %v964_v36, 0 }
 0x4b6   :  { %6251 = vmatprep.subr.msk.bf16.mxu1 %vm977_vm2, %v962_v5  ;;  %v1003_v16 = vsel %vm977_vm2, %v962_v5, 0 }
 0x4b7   :  { %5816 = vmatpush3.bf16.xpose.msra.mxu1 %v1003_v16 }
 0x4b8   :  { %6252 = vmatprep.subr.msk.bf16.mxu1 %vm977_vm2, %v964_v36 }
 0x4bd   :  { %v966_v56 = vpop.permute.xlu1 %965 }
 0x4be   :  { %v1009_v45 = vsel %vm977_vm2, %v966_v56, 0 }
 0x4bf   :  { %5818 = vmatpush3.bf16.xpose.msra.mxu1 %v1006_v17 }
 0x4c0   :  { %6253 = vmatprep.subr.msk.bf16.mxu1 %vm977_vm2, %v966_v56  ;;  %v940_v56 = vld [vmem:[%s9811_s5 + $0x18] sm:$0xff] }
 0x4c1   :  { %v968_v38 = vpop.permute.xlu1 %967 }
 0x4c2   :  { %v1012_v42 = vsel %vm977_vm2, %v968_v38, 0 }
 0x4c5   :  { %v972_v23 = vpop.permute.xlu1 %971  ;;  %v970_v27 = vpop.permute.xlu0 %969 }
 0x4c6   :  { %v1015_v57 = vsel %vm977_vm2, %v970_v27, 0  ;;  %v1018_v31 = vsel %vm977_vm2, %v972_v23, 0 }
 0x4c7   :  { %5820 = vmatpush3.bf16.xpose.msra.mxu1 %v1009_v45 }
 0x4c8   :  { %6254 = vmatprep.subr.msk.bf16.mxu1 %vm977_vm2, %v968_v38  ;;  %v944_v38 = vld [vmem:[%s9811_s5 + $0x38] sm:$0xff] }
 0x4cc   :  { %v976_v43 = vpop.permute.xlu1 %975 }
 0x4cd   :  { %v974_v52 = vpop.permute.xlu0 %973  ;;  %v1024_v35 = vsel %vm977_vm2, %v976_v43, 0 }
 0x4ce   :  { %v1021_v10 = vsel %vm977_vm2, %v974_v52, 0 }
 0x4cf   :  { %5822 = vmatpush3.bf16.xpose.msra.mxu1 %v1012_v42 }
 0x4d0   :  { %6255 = vmatprep.subr.msk.bf16.mxu1 %vm977_vm2, %v970_v27  ;;  %v1278_v55 = vpop.permute.xlu1 %1277  ;;  %v943_v27 = vld [vmem:[%s9811_s5 + $0x30] sm:$0xff] }
 0x4d1   :  { %v1276_v32 = vpop.permute.xlu0 %1275 }
 0x4d2   :  { %5847 = vmatprep.subr.bf16.mxu0 %v1276_v32 }
 0x4d3   :  { %5848 = vmatpush3.bf16.msra.mxu0 %v1276_v32  ;;  %v942_v32 = vld [vmem:[%s9811_s5 + $0x28] sm:$0xff] }
 0x4d4   :  { %5849 = vmatprep.subr.bf16.mxu0 %v1278_v55  ;;  %v1282_v62 = vpop.permute.xlu1 %1281 }
 0x4d5   :  { %v1280_v58 = vpop.permute.xlu0 %1279 }
 0x4d7   :  { %5824 = vmatpush3.bf16.xpose.msra.mxu1 %v1015_v57  ;;  %5850 = vmatpush3.bf16.msra.mxu0 %v1278_v55 }
 0x4d8   :  { %6256 = vmatprep.subr.msk.bf16.mxu1 %vm977_vm2, %v972_v23  ;;  %5851 = vmatprep.subr.bf16.mxu0 %v1280_v58  ;;  %v1286_v8 = vpop.permute.xlu1 %1285 }
 0x4d9   :  { %v1284_v63 = vpop.permute.xlu0 %1283 }
 0x4db   :  { %5852 = vmatpush3.bf16.msra.mxu0 %v1280_v58  ;;  %v941_v58 = vld [vmem:[%s9811_s5 + $0x20] sm:$0xff] }
 0x4dc   :  { %5853 = vmatprep.subr.bf16.mxu0 %v1282_v62  ;;  %v1290_v12 = vpop.permute.xlu1 %1289 }
 0x4dd   :  { %v7533_v37 = vpop.permute.xlu0 %1453 }
 0x4df   :  { %5826 = vmatpush3.bf16.xpose.msra.mxu1 %v1018_v31  ;;  %5854 = vmatpush3.bf16.msra.mxu0 %v1282_v62 }
 0x4e0   :  { %6257 = vmatprep.subr.msk.bf16.mxu1 %vm977_vm2, %v974_v52  ;;  %5855 = vmatprep.subr.bf16.mxu0 %v1284_v63 }
 0x4e1   :  { %v1288_v40 = vpop.permute.xlu0 %1287 }
 0x4e3   :  { %5856 = vmatpush3.bf16.msra.mxu0 %v1284_v63  ;;  %v948_v63 = vld [vmem:[%s9811_s5 + $0x58] sm:$0xff] }
 0x4e4   :  { %5857 = vmatprep.subr.bf16.mxu0 %v1286_v8 }
 0x4e7   :  { %5828 = vmatpush3.bf16.xpose.msra.mxu1 %v1021_v10  ;;  %5858 = vmatpush3.bf16.msra.mxu0 %v1286_v8  ;;  %v947_v10 = vld [vmem:[%s9811_s5 + $0x50] sm:$0xff] }
 0x4e8   :  { %6258 = vmatprep.subr.msk.bf16.mxu1 %vm977_vm2, %v976_v43  ;;  %5859 = vmatprep.subr.bf16.mxu0 %v1288_v40 }
 0x4eb   :  { %5860 = vmatpush3.bf16.msra.mxu0 %v1288_v40 }
 0x4ec   :  { %5861 = vmatprep.subr.bf16.mxu0 %v1290_v12 }
 0x4ef   :  { %5830 = vmatpush3.bf16.xpose.msra.mxu1 %v1024_v35  ;;  %5862 = vmatpush3.bf16.msra.mxu0 %v1290_v12 }
 0x4f0   :  { %6259 = vmatprep.subr.msk.bf16.mxu0 %vm977_vm2, %v7533_v37 }
 0x4f6   :  { %5832 = vmatmul.mubr.msk.bf16.vlgmr.msra.gmra.mrb[16].mxu1 %vm977_vm2, %v7442_v22 }
 0x4f7   :  { %5835 = vmatprep.mubr.msk.bf16.mxu1 %vm977_vm2, %v7462_v50 }
 0x4fe   :  { %5836 = vmatmul.mubr.msk.bf16.gmra.mrb[20].mxu1 %vm977_vm2, %v7460_v48 }
 0x4ff   :  { %5839 = vmatprep.mubr.msk.bf16.mxu1 %vm977_vm2, %v7478_v39 }
 0x506   :  { %5840 = vmatmul.mubr.msk.bf16.gmra.mrb[24].mxu1 %vm977_vm2, %v7476_v0 }
 0x507   :  { %5843 = vmatprep.mubr.msk.bf16.mxu1 %vm977_vm2, %v7496_v61 }
 0x50e   :  { %5844 = vmatmul.mubr.msk.bf16.gmra.mrb[28].mxu1 %vm977_vm2, %v7492_v2 }
 0x5c9   :  { %v5833_v7 = vpop.f32.mrb[16].mxu1 }
 0x5ca   :  { %v7557_v15 = vadd.f32 %v5833_v7, %v939_v14  ;;  %v1060_v18 = vpop.f32.mrb[17].mxu1  ;;  %v946_v14 = vld [vmem:[%s9811_s5 + $0x48] sm:$0xff] }
 0x5cb   :  { %v5834_v30 = vpop.f32.mrb[18].mxu1  ;;  %v7568_v36 = vadd.f32 %v1060_v18, %v937_v29  ;;  %v945_v18 = vld [vmem:[%s9811_s5 + $0x40] sm:$0xff] }
 0x5cc   :  { %1127 = vmax.xlane.f32.xlu0 %v7557_v15  ;;  %v1063_v5 = vpop.f32.mrb[19].mxu1  ;;  %v7578_v45 = vadd.f32 %v5834_v30, %v940_v56  ;;  %v951_v56 = vld [vmem:[%s9811_s5 + $0x70] sm:$0xff] }
 0x5cd   :  { %v7566_v16 = vadd.f32 %v1063_v5, %v938_v21 }
 0x5cf   :  { %1125 = vmax.xlane.f32.xlu1 %v7566_v16 }
 0x5d0   :  { %1123 = vmax.xlane.f32.xlu0 %v7568_v36 }
 0x5d1   :  { %v5837_v17 = vpop.f32.mrb[20].mxu1 }
 0x5d2   :  { %v1076_v23 = vpop.f32.mrb[21].mxu1  ;;  %v7589_v55 = vadd.f32 %v5837_v17, %v943_v27  ;;  %v949_v27 = vld [vmem:[%s9811_s5 + $0x60] sm:$0xff] }
 0x5d3   :  { %v5838_v43 = vpop.f32.mrb[22].mxu1  ;;  %v7601_v31 = vadd.f32 %v1076_v23, %v941_v58  ;;  %v950_v58 = vld [vmem:[%s9811_s5 + $0x68] sm:$0xff] }
 0x5d4   :  { %v7583_v52 = vadd.f32 %v5838_v43, %v944_v38  ;;  %v1079_v42 = vpop.f32.mrb[23].mxu1  ;;  %1129 = vmax.xlane.f32.xlu0 %v7578_v45 }
 0x5d5   :  { %v7595_v57 = vadd.f32 %v1079_v42, %v942_v32  ;;  %v952_v42 = vld [vmem:[%s9811_s5 + $0x78] sm:$0xff] }
 0x5d6   :  { %1137 = vmax.xlane.f32.xlu1 %v7583_v52 }
 0x5d8   :  { %1135 = vmax.xlane.f32.xlu0 %v7589_v55 }
 0x5d9   :  { %v5841_v62 = vpop.f32.mrb[24].mxu1 }
 0x5da   :  { %v1092_v8 = vpop.f32.mrb[25].mxu1  ;;  %1133 = vmax.xlane.f32.xlu1 %v7595_v57  ;;  %v7613_v7 = vadd.f32 %v5841_v62, %v947_v10 }
 0x5db   :  { %v5842_v40 = vpop.f32.mrb[26].mxu1  ;;  %v7622_v30 = vadd.f32 %v1092_v8, %v945_v18 }
 0x5dc   :  { %v7607_v12 = vadd.f32 %v5842_v40, %v948_v63  ;;  %v1095_v35 = vpop.f32.mrb[27].mxu1  ;;  %1131 = vmax.xlane.f32.xlu0 %v7601_v31  ;;  %v7654_v63 = vpop.permute.xlu1 %1455 }
 0x5dd   :  { %v7619_v21 = vadd.f32 %v1095_v35, %v946_v14 }
 0x5de   :  { %1145 = vmax.xlane.f32.xlu1 %v7607_v12 }
 0x5e0   :  { %1143 = vmax.xlane.f32.xlu0 %v7613_v7 }
 0x5e1   :  { %v5845_v29 = vpop.f32.mrb[28].mxu1 }
 0x5e2   :  { %v1108_v5 = vpop.f32.mrb[29].mxu1  ;;  %1141 = vmax.xlane.f32.xlu1 %v7619_v21  ;;  %v7629_v23 = vadd.f32 %v5845_v29, %v951_v56 }
 0x5e3   :  { %v5846_v17 = vpop.f32.mrb[30].mxu1  ;;  %v7635_v43 = vadd.f32 %v1108_v5, %v949_v27 }
 0x5e4   :  { %v1111_v38 = vpop.f32.mrb[31].mxu1  ;;  %1139 = vmax.xlane.f32.xlu0 %v7622_v30  ;;  %v7645_v32 = vadd.f32 %v5846_v17, %v952_v42 }
 0x5e5   :  { %v7651_v62 = vadd.f32 %v1111_v38, %v950_v58 }
 0x5e8   :  { %1151 = vmax.xlane.f32.xlu0 %v7629_v23 }
 0x5ec   :  { %1147 = vmax.xlane.f32.xlu0 %v7635_v43 }
 0x5f3   :  { %1459 = vrot.lane.b32.xlu1 %v7456_v44, %s6802_s21 }
 0x602   :  { %1457 = vrot.lane.b32.xlu0 %v7458_v4, %s6802_s21 }
 0x617   :  { %1153 = vmax.xlane.f32.xlu1 %v7645_v32 }
 0x61b   :  { %1149 = vmax.xlane.f32.xlu1 %v7651_v62 }
 0x659   :  { %v1128_v8 = vpop.xlane.xlu0 %1127 }
 0x65a   :  { %v1157_v10 = vsub.f32 %v7557_v15, %v1128_v8 }
 0x65c   :  { %v1175_v40 = vmul.f32 1.442695, %v1157_v10  ;;  %v1126_v35 = vpop.xlane.xlu1 %1125 }
 0x65d   :  { %v1156_v14 = vsub.f32 %v7566_v16, %v1126_v35  ;;  %v1124_v18 = vpop.xlane.xlu0 %1123 }
 0x65e   :  { %6384 = vpow2.f32 %v1175_v40  ;;  %v1155_v29 = vsub.f32 %v7568_v36, %v1124_v18 }
 0x65f   :  { %v1173_v5 = vmul.f32 1.442695, %v1156_v14 }
 0x660   :  { %v1171_v56 = vmul.f32 1.442695, %v1155_v29 }
 0x661   :  { %6386 = vpow2.f32 %v1173_v5  ;;  %v1130_v17 = vpop.xlane.xlu0 %1129 }
 0x662   :  { %6388 = vpow2.f32 %v1171_v56  ;;  %v1158_v38 = vsub.f32 %v7578_v45, %v1130_v17 }
 0x663   :  { %v1138_v8 = vpop.xlane.xlu1 %1137 }
 0x664   :  { %v1177_v27 = vmul.f32 1.442695, %v1158_v38  ;;  %v1162_v38 = vsub.f32 %v7583_v52, %v1138_v8 }
 0x665   :  { %v1136_v58 = vpop.xlane.xlu0 %1135 }
 0x666   :  { %6390 = vpow2.f32 %v1177_v27  ;;  %v1161_v40 = vsub.f32 %v7589_v55, %v1136_v58  ;;  %v1185_v25 = vmul.f32 1.442695, %v1162_v38 }
 0x667   :  { %v1134_v35 = vpop.xlane.xlu1 %1133 }
 0x668   :  { %v7660_v42 = vpop.eup %6384  ;;  %v1183_v18 = vmul.f32 1.442695, %v1161_v40  ;;  %v1160_v5 = vsub.f32 %v7595_v57, %v1134_v35 }
 0x669   :  { %1207 = vadd.xlane.f32.xlu1 %v7660_v42  ;;  %v1132_v45 = vpop.xlane.xlu0 %1131 }
 0x66a   :  { %v1159_v29 = vsub.f32 %v7601_v31, %v1132_v45  ;;  %6392 = vpow2.f32 %v1183_v18  ;;  %v1181_v60 = vmul.f32 1.442695, %v1160_v5 }
 0x66b   :  { %v7663_v15 = vpop.eup %6386  ;;  %v1146_v56 = vpop.xlane.xlu1 %1145 }
 0x66c   :  { %v7665_v16 = vpop.eup %6388  ;;  %1205 = vadd.xlane.f32.xlu0 %v7663_v15  ;;  %v1179_v27 = vmul.f32 1.442695, %v1159_v29  ;;  %v1166_v52 = vsub.f32 %v7607_v12, %v1146_v56 }
 0x66d   :  { %1203 = vadd.xlane.f32.xlu1 %v7665_v16  ;;  %v1144_v10 = vpop.xlane.xlu0 %1143 }
 0x66e   :  { %v1165_v19 = vsub.f32 %v7613_v7, %v1144_v10  ;;  %6394 = vpow2.f32 %v1179_v27 }
 0x66f   :  { %v1142_v13 = vpop.xlane.xlu1 %1141  ;;  %6396 = vpow2.f32 %v1181_v60 }
 0x670   :  { %v7669_v36 = vpop.eup %6390  ;;  %v1191_v58 = vmul.f32 1.442695, %v1165_v19  ;;  %6398 = vpow2.f32 %v1185_v25  ;;  %v1193_v19 = vmul.f32 1.442695, %v1166_v52 }
 0x671   :  { %1209 = vadd.xlane.f32.xlu1 %v7669_v36  ;;  %v1140_v14 = vpop.xlane.xlu0 %1139 }
 0x672   :  { %v1163_v31 = vsub.f32 %v7622_v30, %v1140_v14  ;;  %6400 = vpow2.f32 %v1191_v58  ;;  %v1164_v30 = vsub.f32 %v7619_v21, %v1142_v13 }
 0x673   :  { %v7687_v7 = vpop.permute.xlu1 %1459 }
 0x674   :  { %v1187_v8 = vmul.f32 1.442695, %v1163_v31  ;;  %v7685_v35 = vpop.eup %6392  ;;  %v1189_v10 = vmul.f32 1.442695, %v1164_v30 }
 0x675   :  { %v1152_v17 = vpop.xlane.xlu0 %1151 }
 0x676   :  { %v1169_v55 = vsub.f32 %v7629_v23, %v1152_v17 }
 0x678   :  { %v1199_v57 = vmul.f32 1.442695, %v1169_v55  ;;  %v7691_v25 = vpop.eup %6394 }
 0x679   :  { %v1148_v45 = vpop.xlane.xlu0 %1147 }
 0x67a   :  { %v1167_v40 = vsub.f32 %v7635_v43, %v1148_v45  ;;  %6402 = vpow2.f32 %v1199_v57  ;;  %v7693_v43 = vpop.eup %6396  ;;  %v1494_v57 = vsel %vm977_vm2, %v7533_v37, 0 }
 0x67b   :  { %6404 = vpow2.f32 %v1187_v8  ;;  %v7698_v18 = vpop.eup %6398 }
 0x67c   :  { %v1195_v60 = vmul.f32 1.442695, %v1167_v40  ;;  %v7700_v13 = vpop.eup %6400 }
 0x67e   :  { %6406 = vpow2.f32 %v1195_v60 }
 0x67f   :  { %6408 = vpow2.f32 %v1193_v19 }
 0x682   :  { %1461 = vrot.lane.b32.xlu0 %v7474_v24, %s6802_s21  ;;  %1463 = vrot.lane.b32.xlu1 %v7472_v28, %s6802_s21 }
 0x684   :  { %v7705_v5 = vpop.eup %6402 }
 0x685   :  { %v7707_v56 = vpop.eup %6404 }
 0x688   :  { %v7711_v17 = vpop.eup %6406 }
 0x689   :  { %v7713_v38 = vpop.eup %6408 }
 0x6a1   :  { %1215 = vadd.xlane.f32.xlu0 %v7685_v35 }
 0x6a4   :  { %v1154_v23 = vpop.xlane.xlu1 %1153 }
 0x6a5   :  { %v1170_v12 = vsub.f32 %v7645_v32, %v1154_v23  ;;  %1211 = vadd.xlane.f32.xlu0 %v7691_v25 }
 0x6a6   :  { %1213 = vadd.xlane.f32.xlu1 %v7693_v43 }
 0x6a7   :  { %v1201_v14 = vmul.f32 1.442695, %v1170_v12 }
 0x6a8   :  { %v1150_v29 = vpop.xlane.xlu1 %1149 }
 0x6a9   :  { %6410 = vpow2.f32 %v1201_v14  ;;  %v1168_v21 = vsub.f32 %v7651_v62, %v1150_v29  ;;  %1217 = vadd.xlane.f32.xlu0 %v7698_v18 }
 0x6aa   :  { %1223 = vadd.xlane.f32.xlu1 %v7700_v13  ;;  %6412 = vpow2.f32 %v1189_v10 }
 0x6ab   :  { %v1197_v32 = vmul.f32 1.442695, %v1168_v21 }
 0x6ad   :  { %1231 = vadd.xlane.f32.xlu0 %v7705_v5  ;;  %6414 = vpow2.f32 %v1197_v32 }
 0x6ae   :  { %1219 = vadd.xlane.f32.xlu1 %v7707_v56 }
 0x6b1   :  { %1227 = vadd.xlane.f32.xlu0 %v7711_v17 }
 0x6b2   :  { %1225 = vadd.xlane.f32.xlu1 %v7713_v38 }
 0x6b3   :  { %v7717_v62 = vpop.eup %6410 }
 0x6b4   :  { %v7719_v27 = vpop.eup %6412 }
 0x6b5   :  { %1233 = vadd.xlane.f32.xlu0 %v7717_v62 }
 0x6b6   :  { %1221 = vadd.xlane.f32.xlu1 %v7719_v27 }
 0x6b7   :  { %v7723_v55 = vpop.eup %6414 }
 0x6ba   :  { %1229 = vadd.xlane.f32.xlu1 %v7723_v55 }
 0x6cb   :  { %1467 = vrot.lane.b32.xlu1 %v7488_v41, %s6802_s21  ;;  %1465 = vrot.lane.b32.xlu0 %v7490_v47, %s6802_s21 }
 0x6cf   :  { %1439 = vrot.lane.b32.xlu1 %v7442_v22, %s6803_s3  ;;  %1437 = vrot.lane.b32.xlu0 %v7446_v53, %s6803_s3  ;;  %v1458_v22 = vpop.permute.xlu0 %1457 }
 0x6d3   :  { %1443 = vrot.lane.b32.xlu1 %v7460_v48, %s6803_s3  ;;  %1441 = vrot.lane.b32.xlu0 %v7462_v50, %s6803_s3 }
 0x6d7   :  { %1447 = vrot.lane.b32.xlu1 %v7476_v0, %s6803_s3  ;;  %1445 = vrot.lane.b32.xlu0 %v7478_v39, %s6803_s3 }
 0x6db   :  { %1451 = vrot.lane.b32.xlu1 %v7492_v2, %s6803_s3  ;;  %1449 = vrot.lane.b32.xlu0 %v7496_v61, %s6803_s3 }
 0x6df   :  { %1768 = vrot.lane.b32.xlu1 %v7438_v49, %s6804_s4  ;;  %1766 = vrot.lane.b32.xlu0 %v7440_v11, %s6804_s4 }
 0x6e3   :  { %1770 = vrot.lane.b32.xlu0 %v7458_v4, %s6804_s4 }
 0x6e7   :  { %1772 = vrot.lane.b32.xlu0 %v7456_v44, %s6804_s4 }
 0x6f6   :  { %v1208_v53 = vpop.xlane.xlu1 %1207 }
 0x6f9   :  { %v1206_v48 = vpop.xlane.xlu0 %1205 }
 0x6fa   :  { %6416 = vrcp.f32 %v1206_v48  ;;  %v1204_v50 = vpop.xlane.xlu1 %1203 }
 0x6fb   :  { %6418 = vrcp.f32 %v1204_v50 }
 0x6fc   :  { %6420 = vrcp.f32 %v1208_v53 }
 0x6fd   :  { %v1462_v37 = vpop.permute.xlu0 %1461 }
 0x6fe   :  { %v1210_v0 = vpop.xlane.xlu1 %1209 }
 0x6ff   :  { %6422 = vrcp.f32 %v1210_v0 }
 0x704   :  { %v6417_v39 = vpop.eup %6416 }
 0x705   :  { %v6419_v49 = vpop.eup %6418  ;;  %v1252_v2 = vmul.f32 %v6417_v39, %v7663_v15  ;;  %v1497_v15 = vsel %vm977_vm2, %v7654_v63, 0 }
 0x706   :  { %v1251_v11 = vmul.f32 %v6419_v49, %v7665_v16  ;;  %v6421_v61 = vpop.eup %6420  ;;  %v1503_v16 = vsel %vm977_vm2, %v7687_v7, 0 }
 0x707   :  { %v1253_v44 = vmul.f32 %v6421_v61, %v7660_v42  ;;  %v1500_v42 = vsel %vm977_vm2, %v1458_v22, 0 }
 0x708   :  { %v1267_v4 = vpack.c.bf16 %v1252_v2, %v1251_v11 }
 0x709   :  { %v6423_v58 = vpop.eup %6422 }
 0x70a   :  { %v1254_v31 = vmul.f32 %v6423_v58, %v7669_v36  ;;  %5863 = vmatprep.mubr.bf16.mxu0 %v1267_v4  ;;  %v1506_v36 = vsel %vm977_vm2, %v1462_v37, 0 }
 0x70c   :  { %v1268_v45 = vpack.c.bf16 %v1254_v31, %v1253_v44 }
 0x70e   :  { %5864 = vmatmul.mubr.bf16.vlgmr.msra.gmra.mrb[16].mxu0 %v1268_v45 }
 0x70f   :  { %5880 = vmatpush3.bf16.xpose.msra.mxu0 %v1494_v57 }
 0x710   :  { %6260 = vmatprep.subr.msk.bf16.mxu0 %vm977_vm2, %v7654_v63  ;;  %v1464_v63 = vpop.permute.xlu1 %1463 }
 0x711   :  { %v1509_v60 = vsel %vm977_vm2, %v1464_v63, 0 }
 0x717   :  { %5882 = vmatpush3.bf16.xpose.msra.mxu0 %v1497_v15 }
 0x718   :  { %6261 = vmatprep.subr.msk.bf16.mxu0 %vm977_vm2, %v1458_v22 }
 0x71f   :  { %5884 = vmatpush3.bf16.xpose.msra.mxu0 %v1500_v42 }
 0x720   :  { %6262 = vmatprep.subr.msk.bf16.mxu0 %vm977_vm2, %v7687_v7 }
 0x727   :  { %5886 = vmatpush3.bf16.xpose.msra.mxu0 %v1503_v16 }
 0x728   :  { %6263 = vmatprep.subr.msk.bf16.mxu0 %vm977_vm2, %v1462_v37 }
 0x72e   :  { %v1216_v40 = vpop.xlane.xlu0 %1215 }
 0x72f   :  { %5888 = vmatpush3.bf16.xpose.msra.mxu0 %v1506_v36 }
 0x730   :  { %6264 = vmatprep.subr.msk.bf16.mxu0 %vm977_vm2, %v1464_v63 }
 0x732   :  { %v1212_v52 = vpop.xlane.xlu0 %1211 }
 0x733   :  { %6424 = vrcp.f32 %v1212_v52  ;;  %v1214_v8 = vpop.xlane.xlu1 %1213 }
 0x734   :  { %6426 = vrcp.f32 %v1214_v8 }
 0x735   :  { %6428 = vrcp.f32 %v1216_v40 }
 0x736   :  { %v1218_v19 = vpop.xlane.xlu0 %1217 }
 0x737   :  { %5890 = vmatpush3.bf16.xpose.msra.mxu0 %v1509_v60  ;;  %6430 = vrcp.f32 %v1218_v19  ;;  %v1224_v7 = vpop.xlane.xlu1 %1223 }
 0x73a   :  { %v1232_v30 = vpop.xlane.xlu0 %1231 }
 0x73b   :  { %v1220_v23 = vpop.xlane.xlu1 %1219 }
 0x73d   :  { %v6425_v12 = vpop.eup %6424 }
 0x73e   :  { %v6427_v10 = vpop.eup %6426  ;;  %v1228_v14 = vpop.xlane.xlu0 %1227  ;;  %v1255_v29 = vmul.f32 %v6425_v12, %v7691_v25 }
 0x73f   :  { %v6429_v21 = vpop.eup %6428  ;;  %v1226_v32 = vpop.xlane.xlu1 %1225  ;;  %v1256_v22 = vmul.f32 %v6427_v10, %v7693_v43 }
 0x740   :  { %6432 = vrcp.f32 %v1226_v32  ;;  %v1257_v0 = vmul.f32 %v6429_v21, %v7685_v35 }
 0x741   :  { %v6431_v53 = vpop.eup %6430  ;;  %v1269_v48 = vpack.c.bf16 %v1256_v22, %v1255_v29  ;;  %6434 = vrcp.f32 %v1220_v23 }
 0x742   :  { %v1234_v50 = vpop.xlane.xlu0 %1233  ;;  %v1258_v39 = vmul.f32 %v6431_v53, %v7698_v18  ;;  %6436 = vrcp.f32 %v1224_v7 }
 0x743   :  { %v1222_v49 = vpop.xlane.xlu1 %1221  ;;  %5867 = vmatprep.mubr.bf16.mxu0 %v1269_v48 }
 0x744   :  { %6438 = vrcp.f32 %v1222_v49  ;;  %v1270_v2 = vpack.c.bf16 %v1258_v39, %v1257_v0 }
 0x745   :  { %6440 = vrcp.f32 %v1228_v14 }
 0x746   :  { %5868 = vmatmul.mubr.bf16.gmra.mrb[20].mxu0 %v1270_v2  ;;  %v1466_v25 = vpop.permute.xlu0 %1465 }
 0x747   :  { %v1230_v11 = vpop.xlane.xlu1 %1229  ;;  %6265 = vmatprep.subr.msk.bf16.mxu0 %vm977_vm2, %v1466_v25  ;;  %v1512_v43 = vsel %vm977_vm2, %v1466_v25, 0 }
 0x748   :  { %6442 = vrcp.f32 %v1230_v11  ;;  %5892 = vmatpush3.bf16.xpose.msra.mxu0 %v1512_v43 }
 0x749   :  { %6444 = vrcp.f32 %v1234_v50 }
 0x74a   :  { %v1438_v61 = vpop.permute.xlu0 %1437  ;;  %v6433_v35 = vpop.eup %6432  ;;  %6446 = vrcp.f32 %v1232_v30 }
 0x74b   :  { %v1468_v18 = vpop.permute.xlu1 %1467  ;;  %v6435_v4 = vpop.eup %6434  ;;  %v1262_v45 = vmul.f32 %v6433_v35, %v7713_v38 }
 0x74c   :  { %6266 = vmatprep.subr.msk.bf16.mxu0 %vm977_vm2, %v1468_v18  ;;  %v6437_v58 = vpop.eup %6436  ;;  %v1515_v15 = vsel %vm977_vm2, %v1468_v18, 0  ;;  %v1259_v42 = vmul.f32 %v6435_v4, %v7707_v56  ;;  %v5357_v18 = vld [vmem:[%s9811_s5 + $0x90] sm:$0xff] }
 0x74d   :  { %v1261_v36 = vmul.f32 %v6437_v58, %v7700_v13 }
 0x74e   :  { %v6439_v44 = vpop.eup %6438  ;;  %v1442_v31 = vpop.permute.xlu0 %1441 }
 0x74f   :  { %v1440_v57 = vpop.permute.xlu1 %1439  ;;  %v1260_v16 = vmul.f32 %v6439_v44, %v7719_v27  ;;  %v6441_v37 = vpop.eup %6440  ;;  %v1272_v8 = vpack.c.bf16 %v1262_v45, %v1261_v36  ;;  %v5355_v45 = vld [vmem:[%s9811_s5 + $0x80] sm:$0xff] }
 0x750   :  { %5894 = vmatpush3.bf16.xpose.msra.mxu0 %v1515_v15  ;;  %v1263_v38 = vmul.f32 %v6441_v37, %v7711_v17  ;;  %v5358_v37 = vld [vmem:[%s9811_s5 + $0x98] sm:$0xff] }
 0x751   :  { %v1271_v40 = vpack.c.bf16 %v1260_v16, %v1259_v42 }
 0x752   :  { %v6443_v63 = vpop.eup %6442  ;;  %v1446_v52 = vpop.permute.xlu0 %1445 }
 0x753   :  { %v6445_v60 = vpop.eup %6444  ;;  %v1444_v19 = vpop.permute.xlu1 %1443  ;;  %5871 = vmatprep.mubr.bf16.mxu0 %v1271_v40  ;;  %v1264_v7 = vmul.f32 %v6443_v63, %v7723_v55  ;;  %v5362_v40 = vld [vmem:[%s9811_s5 + $0xb8] sm:$0xff] }
 0x754   :  { %5872 = vmatmul.mubr.bf16.gmra.mrb[24].mxu0 %v1272_v8  ;;  %v6447_v30 = vpop.eup %6446  ;;  %v1266_v27 = vmul.f32 %v6445_v60, %v7717_v62  ;;  %v5361_v8 = vld [vmem:[%s9811_s5 + $0xb0] sm:$0xff] }
 0x755   :  { %v1273_v56 = vpack.c.bf16 %v1264_v7, %v1263_v38  ;;  %v1265_v13 = vmul.f32 %v6447_v30, %v7705_v5  ;;  %v5360_v7 = vld [vmem:[%s9811_s5 + $0xa8] sm:$0xff] }
 0x756   :  { %v1450_v23 = vpop.permute.xlu0 %1449 }
 0x757   :  { %v1448_v12 = vpop.permute.xlu1 %1447  ;;  %5875 = vmatprep.mubr.bf16.mxu0 %v1273_v56  ;;  %v1274_v14 = vpack.c.bf16 %v1266_v27, %v1265_v13  ;;  %v5359_v56 = vld [vmem:[%s9811_s5 + $0xa0] sm:$0xff] }
 0x75a   :  { %v1767_v10 = vpop.permute.xlu0 %1766 }
 0x75b   :  { %v1452_v29 = vpop.permute.xlu1 %1451  ;;  %5911 = vmatprep.subr.bf16.mxu0 %v1767_v10  ;;  %6235 = vmatprep.subr.bf16.mxu1 %v1767_v10 }
 0x75c   :  { %5876 = vmatmul.mubr.bf16.gmra.mrb[28].mxu0 %v1274_v14  ;;  %6243 = vmatpush3.bf16.msra.mxu1 %v1767_v10  ;;  %v5365_v14 = vld [vmem:[%s9811_s5 + $0xd0] sm:$0xff] }
 0x75d   :  { %5895 = vmatprep.mubr.msk.bf16.mxu0 %vm977_vm2, %v1438_v61 }
 0x75e   :  { %v1771_v55 = vpop.permute.xlu0 %1770 }
 0x75f   :  { %v1769_v17 = vpop.permute.xlu1 %1768 }
 0x760   :  { %6236 = vmatprep.subr.bf16.mxu1 %v1769_v17 }
 0x761   :  { %6244 = vmatpush3.bf16.msra.mxu1 %v1769_v17 }
 0x762   :  { %6237 = vmatprep.subr.bf16.mxu1 %v1771_v55  ;;  %v1773_v5 = vpop.permute.xlu0 %1772 }
 0x764   :  { %5896 = vmatmul.mubr.msk.bf16.vlgmr.msra.gmra.mrb[32].mxu0 %vm977_vm2, %v1440_v57 }
 0x765   :  { %5912 = vmatpush3.bf16.msra.mxu0 %v1767_v10  ;;  %5899 = vmatprep.mubr.msk.bf16.mxu0 %vm977_vm2, %v1442_v31  ;;  %v5356_v31 = vld [vmem:[%s9811_s5 + $0x88] sm:$0xff] }
 0x766   :  { %5913 = vmatprep.subr.bf16.mxu0 %v1769_v17  ;;  %6245 = vmatpush3.bf16.msra.mxu1 %v1771_v55 }
 0x767   :  { %6238 = vmatprep.subr.bf16.mxu1 %v1773_v5 }
 0x769   :  { %5914 = vmatpush3.bf16.msra.mxu0 %v1769_v17 }
 0x76a   :  { %5915 = vmatprep.subr.bf16.mxu0 %v1771_v55  ;;  %6246 = vmatpush3.bf16.msra.mxu1 %v1773_v5 }
 0x76c   :  { %5900 = vmatmul.mubr.msk.bf16.gmra.mrb[36].mxu0 %vm977_vm2, %v1444_v19 }
 0x76d   :  { %5916 = vmatpush3.bf16.msra.mxu0 %v1771_v55  ;;  %5903 = vmatprep.mubr.msk.bf16.mxu0 %vm977_vm2, %v1446_v52 }
 0x76e   :  { %5917 = vmatprep.subr.bf16.mxu0 %v1773_v5 }
 0x771   :  { %5918 = vmatpush3.bf16.msra.mxu0 %v1773_v5  ;;  %v5364_v5 = vld [vmem:[%s9811_s5 + $0xc8] sm:$0xff] }
 0x774   :  { %5904 = vmatmul.mubr.msk.bf16.gmra.mrb[40].mxu0 %vm977_vm2, %v1448_v12  ;;  %v5366_v12 = vld [vmem:[%s9811_s5 + $0xd8] sm:$0xff] }
 0x775   :  { %5907 = vmatprep.mubr.msk.bf16.mxu0 %vm977_vm2, %v1450_v23 }
 0x77c   :  { %5908 = vmatmul.mubr.msk.bf16.gmra.mrb[44].mxu0 %vm977_vm2, %v1452_v29 }
 0x7e1   :  { %v5865_v62 = vpop.f32.mrb[16].mxu0 }
 0x7e2   :  { %1398 = vst.msk [vmem:[#allocation2 + $0x10] sm:$0xff] %vm977_vm2, %v5865_v62  ;;  %v1333_v21 = vpop.f32.mrb[17].mxu0 }
 0x7e3   :  { %1396 = vst.msk [vmem:[#allocation2] sm:$0xff] %vm977_vm2, %v1333_v21  ;;  %v5866_v32 = vpop.f32.mrb[18].mxu0  ;;  %v5363_v21 = vld [vmem:[%s9811_s5 + $0xc0] sm:$0xff] }
 0x7e4   :  { %1399 = vst.msk [vmem:[#allocation2 + $0x18] sm:$0xff] %vm977_vm2, %v5866_v32  ;;  %v1336_v22 = vpop.f32.mrb[19].mxu0 }
 0x7e5   :  { %1397 = vst.msk [vmem:[#allocation2 + $0x8] sm:$0xff] %vm977_vm2, %v1336_v22 }
 0x819   :  { %v5869_v53 = vpop.f32.mrb[20].mxu0 }
 0x81a   :  { %1402 = vst.msk [vmem:[#allocation2 + $0x30] sm:$0xff] %vm977_vm2, %v5869_v53  ;;  %v1349_v48 = vpop.f32.mrb[21].mxu0 }
 0x81b   :  { %1400 = vst.msk [vmem:[#allocation2 + $0x20] sm:$0xff] %vm977_vm2, %v1349_v48  ;;  %v5870_v50 = vpop.f32.mrb[22].mxu0 }
 0x81c   :  { %1403 = vst.msk [vmem:[#allocation2 + $0x38] sm:$0xff] %vm977_vm2, %v5870_v50  ;;  %v1352_v0 = vpop.f32.mrb[23].mxu0  ;;  %v5369_v50 = vld [vmem:[%s9811_s5 + $0xf0] sm:$0xff] }
 0x81d   :  { %1401 = vst.msk [vmem:[#allocation2 + $0x28] sm:$0xff] %vm977_vm2, %v1352_v0 }
 0x827   :  { %v5873_v39 = vpop.f32.mrb[24].mxu0 }
 0x828   :  { %1406 = vst.msk [vmem:[#allocation2 + $0x50] sm:$0xff] %vm977_vm2, %v5873_v39  ;;  %v1365_v49 = vpop.f32.mrb[25].mxu0 }
 0x829   :  { %1404 = vst.msk [vmem:[#allocation2 + $0x40] sm:$0xff] %vm977_vm2, %v1365_v49  ;;  %v5874_v2 = vpop.f32.mrb[26].mxu0 }
 0x82a   :  { %1407 = vst.msk [vmem:[#allocation2 + $0x58] sm:$0xff] %vm977_vm2, %v5874_v2  ;;  %v1368_v25 = vpop.f32.mrb[27].mxu0  ;;  %v5367_v2 = vld [vmem:[%s9811_s5 + $0xe0] sm:$0xff] }
 0x82b   :  { %1405 = vst.msk [vmem:[#allocation2 + $0x48] sm:$0xff] %vm977_vm2, %v1368_v25 }
 0x82f   :  { %v5877_v11 = vpop.f32.mrb[28].mxu0 }
 0x830   :  { %1410 = vst.msk [vmem:[#allocation2 + $0x70] sm:$0xff] %vm977_vm2, %v5877_v11  ;;  %v1381_v43 = vpop.f32.mrb[29].mxu0  ;;  %v5370_v11 = vld [vmem:[%s9811_s5 + $0xf8] sm:$0xff] }
 0x831   :  { %1408 = vst.msk [vmem:[#allocation2 + $0x60] sm:$0xff] %vm977_vm2, %v1381_v43  ;;  %v5878_v61 = vpop.f32.mrb[30].mxu0 }
 0x832   :  { %1411 = vst.msk [vmem:[#allocation2 + $0x78] sm:$0xff] %vm977_vm2, %v5878_v61  ;;  %v1384_v35 = vpop.f32.mrb[31].mxu0  ;;  %v5368_v61 = vld [vmem:[%s9811_s5 + $0xe8] sm:$0xff] }
 0x833   :  { %1409 = vst.msk [vmem:[#allocation2 + $0x68] sm:$0xff] %vm977_vm2, %v1384_v35 }
 0x837   :  { %v5897_v4 = vpop.f32.mrb[32].mxu0 }
 0x838   :  { %v7817_v58 = vadd.f32 %v5897_v4, %v5357_v18  ;;  %v1551_v44 = vpop.f32.mrb[33].mxu0 }
 0x839   :  { %v5898_v57 = vpop.f32.mrb[34].mxu0  ;;  %v7828_v16 = vadd.f32 %v5355_v45, %v1551_v44 }
 0x83a   :  { %1618 = vmax.xlane.f32.xlu0 %v7817_v58  ;;  %v1554_v15 = vpop.f32.mrb[35].mxu0  ;;  %v7838_v63 = vadd.f32 %v5898_v57, %v5358_v37 }
 0x83b   :  { %v7826_v42 = vadd.f32 %v5356_v31, %v1554_v15 }
 0x83d   :  { %1616 = vmax.xlane.f32.xlu1 %v7826_v42 }
 0x83e   :  { %1614 = vmax.xlane.f32.xlu0 %v7828_v16 }
 0x83f   :  { %v5901_v36 = vpop.f32.mrb[36].mxu0 }
 0x840   :  { %v1567_v52 = vpop.f32.mrb[37].mxu0  ;;  %v7849_v30 = vadd.f32 %v5901_v36, %v5361_v8 }
 0x841   :  { %v5902_v60 = vpop.f32.mrb[38].mxu0  ;;  %v7861_v13 = vadd.f32 %v5359_v56, %v1567_v52 }
 0x842   :  { %v7843_v19 = vadd.f32 %v5902_v60, %v5362_v40  ;;  %1620 = vmax.xlane.f32.xlu0 %v7838_v63  ;;  %v1570_v38 = vpop.f32.mrb[39].mxu0 }
 0x843   :  { %v7855_v23 = vadd.f32 %v5360_v7, %v1570_v38 }
 0x844   :  { %1628 = vmax.xlane.f32.xlu1 %v7843_v19 }
 0x846   :  { %1626 = vmax.xlane.f32.xlu0 %v7849_v30 }
 0x847   :  { %v5905_v27 = vpop.f32.mrb[40].mxu0 }
 0x848   :  { %1624 = vmax.xlane.f32.xlu1 %v7855_v23  ;;  %v1583_v10 = vpop.f32.mrb[41].mxu0  ;;  %v7873_v62 = vadd.f32 %v5905_v27, %v5365_v14 }
 0x849   :  { %v5906_v29 = vpop.f32.mrb[42].mxu0  ;;  %v7882_v53 = vadd.f32 %v5363_v21, %v1583_v10 }
 0x84a   :  { %v7867_v17 = vadd.f32 %v5906_v29, %v5366_v12  ;;  %1622 = vmax.xlane.f32.xlu0 %v7861_v13  ;;  %v1586_v55 = vpop.f32.mrb[43].mxu0 }
 0x84b   :  { %v7879_v32 = vadd.f32 %v5364_v5, %v1586_v55 }
 0x84c   :  { %1636 = vmax.xlane.f32.xlu1 %v7867_v17 }
 0x84e   :  { %1634 = vmax.xlane.f32.xlu0 %v7873_v62 }
 0x84f   :  { %v5909_v22 = vpop.f32.mrb[44].mxu0 }
 0x850   :  { %1632 = vmax.xlane.f32.xlu1 %v7879_v32  ;;  %v1599_v48 = vpop.f32.mrb[45].mxu0  ;;  %v7889_v49 = vadd.f32 %v5909_v22, %v5369_v50 }
 0x851   :  { %v5910_v0 = vpop.f32.mrb[46].mxu0  ;;  %v7895_v25 = vadd.f32 %v5367_v2, %v1599_v48 }
 0x852   :  { %1630 = vmax.xlane.f32.xlu0 %v7882_v53  ;;  %v1602_v39 = vpop.f32.mrb[47].mxu0  ;;  %v7905_v43 = vadd.f32 %v5910_v0, %v5370_v11 }
 0x853   :  { %v7911_v35 = vadd.f32 %v5368_v61, %v1602_v39 }
 0x856   :  { %1642 = vmax.xlane.f32.xlu0 %v7889_v49 }
 0x85a   :  { %1638 = vmax.xlane.f32.xlu0 %v7895_v25 }
 0x861   :  { %1776 = vrot.lane.b32.xlu1 %v7472_v28, %s6804_s4 }
 0x870   :  { %1774 = vrot.lane.b32.xlu0 %v7474_v24, %s6804_s4 }
 0x885   :  { %1644 = vmax.xlane.f32.xlu1 %v7905_v43 }
 0x889   :  { %1640 = vmax.xlane.f32.xlu1 %v7911_v35 }
 0x8c7   :  { %v1619_v28 = vpop.xlane.xlu0 %1618 }
 0x8c8   :  { %v1648_v18 = vsub.f32 %v7817_v58, %v1619_v28 }
 0x8ca   :  { %v1666_v24 = vmul.f32 1.442695, %v1648_v18  ;;  %v1617_v44 = vpop.xlane.xlu1 %1616 }
 0x8cb   :  { %v1615_v4 = vpop.xlane.xlu0 %1614  ;;  %v1647_v57 = vsub.f32 %v7826_v42, %v1617_v44 }
 0x8cc   :  { %6448 = vpow2.f32 %v1666_v24  ;;  %v1646_v31 = vsub.f32 %v7828_v16, %v1615_v4 }
 0x8cd   :  { %v1664_v52 = vmul.f32 1.442695, %v1647_v57 }
 0x8ce   :  { %v1662_v45 = vmul.f32 1.442695, %v1646_v31 }
 0x8cf   :  { %v1621_v15 = vpop.xlane.xlu0 %1620 }
 0x8d0   :  { %6450 = vpow2.f32 %v1662_v45  ;;  %v1649_v37 = vsub.f32 %v7838_v63, %v1621_v15 }
 0x8d1   :  { %v1629_v36 = vpop.xlane.xlu1 %1628 }
 0x8d2   :  { %v1668_v40 = vmul.f32 1.442695, %v1649_v37  ;;  %v1653_v8 = vsub.f32 %v7843_v19, %v1629_v36 }
 0x8d3   :  { %v1627_v60 = vpop.xlane.xlu0 %1626 }
 0x8d4   :  { %6452 = vpow2.f32 %v1668_v40  ;;  %v1652_v58 = vsub.f32 %v7849_v30, %v1627_v60  ;;  %v1676_v56 = vmul.f32 1.442695, %v1653_v8 }
 0x8d5   :  { %v1625_v38 = vpop.xlane.xlu1 %1624  ;;  %6454 = vpow2.f32 %v1664_v52 }
 0x8d6   :  { %v7920_v7 = vpop.eup %6448  ;;  %v1674_v16 = vmul.f32 1.442695, %v1652_v58  ;;  %v1651_v63 = vsub.f32 %v7855_v23, %v1625_v38 }
 0x8d7   :  { %1698 = vadd.xlane.f32.xlu1 %v7920_v7  ;;  %v1623_v42 = vpop.xlane.xlu0 %1622 }
 0x8d8   :  { %6456 = vpow2.f32 %v1674_v16  ;;  %v1650_v27 = vsub.f32 %v7861_v13, %v1623_v42  ;;  %v1672_v10 = vmul.f32 1.442695, %v1651_v63 }
 0x8d9   :  { %6458 = vpow2.f32 %v1676_v56  ;;  %v1637_v23 = vpop.xlane.xlu1 %1636 }
 0x8da   :  { %v7925_v12 = vpop.eup %6450  ;;  %v1670_v19 = vmul.f32 1.442695, %v1650_v27  ;;  %v1657_v61 = vsub.f32 %v7867_v17, %v1637_v23 }
 0x8db   :  { %1694 = vadd.xlane.f32.xlu1 %v7925_v12  ;;  %v1635_v30 = vpop.xlane.xlu0 %1634 }
 0x8dc   :  { %6460 = vpow2.f32 %v1670_v19  ;;  %v1684_v24 = vmul.f32 1.442695, %v1657_v61  ;;  %v1656_v4 = vsub.f32 %v7873_v62, %v1635_v30 }
 0x8dd   :  { %6462 = vpow2.f32 %v1672_v10  ;;  %v1633_v48 = vpop.xlane.xlu1 %1632 }
 0x8de   :  { %v7928_v14 = vpop.eup %6452  ;;  %v1655_v28 = vsub.f32 %v7879_v32, %v1633_v48  ;;  %v1682_v45 = vmul.f32 1.442695, %v1656_v4 }
 0x8df   :  { %1700 = vadd.xlane.f32.xlu1 %v7928_v14  ;;  %v1631_v29 = vpop.xlane.xlu0 %1630  ;;  %v7931_v55 = vpop.eup %6454 }
 0x8e0   :  { %v1654_v11 = vsub.f32 %v7882_v53, %v1631_v29  ;;  %v1680_v44 = vmul.f32 1.442695, %v1655_v28 }
 0x8e1   :  { %v1777_v2 = vpop.permute.xlu1 %1776 }
 0x8e2   :  { %v7933_v5 = vpop.eup %6456  ;;  %v1678_v18 = vmul.f32 1.442695, %v1654_v11 }
 0x8e3   :  { %1696 = vadd.xlane.f32.xlu1 %v7931_v55  ;;  %1706 = vadd.xlane.f32.xlu0 %v7933_v5  ;;  %v1643_v13 = vpop.xlane.xlu0 %1642  ;;  %v7937_v21 = vpop.eup %6458 }
 0x8e4   :  { %6464 = vpow2.f32 %v1678_v18  ;;  %v1660_v17 = vsub.f32 %v7889_v49, %v1643_v13 }
 0x8e5   :  { %6466 = vpow2.f32 %v1684_v24 }
 0x8e6   :  { %v7939_v22 = vpop.eup %6460  ;;  %6468 = vpow2.f32 %v1680_v44  ;;  %v1690_v36 = vmul.f32 1.442695, %v1660_v17 }
 0x8e7   :  { %1708 = vadd.xlane.f32.xlu0 %v7937_v21  ;;  %1702 = vadd.xlane.f32.xlu1 %v7939_v22  ;;  %v1639_v50 = vpop.xlane.xlu0 %1638  ;;  %v7943_v0 = vpop.eup %6462  ;;  %6470 = vpow2.f32 %v1682_v45 }
 0x8eb   :  { %1704 = vadd.xlane.f32.xlu0 %v7943_v0  ;;  %v1775_v39 = vpop.permute.xlu0 %1774 }
 0x8ec   :  { %5919 = vmatprep.subr.bf16.mxu0 %v1775_v39  ;;  %6239 = vmatprep.subr.bf16.mxu1 %v1775_v39 }
 0x8ed   :  { %5920 = vmatpush3.bf16.msra.mxu0 %v1775_v39  ;;  %6247 = vmatpush3.bf16.msra.mxu1 %v1775_v39 }
 0x8ee   :  { %5921 = vmatprep.subr.bf16.mxu0 %v1777_v2  ;;  %6240 = vmatprep.subr.bf16.mxu1 %v1777_v2  ;;  %v7958_v37 = vpop.eup %6464 }
 0x8ef   :  { %v7961_v40 = vpop.eup %6466 }
 0x8f1   :  { %5922 = vmatpush3.bf16.msra.mxu0 %v1777_v2  ;;  %6248 = vmatpush3.bf16.msra.mxu1 %v1777_v2 }
 0x8f8   :  { %1780 = vrot.lane.b32.xlu1 %v7488_v41, %s6804_s4  ;;  %v1658_v41 = vsub.f32 %v7895_v25, %v1639_v50  ;;  %v7963_v25 = vpop.eup %6468 }
 0x8f9   :  { %v7967_v49 = vpop.eup %6470 }
 0x8fa   :  { %v1686_v32 = vmul.f32 1.442695, %v1658_v41 }
 0x901   :  { %1778 = vrot.lane.b32.xlu0 %v7490_v47, %s6804_s4 }
 0x912   :  { %v1645_v31 = vpop.xlane.xlu1 %1644 }
 0x913   :  { %v1661_v47 = vsub.f32 %v7905_v43, %v1645_v31 }
 0x915   :  { %v1692_v62 = vmul.f32 1.442695, %v1661_v47 }
 0x916   :  { %v1641_v57 = vpop.xlane.xlu1 %1640 }
 0x917   :  { %v1659_v53 = vsub.f32 %v7911_v35, %v1641_v57 }
 0x919   :  { %v1688_v15 = vmul.f32 1.442695, %v1659_v53 }
 0x91b   :  { %6472 = vpow2.f32 %v1688_v15 }
 0x91c   :  { %1710 = vadd.xlane.f32.xlu1 %v7958_v37  ;;  %6474 = vpow2.f32 %v1686_v32 }
 0x91d   :  { %6476 = vpow2.f32 %v1692_v62 }
 0x91e   :  { %6478 = vpow2.f32 %v1690_v36 }
 0x920   :  { %1712 = vadd.xlane.f32.xlu0 %v7963_v25  ;;  %1716 = vadd.xlane.f32.xlu1 %v7961_v40 }
 0x924   :  { %1714 = vadd.xlane.f32.xlu0 %v7967_v49 }
 0x925   :  { %v7970_v43 = vpop.eup %6472 }
 0x926   :  { %1720 = vadd.xlane.f32.xlu1 %v7970_v43  ;;  %v7973_v35 = vpop.eup %6474 }
 0x927   :  { %v7976_v52 = vpop.eup %6476 }
 0x928   :  { %1718 = vadd.xlane.f32.xlu0 %v7973_v35  ;;  %v7979_v8 = vpop.eup %6478 }
 0x92a   :  { %1724 = vadd.xlane.f32.xlu1 %v7976_v52 }
 0x92c   :  { %1722 = vadd.xlane.f32.xlu0 %v7979_v8 }
 0x964   :  { %v1699_v60 = vpop.xlane.xlu1 %1698 }
 0x968   :  { %v1695_v58 = vpop.xlane.xlu1 %1694 }
 0x969   :  { %6480 = vrcp.f32 %v1695_v58 }
 0x96c   :  { %v1701_v38 = vpop.xlane.xlu1 %1700 }
 0x970   :  { %v1697_v16 = vpop.xlane.xlu1 %1696  ;;  %v1707_v56 = vpop.xlane.xlu0 %1706 }
 0x971   :  { %6482 = vrcp.f32 %v1697_v16 }
 0x972   :  { %6484 = vrcp.f32 %v1701_v38 }
 0x973   :  { %6486 = vrcp.f32 %v1699_v60  ;;  %v6481_v19 = vpop.eup %6480 }
 0x974   :  { %v1703_v42 = vpop.xlane.xlu1 %1702  ;;  %v1709_v63 = vpop.xlane.xlu0 %1708  ;;  %v1742_v23 = vmul.f32 %v6481_v19, %v7925_v12 }
 0x975   :  { %6488 = vrcp.f32 %v1709_v63 }
 0x976   :  { %6490 = vrcp.f32 %v1703_v42 }
 0x977   :  { %6492 = vrcp.f32 %v1707_v56 }
 0x978   :  { %v1705_v27 = vpop.xlane.xlu0 %1704  ;;  %v1781_v50 = vpop.permute.xlu1 %1780 }
 0x979   :  { %6494 = vrcp.f32 %v1705_v27 }
 0x97b   :  { %v6483_v30 = vpop.eup %6482 }
 0x97c   :  { %v6485_v10 = vpop.eup %6484  ;;  %v1779_v29 = vpop.permute.xlu0 %1778  ;;  %v1743_v13 = vmul.f32 %v6483_v30, %v7931_v55 }
 0x97d   :  { %5923 = vmatprep.subr.bf16.mxu0 %v1779_v29  ;;  %6241 = vmatprep.subr.bf16.mxu1 %v1779_v29  ;;  %v6487_v48 = vpop.eup %6486  ;;  %v1745_v2 = vmul.f32 %v6485_v10, %v7928_v14 }
 0x97e   :  { %5924 = vmatpush3.bf16.msra.mxu0 %v1779_v29  ;;  %6249 = vmatpush3.bf16.msra.mxu1 %v1779_v29  ;;  %v1758_v39 = vpack.c.bf16 %v1743_v13, %v1742_v23  ;;  %v1744_v28 = vmul.f32 %v6487_v48, %v7920_v7 }
 0x97f   :  { %5925 = vmatprep.subr.bf16.mxu0 %v1781_v50  ;;  %6242 = vmatprep.subr.bf16.mxu1 %v1781_v50  ;;  %v6489_v11 = vpop.eup %6488 }
 0x980   :  { %5927 = vmatprep.mubr.bf16.mxu0 %v1758_v39  ;;  %v6491_v61 = vpop.eup %6490  ;;  %v1749_v55 = vmul.f32 %v6489_v11, %v7937_v21  ;;  %v1759_v24 = vpack.c.bf16 %v1745_v2, %v1744_v28 }
 0x981   :  { %v6493_v18 = vpop.eup %6492  ;;  %v1746_v4 = vmul.f32 %v6491_v61, %v7939_v22 }
 0x982   :  { %5926 = vmatpush3.bf16.msra.mxu0 %v1781_v50  ;;  %6250 = vmatpush3.bf16.msra.mxu1 %v1781_v50  ;;  %v1748_v14 = vmul.f32 %v6493_v18, %v7933_v5 }
 0x983   :  { %v6495_v12 = vpop.eup %6494 }
 0x984   :  { %v1747_v44 = vmul.f32 %v6495_v12, %v7943_v0  ;;  %v1761_v45 = vpack.c.bf16 %v1749_v55, %v1748_v14 }
 0x985   :  { %5928 = vmatmul.mubr.bf16.vlgmr.msra.gmra.mrb[48].mxu0 %v1759_v24 }
 0x986   :  { %v1760_v31 = vpack.c.bf16 %v1747_v44, %v1746_v4 }
 0x988   :  { %5931 = vmatprep.mubr.bf16.mxu1 %v1760_v31 }
 0x989   :  { %5932 = vmatmul.mubr.bf16.vlgmr.msra.gmra.mrb[32].mxu1 %v1761_v45 }
 0x9a9   :  { %v1711_v41 = vpop.xlane.xlu1 %1710 }
 0x9aa   :  { %6496 = vrcp.f32 %v1711_v41 }
 0x9ad   :  { %v1717_v7 = vpop.xlane.xlu1 %1716  ;;  %v1713_v57 = vpop.xlane.xlu0 %1712 }
 0x9ae   :  { %6498 = vrcp.f32 %v1713_v57 }
 0x9af   :  { %6500 = vrcp.f32 %v1717_v7 }
 0x9b1   :  { %v1715_v47 = vpop.xlane.xlu0 %1714 }
 0x9b2   :  { %6502 = vrcp.f32 %v1715_v47 }
 0x9b3   :  { %v1721_v21 = vpop.xlane.xlu1 %1720 }
 0x9b4   :  { %6504 = vrcp.f32 %v1721_v21  ;;  %v6497_v0 = vpop.eup %6496 }
 0x9b5   :  { %v1719_v22 = vpop.xlane.xlu0 %1718  ;;  %v1750_v15 = vmul.f32 %v6497_v0, %v7958_v37 }
 0x9b6   :  { %6506 = vrcp.f32 %v1719_v22 }
 0x9b7   :  { %v1725_v53 = vpop.xlane.xlu1 %1724 }
 0x9b8   :  { %6508 = vrcp.f32 %v1725_v53  ;;  %v6499_v5 = vpop.eup %6498 }
 0x9b9   :  { %v1723_v17 = vpop.xlane.xlu0 %1722  ;;  %v6501_v32 = vpop.eup %6500  ;;  %v1751_v62 = vmul.f32 %v6499_v5, %v7963_v25 }
 0x9ba   :  { %6510 = vrcp.f32 %v1723_v17  ;;  %v1753_v38 = vmul.f32 %v6501_v32, %v7961_v40  ;;  %v6294_v40 = vld [vmem:[%s9812_s10] sm:$0xff]  }
 0x9bb   :  { %v1762_v60 = vpack.c.bf16 %v1751_v62, %v1750_v15  ;;  %5943 = vmatprep.subr.bf16.mxu1 %v6294_v40 }
 0x9bc   :  { %v6503_v36 = vpop.eup %6502  ;;  %5944 = vmatpush3.bf16.msra.mxu1 %v6294_v40 }
 0x9bd   :  { %v1752_v58 = vmul.f32 %v6503_v36, %v7967_v49  ;;  %5935 = vmatprep.mubr.bf16.mxu1 %v1762_v60 }
 0x9be   :  { %v6505_v16 = vpop.eup %6504 }
 0x9bf   :  { %v1763_v56 = vpack.c.bf16 %v1753_v38, %v1752_v58  ;;  %v1755_v27 = vmul.f32 %v6505_v16, %v7970_v43  ;;  %v6295_v43 = vld [vmem:[%s9812_s10 + $0x8] sm:$0xff]  }
 0x9c0   :  { %v6507_v42 = vpop.eup %6506  ;;  %5945 = vmatprep.subr.bf16.mxu1 %v6295_v43 }
 0x9c1   :  { %5936 = vmatmul.mubr.bf16.gmra.mrb[36].mxu1 %v1763_v56  ;;  %v1754_v63 = vmul.f32 %v6507_v42, %v7973_v35 }
 0x9c2   :  { %v6509_v19 = vpop.eup %6508  ;;  %5946 = vmatpush3.bf16.msra.mxu1 %v6295_v43 }
 0x9c3   :  { %v1764_v30 = vpack.c.bf16 %v1755_v27, %v1754_v63  ;;  %v1757_v10 = vmul.f32 %v6509_v19, %v7976_v52 }
 0x9c4   :  { %v6511_v37 = vpop.eup %6510 }
 0x9c5   :  { %5939 = vmatprep.mubr.bf16.mxu1 %v1764_v30  ;;  %v1756_v25 = vmul.f32 %v6511_v37, %v7979_v8 }
 0x9c7   :  { %v1765_v49 = vpack.c.bf16 %v1757_v10, %v1756_v25 }
 0x9c9   :  { %5940 = vmatmul.mubr.bf16.gmra.mrb[40].mxu1 %v1765_v49 }
 0xa58   :  { %v5929_v29 = vpop.f32.mrb[48].mxu0 }
 0xa59   :  { %1907 = vrot.lane.b32.xlu1 %v5929_v29, %s6805_s19  ;;  %v1824_v35 = vpop.f32.mrb[49].mxu0 }
 0xa5a   :  { %1903 = vrot.lane.b32.xlu0 %v1824_v35, %s6805_s19  ;;  %v5930_v52 = vpop.f32.mrb[50].mxu0 }
 0xa5b   :  { %v1827_v8 = vpop.f32.mrb[51].mxu0 }
 0xa5c   :  { %v5933_v23 = vpop.f32.mrb[32].mxu1 }
 0xa5d   :  { %v1840_v13 = vpop.f32.mrb[33].mxu1  ;;  %1905 = vrot.lane.b32.xlu1 %v1827_v8, %s6805_s19 }
 0xa5e   :  { %v5934_v48 = vpop.f32.mrb[34].mxu1  ;;  %1911 = vrot.lane.b32.xlu0 %v1840_v13, %s6805_s19 }
 0xa5f   :  { %v1843_v50 = vpop.f32.mrb[35].mxu1 }
 0xa61   :  { %1909 = vrot.lane.b32.xlu1 %v5930_v52, %s6805_s19 }
 0xa62   :  { %1915 = vrot.lane.b32.xlu0 %v5933_v23, %s6805_s19  ;;  %v8047_v23 = vld [vmem:[%s9813_s11] ss:$0 sm:$0xff] }
 0xa65   :  { %1913 = vrot.lane.b32.xlu1 %v1843_v50, %s6805_s19 }
 0xa69   :  { %1917 = vrot.lane.b32.xlu1 %v5934_v48, %s6805_s19 }
 0xa94   :  { %v5937_v39 = vpop.f32.mrb[36].mxu1 }
 0xa95   :  { %v1856_v2 = vpop.f32.mrb[37].mxu1 }
 0xa96   :  { %1919 = vrot.lane.b32.xlu0 %v1856_v2, %s6805_s19  ;;  %v5938_v11 = vpop.f32.mrb[38].mxu1 }
 0xa97   :  { %v1859_v61 = vpop.f32.mrb[39].mxu1 }
 0xa98   :  { %1921 = vrot.lane.b32.xlu1 %v1859_v61, %s6805_s19 }
 0xa9a   :  { %1923 = vrot.lane.b32.xlu0 %v5937_v39, %s6805_s19 }
 0xa9c   :  { %1925 = vrot.lane.b32.xlu1 %v5938_v11, %s6805_s19  ;;  %v5941_v28 = vpop.f32.mrb[40].mxu1 }
 0xa9d   :  { %v1872_v18 = vpop.f32.mrb[41].mxu1 }
 0xa9e   :  { %1927 = vrot.lane.b32.xlu0 %v1872_v18, %s6805_s19  ;;  %v5942_v12 = vpop.f32.mrb[42].mxu1 }
 0xa9f   :  { %v1875_v55 = vpop.f32.mrb[43].mxu1 }
 0xaa0   :  { %1929 = vrot.lane.b32.xlu1 %v1875_v55, %s6805_s19 }
 0xaa2   :  { %1931 = vrot.lane.b32.xlu0 %v5941_v28, %s6805_s19 }
 0xaa4   :  { %1933 = vrot.lane.b32.xlu1 %v5942_v12, %s6805_s19 }
 0xacb   :  { %v1908_v24 = vpop.permute.xlu1 %1907 }
 0xacc   :  { %1954 = vst.msk [vmem:[#allocation2 + $0x10] sm:$0xff] %vm1951_vm3, %v1908_v24  ;;  %v1904_v4 = vpop.permute.xlu0 %1903 }
 0xacd   :  { %1952 = vst.msk [vmem:[#allocation2] sm:$0xff] %vm1951_vm3, %v1904_v4 }
 0xacf   :  { %v1906_v44 = vpop.permute.xlu1 %1905 }
 0xad0   :  { %1953 = vst.msk [vmem:[#allocation2 + $0x8] sm:$0xff] %vm1951_vm3, %v1906_v44  ;;  %v1912_v14 = vpop.permute.xlu0 %1911 }
 0xad1   :  { %1956 = vst.msk [vmem:[#allocation2 + $0x20] sm:$0xff] %vm1951_vm3, %v1912_v14 }
 0xad3   :  { %v1910_v31 = vpop.permute.xlu1 %1909  ;;  %v1970_v22 = vld [vmem:[#allocation2 + $0x10] sm:$0xff] }
 0xad4   :  { %1955 = vst.msk [vmem:[#allocation2 + $0x18] sm:$0xff] %vm1951_vm3, %v1910_v31  ;;  %v1916_v45 = vpop.permute.xlu0 %1915  ;;  %v1968_v7 = vld [vmem:[#allocation2] sm:$0xff] }
 0xad5   :  { %1958 = vst.msk [vmem:[#allocation2 + $0x30] sm:$0xff] %vm1951_vm3, %v1916_v45 }
 0xad7   :  { %v1914_v41 = vpop.permute.xlu1 %1913  ;;  %v1969_v57 = vld [vmem:[#allocation2 + $0x8] sm:$0xff] }
 0xad8   :  { %1957 = vst.msk [vmem:[#allocation2 + $0x28] sm:$0xff] %vm1951_vm3, %v1914_v41  ;;  %v1984_v47 = vpack.c.bf16 %v1969_v57, %v1968_v7  ;;  %v1972_v5 = vld [vmem:[#allocation2 + $0x20] sm:$0xff] }
 0xada   :  { %5947 = vmatprep.mubr.msk.bf16.mxu1 %vm245_vm1, %v1984_v47 }
 0xadb   :  { %v1918_v21 = vpop.permute.xlu1 %1917  ;;  %v1971_v0 = vld [vmem:[#allocation2 + $0x18] sm:$0xff] }
 0xadc   :  { %1959 = vst.msk [vmem:[#allocation2 + $0x38] sm:$0xff] %vm1951_vm3, %v1918_v21  ;;  %v1985_v53 = vpack.c.bf16 %v1971_v0, %v1970_v22  ;;  %v1974_v15 = vld [vmem:[#allocation2 + $0x30] sm:$0xff] }
 0xade   :  { %5948 = vmatmul.mubr.msk.bf16.vlgmr.msra.gmra.mrb[44].mxu1 %vm245_vm1, %v1985_v53 }
 0xadf   :  { %v1973_v17 = vld [vmem:[#allocation2 + $0x28] sm:$0xff] }
 0xae0   :  { %v1986_v32 = vpack.c.bf16 %v1973_v17, %v1972_v5 }
 0xae2   :  { %5951 = vmatprep.mubr.msk.bf16.mxu1 %vm245_vm1, %v1986_v32 }
 0xae3   :  { %v1975_v62 = vld [vmem:[#allocation2 + $0x38] sm:$0xff] }
 0xae4   :  { %v1987_v36 = vpack.c.bf16 %v1975_v62, %v1974_v15 }
 0xae6   :  { %5952 = vmatmul.mubr.msk.bf16.gmra.mrb[48].mxu1 %vm245_vm1, %v1987_v36 }
 0xb08   :  { %v1920_v60 = vpop.permute.xlu0 %1919 }
 0xb09   :  { %1960 = vst.msk [vmem:[#allocation2 + $0x40] sm:$0xff] %vm1951_vm3, %v1920_v60 }
 0xb0a   :  { %v1922_v58 = vpop.permute.xlu1 %1921 }
 0xb0b   :  { %1961 = vst.msk [vmem:[#allocation2 + $0x48] sm:$0xff] %vm1951_vm3, %v1922_v58 }
 0xb0c   :  { %v1924_v38 = vpop.permute.xlu0 %1923 }
 0xb0d   :  { %1962 = vst.msk [vmem:[#allocation2 + $0x50] sm:$0xff] %vm1951_vm3, %v1924_v38 }
 0xb0e   :  { %v1926_v16 = vpop.permute.xlu1 %1925 }
 0xb0f   :  { %1963 = vst.msk [vmem:[#allocation2 + $0x58] sm:$0xff] %vm1951_vm3, %v1926_v16 }
 0xb10   :  { %v1928_v56 = vpop.permute.xlu0 %1927  ;;  %v1976_v63 = vld [vmem:[#allocation2 + $0x40] sm:$0xff] }
 0xb11   :  { %1964 = vst.msk [vmem:[#allocation2 + $0x60] sm:$0xff] %vm1951_vm3, %v1928_v56 }
 0xb12   :  { %v1930_v42 = vpop.permute.xlu1 %1929  ;;  %v1977_v27 = vld [vmem:[#allocation2 + $0x48] sm:$0xff] }
 0xb13   :  { %1965 = vst.msk [vmem:[#allocation2 + $0x68] sm:$0xff] %vm1951_vm3, %v1930_v42  ;;  %v1988_v19 = vpack.c.bf16 %v1977_v27, %v1976_v63 }
 0xb14   :  { %v1932_v30 = vpop.permute.xlu0 %1931  ;;  %v1978_v25 = vld [vmem:[#allocation2 + $0x50] sm:$0xff] }
 0xb15   :  { %1966 = vst.msk [vmem:[#allocation2 + $0x70] sm:$0xff] %vm1951_vm3, %v1932_v30  ;;  %5955 = vmatprep.mubr.msk.bf16.mxu1 %vm245_vm1, %v1988_v19 }
 0xb16   :  { %v1934_v37 = vpop.permute.xlu1 %1933  ;;  %v1979_v10 = vld [vmem:[#allocation2 + $0x58] sm:$0xff] }
 0xb17   :  { %1967 = vst.msk [vmem:[#allocation2 + $0x78] sm:$0xff] %vm1951_vm3, %v1934_v37  ;;  %v1989_v49 = vpack.c.bf16 %v1979_v10, %v1978_v25  ;;  %v9841_v25 = vld [vmem:[#allocation3_spill] sm:$0xff] }
 0xb18   :  { %v1980_v40 = vld [vmem:[#allocation2 + $0x60] sm:$0xff] }
 0xb19   :  { %5956 = vmatmul.mubr.msk.bf16.gmra.mrb[52].mxu1 %vm245_vm1, %v1989_v49 }
 0xb1a   :  { %v1981_v29 = vld [vmem:[#allocation2 + $0x68] sm:$0xff] }
 0xb1b   :  { %v1990_v43 = vpack.c.bf16 %v1981_v29, %v1980_v40  ;;  %v9842_v29 = vld [vmem:[#allocation5_spill] sm:$0xff] }
 0xb1c   :  { %v1982_v35 = vld [vmem:[#allocation2 + $0x70] sm:$0xff] }
 0xb1d   :  { %5959 = vmatprep.mubr.msk.bf16.mxu1 %vm245_vm1, %v1990_v43 }
 0xb1e   :  { %v1983_v52 = vld [vmem:[#allocation2 + $0x78] sm:$0xff] }
 0xb1f   :  { %v1991_v8 = vpack.c.bf16 %v1983_v52, %v1982_v35  ;;  %v9843_v35 = vld [vmem:[#allocation4_spill] sm:$0xff] }
 0xb21   :  { %5960 = vmatmul.mubr.msk.bf16.gmra.mrb[56].mxu1 %vm245_vm1, %v1991_v8 }
 0xbb1   :  { %v5949_v13 = vpop.f32.mrb[44].mxu1 }
 0xbb2   :  { %v2073_v48 = vpop.f32.mrb[45].mxu1  ;;  %v2082_v50 = vadd.f32 %v5949_v13, %v8047_v23  ;;  %v9844_v13 = vld [vmem:[#allocation6_spill] sm:$0xff] }
 0xbb3   :  { %v2074_v39 = vadd.f32 %v8047_v23, %v2073_v48  ;;  %v5950_v2 = vpop.f32.mrb[46].mxu1 }
 0xbb4   :  { %v2076_v11 = vpop.f32.mrb[47].mxu1  ;;  %v8056_v18 = vadd.f32 %v2082_v50, %v7165_v6  ;;  %v2085_v12 = vadd.f32 %v5950_v2, %v8047_v23 }
 0xbb5   :  { %v8052_v61 = vadd.f32 %v2074_v39, %v7152_v20  ;;  %v2077_v28 = vadd.f32 %v8047_v23, %v2076_v11 }
 0xbb6   :  { %v8067_v14 = vadd.f32 %v2085_v12, %v7174_v51 }
 0xbb7   :  { %v8060_v55 = vadd.f32 %v2077_v28, %v7161_v34  ;;  %v2154_v24 = vsel %vm245_vm1, %v8052_v61, 0.0  ;;  %v2160_v34 = vsel %vm245_vm1, %v8056_v18, 0.0 }
 0xbb8   :  { %2155 = vadd.xlane.f32.xlu0 %v2154_v24  ;;  %v2163_v21 = vsel %vm245_vm1, %v8067_v14, 0.0 }
 0xbb9   :  { %v5953_v4 = vpop.f32.mrb[48].mxu1  ;;  %v2157_v44 = vsel %vm245_vm1, %v8060_v55, 0.0 }
 0xbba   :  { %2158 = vadd.xlane.f32.xlu1 %v2157_v44  ;;  %v2089_v20 = vpop.f32.mrb[49].mxu1  ;;  %v2098_v57 = vadd.f32 %v5953_v4, %v8047_v23 }
 0xbbb   :  { %v2090_v6 = vadd.f32 %v8047_v23, %v2089_v20  ;;  %v5954_v31 = vpop.f32.mrb[50].mxu1 }
 0xbbc   :  { %2161 = vadd.xlane.f32.xlu0 %v2160_v34  ;;  %v2092_v45 = vpop.f32.mrb[51].mxu1  ;;  %v2101_v41 = vadd.f32 %v5954_v31, %v8047_v23  ;;  %v8089_v53 = vadd.f32 %v2098_v57, %v7193_v54 }
 0xbbd   :  { %v2093_v7 = vadd.f32 %v8047_v23, %v2092_v45  ;;  %v8076_v47 = vadd.f32 %v2090_v6, %v7182_v46 }
 0xbbe   :  { %v8084_v22 = vadd.f32 %v2101_v41, %v7203_v3  ;;  %v2172_v5 = vsel %vm245_vm1, %v8089_v53, 0.0 }
 0xbbf   :  { %v8079_v51 = vadd.f32 %v2093_v7, %v7189_v59  ;;  %v2166_v46 = vsel %vm245_vm1, %v8076_v47, 0.0 }
 0xbc0   :  { %2164 = vadd.xlane.f32.xlu0 %v2163_v21  ;;  %v2175_v59 = vsel %vm245_vm1, %v8084_v22, 0.0 }
 0xbc1   :  { %v2169_v0 = vsel %vm245_vm1, %v8079_v51, 0.0 }
 0xbc2   :  { %2170 = vadd.xlane.f32.xlu1 %v2169_v0 }
 0xbc4   :  { %2167 = vadd.xlane.f32.xlu0 %v2166_v46 }
 0xbc6   :  { %2176 = vadd.xlane.f32.xlu1 %v2175_v59 }
 0xbc8   :  { %2173 = vadd.xlane.f32.xlu0 %v2172_v5 }
 0xbec   :  { %v5957_v3 = vpop.f32.mrb[52].mxu1 }
 0xbed   :  { %v2105_v17 = vpop.f32.mrb[53].mxu1  ;;  %v2114_v32 = vadd.f32 %v5957_v3, %v8047_v23 }
 0xbee   :  { %v2106_v15 = vadd.f32 %v8047_v23, %v2105_v17  ;;  %v5958_v54 = vpop.f32.mrb[54].mxu1 }
 0xbef   :  { %v2108_v62 = vpop.f32.mrb[55].mxu1  ;;  %v2117_v60 = vadd.f32 %v5958_v54, %v8047_v23  ;;  %v8105_v38 = vadd.f32 %v2114_v32, %v7221_v1 }
 0xbf0   :  { %v8100_v36 = vadd.f32 %v2106_v15, %v7207_v26  ;;  %v2109_v58 = vadd.f32 %v8047_v23, %v2108_v62 }
 0xbf1   :  { %v8113_v42 = vadd.f32 %v2117_v60, %v7231_v9 }
 0xbf2   :  { %v8108_v16 = vadd.f32 %v2109_v58, %v7217_v33  ;;  %v2178_v56 = vsel %vm245_vm1, %v8100_v36, 0.0  ;;  %v2184_v33 = vsel %vm245_vm1, %v8105_v38, 0.0 }
 0xbf3   :  { %2179 = vadd.xlane.f32.xlu0 %v2178_v56  ;;  %v2187_v40 = vsel %vm245_vm1, %v8113_v42, 0.0 }
 0xbf4   :  { %v5961_v63 = vpop.f32.mrb[56].mxu1  ;;  %v2181_v26 = vsel %vm245_vm1, %v8108_v16, 0.0 }
 0xbf5   :  { %2182 = vadd.xlane.f32.xlu1 %v2181_v26  ;;  %v2121_v27 = vpop.f32.mrb[57].mxu1  ;;  %v2130_v19 = vadd.f32 %v5961_v63, %v8047_v23 }
 0xbf6   :  { %v2122_v1 = vadd.f32 %v8047_v23, %v2121_v27  ;;  %v5962_v30 = vpop.f32.mrb[58].mxu1 }
 0xbf7   :  { %2185 = vadd.xlane.f32.xlu0 %v2184_v33  ;;  %v2124_v37 = vpop.f32.mrb[59].mxu1  ;;  %v2133_v9 = vadd.f32 %v5962_v30, %v8047_v23  ;;  %v8129_v43 = vadd.f32 %v2130_v19, %v9842_v29  ;;  %v6297_v29 = vld [vmem:[%s9814_s14 + $0x8] sm:$0xff]  }
 0xbf8   :  { %v8122_v10 = vadd.f32 %v2122_v1, %v9841_v25  ;;  %v2125_v49 = vadd.f32 %v8047_v23, %v2124_v37 }
 0xbf9   :  { %2188 = vadd.xlane.f32.xlu1 %v2187_v40  ;;  %v8137_v48 = vadd.f32 %v2133_v9, %v9844_v13  ;;  %v2196_v50 = vsel %vm245_vm1, %v8129_v43, 0.0  ;;  %v6296_v40 = vld [vmem:[%s9814_s14] sm:$0xff]  }
 0xbfa   :  { %v8132_v52 = vadd.f32 %v2125_v49, %v9843_v35  ;;  %v2190_v8 = vsel %vm245_vm1, %v8122_v10, 0.0  ;;  %5963 = vmatprep.subr.bf16.mxu0 %v6296_v40 }
 0xbfb   :  { %2191 = vadd.xlane.f32.xlu0 %v2190_v8  ;;  %v2199_v39 = vsel %vm245_vm1, %v8137_v48, 0.0  ;;  %5964 = vmatpush3.bf16.msra.mxu0 %v6296_v40 }
 0xbfc   :  { %v2193_v23 = vsel %vm245_vm1, %v8132_v52, 0.0  ;;  %5965 = vmatprep.subr.bf16.mxu0 %v6297_v29 }
 0xbfd   :  { %2194 = vadd.xlane.f32.xlu1 %v2193_v23 }
 0xbff   :  { %2197 = vadd.xlane.f32.xlu0 %v2196_v50  ;;  %5966 = vmatpush3.bf16.msra.mxu0 %v6297_v29 }
 0xc01   :  { %2200 = vadd.xlane.f32.xlu1 %v2199_v39 }
 0xc45   :  { %v2156_v2 = vpop.xlane.xlu0 %2155 }
 0xc46   :  { %v2202_v11 = vmul.f32 0.03125, %v2156_v2 }
 0xc47   :  { %v2159_v28 = vpop.xlane.xlu1 %2158 }
 0xc48   :  { %v8146_v12 = vsub.f32 %v8052_v61, %v2202_v11  ;;  %v2203_v24 = vmul.f32 0.03125, %v2159_v28 }
 0xc49   :  { %v2162_v4 = vpop.xlane.xlu0 %2161 }
 0xc4a   :  { %v8149_v44 = vsub.f32 %v8060_v55, %v2203_v24  ;;  %v2204_v20 = vmul.f32 0.03125, %v2162_v4  ;;  %v2234_v6 = vmul.f32 %v8146_v12, %v8146_v12 }
 0xc4c   :  { %v8154_v31 = vsub.f32 %v8056_v18, %v2204_v20  ;;  %v2250_v34 = vsel %vm245_vm1, %v2234_v6, 0.0  ;;  %v2235_v45 = vmul.f32 %v8149_v44, %v8149_v44 }
 0xc4d   :  { %2251 = vadd.xlane.f32.xlu0 %v2250_v34  ;;  %v2165_v41 = vpop.xlane.xlu0 %2164 }
 0xc4e   :  { %v2205_v7 = vmul.f32 0.03125, %v2165_v41  ;;  %v2253_v57 = vsel %vm245_vm1, %v2235_v45, 0.0  ;;  %v2236_v21 = vmul.f32 %v8154_v31, %v8154_v31 }
 0xc4f   :  { %v2171_v0 = vpop.xlane.xlu1 %2170  ;;  %2254 = vadd.xlane.f32.xlu1 %v2253_v57 }
 0xc50   :  { %v8163_v46 = vsub.f32 %v8067_v14, %v2205_v7  ;;  %v2207_v59 = vmul.f32 0.03125, %v2171_v0  ;;  %v2256_v5 = vsel %vm245_vm1, %v2236_v21, 0.0 }
 0xc51   :  { %2257 = vadd.xlane.f32.xlu0 %v2256_v5  ;;  %v2168_v3 = vpop.xlane.xlu0 %2167 }
 0xc52   :  { %v8167_v17 = vsub.f32 %v8079_v51, %v2207_v59  ;;  %v2206_v32 = vmul.f32 0.03125, %v2168_v3  ;;  %v2237_v15 = vmul.f32 %v8163_v46, %v8163_v46 }
 0xc53   :  { %v2177_v54 = vpop.xlane.xlu1 %2176 }
 0xc54   :  { %v8172_v62 = vsub.f32 %v8076_v47, %v2206_v32  ;;  %v2209_v60 = vmul.f32 0.03125, %v2177_v54  ;;  %v2259_v58 = vsel %vm245_vm1, %v2237_v15, 0.0  ;;  %v2239_v56 = vmul.f32 %v8167_v17, %v8167_v17 }
 0xc55   :  { %2260 = vadd.xlane.f32.xlu1 %v2259_v58  ;;  %v2174_v63 = vpop.xlane.xlu0 %2173 }
 0xc56   :  { %v8178_v26 = vsub.f32 %v8084_v22, %v2209_v60  ;;  %v2208_v27 = vmul.f32 0.03125, %v2174_v63  ;;  %v2238_v19 = vmul.f32 %v8172_v62, %v8172_v62  ;;  %v2265_v30 = vsel %vm245_vm1, %v2239_v56, 0.0 }
 0xc58   :  { %v8183_v1 = vsub.f32 %v8089_v53, %v2208_v27  ;;  %v2262_v33 = vsel %vm245_vm1, %v2238_v19, 0.0  ;;  %v2241_v37 = vmul.f32 %v8178_v26, %v8178_v26 }
 0xc59   :  { %2266 = vadd.xlane.f32.xlu1 %v2265_v30  ;;  %2263 = vadd.xlane.f32.xlu0 %v2262_v33 }
 0xc5a   :  { %v2240_v25 = vmul.f32 %v8183_v1, %v8183_v1  ;;  %v2271_v9 = vsel %vm245_vm1, %v2241_v37, 0.0 }
 0xc5c   :  { %v2268_v49 = vsel %vm245_vm1, %v2240_v25, 0.0 }
 0xc5d   :  { %2272 = vadd.xlane.f32.xlu1 %v2271_v9  ;;  %2269 = vadd.xlane.f32.xlu0 %v2268_v49 }
 0xc80   :  { %v2180_v35 = vpop.xlane.xlu0 %2179 }
 0xc81   :  { %v2210_v8 = vmul.f32 0.03125, %v2180_v35 }
 0xc82   :  { %v2183_v13 = vpop.xlane.xlu1 %2182 }
 0xc83   :  { %v8200_v23 = vsub.f32 %v8100_v36, %v2210_v8  ;;  %v2211_v50 = vmul.f32 0.03125, %v2183_v13 }
 0xc84   :  { %v2186_v39 = vpop.xlane.xlu0 %2185 }
 0xc85   :  { %v8203_v2 = vsub.f32 %v8108_v16, %v2211_v50  ;;  %v2212_v11 = vmul.f32 0.03125, %v2186_v39  ;;  %v2242_v28 = vmul.f32 %v8200_v23, %v8200_v23 }
 0xc86   :  { %v2189_v24 = vpop.xlane.xlu1 %2188 }
 0xc87   :  { %v8208_v4 = vsub.f32 %v8105_v38, %v2212_v11  ;;  %v2213_v20 = vmul.f32 0.03125, %v2189_v24  ;;  %v2274_v6 = vsel %vm245_vm1, %v2242_v28, 0.0  ;;  %v2243_v34 = vmul.f32 %v8203_v2, %v8203_v2 }
 0xc88   :  { %2275 = vadd.xlane.f32.xlu0 %v2274_v6  ;;  %v2192_v45 = vpop.xlane.xlu0 %2191 }
 0xc89   :  { %v8214_v41 = vsub.f32 %v8113_v42, %v2213_v20  ;;  %v2214_v7 = vmul.f32 0.03125, %v2192_v45  ;;  %v2277_v57 = vsel %vm245_vm1, %v2243_v34, 0.0  ;;  %v2244_v21 = vmul.f32 %v8208_v4, %v8208_v4 }
 0xc8a   :  { %v2195_v0 = vpop.xlane.xlu1 %2194  ;;  %2278 = vadd.xlane.f32.xlu1 %v2277_v57 }
 0xc8b   :  { %v8220_v59 = vsub.f32 %v8122_v10, %v2214_v7  ;;  %v2215_v5 = vmul.f32 0.03125, %v2195_v0  ;;  %v2280_v3 = vsel %vm245_vm1, %v2244_v21, 0.0  ;;  %v2245_v32 = vmul.f32 %v8214_v41, %v8214_v41 }
 0xc8c   :  { %2281 = vadd.xlane.f32.xlu0 %v2280_v3  ;;  %v2198_v15 = vpop.xlane.xlu0 %2197  ;;  %v8250_v3 = vld [vmem:[%s9815_s12] ss:$0 sm:$0xff] }
 0xc8d   :  { %v8226_v54 = vsub.f32 %v8132_v52, %v2215_v5  ;;  %v2216_v60 = vmul.f32 0.03125, %v2198_v15  ;;  %v2283_v58 = vsel %vm245_vm1, %v2245_v32, 0.0  ;;  %v2246_v56 = vmul.f32 %v8220_v59, %v8220_v59 }
 0xc8e   :  { %v2201_v63 = vpop.xlane.xlu1 %2200  ;;  %2284 = vadd.xlane.f32.xlu1 %v2283_v58 }
 0xc8f   :  { %v8232_v27 = vsub.f32 %v8129_v43, %v2216_v60  ;;  %v2217_v19 = vmul.f32 0.03125, %v2201_v63  ;;  %v2286_v30 = vsel %vm245_vm1, %v2246_v56, 0.0  ;;  %v2247_v33 = vmul.f32 %v8226_v54, %v8226_v54 }
 0xc90   :  { %2287 = vadd.xlane.f32.xlu0 %v2286_v30 }
 0xc91   :  { %v8238_v37 = vsub.f32 %v8137_v48, %v2217_v19  ;;  %v2289_v25 = vsel %vm245_vm1, %v2247_v33, 0.0  ;;  %v2248_v9 = vmul.f32 %v8232_v27, %v8232_v27 }
 0xc92   :  { %2290 = vadd.xlane.f32.xlu1 %v2289_v25 }
 0xc93   :  { %v2292_v49 = vsel %vm245_vm1, %v2248_v9, 0.0  ;;  %v2249_v40 = vmul.f32 %v8238_v37, %v8238_v37 }
 0xc94   :  { %2293 = vadd.xlane.f32.xlu0 %v2292_v49 }
 0xc95   :  { %v2295_v29 = vsel %vm245_vm1, %v2249_v40, 0.0 }
 0xc96   :  { %2296 = vadd.xlane.f32.xlu1 %v2295_v29  ;;  %v8258_v29 = vld [vmem:[%s9816_s13] ss:$0 sm:$0xff] }
 0xcda   :  { %v2252_v35 = vpop.xlane.xlu0 %2251 }
 0xcdb   :  { %v2298_v8 = vmul.f32 0.03125, %v2252_v35 }
 0xcdc   :  { %v2255_v13 = vpop.xlane.xlu1 %2254 }
 0xcdd   :  { %v2314_v50 = vadd.f32 1e-05, %v2298_v8  ;;  %v2299_v39 = vmul.f32 0.03125, %v2255_v13 }
 0xcde   :  { %v2258_v11 = vpop.xlane.xlu0 %2257 }
 0xcdf   :  { %6512 = vrsqrt.f32 %v2314_v50  ;;  %v2315_v28 = vadd.f32 1e-05, %v2299_v39  ;;  %v2300_v24 = vmul.f32 0.03125, %v2258_v11 }
 0xce1   :  { %6514 = vrsqrt.f32 %v2315_v28  ;;  %v2316_v20 = vadd.f32 1e-05, %v2300_v24 }
 0xce2   :  { %v2261_v6 = vpop.xlane.xlu1 %2260 }
 0xce3   :  { %6516 = vrsqrt.f32 %v2316_v20  ;;  %v2301_v34 = vmul.f32 0.03125, %v2261_v6 }
 0xce5   :  { %v2317_v45 = vadd.f32 1e-05, %v2301_v34 }
 0xce6   :  { %v2267_v7 = vpop.xlane.xlu1 %2266  ;;  %v2264_v57 = vpop.xlane.xlu0 %2263 }
 0xce7   :  { %6518 = vrsqrt.f32 %v2317_v45  ;;  %v2303_v21 = vmul.f32 0.03125, %v2267_v7  ;;  %v2302_v0 = vmul.f32 0.03125, %v2264_v57 }
 0xce9   :  { %v6513_v5 = vpop.eup %6512  ;;  %v2319_v32 = vadd.f32 1e-05, %v2303_v21  ;;  %v2318_v15 = vadd.f32 1e-05, %v2302_v0 }
 0xcea   :  { %v2273_v60 = vpop.xlane.xlu1 %2272  ;;  %v2270_v58 = vpop.xlane.xlu0 %2269  ;;  %v2346_v56 = vmul.f32 %v6513_v5, %v8146_v12 }
 0xceb   :  { %v6515_v63 = vpop.eup %6514  ;;  %6520 = vrsqrt.f32 %v2319_v32  ;;  %v2305_v19 = vmul.f32 0.03125, %v2273_v60  ;;  %v2304_v30 = vmul.f32 0.03125, %v2270_v58 }
 0xcec   :  { %6522 = vrsqrt.f32 %v2318_v15  ;;  %v2347_v33 = vmul.f32 %v6515_v63, %v8149_v44  ;;  %v2368_v25 = vmul.f32 %v8250_v3, %v2346_v56 }
 0xced   :  { %v6517_v9 = vpop.eup %6516  ;;  %v2321_v49 = vadd.f32 1e-05, %v2305_v19  ;;  %v2320_v40 = vadd.f32 1e-05, %v2304_v30 }
 0xcee   :  { %v2348_v35 = vmul.f32 %v6517_v9, %v8154_v31  ;;  %v2369_v12 = vmul.f32 %v8250_v3, %v2347_v33  ;;  %v2390_v8 = vadd.f32 %v8258_v29, %v2368_v25 }
 0xcef   :  { %6524 = vrsqrt.f32 %v2321_v49 }
 0xcf0   :  { %6526 = vrsqrt.f32 %v2320_v40  ;;  %v2391_v44 = vadd.f32 %v8258_v29, %v2369_v12  ;;  %v2370_v50 = vmul.f32 %v8250_v3, %v2348_v35 }
 0xcf1   :  { %v6519_v13 = vpop.eup %6518 }
 0xcf2   :  { %v2349_v39 = vmul.f32 %v6519_v13, %v8163_v46  ;;  %v2406_v11 = vpack.c.bf16 %v2391_v44, %v2390_v8  ;;  %v2392_v20 = vadd.f32 %v8258_v29, %v2370_v50 }
 0xcf4   :  { %v2371_v28 = vmul.f32 %v8250_v3, %v2349_v39  ;;  %5967 = vmatprep.mubr.msk.bf16.mxu0 %vm245_vm1, %v2406_v11 }
 0xcf5   :  { %v6521_v24 = vpop.eup %6520 }
 0xcf6   :  { %v6523_v31 = vpop.eup %6522  ;;  %v2393_v6 = vadd.f32 %v8258_v29, %v2371_v28  ;;  %v2351_v34 = vmul.f32 %v6521_v24, %v8167_v17 }
 0xcf7   :  { %v2350_v45 = vmul.f32 %v6523_v31, %v8172_v62 }
 0xcf8   :  { %v2407_v7 = vpack.c.bf16 %v2393_v6, %v2392_v20  ;;  %v2373_v57 = vmul.f32 %v8250_v3, %v2351_v34 }
 0xcf9   :  { %v6525_v21 = vpop.eup %6524  ;;  %v2372_v46 = vmul.f32 %v8250_v3, %v2350_v45 }
 0xcfa   :  { %v6527_v0 = vpop.eup %6526  ;;  %5968 = vmatmul.mubr.msk.bf16.vlgmr.msra.gmra.mrb[52].mxu0 %vm245_vm1, %v2407_v7  ;;  %v2395_v5 = vadd.f32 %v8258_v29, %v2373_v57  ;;  %v2353_v32 = vmul.f32 %v6525_v21, %v8178_v26 }
 0xcfb   :  { %v2394_v15 = vadd.f32 %v8258_v29, %v2372_v46  ;;  %v2352_v60 = vmul.f32 %v6527_v0, %v8183_v1 }
 0xcfc   :  { %v2375_v17 = vmul.f32 %v8250_v3, %v2353_v32 }
 0xcfd   :  { %v2408_v62 = vpack.c.bf16 %v2395_v5, %v2394_v15  ;;  %v2374_v58 = vmul.f32 %v8250_v3, %v2352_v60 }
 0xcfe   :  { %v2397_v56 = vadd.f32 %v8258_v29, %v2375_v17 }
 0xcff   :  { %5971 = vmatprep.mubr.msk.bf16.mxu0 %vm245_vm1, %v2408_v62  ;;  %v2396_v63 = vadd.f32 %v8258_v29, %v2374_v58 }
 0xd01   :  { %v2409_v19 = vpack.c.bf16 %v2397_v56, %v2396_v63 }
 0xd03   :  { %5972 = vmatmul.mubr.msk.bf16.gmra.mrb[56].mxu0 %vm245_vm1, %v2409_v19 }
 0xd15   :  { %v2276_v30 = vpop.xlane.xlu0 %2275 }
 0xd16   :  { %v2306_v26 = vmul.f32 0.03125, %v2276_v30 }
 0xd17   :  { %v2279_v33 = vpop.xlane.xlu1 %2278 }
 0xd18   :  { %v2322_v25 = vadd.f32 1e-05, %v2306_v26  ;;  %v2307_v9 = vmul.f32 0.03125, %v2279_v33 }
 0xd19   :  { %v2282_v1 = vpop.xlane.xlu0 %2281 }
 0xd1a   :  { %6528 = vrsqrt.f32 %v2322_v25  ;;  %v2323_v49 = vadd.f32 1e-05, %v2307_v9  ;;  %v2308_v40 = vmul.f32 0.03125, %v2282_v1 }
 0xd1b   :  { %v2285_v35 = vpop.xlane.xlu1 %2284 }
 0xd1c   :  { %6530 = vrsqrt.f32 %v2323_v49  ;;  %v2324_v12 = vadd.f32 1e-05, %v2308_v40  ;;  %v2309_v8 = vmul.f32 0.03125, %v2285_v35 }
 0xd1d   :  { %v2288_v44 = vpop.xlane.xlu0 %2287 }
 0xd1e   :  { %6532 = vrsqrt.f32 %v2324_v12  ;;  %v2325_v13 = vadd.f32 1e-05, %v2309_v8  ;;  %v2310_v50 = vmul.f32 0.03125, %v2288_v44 }
 0xd1f   :  { %v2291_v39 = vpop.xlane.xlu1 %2290 }
 0xd20   :  { %6534 = vrsqrt.f32 %v2325_v13  ;;  %v2326_v11 = vadd.f32 1e-05, %v2310_v50  ;;  %v2311_v28 = vmul.f32 0.03125, %v2291_v39 }
 0xd21   :  { %v2294_v24 = vpop.xlane.xlu0 %2293 }
 0xd22   :  { %6536 = vrsqrt.f32 %v2326_v11  ;;  %v2327_v31 = vadd.f32 1e-05, %v2311_v28  ;;  %v2312_v20 = vmul.f32 0.03125, %v2294_v24  ;;  %v6298_v11 = vld [vmem:[%s9817_s16] sm:$0xff]   ;;  %v6303_v24 = vld [vmem:[%s9817_s16 + $0x28] sm:$0xff]  }
 0xd23   :  { %v2297_v6 = vpop.xlane.xlu1 %2296  ;;  %5983 = vmatprep.subr.bf16.mxu1 %v6298_v11  ;;  %v6302_v28 = vld [vmem:[%s9817_s16 + $0x20] sm:$0xff]  }
 0xd24   :  { %v6529_v34 = vpop.eup %6528  ;;  %6538 = vrsqrt.f32 %v2327_v31  ;;  %v2328_v45 = vadd.f32 1e-05, %v2312_v20  ;;  %v2313_v7 = vmul.f32 0.03125, %v2297_v6  ;;  %5984 = vmatpush3.bf16.msra.mxu1 %v6298_v11  ;;  %v6304_v31 = vld [vmem:[%s9817_s16 + $0x30] sm:$0xff]   ;;  %v6305_v20 = vld [vmem:[%s9817_s16 + $0x38] sm:$0xff]  }
 0xd25   :  { %v2354_v57 = vmul.f32 %v6529_v34, %v8200_v23  ;;  %v8340_v6 = vld [vmem:[%s9818_s15] ss:$0 sm:$0xff] }
 0xd26   :  { %v6531_v21 = vpop.eup %6530  ;;  %6540 = vrsqrt.f32 %v2328_v45  ;;  %v2329_v46 = vadd.f32 1e-05, %v2313_v7 }
 0xd27   :  { %v2355_v0 = vmul.f32 %v6531_v21, %v8203_v2  ;;  %v2376_v5 = vmul.f32 %v8250_v3, %v2354_v57 }
 0xd28   :  { %v6533_v32 = vpop.eup %6532  ;;  %6542 = vrsqrt.f32 %v2329_v46 }
 0xd29   :  { %v2377_v15 = vmul.f32 %v8250_v3, %v2355_v0  ;;  %v2356_v60 = vmul.f32 %v6533_v32, %v8208_v4  ;;  %v2398_v62 = vadd.f32 %v8258_v29, %v2376_v5 }
 0xd2a   :  { %v6535_v17 = vpop.eup %6534 }
 0xd2b   :  { %v2399_v58 = vadd.f32 %v8258_v29, %v2377_v15  ;;  %v2357_v23 = vmul.f32 %v6535_v17, %v8214_v41  ;;  %v2378_v56 = vmul.f32 %v8250_v3, %v2356_v60 }
 0xd2c   :  { %v6537_v63 = vpop.eup %6536 }
 0xd2d   :  { %v2410_v19 = vpack.c.bf16 %v2399_v58, %v2398_v62  ;;  %v2379_v2 = vmul.f32 %v8250_v3, %v2357_v23  ;;  %v2358_v30 = vmul.f32 %v6537_v63, %v8220_v59  ;;  %v2400_v4 = vadd.f32 %v8258_v29, %v2378_v56 }
 0xd2e   :  { %v6539_v26 = vpop.eup %6538 }
 0xd2f   :  { %5975 = vmatprep.mubr.msk.bf16.mxu0 %vm245_vm1, %v2410_v19  ;;  %v2401_v33 = vadd.f32 %v8258_v29, %v2379_v2  ;;  %v2359_v25 = vmul.f32 %v6539_v26, %v8226_v54  ;;  %v2380_v9 = vmul.f32 %v8250_v3, %v2358_v30 }
 0xd30   :  { %v6541_v41 = vpop.eup %6540 }
 0xd31   :  { %v2411_v1 = vpack.c.bf16 %v2401_v33, %v2400_v4  ;;  %v2381_v49 = vmul.f32 %v8250_v3, %v2359_v25  ;;  %v2360_v40 = vmul.f32 %v6541_v41, %v8232_v27  ;;  %v2402_v59 = vadd.f32 %v8258_v29, %v2380_v9 }
 0xd32   :  { %v6543_v35 = vpop.eup %6542 }
 0xd33   :  { %5976 = vmatmul.mubr.msk.bf16.gmra.mrb[60].mxu0 %vm245_vm1, %v2411_v1  ;;  %v2403_v12 = vadd.f32 %v8258_v29, %v2381_v49  ;;  %v2361_v8 = vmul.f32 %v6543_v35, %v8238_v37  ;;  %v2382_v44 = vmul.f32 %v8250_v3, %v2360_v40  ;;  %v6299_v37 = vld [vmem:[%s9817_s16 + $0x8] sm:$0xff]  }
 0xd34   :  { %5985 = vmatprep.subr.bf16.mxu1 %v6299_v37 }
 0xd35   :  { %v2412_v54 = vpack.c.bf16 %v2403_v12, %v2402_v59  ;;  %v2383_v13 = vmul.f32 %v8250_v3, %v2361_v8  ;;  %v2404_v50 = vadd.f32 %v8258_v29, %v2382_v44  ;;  %5986 = vmatpush3.bf16.msra.mxu1 %v6299_v37  ;;  %v6300_v3 = vld [vmem:[%s9817_s16 + $0x10] sm:$0xff]  }
 0xd36   :  { %5987 = vmatprep.subr.bf16.mxu1 %v6300_v3 }
 0xd37   :  { %5979 = vmatprep.mubr.msk.bf16.mxu0 %vm245_vm1, %v2412_v54  ;;  %v2405_v27 = vadd.f32 %v8258_v29, %v2383_v13  ;;  %v6301_v29 = vld [vmem:[%s9817_s16 + $0x18] sm:$0xff]  }
 0xd39   :  { %v2413_v39 = vpack.c.bf16 %v2405_v27, %v2404_v50  ;;  %5988 = vmatpush3.bf16.msra.mxu1 %v6300_v3 }
 0xd3a   :  { %5989 = vmatprep.subr.bf16.mxu1 %v6301_v29 }
 0xd3b   :  { %5980 = vmatmul.mubr.msk.bf16.gmra.mrb[64].mxu0 %vm245_vm1, %v2413_v39 }
 0xd3d   :  { %5990 = vmatpush3.bf16.msra.mxu1 %v6301_v29 }
 0xd3e   :  { %5991 = vmatprep.subr.bf16.mxu1 %v6302_v28 }
 0xd41   :  { %5992 = vmatpush3.bf16.msra.mxu1 %v6302_v28 }
 0xd42   :  { %5993 = vmatprep.subr.bf16.mxu1 %v6303_v24 }
 0xd45   :  { %5994 = vmatpush3.bf16.msra.mxu1 %v6303_v24 }
 0xd46   :  { %5995 = vmatprep.subr.bf16.mxu1 %v6304_v31 }
 0xd49   :  { %5996 = vmatpush3.bf16.msra.mxu1 %v6304_v31 }
 0xd4a   :  { %5997 = vmatprep.subr.bf16.mxu1 %v6305_v20 }
 0xd4d   :  { %5998 = vmatpush3.bf16.msra.mxu1 %v6305_v20 }
 0xdcd   :  { %v5969_v34 = vpop.f32.mrb[52].mxu0 }
 0xdce   :  { %v8343_v45 = vadd.f32 %v5969_v34, %v8340_v6  ;;  %v2495_v7 = vpop.f32.mrb[53].mxu0 }
 0xdcf   :  { %v8346_v57 = vadd.f32 %v8340_v6, %v2495_v7  ;;  %v5970_v21 = vpop.f32.mrb[54].mxu0 }
 0xdd0   :  { %v2576_v46 = vmul.f32 0.044715, %v8343_v45  ;;  %v8350_v0 = vadd.f32 %v5970_v21, %v8340_v6  ;;  %v2498_v5 = vpop.f32.mrb[55].mxu0 }
 0xdd1   :  { %v2574_v32 = vmul.f32 0.044715, %v8346_v57  ;;  %v8354_v15 = vadd.f32 %v8340_v6, %v2498_v5 }
 0xdd2   :  { %v2592_v60 = vmul.f32 %v2576_v46, %v8343_v45  ;;  %v2577_v17 = vmul.f32 0.044715, %v8350_v0 }
 0xdd3   :  { %v2590_v62 = vmul.f32 %v2574_v32, %v8346_v57  ;;  %v2575_v58 = vmul.f32 0.044715, %v8354_v15 }
 0xdd4   :  { %v2608_v23 = vmul.f32 %v2592_v60, %v8343_v45  ;;  %v2593_v56 = vmul.f32 %v2577_v17, %v8350_v0 }
 0xdd5   :  { %v2606_v63 = vmul.f32 %v2590_v62, %v8346_v57  ;;  %v2591_v19 = vmul.f32 %v2575_v58, %v8354_v15 }
 0xdd6   :  { %v2624_v2 = vadd.f32 %v2608_v23, %v8343_v45  ;;  %v2609_v30 = vmul.f32 %v2593_v56, %v8350_v0  ;;  %v5973_v26 = vpop.f32.mrb[56].mxu0 }
 0xdd7   :  { %v2607_v4 = vmul.f32 %v2591_v19, %v8354_v15  ;;  %v8368_v33 = vadd.f32 %v5973_v26, %v8340_v6  ;;  %v2511_v25 = vpop.f32.mrb[57].mxu0  ;;  %v2622_v9 = vadd.f32 %v2606_v63, %v8346_v57  ;;  %v2561_v26 = vmul.f32 0.5, %v8350_v0 }
 0xdd8   :  { %v2640_v41 = vmul.f32 0.7978846, %v2624_v2  ;;  %v2625_v1 = vadd.f32 %v2609_v30, %v8350_v0  ;;  %v8373_v49 = vadd.f32 %v8340_v6, %v2511_v25  ;;  %v5974_v40 = vpop.f32.mrb[58].mxu0  ;;  %v2560_v30 = vmul.f32 0.5, %v8343_v45 }
 0xdd9   :  { %v2580_v35 = vmul.f32 0.044715, %v8368_v33  ;;  %v2523_v59 = vadd.f32 %v5974_v40, %v8340_v6  ;;  %v2514_v12 = vpop.f32.mrb[59].mxu0  ;;  %v2623_v8 = vadd.f32 %v2607_v4, %v8354_v15  ;;  %v2638_v44 = vmul.f32 0.7978846, %v2622_v9 }
 0xdda   :  { %6544 = vtanh.f32 %v2640_v41  ;;  %v2641_v54 = vmul.f32 0.7978846, %v2625_v1  ;;  %v2578_v13 = vmul.f32 0.044715, %v8373_v49  ;;  %v2515_v50 = vadd.f32 %v8340_v6, %v2514_v12 }
 0xddb   :  { %v2596_v27 = vmul.f32 %v2580_v35, %v8368_v33  ;;  %v2581_v39 = vmul.f32 0.044715, %v2523_v59  ;;  %v2639_v11 = vmul.f32 0.7978846, %v2623_v8  ;;  %6546 = vtanh.f32 %v2638_v44 }
 0xddc   :  { %6548 = vtanh.f32 %v2641_v54  ;;  %v2594_v37 = vmul.f32 %v2578_v13, %v8373_v49  ;;  %v2579_v3 = vmul.f32 0.044715, %v2515_v50  ;;  %v2558_v25 = vmul.f32 0.5, %v8346_v57 }
 0xddd   :  { %v2612_v29 = vmul.f32 %v2596_v27, %v8368_v33  ;;  %v2597_v28 = vmul.f32 %v2581_v39, %v2523_v59  ;;  %6550 = vtanh.f32 %v2639_v11  ;;  %v2559_v9 = vmul.f32 0.5, %v8354_v15 }
 0xdde   :  { %v2610_v24 = vmul.f32 %v2594_v37, %v8373_v49  ;;  %v2595_v31 = vmul.f32 %v2579_v3, %v2515_v50  ;;  %v2564_v11 = vmul.f32 0.5, %v8368_v33  ;;  %v2565_v57 = vmul.f32 0.5, %v2523_v59 }
 0xddf   :  { %v2613_v20 = vmul.f32 %v2597_v28, %v2523_v59  ;;  %v2628_v34 = vadd.f32 %v2612_v29, %v8368_v33  ;;  %v2562_v15 = vmul.f32 0.5, %v8373_v49  ;;  %v2563_v3 = vmul.f32 0.5, %v2515_v50 }
 0xde0   :  { %v2611_v7 = vmul.f32 %v2595_v31, %v2515_v50  ;;  %v2626_v21 = vadd.f32 %v2610_v24, %v8373_v49 }
 0xde1   :  { %v2629_v46 = vadd.f32 %v2613_v20, %v2523_v59  ;;  %v2644_v5 = vmul.f32 0.7978846, %v2628_v34 }
 0xde2   :  { %v2627_v32 = vadd.f32 %v2611_v7, %v2515_v50  ;;  %v2642_v60 = vmul.f32 0.7978846, %v2626_v21 }
 0xde3   :  { %v2645_v17 = vmul.f32 0.7978846, %v2629_v46  ;;  %6552 = vtanh.f32 %v2644_v5 }
 0xde4   :  { %v6545_v62 = vpop.eup %6544  ;;  %v2643_v58 = vmul.f32 0.7978846, %v2627_v32  ;;  %6554 = vtanh.f32 %v2642_v60 }
 0xde5   :  { %v6547_v23 = vpop.eup %6546  ;;  %v2672_v56 = vadd.f32 1.0, %v6545_v62  ;;  %6556 = vtanh.f32 %v2645_v17 }
 0xde6   :  { %v6549_v63 = vpop.eup %6548  ;;  %v2670_v19 = vadd.f32 1.0, %v6547_v23  ;;  %6558 = vtanh.f32 %v2643_v58 }
 0xde7   :  { %v6551_v2 = vpop.eup %6550  ;;  %v2673_v4 = vadd.f32 1.0, %v6549_v63  ;;  %v2688_v1 = vmul.f32 %v2672_v56, %v2560_v30 }
 0xde8   :  { %v2671_v41 = vadd.f32 1.0, %v6551_v2  ;;  %v2686_v35 = vmul.f32 %v2670_v19, %v2558_v25 }
 0xde9   :  { %v2689_v40 = vmul.f32 %v2673_v4, %v2561_v26 }
 0xdea   :  { %v2687_v12 = vmul.f32 %v2671_v41, %v2559_v9 }
 0xdeb   :  { %v2703_v8 = vpack.c.bf16 %v2689_v40, %v2688_v1 }
 0xdec   :  { %v2702_v44 = vpack.c.bf16 %v2687_v12, %v2686_v35 }
 0xded   :  { %v6553_v54 = vpop.eup %6552 }
 0xdee   :  { %v6555_v13 = vpop.eup %6554  ;;  %5999 = vmatprep.mubr.bf16.mxu1 %v2702_v44  ;;  %v2676_v27 = vadd.f32 1.0, %v6553_v54 }
 0xdef   :  { %v6557_v39 = vpop.eup %6556  ;;  %6000 = vmatmul.mubr.bf16.vlgmr.msra.gmra.mrb[60].mxu1 %v2703_v8  ;;  %v2674_v45 = vadd.f32 1.0, %v6555_v13 }
 0xdf0   :  { %v6559_v0 = vpop.eup %6558  ;;  %v2677_v37 = vadd.f32 1.0, %v6557_v39  ;;  %v2692_v28 = vmul.f32 %v2676_v27, %v2564_v11 }
 0xdf1   :  { %v2675_v29 = vadd.f32 1.0, %v6559_v0  ;;  %v2690_v31 = vmul.f32 %v2674_v45, %v2562_v15 }
 0xdf2   :  { %v2693_v24 = vmul.f32 %v2677_v37, %v2565_v57 }
 0xdf3   :  { %v2691_v20 = vmul.f32 %v2675_v29, %v2563_v3 }
 0xdf4   :  { %v2705_v34 = vpack.c.bf16 %v2693_v24, %v2692_v28 }
 0xdf5   :  { %v2704_v7 = vpack.c.bf16 %v2691_v20, %v2690_v31 }
 0xdf7   :  { %6003 = vmatprep.mubr.bf16.mxu1 %v2704_v7 }
 0xdf8   :  { %6004 = vmatmul.mubr.bf16.gmra.mrb[64].mxu1 %v2705_v34 }
 0xe06   :  { %v5977_v21 = vpop.f32.mrb[60].mxu0 }
 0xe07   :  { %v8393_v46 = vadd.f32 %v5977_v21, %v8340_v6  ;;  %v2527_v5 = vpop.f32.mrb[61].mxu0 }
 0xe08   :  { %v8396_v33 = vadd.f32 %v8340_v6, %v2527_v5  ;;  %v5978_v59 = vpop.f32.mrb[62].mxu0 }
 0xe09   :  { %v2584_v49 = vmul.f32 0.044715, %v8393_v46  ;;  %v8400_v50 = vadd.f32 %v5978_v59, %v8340_v6  ;;  %v2530_v32 = vpop.f32.mrb[63].mxu0 }
 0xe0a   :  { %v2582_v60 = vmul.f32 0.044715, %v8396_v33  ;;  %v8404_v17 = vadd.f32 %v8340_v6, %v2530_v32 }
 0xe0b   :  { %v2600_v62 = vmul.f32 %v2584_v49, %v8393_v46  ;;  %v2585_v58 = vmul.f32 0.044715, %v8400_v50 }
 0xe0c   :  { %v2598_v23 = vmul.f32 %v2582_v60, %v8396_v33  ;;  %v2583_v56 = vmul.f32 0.044715, %v8404_v17 }
 0xe0d   :  { %v2616_v63 = vmul.f32 %v2600_v62, %v8393_v46  ;;  %v2601_v19 = vmul.f32 %v2585_v58, %v8400_v50 }
 0xe0e   :  { %v2614_v2 = vmul.f32 %v2598_v23, %v8396_v33  ;;  %v2599_v30 = vmul.f32 %v2583_v56, %v8404_v17  ;;  %v5981_v26 = vpop.f32.mrb[64].mxu0 }
 0xe0f   :  { %v2617_v4 = vmul.f32 %v2601_v19, %v8400_v50  ;;  %v8416_v25 = vadd.f32 %v5981_v26, %v8340_v6  ;;  %v2543_v9 = vpop.f32.mrb[65].mxu0  ;;  %v2632_v41 = vadd.f32 %v2616_v63, %v8393_v46  ;;  %v2568_v26 = vmul.f32 0.5, %v8393_v46 }
 0xe10   :  { %v2615_v1 = vmul.f32 %v2599_v30, %v8404_v17  ;;  %v8421_v40 = vadd.f32 %v8340_v6, %v2543_v9  ;;  %v5982_v35 = vpop.f32.mrb[66].mxu0  ;;  %v2630_v12 = vadd.f32 %v2614_v2, %v8396_v33 }
 0xe11   :  { %v2588_v8 = vmul.f32 0.044715, %v8416_v25  ;;  %v2555_v44 = vadd.f32 %v5982_v35, %v8340_v6  ;;  %v2546_v54 = vpop.f32.mrb[67].mxu0  ;;  %v2633_v13 = vadd.f32 %v2617_v4, %v8400_v50  ;;  %v2648_v27 = vmul.f32 0.7978846, %v2632_v41 }
 0xe12   :  { %v2586_v39 = vmul.f32 0.044715, %v8421_v40  ;;  %v2547_v45 = vadd.f32 %v8340_v6, %v2546_v54  ;;  %v2631_v0 = vadd.f32 %v2615_v1, %v8404_v17  ;;  %v2646_v11 = vmul.f32 0.7978846, %v2630_v12 }
 0xe13   :  { %v2604_v57 = vmul.f32 %v2588_v8, %v8416_v25  ;;  %v2589_v37 = vmul.f32 0.044715, %v2555_v44  ;;  %v2649_v15 = vmul.f32 0.7978846, %v2633_v13  ;;  %6560 = vtanh.f32 %v2648_v27 }
 0xe14   :  { %v2602_v3 = vmul.f32 %v2586_v39, %v8421_v40  ;;  %v2587_v29 = vmul.f32 0.044715, %v2547_v45  ;;  %v2647_v28 = vmul.f32 0.7978846, %v2631_v0  ;;  %6562 = vtanh.f32 %v2646_v11 }
 0xe15   :  { %v2620_v24 = vmul.f32 %v2604_v57, %v8416_v25  ;;  %v2605_v31 = vmul.f32 %v2589_v37, %v2555_v44  ;;  %6564 = vtanh.f32 %v2649_v15  ;;  %v2569_v4 = vmul.f32 0.5, %v8400_v50 }
 0xe16   :  { %v2618_v20 = vmul.f32 %v2602_v3, %v8421_v40  ;;  %v2603_v6 = vmul.f32 %v2587_v29, %v2547_v45  ;;  %6566 = vtanh.f32 %v2647_v28  ;;  %v2566_v41 = vmul.f32 0.5, %v8396_v33 }
 0xe17   :  { %v2621_v34 = vmul.f32 %v2605_v31, %v2555_v44  ;;  %v2636_v7 = vadd.f32 %v2620_v24, %v8416_v25  ;;  %v2567_v1 = vmul.f32 0.5, %v8404_v17  ;;  %v2572_v50 = vmul.f32 0.5, %v8416_v25 }
 0xe18   :  { %v2619_v21 = vmul.f32 %v2603_v6, %v2547_v45  ;;  %v2634_v5 = vadd.f32 %v2618_v20, %v8421_v40  ;;  %v2573_v33 = vmul.f32 0.5, %v2555_v44  ;;  %v2570_v17 = vmul.f32 0.5, %v8421_v40 }
 0xe19   :  { %v2637_v59 = vadd.f32 %v2621_v34, %v2555_v44  ;;  %v2652_v49 = vmul.f32 0.7978846, %v2636_v7  ;;  %v2571_v29 = vmul.f32 0.5, %v2547_v45 }
 0xe1a   :  { %v2635_v32 = vadd.f32 %v2619_v21, %v2547_v45  ;;  %v2650_v60 = vmul.f32 0.7978846, %v2634_v5  ;;  %v8445_v21 = vld [vmem:[%s9819_s17] ss:$0 sm:$0xff] }
 0xe1b   :  { %v2653_v62 = vmul.f32 0.7978846, %v2637_v59  ;;  %6568 = vtanh.f32 %v2652_v49 }
 0xe1c   :  { %v2651_v58 = vmul.f32 0.7978846, %v2635_v32  ;;  %6570 = vtanh.f32 %v2650_v60 }
 0xe1d   :  { %v6561_v23 = vpop.eup %6560  ;;  %6572 = vtanh.f32 %v2653_v62 }
 0xe1e   :  { %v6563_v56 = vpop.eup %6562  ;;  %v2680_v63 = vadd.f32 1.0, %v6561_v23  ;;  %6574 = vtanh.f32 %v2651_v58 }
 0xe1f   :  { %v6565_v19 = vpop.eup %6564  ;;  %v2678_v2 = vadd.f32 1.0, %v6563_v56 }
 0xe20   :  { %v6567_v30 = vpop.eup %6566  ;;  %v2681_v9 = vadd.f32 1.0, %v6565_v19  ;;  %v2696_v12 = vmul.f32 %v2680_v63, %v2568_v26 }
 0xe21   :  { %v2679_v35 = vadd.f32 1.0, %v6567_v30  ;;  %v2694_v54 = vmul.f32 %v2678_v2, %v2566_v41 }
 0xe22   :  { %v2697_v8 = vmul.f32 %v2681_v9, %v2569_v4 }
 0xe23   :  { %v2695_v13 = vmul.f32 %v2679_v35, %v2567_v1 }
 0xe24   :  { %v2707_v27 = vpack.c.bf16 %v2697_v8, %v2696_v12 }
 0xe25   :  { %v6569_v39 = vpop.eup %6568  ;;  %v2706_v0 = vpack.c.bf16 %v2695_v13, %v2694_v54 }
 0xe26   :  { %v6571_v11 = vpop.eup %6570  ;;  %v2684_v57 = vadd.f32 1.0, %v6569_v39 }
 0xe27   :  { %v6573_v37 = vpop.eup %6572  ;;  %6007 = vmatprep.mubr.bf16.mxu1 %v2706_v0  ;;  %v2682_v46 = vadd.f32 1.0, %v6571_v11 }
 0xe28   :  { %v6575_v15 = vpop.eup %6574  ;;  %6008 = vmatmul.mubr.bf16.gmra.mrb[68].mxu1 %v2707_v27  ;;  %v2685_v3 = vadd.f32 1.0, %v6573_v37  ;;  %v2700_v24 = vmul.f32 %v2684_v57, %v2572_v50 }
 0xe29   :  { %v2683_v28 = vadd.f32 1.0, %v6575_v15  ;;  %v2698_v20 = vmul.f32 %v2682_v46, %v2570_v17 }
 0xe2a   :  { %v2701_v31 = vmul.f32 %v2685_v3, %v2573_v33 }
 0xe2b   :  { %v2699_v6 = vmul.f32 %v2683_v28, %v2571_v29 }
 0xe2c   :  { %v2709_v34 = vpack.c.bf16 %v2701_v31, %v2700_v24 }
 0xe2d   :  { %v2708_v7 = vpack.c.bf16 %v2699_v6, %v2698_v20 }
 0xe2f   :  { %6011 = vmatprep.mubr.bf16.mxu1 %v2708_v7 }
 0xe30   :  { %6012 = vmatmul.mubr.bf16.gmra.mrb[72].mxu1 %v2709_v34 }
 0xec2   :  { %v6001_v25 = vpop.f32.mrb[60].mxu1 }
 0xec3   :  { %v2815_v44 = vpop.f32.mrb[61].mxu1  ;;  %v2824_v5 = vadd.f32 %v6001_v25, %v8445_v21 }
 0xec4   :  { %v2816_v40 = vadd.f32 %v8445_v21, %v2815_v44  ;;  %v6002_v45 = vpop.f32.mrb[62].mxu1 }
 0xec5   :  { %v2818_v59 = vpop.f32.mrb[63].mxu1  ;;  %v2827_v32 = vadd.f32 %v6002_v45, %v8445_v21  ;;  %v8455_v62 = vadd.f32 %v2824_v5, %v8056_v18 }
 0xec6   :  { %v8450_v49 = vadd.f32 %v2816_v40, %v8052_v61  ;;  %v2819_v60 = vadd.f32 %v8445_v21, %v2818_v59 }
 0xec7   :  { %v8463_v56 = vadd.f32 %v2827_v32, %v8067_v14  ;;  %v2904_v18 = vsel %vm245_vm1, %v8455_v62, 0.0 }
 0xec8   :  { %v8458_v58 = vadd.f32 %v2819_v60, %v8060_v55  ;;  %v2898_v23 = vsel %vm245_vm1, %v8450_v49, 0.0 }
 0xec9   :  { %2899 = vadd.xlane.f32.xlu0 %v2898_v23  ;;  %v2907_v14 = vsel %vm245_vm1, %v8463_v56, 0.0 }
 0xeca   :  { %v2901_v61 = vsel %vm245_vm1, %v8458_v58, 0.0 }
 0xecb   :  { %v6005_v63 = vpop.f32.mrb[64].mxu1  ;;  %2902 = vadd.xlane.f32.xlu1 %v2901_v61 }
 0xecc   :  { %v2831_v19 = vpop.f32.mrb[65].mxu1  ;;  %v2840_v2 = vadd.f32 %v6005_v63, %v8445_v21 }
 0xecd   :  { %v2832_v55 = vadd.f32 %v8445_v21, %v2831_v19  ;;  %v6006_v30 = vpop.f32.mrb[66].mxu1  ;;  %2905 = vadd.xlane.f32.xlu0 %v2904_v18 }
 0xece   :  { %v2834_v26 = vpop.f32.mrb[67].mxu1  ;;  %v2843_v9 = vadd.f32 %v6006_v30, %v8445_v21  ;;  %v8479_v1 = vadd.f32 %v2840_v2, %v8089_v53 }
 0xecf   :  { %v8474_v4 = vadd.f32 %v2832_v55, %v8076_v47  ;;  %v2835_v41 = vadd.f32 %v8445_v21, %v2834_v26  ;;  %2908 = vadd.xlane.f32.xlu1 %v2907_v14 }
 0xed0   :  { %v8487_v8 = vadd.f32 %v2843_v9, %v8084_v22  ;;  %v2916_v54 = vsel %vm245_vm1, %v8479_v1, 0.0 }
 0xed1   :  { %v8482_v35 = vadd.f32 %v2835_v41, %v8079_v51  ;;  %v2910_v12 = vsel %vm245_vm1, %v8474_v4, 0.0 }
 0xed2   :  { %2911 = vadd.xlane.f32.xlu0 %v2910_v12  ;;  %v2919_v53 = vsel %vm245_vm1, %v8487_v8, 0.0 }
 0xed3   :  { %v2913_v47 = vsel %vm245_vm1, %v8482_v35, 0.0 }
 0xed4   :  { %2914 = vadd.xlane.f32.xlu1 %v2913_v47 }
 0xed6   :  { %2917 = vadd.xlane.f32.xlu0 %v2916_v54 }
 0xed8   :  { %2920 = vadd.xlane.f32.xlu1 %v2919_v53 }
 0xefb   :  { %v6009_v51 = vpop.f32.mrb[68].mxu1 }
 0xefc   :  { %v2847_v13 = vpop.f32.mrb[69].mxu1  ;;  %v2856_v27 = vadd.f32 %v6009_v51, %v8445_v21 }
 0xefd   :  { %v2848_v39 = vadd.f32 %v8445_v21, %v2847_v13  ;;  %v6010_v22 = vpop.f32.mrb[70].mxu1 }
 0xefe   :  { %v2850_v0 = vpop.f32.mrb[71].mxu1  ;;  %v2859_v57 = vadd.f32 %v6010_v22, %v8445_v21  ;;  %v8503_v46 = vadd.f32 %v2856_v27, %v8105_v38 }
 0xeff   :  { %v8498_v11 = vadd.f32 %v2848_v39, %v8100_v36  ;;  %v2851_v37 = vadd.f32 %v8445_v21, %v2850_v0 }
 0xf00   :  { %v8511_v33 = vadd.f32 %v2859_v57, %v8113_v42 }
 0xf01   :  { %v8506_v15 = vadd.f32 %v2851_v37, %v8108_v16  ;;  %v2922_v50 = vsel %vm245_vm1, %v8498_v11, 0.0  ;;  %v2928_v16 = vsel %vm245_vm1, %v8503_v46, 0.0 }
 0xf02   :  { %2923 = vadd.xlane.f32.xlu0 %v2922_v50  ;;  %v2931_v6 = vsel %vm245_vm1, %v8511_v33, 0.0 }
 0xf03   :  { %v6013_v3 = vpop.f32.mrb[72].mxu1  ;;  %v2925_v36 = vsel %vm245_vm1, %v8506_v15, 0.0 }
 0xf04   :  { %2926 = vadd.xlane.f32.xlu1 %v2925_v36  ;;  %v2863_v17 = vpop.f32.mrb[73].mxu1  ;;  %v2872_v29 = vadd.f32 %v6013_v3, %v8445_v21 }
 0xf05   :  { %v2864_v38 = vadd.f32 %v8445_v21, %v2863_v17  ;;  %v6014_v28 = vpop.f32.mrb[74].mxu1 }
 0xf06   :  { %2929 = vadd.xlane.f32.xlu0 %v2928_v16  ;;  %v2866_v24 = vpop.f32.mrb[75].mxu1  ;;  %v2875_v42 = vadd.f32 %v6014_v28, %v8445_v21  ;;  %v8527_v34 = vadd.f32 %v2872_v29, %v8129_v43 }
 0xf07   :  { %v8520_v31 = vadd.f32 %v2864_v38, %v8122_v10  ;;  %v2867_v20 = vadd.f32 %v8445_v21, %v2866_v24  ;;  %v6306_v24 = vld [vmem:[%s9807_s8 + $0x10] sm:$0xff]  }
 0xf08   :  { %2932 = vadd.xlane.f32.xlu1 %v2931_v6  ;;  %9846 = vst [vmem:[#allocation5_spill] sm:$0xff] %v8527_v34  ;;  %v8535_v10 = vadd.f32 %v2875_v42, %v8137_v48  ;;  %v2940_v44 = vsel %vm245_vm1, %v8527_v34, 0.0  ;;  %v6307_v42 = vld [vmem:[%s9807_s8 + $0x18] sm:$0xff]   ;;  %6015 = vmatprep.subr.bf16.mxu0 %v6306_v24 }
 0xf09   :  { %9845 = vst [vmem:[#allocation3_spill] sm:$0xff] %v8520_v31  ;;  %v8530_v7 = vadd.f32 %v2867_v20, %v8132_v52  ;;  %v2934_v25 = vsel %vm245_vm1, %v8520_v31, 0.0  ;;  %6016 = vmatpush3.bf16.msra.mxu0 %v6306_v24 }
 0xf0a   :  { %2935 = vadd.xlane.f32.xlu0 %v2934_v25  ;;  %9848 = vst [vmem:[#allocation6_spill] sm:$0xff] %v8535_v10  ;;  %v2943_v43 = vsel %vm245_vm1, %v8535_v10, 0.0  ;;  %6017 = vmatprep.subr.bf16.mxu0 %v6307_v42 }
 0xf0b   :  { %9847 = vst [vmem:[#allocation4_spill] sm:$0xff] %v8530_v7  ;;  %v2937_v21 = vsel %vm245_vm1, %v8530_v7, 0.0 }
 0xf0c   :  { %2938 = vadd.xlane.f32.xlu1 %v2937_v21 }
 0xf0d   :  { %6018 = vmatpush3.bf16.msra.mxu0 %v6307_v42 }
 0xf0e   :  { %2941 = vadd.xlane.f32.xlu0 %v2940_v44 }
 0xf10   :  { %2944 = vadd.xlane.f32.xlu1 %v2943_v43 }
 0xf56   :  { %v2900_v52 = vpop.xlane.xlu0 %2899 }
 0xf57   :  { %v2946_v5 = vmul.f32 0.03125, %v2900_v52 }
 0xf58   :  { %v2903_v40 = vpop.xlane.xlu1 %2902 }
 0xf59   :  { %v8544_v45 = vsub.f32 %v8450_v49, %v2946_v5  ;;  %v2947_v48 = vmul.f32 0.03125, %v2903_v40 }
 0xf5a   :  { %v2906_v59 = vpop.xlane.xlu0 %2905 }
 0xf5b   :  { %v8547_v32 = vsub.f32 %v8458_v58, %v2947_v48  ;;  %v2948_v60 = vmul.f32 0.03125, %v2906_v59  ;;  %v2978_v23 = vmul.f32 %v8544_v45, %v8544_v45 }
 0xf5c   :  { %v2909_v61 = vpop.xlane.xlu1 %2908 }
 0xf5d   :  { %v8552_v63 = vsub.f32 %v8455_v62, %v2948_v60  ;;  %v2949_v19 = vmul.f32 0.03125, %v2909_v61  ;;  %v2994_v18 = vsel %vm245_vm1, %v2978_v23, 0.0  ;;  %v2979_v2 = vmul.f32 %v8547_v32, %v8547_v32 }
 0xf5e   :  { %2995 = vadd.xlane.f32.xlu0 %v2994_v18 }
 0xf5f   :  { %v8558_v55 = vsub.f32 %v8463_v56, %v2949_v19  ;;  %v2912_v30 = vpop.xlane.xlu0 %2911  ;;  %v2997_v26 = vsel %vm245_vm1, %v2979_v2, 0.0  ;;  %v2980_v14 = vmul.f32 %v8552_v63, %v8552_v63 }
 0xf60   :  { %v2950_v9 = vmul.f32 0.03125, %v2912_v30  ;;  %2998 = vadd.xlane.f32.xlu1 %v2997_v26 }
 0xf61   :  { %v2915_v41 = vpop.xlane.xlu1 %2914  ;;  %v3000_v12 = vsel %vm245_vm1, %v2980_v14, 0.0  ;;  %v2981_v47 = vmul.f32 %v8558_v55, %v8558_v55 }
 0xf62   :  { %v8567_v54 = vsub.f32 %v8474_v4, %v2950_v9  ;;  %v2951_v53 = vmul.f32 0.03125, %v2915_v41  ;;  %3001 = vadd.xlane.f32.xlu0 %v3000_v12 }
 0xf63   :  { %v2918_v51 = vpop.xlane.xlu0 %2917  ;;  %v3003_v13 = vsel %vm245_vm1, %v2981_v47, 0.0 }
 0xf64   :  { %v8571_v27 = vsub.f32 %v8482_v35, %v2951_v53  ;;  %v2952_v39 = vmul.f32 0.03125, %v2918_v51  ;;  %3004 = vadd.xlane.f32.xlu1 %v3003_v13  ;;  %v2982_v22 = vmul.f32 %v8567_v54, %v8567_v54 }
 0xf65   :  { %v2921_v0 = vpop.xlane.xlu1 %2920 }
 0xf66   :  { %v8576_v57 = vsub.f32 %v8479_v1, %v2952_v39  ;;  %v2953_v37 = vmul.f32 0.03125, %v2921_v0  ;;  %v3006_v50 = vsel %vm245_vm1, %v2982_v22, 0.0  ;;  %v2983_v3 = vmul.f32 %v8571_v27, %v8571_v27 }
 0xf67   :  { %3007 = vadd.xlane.f32.xlu0 %v3006_v50 }
 0xf68   :  { %v8582_v36 = vsub.f32 %v8487_v8, %v2953_v37  ;;  %v3009_v17 = vsel %vm245_vm1, %v2983_v3, 0.0  ;;  %v2984_v29 = vmul.f32 %v8576_v57, %v8576_v57 }
 0xf69   :  { %3010 = vadd.xlane.f32.xlu1 %v3009_v17 }
 0xf6a   :  { %v3012_v38 = vsel %vm245_vm1, %v2984_v29, 0.0  ;;  %v2985_v28 = vmul.f32 %v8582_v36, %v8582_v36 }
 0xf6b   :  { %3013 = vadd.xlane.f32.xlu0 %v3012_v38 }
 0xf6c   :  { %v3015_v16 = vsel %vm245_vm1, %v2985_v28, 0.0 }
 0xf6d   :  { %3016 = vadd.xlane.f32.xlu1 %v3015_v16 }
 0xf8f   :  { %v2924_v20 = vpop.xlane.xlu0 %2923 }
 0xf90   :  { %v2954_v6 = vmul.f32 0.03125, %v2924_v20 }
 0xf91   :  { %v2927_v25 = vpop.xlane.xlu1 %2926 }
 0xf92   :  { %v8598_v21 = vsub.f32 %v8498_v11, %v2954_v6  ;;  %v2955_v44 = vmul.f32 0.03125, %v2927_v25 }
 0xf93   :  { %v2930_v43 = vpop.xlane.xlu0 %2929 }
 0xf94   :  { %v8601_v52 = vsub.f32 %v8506_v15, %v2955_v44  ;;  %v2956_v5 = vmul.f32 0.03125, %v2930_v43  ;;  %v2986_v40 = vmul.f32 %v8598_v21, %v8598_v21 }
 0xf95   :  { %v2933_v48 = vpop.xlane.xlu1 %2932 }
 0xf96   :  { %v8606_v59 = vsub.f32 %v8503_v46, %v2956_v5  ;;  %v2957_v60 = vmul.f32 0.03125, %v2933_v48  ;;  %v3018_v23 = vsel %vm245_vm1, %v2986_v40, 0.0  ;;  %v2987_v61 = vmul.f32 %v8601_v52, %v8601_v52 }
 0xf97   :  { %3019 = vadd.xlane.f32.xlu0 %v3018_v23  ;;  %v2936_v19 = vpop.xlane.xlu0 %2935 }
 0xf98   :  { %v8612_v18 = vsub.f32 %v8511_v33, %v2957_v60  ;;  %v2958_v2 = vmul.f32 0.03125, %v2936_v19  ;;  %v3021_v30 = vsel %vm245_vm1, %v2987_v61, 0.0  ;;  %v2988_v26 = vmul.f32 %v8606_v59, %v8606_v59 }
 0xf99   :  { %3022 = vadd.xlane.f32.xlu1 %v3021_v30  ;;  %v2939_v14 = vpop.xlane.xlu1 %2938 }
 0xf9a   :  { %v8618_v9 = vsub.f32 %v8520_v31, %v2958_v2  ;;  %v2959_v41 = vmul.f32 0.03125, %v2939_v14  ;;  %v3024_v12 = vsel %vm245_vm1, %v2988_v26, 0.0  ;;  %v2989_v47 = vmul.f32 %v8612_v18, %v8612_v18 }
 0xf9b   :  { %3025 = vadd.xlane.f32.xlu0 %v3024_v12  ;;  %v2942_v53 = vpop.xlane.xlu0 %2941 }
 0xf9c   :  { %v8624_v51 = vsub.f32 %v8530_v7, %v2959_v41  ;;  %v2960_v13 = vmul.f32 0.03125, %v2942_v53  ;;  %v3027_v39 = vsel %vm245_vm1, %v2989_v47, 0.0  ;;  %v2990_v22 = vmul.f32 %v8618_v9, %v8618_v9 }
 0xf9d   :  { %3028 = vadd.xlane.f32.xlu1 %v3027_v39  ;;  %v2945_v0 = vpop.xlane.xlu1 %2944  ;;  %v8648_v39 = vld [vmem:[%s9808_s6 + $0x1] ss:$0 sm:$0xff] }
 0xf9e   :  { %v8630_v37 = vsub.f32 %v8527_v34, %v2960_v13  ;;  %v2961_v50 = vmul.f32 0.03125, %v2945_v0  ;;  %v3030_v3 = vsel %vm245_vm1, %v2990_v22, 0.0  ;;  %v2991_v17 = vmul.f32 %v8624_v51, %v8624_v51 }
 0xf9f   :  { %3031 = vadd.xlane.f32.xlu0 %v3030_v3 }
 0xfa0   :  { %v8636_v29 = vsub.f32 %v8535_v10, %v2961_v50  ;;  %v3033_v38 = vsel %vm245_vm1, %v2991_v17, 0.0  ;;  %v2992_v28 = vmul.f32 %v8630_v37, %v8630_v37 }
 0xfa1   :  { %3034 = vadd.xlane.f32.xlu1 %v3033_v38 }
 0xfa2   :  { %v3036_v16 = vsel %vm245_vm1, %v2992_v28, 0.0  ;;  %v2993_v24 = vmul.f32 %v8636_v29, %v8636_v29 }
 0xfa3   :  { %3037 = vadd.xlane.f32.xlu0 %v3036_v16 }
 0xfa4   :  { %v3039_v42 = vsel %vm245_vm1, %v2993_v24, 0.0 }
 0xfa5   :  { %3040 = vadd.xlane.f32.xlu1 %v3039_v42  ;;  %v8656_v42 = vld [vmem:[%s9809_s7 + $0x1] ss:$0 sm:$0xff] }
 0xfeb   :  { %v2996_v20 = vpop.xlane.xlu0 %2995 }
 0xfec   :  { %v3042_v6 = vmul.f32 0.03125, %v2996_v20 }
 0xfed   :  { %v2999_v25 = vpop.xlane.xlu1 %2998 }
 0xfee   :  { %v3058_v44 = vadd.f32 1e-05, %v3042_v6  ;;  %v3043_v43 = vmul.f32 0.03125, %v2999_v25 }
 0xfef   :  { %v3002_v5 = vpop.xlane.xlu0 %3001 }
 0xff0   :  { %6576 = vrsqrt.f32 %v3058_v44  ;;  %v3059_v40 = vadd.f32 1e-05, %v3043_v43  ;;  %v3044_v48 = vmul.f32 0.03125, %v3002_v5 }
 0xff1   :  { %v3005_v60 = vpop.xlane.xlu1 %3004 }
 0xff2   :  { %6578 = vrsqrt.f32 %v3059_v40  ;;  %v3060_v23 = vadd.f32 1e-05, %v3044_v48  ;;  %v3045_v61 = vmul.f32 0.03125, %v3005_v60 }
 0xff4   :  { %6580 = vrsqrt.f32 %v3060_v23  ;;  %v3061_v19 = vadd.f32 1e-05, %v3045_v61  ;;  %v3008_v2 = vpop.xlane.xlu0 %3007 }
 0xff5   :  { %v3046_v30 = vmul.f32 0.03125, %v3008_v2 }
 0xff6   :  { %6582 = vrsqrt.f32 %v3061_v19  ;;  %v3011_v26 = vpop.xlane.xlu1 %3010 }
 0xff7   :  { %v3062_v14 = vadd.f32 1e-05, %v3046_v30  ;;  %v3047_v41 = vmul.f32 0.03125, %v3011_v26 }
 0xff8   :  { %v3014_v12 = vpop.xlane.xlu0 %3013 }
 0xff9   :  { %6584 = vrsqrt.f32 %v3062_v14  ;;  %v3063_v47 = vadd.f32 1e-05, %v3047_v41  ;;  %v3048_v53 = vmul.f32 0.03125, %v3014_v12 }
 0xffa   :  { %v6577_v13 = vpop.eup %6576  ;;  %v3017_v22 = vpop.xlane.xlu1 %3016 }
 0xffb   :  { %6586 = vrsqrt.f32 %v3063_v47  ;;  %v3064_v0 = vadd.f32 1e-05, %v3048_v53  ;;  %v3049_v50 = vmul.f32 0.03125, %v3017_v22  ;;  %v3090_v3 = vmul.f32 %v6577_v13, %v8544_v45 }
 0xffc   :  { %v6579_v17 = vpop.eup %6578 }
 0xffd   :  { %6588 = vrsqrt.f32 %v3064_v0  ;;  %v3065_v38 = vadd.f32 1e-05, %v3049_v50  ;;  %v3091_v28 = vmul.f32 %v6579_v17, %v8547_v32  ;;  %v3112_v16 = vmul.f32 %v8648_v39, %v3090_v3 }
 0xffe   :  { %v6581_v24 = vpop.eup %6580 }
 0xfff   :  { %v3092_v20 = vmul.f32 %v6581_v24, %v8552_v63  ;;  %6590 = vrsqrt.f32 %v3065_v38  ;;  %v3113_v6 = vmul.f32 %v8648_v39, %v3091_v28  ;;  %v3134_v32 = vadd.f32 %v8656_v42, %v3112_v16 }
0x1000   :  { %v6583_v25 = vpop.eup %6582 }
0x1001   :  { %v3114_v45 = vmul.f32 %v8648_v39, %v3092_v20  ;;  %v3093_v44 = vmul.f32 %v6583_v25, %v8558_v55  ;;  %v3135_v43 = vadd.f32 %v8656_v42, %v3113_v6 }
0x1003   :  { %v6585_v5 = vpop.eup %6584  ;;  %v3115_v40 = vmul.f32 %v8648_v39, %v3093_v44  ;;  %v3150_v48 = vpack.c.bf16 %v3135_v43, %v3134_v32  ;;  %v3136_v63 = vadd.f32 %v8656_v42, %v3114_v45 }
0x1004   :  { %v3094_v60 = vmul.f32 %v6585_v5, %v8567_v54 }
0x1005   :  { %v6587_v23 = vpop.eup %6586  ;;  %v3137_v61 = vadd.f32 %v8656_v42, %v3115_v40  ;;  %6019 = vmatprep.mubr.msk.bf16.mxu0 %vm245_vm1, %v3150_v48 }
0x1006   :  { %v3095_v19 = vmul.f32 %v6587_v23, %v8571_v27  ;;  %v3116_v55 = vmul.f32 %v8648_v39, %v3094_v60 }
0x1007   :  { %v6589_v2 = vpop.eup %6588  ;;  %v3151_v30 = vpack.c.bf16 %v3137_v61, %v3136_v63 }
0x1008   :  { %v3117_v26 = vmul.f32 %v8648_v39, %v3095_v19  ;;  %v3096_v14 = vmul.f32 %v6589_v2, %v8576_v57  ;;  %v3138_v54 = vadd.f32 %v8656_v42, %v3116_v55 }
0x1009   :  { %v6591_v41 = vpop.eup %6590  ;;  %6020 = vmatmul.mubr.msk.bf16.vlgmr.msra.gmra.mrb[68].mxu0 %vm245_vm1, %v3151_v30 }
0x100a   :  { %v3139_v12 = vadd.f32 %v8656_v42, %v3117_v26  ;;  %v3097_v47 = vmul.f32 %v6591_v41, %v8582_v36  ;;  %v3118_v53 = vmul.f32 %v8648_v39, %v3096_v14 }
0x100c   :  { %v3152_v27 = vpack.c.bf16 %v3139_v12, %v3138_v54  ;;  %v3119_v13 = vmul.f32 %v8648_v39, %v3097_v47  ;;  %v3140_v22 = vadd.f32 %v8656_v42, %v3118_v53 }
0x100e   :  { %6023 = vmatprep.mubr.msk.bf16.mxu0 %vm245_vm1, %v3152_v27  ;;  %v3141_v57 = vadd.f32 %v8656_v42, %v3119_v13 }
0x1010   :  { %v3153_v0 = vpack.c.bf16 %v3141_v57, %v3140_v22 }
0x1012   :  { %6024 = vmatmul.mubr.msk.bf16.gmra.mrb[72].mxu0 %vm245_vm1, %v3153_v0 }
0x1024   :  { %v3020_v50 = vpop.xlane.xlu0 %3019 }
0x1025   :  { %v3050_v3 = vmul.f32 0.03125, %v3020_v50 }
0x1026   :  { %v3023_v17 = vpop.xlane.xlu1 %3022 }
0x1027   :  { %v3066_v38 = vadd.f32 1e-05, %v3050_v3  ;;  %v3051_v28 = vmul.f32 0.03125, %v3023_v17 }
0x1028   :  { %v3026_v36 = vpop.xlane.xlu0 %3025 }
0x1029   :  { %6592 = vrsqrt.f32 %v3066_v38  ;;  %v3067_v16 = vadd.f32 1e-05, %v3051_v28  ;;  %v3052_v24 = vmul.f32 0.03125, %v3026_v36 }
0x102a   :  { %v3029_v20 = vpop.xlane.xlu1 %3028 }
0x102b   :  { %6594 = vrsqrt.f32 %v3067_v16  ;;  %v3068_v6 = vadd.f32 1e-05, %v3052_v24  ;;  %v3053_v25 = vmul.f32 0.03125, %v3029_v20 }
0x102c   :  { %v3032_v45 = vpop.xlane.xlu0 %3031 }
0x102d   :  { %6596 = vrsqrt.f32 %v3068_v6  ;;  %v3069_v44 = vadd.f32 1e-05, %v3053_v25  ;;  %v3054_v32 = vmul.f32 0.03125, %v3032_v45 }
0x102e   :  { %v3035_v43 = vpop.xlane.xlu1 %3034 }
0x102f   :  { %6598 = vrsqrt.f32 %v3069_v44  ;;  %v3070_v5 = vadd.f32 1e-05, %v3054_v32  ;;  %v3055_v40 = vmul.f32 0.03125, %v3035_v43 }
0x1030   :  { %v3038_v48 = vpop.xlane.xlu0 %3037 }
0x1031   :  { %6600 = vrsqrt.f32 %v3070_v5  ;;  %v3071_v60 = vadd.f32 1e-05, %v3055_v40  ;;  %v3056_v23 = vmul.f32 0.03125, %v3038_v48  ;;  %v8714_v5 = vld [vmem:[%s9810_s9 + $0x1] ss:$0 sm:$0xff] }
0x1032   :  { %v3041_v63 = vpop.xlane.xlu1 %3040 }
0x1033   :  { %v6593_v61 = vpop.eup %6592  ;;  %6602 = vrsqrt.f32 %v3071_v60  ;;  %v3072_v19 = vadd.f32 1e-05, %v3056_v23  ;;  %v3057_v55 = vmul.f32 0.03125, %v3041_v63 }
0x1034   :  { %v3098_v2 = vmul.f32 %v6593_v61, %v8598_v21 }
0x1035   :  { %v6595_v30 = vpop.eup %6594  ;;  %6604 = vrsqrt.f32 %v3072_v19  ;;  %v3073_v26 = vadd.f32 1e-05, %v3057_v55 }
0x1036   :  { %v3099_v14 = vmul.f32 %v6595_v30, %v8601_v52  ;;  %v3120_v41 = vmul.f32 %v8648_v39, %v3098_v2 }
0x1037   :  { %v6597_v54 = vpop.eup %6596  ;;  %6606 = vrsqrt.f32 %v3073_v26 }
0x1038   :  { %v3121_v12 = vmul.f32 %v8648_v39, %v3099_v14  ;;  %v3100_v47 = vmul.f32 %v6597_v54, %v8606_v59  ;;  %v3142_v27 = vadd.f32 %v8656_v42, %v3120_v41 }
0x1039   :  { %v6599_v53 = vpop.eup %6598 }
0x103a   :  { %v3143_v13 = vadd.f32 %v8656_v42, %v3121_v12  ;;  %v3101_v21 = vmul.f32 %v6599_v53, %v8612_v18  ;;  %v3122_v22 = vmul.f32 %v8648_v39, %v3100_v47 }
0x103b   :  { %v6601_v57 = vpop.eup %6600 }
0x103c   :  { %v3154_v0 = vpack.c.bf16 %v3143_v13, %v3142_v27  ;;  %v3123_v52 = vmul.f32 %v8648_v39, %v3101_v21  ;;  %v3102_v50 = vmul.f32 %v6601_v57, %v8618_v9  ;;  %v3144_v59 = vadd.f32 %v8656_v42, %v3122_v22 }
0x103d   :  { %v6603_v3 = vpop.eup %6602 }
0x103e   :  { %6027 = vmatprep.mubr.msk.bf16.mxu0 %vm245_vm1, %v3154_v0  ;;  %v3145_v17 = vadd.f32 %v8656_v42, %v3123_v52  ;;  %v3103_v38 = vmul.f32 %v6603_v3, %v8624_v51  ;;  %v3124_v28 = vmul.f32 %v8648_v39, %v3102_v50 }
0x103f   :  { %v6605_v18 = vpop.eup %6604 }
0x1040   :  { %v3155_v36 = vpack.c.bf16 %v3145_v17, %v3144_v59  ;;  %v3125_v16 = vmul.f32 %v8648_v39, %v3103_v38  ;;  %v3104_v24 = vmul.f32 %v6605_v18, %v8630_v37  ;;  %v3146_v9 = vadd.f32 %v8656_v42, %v3124_v28 }
0x1041   :  { %v6607_v20 = vpop.eup %6606 }
0x1042   :  { %6028 = vmatmul.mubr.msk.bf16.gmra.mrb[76].mxu0 %vm245_vm1, %v3155_v36  ;;  %v3147_v6 = vadd.f32 %v8656_v42, %v3125_v16  ;;  %v3105_v25 = vmul.f32 %v6607_v20, %v8636_v29  ;;  %v3126_v45 = vmul.f32 %v8648_v39, %v3104_v24 }
0x1044   :  { %v3156_v51 = vpack.c.bf16 %v3147_v6, %v3146_v9  ;;  %v3127_v44 = vmul.f32 %v8648_v39, %v3105_v25  ;;  %v3148_v32 = vadd.f32 %v8656_v42, %v3126_v45 }
0x1046   :  { %6031 = vmatprep.mubr.msk.bf16.mxu0 %vm245_vm1, %v3156_v51  ;;  %v3149_v37 = vadd.f32 %v8656_v42, %v3127_v44 }
0x1048   :  { %v3157_v43 = vpack.c.bf16 %v3149_v37, %v3148_v32 }
0x104a   :  { %6032 = vmatmul.mubr.msk.bf16.gmra.mrb[80].mxu0 %vm245_vm1, %v3157_v43 }
0x10dc   :  { %v6021_v29 = vpop.f32.mrb[68].mxu0 }
0x10dd   :  { %v3250_v40 = vadd.f32 %v6021_v29, %v8714_v5  ;;  %v3241_v48 = vpop.f32.mrb[69].mxu0 }
0x10de   :  { %v3242_v39 = vadd.f32 %v8714_v5, %v3241_v48  ;;  %v6022_v60 = vpop.f32.mrb[70].mxu0 }
0x10df   :  { %v3253_v23 = vadd.f32 %v6022_v60, %v8714_v5  ;;  %v3244_v63 = vpop.f32.mrb[71].mxu0  ;;  %v3306_v61 = vmul.f32 0.25, %v3250_v40 }
0x10e0   :  { %v3245_v42 = vadd.f32 %v8714_v5, %v3244_v63  ;;  %v3304_v2 = vmul.f32 0.25, %v3242_v39 }
0x10e1   :  { %v3307_v19 = vmul.f32 0.25, %v3253_v23  ;;  %v8720_v55 = vpack.c.bf16 %v3253_v23, %v3250_v40 }
0x10e2   :  { %v3305_v30 = vmul.f32 0.25, %v3245_v42  ;;  %v8722_v26 = vpack.c.bf16 %v3245_v42, %v3242_v39 }
0x10e3   :  { %v8724_v14 = vpack.c.bf16 %v3307_v19, %v3306_v61  ;;  %3363 = vrot.lane.b32.xlu1 %v8720_v55, %s6800_s30 }
0x10e4   :  { %v8728_v41 = vpack.c.bf16 %v3305_v30, %v3304_v2  ;;  %3361 = vrot.lane.b32.xlu0 %v8722_v26, %s6800_s30 }
0x10e5   :  { %v6025_v54 = vpop.f32.mrb[72].mxu0 }
0x10e6   :  { %v3266_v12 = vadd.f32 %v6025_v54, %v8714_v5  ;;  %v3257_v47 = vpop.f32.mrb[73].mxu0  ;;  %6051 = vmatprep.mubr.msk.bf16.mxu1 %vm977_vm2, %v8728_v41 }
0x10e7   :  { %v3258_v53 = vadd.f32 %v8714_v5, %v3257_v47  ;;  %v6026_v27 = vpop.f32.mrb[74].mxu0 }
0x10e8   :  { %v3269_v13 = vadd.f32 %v6026_v27, %v8714_v5  ;;  %v3260_v21 = vpop.f32.mrb[75].mxu0  ;;  %v3310_v57 = vmul.f32 0.25, %v3266_v12 }
0x10e9   :  { %v3261_v22 = vadd.f32 %v8714_v5, %v3260_v21  ;;  %v3308_v50 = vmul.f32 0.25, %v3258_v53 }
0x10ea   :  { %v3311_v0 = vmul.f32 0.25, %v3269_v13  ;;  %v8738_v52 = vpack.c.bf16 %v3269_v13, %v3266_v12 }
0x10eb   :  { %v3309_v3 = vmul.f32 0.25, %v3261_v22  ;;  %v8740_v59 = vpack.c.bf16 %v3261_v22, %v3258_v53 }
0x10ec   :  { %v8742_v17 = vpack.c.bf16 %v3311_v0, %v3310_v57 }
0x10ed   :  { %v8744_v38 = vpack.c.bf16 %v3309_v3, %v3308_v50  ;;  %3365 = vrot.lane.b32.xlu1 %v8740_v59, %s6800_s30 }
0x10f1   :  { %3367 = vrot.lane.b32.xlu1 %v8738_v52, %s6800_s30 }
0x1115   :  { %v6029_v28 = vpop.f32.mrb[76].mxu0 }
0x1116   :  { %v3282_v18 = vadd.f32 %v6029_v28, %v8714_v5  ;;  %v3273_v36 = vpop.f32.mrb[77].mxu0 }
0x1117   :  { %v3274_v16 = vadd.f32 %v8714_v5, %v3273_v36  ;;  %v6030_v24 = vpop.f32.mrb[78].mxu0 }
0x1118   :  { %v3285_v20 = vadd.f32 %v6030_v24, %v8714_v5  ;;  %v3276_v9 = vpop.f32.mrb[79].mxu0  ;;  %v3314_v25 = vmul.f32 0.25, %v3282_v18 }
0x1119   :  { %v3277_v6 = vadd.f32 %v8714_v5, %v3276_v9  ;;  %v3312_v44 = vmul.f32 0.25, %v3274_v16 }
0x111a   :  { %v3315_v45 = vmul.f32 0.25, %v3285_v20  ;;  %v8754_v51 = vpack.c.bf16 %v3285_v20, %v3282_v18 }
0x111b   :  { %v3313_v32 = vmul.f32 0.25, %v3277_v6  ;;  %v8756_v37 = vpack.c.bf16 %v3277_v6, %v3274_v16 }
0x111c   :  { %v8758_v43 = vpack.c.bf16 %v3315_v45, %v3314_v25  ;;  %3371 = vrot.lane.b32.xlu1 %v8754_v51, %s6800_s30 }
0x111d   :  { %v8762_v29 = vpack.c.bf16 %v3313_v32, %v3312_v44  ;;  %3369 = vrot.lane.b32.xlu0 %v8756_v37, %s6800_s30  ;;  %v6033_v40 = vpop.f32.mrb[80].mxu0 }
0x111e   :  { %v3298_v48 = vadd.f32 %v6033_v40, %v8714_v5  ;;  %v3289_v39 = vpop.f32.mrb[81].mxu0 }
0x111f   :  { %v3290_v60 = vadd.f32 %v8714_v5, %v3289_v39  ;;  %v6034_v23 = vpop.f32.mrb[82].mxu0 }
0x1120   :  { %v3301_v63 = vadd.f32 %v6034_v23, %v8714_v5  ;;  %v3292_v42 = vpop.f32.mrb[83].mxu0  ;;  %v3318_v19 = vmul.f32 0.25, %v3298_v48 }
0x1121   :  { %v3293_v61 = vadd.f32 %v8714_v5, %v3292_v42  ;;  %v3316_v54 = vmul.f32 0.25, %v3290_v60 }
0x1122   :  { %v3319_v2 = vmul.f32 0.25, %v3301_v63  ;;  %v8770_v30 = vpack.c.bf16 %v3301_v63, %v3298_v48  ;;  %v5434_v63 = vld [vmem:[%s9811_s5 + $0x110] sm:$0xff] }
0x1123   :  { %v3317_v12 = vmul.f32 0.25, %v3293_v61  ;;  %v8772_v47 = vpack.c.bf16 %v3293_v61, %v3290_v60 }
0x1124   :  { %v8774_v53 = vpack.c.bf16 %v3319_v2, %v3318_v19  ;;  %3375 = vrot.lane.b32.xlu1 %v8770_v30, %s6800_s30  ;;  %v5433_v2 = vld [vmem:[%s9811_s5 + $0x108] sm:$0xff] }
0x1125   :  { %v8778_v27 = vpack.c.bf16 %v3317_v12, %v3316_v54  ;;  %3373 = vrot.lane.b32.xlu0 %v8772_v47, %s6800_s30  ;;  %v5432_v54 = vld [vmem:[%s9811_s5 + $0x100] sm:$0xff] }
0x1128   :  { %3676 = vrot.lane.b32.xlu1 %v8720_v55, %s6801_s1 }
0x1129   :  { %3674 = vrot.lane.b32.xlu0 %v8722_v26, %s6801_s1 }
0x112c   :  { %3680 = vrot.lane.b32.xlu1 %v8738_v52, %s6801_s1 }
0x112d   :  { %3678 = vrot.lane.b32.xlu0 %v8740_v59, %s6801_s1 }
0x1130   :  { %3684 = vrot.lane.b32.xlu1 %v8754_v51, %s6801_s1 }
0x1131   :  { %3682 = vrot.lane.b32.xlu0 %v8756_v37, %s6801_s1 }
0x1134   :  { %3688 = vrot.lane.b32.xlu1 %v8770_v30, %s6801_s1 }
0x1135   :  { %3852 = vrot.lane.b32.xlu0 %v8722_v26, %s6802_s21 }
0x1138   :  { %3854 = vrot.lane.b32.xlu1 %v8720_v55, %s6802_s21 }
0x1139   :  { %3686 = vrot.lane.b32.xlu0 %v8772_v47, %s6801_s1 }
0x1155   :  { %v3364_v21 = vpop.permute.xlu1 %3363 }
0x1156   :  { %v3362_v5 = vpop.permute.xlu0 %3361  ;;  %v3405_v22 = vsel %vm977_vm2, %v3364_v21, 0 }
0x1157   :  { %6267 = vmatprep.subr.msk.bf16.mxu1 %vm977_vm2, %v3362_v5  ;;  %v3402_v13 = vsel %vm977_vm2, %v3362_v5, 0 }
0x1158   :  { %6036 = vmatpush3.bf16.xpose.msra.mxu1 %v3402_v13 }
0x1159   :  { %6268 = vmatprep.subr.msk.bf16.mxu1 %vm977_vm2, %v3364_v21 }
0x115f   :  { %v3366_v57 = vpop.permute.xlu1 %3365 }
0x1160   :  { %6038 = vmatpush3.bf16.xpose.msra.mxu1 %v3405_v22  ;;  %v3408_v0 = vsel %vm977_vm2, %v3366_v57, 0  ;;  %v5435_v22 = vld [vmem:[%s9811_s5 + $0x118] sm:$0xff] }
0x1161   :  { %6269 = vmatprep.subr.msk.bf16.mxu1 %vm977_vm2, %v3366_v57 }
0x1163   :  { %v3368_v50 = vpop.permute.xlu1 %3367 }
0x1164   :  { %v3411_v3 = vsel %vm977_vm2, %v3368_v50, 0 }
0x1168   :  { %6040 = vmatpush3.bf16.xpose.msra.mxu1 %v3408_v0  ;;  %v5439_v0 = vld [vmem:[%s9811_s5 + $0x138] sm:$0xff] }
0x1169   :  { %6270 = vmatprep.subr.msk.bf16.mxu1 %vm977_vm2, %v3368_v50 }
0x1170   :  { %6042 = vmatpush3.bf16.xpose.msra.mxu1 %v3411_v3 }
0x118e   :  { %v3372_v36 = vpop.permute.xlu1 %3371 }
0x118f   :  { %v3370_v28 = vpop.permute.xlu0 %3369  ;;  %v3417_v20 = vsel %vm977_vm2, %v3372_v36, 0 }
0x1190   :  { %6271 = vmatprep.subr.msk.bf16.mxu1 %vm977_vm2, %v3370_v28  ;;  %v3414_v18 = vsel %vm977_vm2, %v3370_v28, 0  ;;  %v5438_v28 = vld [vmem:[%s9811_s5 + $0x130] sm:$0xff] }
0x1191   :  { %6044 = vmatpush3.bf16.xpose.msra.mxu1 %v3414_v18 }
0x1192   :  { %6272 = vmatprep.subr.msk.bf16.mxu1 %vm977_vm2, %v3372_v36 }
0x1196   :  { %v3376_v16 = vpop.permute.xlu1 %3375 }
0x1197   :  { %v3374_v24 = vpop.permute.xlu0 %3373  ;;  %v3423_v40 = vsel %vm977_vm2, %v3376_v16, 0 }
0x1198   :  { %v3420_v45 = vsel %vm977_vm2, %v3374_v24, 0 }
0x1199   :  { %6046 = vmatpush3.bf16.xpose.msra.mxu1 %v3417_v20 }
0x119a   :  { %6273 = vmatprep.subr.msk.bf16.mxu1 %vm977_vm2, %v3374_v24  ;;  %v3677_v6 = vpop.permute.xlu1 %3676  ;;  %v5437_v24 = vld [vmem:[%s9811_s5 + $0x128] sm:$0xff] }
0x119b   :  { %v3675_v9 = vpop.permute.xlu0 %3674 }
0x119c   :  { %6067 = vmatprep.subr.bf16.mxu0 %v3675_v9 }
0x119d   :  { %6068 = vmatpush3.bf16.msra.mxu0 %v3675_v9  ;;  %v5436_v9 = vld [vmem:[%s9811_s5 + $0x120] sm:$0xff] }
0x119e   :  { %6069 = vmatprep.subr.bf16.mxu0 %v3677_v6  ;;  %v3681_v44 = vpop.permute.xlu1 %3680 }
0x119f   :  { %v3679_v25 = vpop.permute.xlu0 %3678 }
0x11a1   :  { %6048 = vmatpush3.bf16.xpose.msra.mxu1 %v3420_v45  ;;  %6070 = vmatpush3.bf16.msra.mxu0 %v3677_v6  ;;  %v5443_v45 = vld [vmem:[%s9811_s5 + $0x158] sm:$0xff] }
0x11a2   :  { %6274 = vmatprep.subr.msk.bf16.mxu1 %vm977_vm2, %v3376_v16  ;;  %6071 = vmatprep.subr.bf16.mxu0 %v3679_v25  ;;  %v3685_v39 = vpop.permute.xlu1 %3684 }
0x11a3   :  { %v3683_v32 = vpop.permute.xlu0 %3682 }
0x11a5   :  { %6072 = vmatpush3.bf16.msra.mxu0 %v3679_v25 }
0x11a6   :  { %6073 = vmatprep.subr.bf16.mxu0 %v3681_v44  ;;  %v3689_v23 = vpop.permute.xlu1 %3688 }
0x11a7   :  { %v8818_v48 = vpop.permute.xlu0 %3852 }
0x11a9   :  { %6050 = vmatpush3.bf16.xpose.msra.mxu1 %v3423_v40  ;;  %6074 = vmatpush3.bf16.msra.mxu0 %v3681_v44  ;;  %v5442_v40 = vld [vmem:[%s9811_s5 + $0x150] sm:$0xff] }
0x11aa   :  { %6075 = vmatprep.subr.bf16.mxu0 %v3683_v32 }
0x11ab   :  { %v3687_v60 = vpop.permute.xlu0 %3686 }
0x11ad   :  { %6076 = vmatpush3.bf16.msra.mxu0 %v3683_v32 }
0x11ae   :  { %6077 = vmatprep.subr.bf16.mxu0 %v3685_v39 }
0x11b0   :  { %6052 = vmatmul.mubr.msk.bf16.vlgmr.msra.gmra.mrb[76].mxu1 %vm977_vm2, %v8724_v14 }
0x11b1   :  { %6055 = vmatprep.mubr.msk.bf16.mxu1 %vm977_vm2, %v8744_v38  ;;  %6078 = vmatpush3.bf16.msra.mxu0 %v3685_v39 }
0x11b2   :  { %6079 = vmatprep.subr.bf16.mxu0 %v3687_v60 }
0x11b5   :  { %6080 = vmatpush3.bf16.msra.mxu0 %v3687_v60 }
0x11b6   :  { %6081 = vmatprep.subr.bf16.mxu0 %v3689_v23 }
0x11b8   :  { %6056 = vmatmul.mubr.msk.bf16.gmra.mrb[80].mxu1 %vm977_vm2, %v8742_v17 }
0x11b9   :  { %6059 = vmatprep.mubr.msk.bf16.mxu1 %vm977_vm2, %v8762_v29  ;;  %6082 = vmatpush3.bf16.msra.mxu0 %v3689_v23 }
0x11ba   :  { %6275 = vmatprep.subr.msk.bf16.mxu0 %vm977_vm2, %v8818_v48 }
0x11c0   :  { %6060 = vmatmul.mubr.msk.bf16.gmra.mrb[84].mxu1 %vm977_vm2, %v8758_v43 }
0x11c1   :  { %6063 = vmatprep.mubr.msk.bf16.mxu1 %vm977_vm2, %v8778_v27 }
0x11c8   :  { %6064 = vmatmul.mubr.msk.bf16.gmra.mrb[88].mxu1 %vm977_vm2, %v8774_v53 }
0x1283   :  { %v6053_v42 = vpop.f32.mrb[76].mxu1 }
0x1284   :  { %v8839_v61 = vadd.f32 %v6053_v42, %v5434_v63  ;;  %v3459_v19 = vpop.f32.mrb[77].mxu1  ;;  %v5441_v63 = vld [vmem:[%s9811_s5 + $0x148] sm:$0xff] }
0x1285   :  { %v6054_v12 = vpop.f32.mrb[78].mxu1  ;;  %v8850_v21 = vadd.f32 %v5432_v54, %v3459_v19  ;;  %v5440_v19 = vld [vmem:[%s9811_s5 + $0x140] sm:$0xff] }
0x1286   :  { %3526 = vmax.xlane.f32.xlu0 %v8839_v61  ;;  %v3462_v5 = vpop.f32.mrb[79].mxu1  ;;  %v8860_v50 = vadd.f32 %v6054_v12, %v5435_v22  ;;  %v5446_v22 = vld [vmem:[%s9811_s5 + $0x170] sm:$0xff] }
0x1287   :  { %v8848_v13 = vadd.f32 %v5433_v2, %v3462_v5 }
0x1289   :  { %3524 = vmax.xlane.f32.xlu1 %v8848_v13 }
0x128a   :  { %3522 = vmax.xlane.f32.xlu0 %v8850_v21 }
0x128b   :  { %v6057_v57 = vpop.f32.mrb[80].mxu1 }
0x128c   :  { %v3475_v3 = vpop.f32.mrb[81].mxu1  ;;  %v8871_v20 = vadd.f32 %v6057_v57, %v5438_v28  ;;  %v5444_v28 = vld [vmem:[%s9811_s5 + $0x160] sm:$0xff] }
0x128d   :  { %v6058_v18 = vpop.f32.mrb[82].mxu1  ;;  %v8883_v44 = vadd.f32 %v5436_v9, %v3475_v3  ;;  %v5445_v9 = vld [vmem:[%s9811_s5 + $0x168] sm:$0xff] }
0x128e   :  { %v8865_v36 = vadd.f32 %v6058_v18, %v5439_v0  ;;  %v3478_v16 = vpop.f32.mrb[83].mxu1  ;;  %3528 = vmax.xlane.f32.xlu0 %v8860_v50 }
0x128f   :  { %v8877_v6 = vadd.f32 %v5437_v24, %v3478_v16  ;;  %v5447_v16 = vld [vmem:[%s9811_s5 + $0x178] sm:$0xff] }
0x1290   :  { %3536 = vmax.xlane.f32.xlu1 %v8865_v36 }
0x1292   :  { %3534 = vmax.xlane.f32.xlu0 %v8871_v20 }
0x1293   :  { %v6061_v25 = vpop.f32.mrb[84].mxu1 }
0x1294   :  { %v3491_v32 = vpop.f32.mrb[85].mxu1  ;;  %3532 = vmax.xlane.f32.xlu1 %v8877_v6  ;;  %v8895_v42 = vadd.f32 %v6061_v25, %v5442_v40 }
0x1295   :  { %v6062_v39 = vpop.f32.mrb[86].mxu1  ;;  %v8904_v12 = vadd.f32 %v5440_v19, %v3491_v32 }
0x1296   :  { %v8889_v60 = vadd.f32 %v6062_v39, %v5443_v45  ;;  %v3494_v23 = vpop.f32.mrb[87].mxu1  ;;  %3530 = vmax.xlane.f32.xlu0 %v8883_v44  ;;  %v8936_v45 = vpop.permute.xlu1 %3854 }
0x1297   :  { %v8901_v2 = vadd.f32 %v5441_v63, %v3494_v23 }
0x1298   :  { %3544 = vmax.xlane.f32.xlu1 %v8889_v60 }
0x129a   :  { %3542 = vmax.xlane.f32.xlu0 %v8895_v42 }
0x129b   :  { %v6065_v54 = vpop.f32.mrb[88].mxu1 }
0x129c   :  { %v3507_v5 = vpop.f32.mrb[89].mxu1  ;;  %3540 = vmax.xlane.f32.xlu1 %v8901_v2  ;;  %v8911_v3 = vadd.f32 %v6065_v54, %v5446_v22 }
0x129d   :  { %v6066_v57 = vpop.f32.mrb[90].mxu1  ;;  %v8917_v18 = vadd.f32 %v5444_v28, %v3507_v5 }
0x129e   :  { %v3510_v0 = vpop.f32.mrb[91].mxu1  ;;  %3538 = vmax.xlane.f32.xlu0 %v8904_v12  ;;  %v8927_v24 = vadd.f32 %v6066_v57, %v5447_v16 }
0x129f   :  { %v8933_v25 = vadd.f32 %v5445_v9, %v3510_v0 }
0x12a2   :  { %3550 = vmax.xlane.f32.xlu0 %v8911_v3 }
0x12a6   :  { %3546 = vmax.xlane.f32.xlu0 %v8917_v18 }
0x12ad   :  { %3858 = vrot.lane.b32.xlu1 %v8738_v52, %s6802_s21 }
0x12bc   :  { %3856 = vrot.lane.b32.xlu0 %v8740_v59, %s6802_s21 }
0x12d1   :  { %3552 = vmax.xlane.f32.xlu1 %v8927_v24 }
0x12d5   :  { %3548 = vmax.xlane.f32.xlu1 %v8933_v25 }
0x1313   :  { %v3527_v32 = vpop.xlane.xlu0 %3526 }
0x1314   :  { %v3556_v40 = vsub.f32 %v8839_v61, %v3527_v32 }
0x1316   :  { %v3574_v39 = vmul.f32 1.442695, %v3556_v40  ;;  %v3525_v23 = vpop.xlane.xlu1 %3524 }
0x1317   :  { %v3555_v63 = vsub.f32 %v8848_v13, %v3525_v23  ;;  %v3523_v19 = vpop.xlane.xlu0 %3522 }
0x1318   :  { %6608 = vpow2.f32 %v3574_v39  ;;  %v3554_v54 = vsub.f32 %v8850_v21, %v3523_v19 }
0x1319   :  { %v3572_v5 = vmul.f32 1.442695, %v3555_v63 }
0x131a   :  { %v3570_v22 = vmul.f32 1.442695, %v3554_v54 }
0x131b   :  { %6610 = vpow2.f32 %v3572_v5  ;;  %v3529_v57 = vpop.xlane.xlu0 %3528 }
0x131c   :  { %6612 = vpow2.f32 %v3570_v22  ;;  %v3557_v0 = vsub.f32 %v8860_v50, %v3529_v57 }
0x131d   :  { %v3537_v32 = vpop.xlane.xlu1 %3536 }
0x131e   :  { %v3576_v28 = vmul.f32 1.442695, %v3557_v0  ;;  %v3561_v0 = vsub.f32 %v8865_v36, %v3537_v32 }
0x131f   :  { %v3535_v9 = vpop.xlane.xlu0 %3534 }
0x1320   :  { %6614 = vpow2.f32 %v3576_v28  ;;  %v3560_v39 = vsub.f32 %v8871_v20, %v3535_v9  ;;  %v3584_v34 = vmul.f32 1.442695, %v3561_v0 }
0x1321   :  { %v3533_v23 = vpop.xlane.xlu1 %3532 }
0x1322   :  { %v8942_v16 = vpop.eup %6608  ;;  %v3582_v19 = vmul.f32 1.442695, %v3560_v39  ;;  %v3559_v5 = vsub.f32 %v8877_v6, %v3533_v23 }
0x1323   :  { %3606 = vadd.xlane.f32.xlu1 %v8942_v16  ;;  %v3531_v50 = vpop.xlane.xlu0 %3530 }
0x1324   :  { %v3558_v54 = vsub.f32 %v8883_v44, %v3531_v50  ;;  %6616 = vpow2.f32 %v3582_v19  ;;  %v3580_v10 = vmul.f32 1.442695, %v3559_v5 }
0x1325   :  { %v8945_v61 = vpop.eup %6610  ;;  %v3545_v22 = vpop.xlane.xlu1 %3544 }
0x1326   :  { %v8947_v13 = vpop.eup %6612  ;;  %3604 = vadd.xlane.f32.xlu0 %v8945_v61  ;;  %v3578_v28 = vmul.f32 1.442695, %v3558_v54  ;;  %v3565_v36 = vsub.f32 %v8889_v60, %v3545_v22 }
0x1327   :  { %3602 = vadd.xlane.f32.xlu1 %v8947_v13  ;;  %v3543_v40 = vpop.xlane.xlu0 %3542 }
0x1328   :  { %v3564_v7 = vsub.f32 %v8895_v42, %v3543_v40  ;;  %6618 = vpow2.f32 %v3578_v28 }
0x1329   :  { %v3541_v31 = vpop.xlane.xlu1 %3540  ;;  %6620 = vpow2.f32 %v3580_v10 }
0x132a   :  { %v8951_v21 = vpop.eup %6614  ;;  %v3590_v9 = vmul.f32 1.442695, %v3564_v7  ;;  %6622 = vpow2.f32 %v3584_v34  ;;  %v3592_v7 = vmul.f32 1.442695, %v3565_v36 }
0x132b   :  { %3608 = vadd.xlane.f32.xlu1 %v8951_v21  ;;  %v3539_v63 = vpop.xlane.xlu0 %3538 }
0x132c   :  { %v3562_v44 = vsub.f32 %v8904_v12, %v3539_v63  ;;  %6624 = vpow2.f32 %v3590_v9  ;;  %v3563_v12 = vsub.f32 %v8901_v2, %v3541_v31 }
0x132d   :  { %v8969_v42 = vpop.permute.xlu1 %3858 }
0x132e   :  { %v3586_v32 = vmul.f32 1.442695, %v3562_v44  ;;  %v8967_v23 = vpop.eup %6616  ;;  %v3588_v40 = vmul.f32 1.442695, %v3563_v12 }
0x132f   :  { %v3551_v57 = vpop.xlane.xlu0 %3550 }
0x1330   :  { %v3568_v20 = vsub.f32 %v8911_v3, %v3551_v57 }
0x1332   :  { %v3598_v6 = vmul.f32 1.442695, %v3568_v20  ;;  %v8973_v34 = vpop.eup %6618 }
0x1333   :  { %v3547_v50 = vpop.xlane.xlu0 %3546 }
0x1334   :  { %v3566_v39 = vsub.f32 %v8917_v18, %v3547_v50  ;;  %6626 = vpow2.f32 %v3598_v6  ;;  %v8975_v18 = vpop.eup %6620 }
0x1335   :  { %6628 = vpow2.f32 %v3586_v32  ;;  %v8980_v19 = vpop.eup %6622 }
0x1336   :  { %v3594_v10 = vmul.f32 1.442695, %v3566_v39  ;;  %v8982_v31 = vpop.eup %6624  ;;  %v3893_v39 = vsel %vm977_vm2, %v8818_v48, 0 }
0x1338   :  { %6630 = vpow2.f32 %v3594_v10 }
0x1339   :  { %6632 = vpow2.f32 %v3592_v7 }
0x133c   :  { %3860 = vrot.lane.b32.xlu0 %v8756_v37, %s6802_s21  ;;  %3862 = vrot.lane.b32.xlu1 %v8754_v51, %s6802_s21 }
0x133e   :  { %v8987_v5 = vpop.eup %6626 }
0x133f   :  { %v8989_v22 = vpop.eup %6628 }
0x1342   :  { %v8993_v57 = vpop.eup %6630 }
0x1343   :  { %v8995_v0 = vpop.eup %6632 }
0x135b   :  { %3614 = vadd.xlane.f32.xlu0 %v8967_v23 }
0x135e   :  { %v3553_v3 = vpop.xlane.xlu1 %3552 }
0x135f   :  { %v3569_v60 = vsub.f32 %v8927_v24, %v3553_v3  ;;  %3610 = vadd.xlane.f32.xlu0 %v8973_v34 }
0x1360   :  { %3612 = vadd.xlane.f32.xlu1 %v8975_v18 }
0x1361   :  { %v3600_v63 = vmul.f32 1.442695, %v3569_v60 }
0x1362   :  { %v3549_v54 = vpop.xlane.xlu1 %3548 }
0x1363   :  { %6634 = vpow2.f32 %v3600_v63  ;;  %v3567_v2 = vsub.f32 %v8933_v25, %v3549_v54  ;;  %3616 = vadd.xlane.f32.xlu0 %v8980_v19 }
0x1364   :  { %3622 = vadd.xlane.f32.xlu1 %v8982_v31  ;;  %6636 = vpow2.f32 %v3588_v40 }
0x1365   :  { %v3596_v24 = vmul.f32 1.442695, %v3567_v2 }
0x1367   :  { %3630 = vadd.xlane.f32.xlu0 %v8987_v5  ;;  %6638 = vpow2.f32 %v3596_v24 }
0x1368   :  { %3618 = vadd.xlane.f32.xlu1 %v8989_v22 }
0x136b   :  { %3626 = vadd.xlane.f32.xlu0 %v8993_v57 }
0x136c   :  { %3624 = vadd.xlane.f32.xlu1 %v8995_v0 }
0x136d   :  { %v8999_v25 = vpop.eup %6634 }
0x136e   :  { %v9001_v28 = vpop.eup %6636 }
0x136f   :  { %3632 = vadd.xlane.f32.xlu0 %v8999_v25 }
0x1370   :  { %3620 = vadd.xlane.f32.xlu1 %v9001_v28 }
0x1371   :  { %v9005_v20 = vpop.eup %6638 }
0x1374   :  { %3628 = vadd.xlane.f32.xlu1 %v9005_v20 }
0x1385   :  { %3866 = vrot.lane.b32.xlu1 %v8770_v30, %s6802_s21  ;;  %3864 = vrot.lane.b32.xlu0 %v8772_v47, %s6802_s21 }
0x1389   :  { %3838 = vrot.lane.b32.xlu1 %v8724_v14, %s6803_s3  ;;  %3836 = vrot.lane.b32.xlu0 %v8728_v41, %s6803_s3  ;;  %v3857_v14 = vpop.permute.xlu0 %3856 }
0x138d   :  { %3842 = vrot.lane.b32.xlu1 %v8742_v17, %s6803_s3  ;;  %3840 = vrot.lane.b32.xlu0 %v8744_v38, %s6803_s3 }
0x1391   :  { %3846 = vrot.lane.b32.xlu1 %v8758_v43, %s6803_s3  ;;  %3844 = vrot.lane.b32.xlu0 %v8762_v29, %s6803_s3 }
0x1395   :  { %3850 = vrot.lane.b32.xlu1 %v8774_v53, %s6803_s3  ;;  %3848 = vrot.lane.b32.xlu0 %v8778_v27, %s6803_s3 }
0x1399   :  { %4167 = vrot.lane.b32.xlu1 %v8720_v55, %s6804_s4  ;;  %4165 = vrot.lane.b32.xlu0 %v8722_v26, %s6804_s4 }
0x139d   :  { %4169 = vrot.lane.b32.xlu0 %v8740_v59, %s6804_s4 }
0x13b0   :  { %v3607_v41 = vpop.xlane.xlu1 %3606 }
0x13b3   :  { %v3605_v17 = vpop.xlane.xlu0 %3604 }
0x13b4   :  { %6640 = vrcp.f32 %v3605_v17  ;;  %v3603_v38 = vpop.xlane.xlu1 %3602 }
0x13b5   :  { %6642 = vrcp.f32 %v3603_v38 }
0x13b6   :  { %6644 = vrcp.f32 %v3607_v41 }
0x13b7   :  { %v3861_v48 = vpop.permute.xlu0 %3860 }
0x13b8   :  { %v3609_v43 = vpop.xlane.xlu1 %3608 }
0x13b9   :  { %6646 = vrcp.f32 %v3609_v43 }
0x13be   :  { %v6641_v29 = vpop.eup %6640 }
0x13bf   :  { %v6643_v53 = vpop.eup %6642  ;;  %v3651_v27 = vmul.f32 %v6641_v29, %v8945_v61  ;;  %v3896_v61 = vsel %vm977_vm2, %v8936_v45, 0 }
0x13c0   :  { %v3650_v55 = vmul.f32 %v6643_v53, %v8947_v13  ;;  %v6645_v9 = vpop.eup %6644  ;;  %v3902_v13 = vsel %vm977_vm2, %v8969_v42, 0 }
0x13c1   :  { %v3652_v59 = vmul.f32 %v6645_v9, %v8942_v16  ;;  %v3899_v16 = vsel %vm977_vm2, %v3857_v14, 0 }
0x13c2   :  { %v3666_v26 = vpack.c.bf16 %v3651_v27, %v3650_v55 }
0x13c3   :  { %v6647_v44 = vpop.eup %6646 }
0x13c4   :  { %v3653_v50 = vmul.f32 %v6647_v44, %v8951_v21  ;;  %6083 = vmatprep.mubr.bf16.mxu0 %v3666_v26  ;;  %v3905_v21 = vsel %vm977_vm2, %v3861_v48, 0 }
0x13c6   :  { %v3667_v6 = vpack.c.bf16 %v3653_v50, %v3652_v59 }
0x13c8   :  { %6084 = vmatmul.mubr.bf16.vlgmr.msra.gmra.mrb[84].mxu0 %v3667_v6 }
0x13c9   :  { %6100 = vmatpush3.bf16.xpose.msra.mxu0 %v3893_v39 }
0x13ca   :  { %6276 = vmatprep.subr.msk.bf16.mxu0 %vm977_vm2, %v8936_v45  ;;  %v3863_v45 = vpop.permute.xlu1 %3862 }
0x13cb   :  { %v3908_v7 = vsel %vm977_vm2, %v3863_v45, 0 }
0x13d1   :  { %6102 = vmatpush3.bf16.xpose.msra.mxu0 %v3896_v61 }
0x13d2   :  { %6277 = vmatprep.subr.msk.bf16.mxu0 %vm977_vm2, %v3857_v14 }
0x13d9   :  { %6104 = vmatpush3.bf16.xpose.msra.mxu0 %v3899_v16 }
0x13da   :  { %6278 = vmatprep.subr.msk.bf16.mxu0 %vm977_vm2, %v8969_v42 }
0x13e1   :  { %6106 = vmatpush3.bf16.xpose.msra.mxu0 %v3902_v13 }
0x13e2   :  { %6279 = vmatprep.subr.msk.bf16.mxu0 %vm977_vm2, %v3861_v48 }
0x13e8   :  { %v3615_v36 = vpop.xlane.xlu0 %3614 }
0x13e9   :  { %6108 = vmatpush3.bf16.xpose.msra.mxu0 %v3905_v21 }
0x13ea   :  { %6280 = vmatprep.subr.msk.bf16.mxu0 %vm977_vm2, %v3863_v45 }
0x13ec   :  { %v3611_v32 = vpop.xlane.xlu0 %3610 }
0x13ed   :  { %6648 = vrcp.f32 %v3611_v32  ;;  %v3613_v10 = vpop.xlane.xlu1 %3612 }
0x13ee   :  { %6650 = vrcp.f32 %v3613_v10 }
0x13ef   :  { %6652 = vrcp.f32 %v3615_v36 }
0x13f0   :  { %v3617_v12 = vpop.xlane.xlu0 %3616 }
0x13f1   :  { %6110 = vmatpush3.bf16.xpose.msra.mxu0 %v3908_v7  ;;  %6654 = vrcp.f32 %v3617_v12  ;;  %v3623_v42 = vpop.xlane.xlu1 %3622 }
0x13f4   :  { %v3631_v3 = vpop.xlane.xlu0 %3630 }
0x13f5   :  { %v3619_v60 = vpop.xlane.xlu1 %3618 }
0x13f7   :  { %v6649_v40 = vpop.eup %6648 }
0x13f8   :  { %v6651_v63 = vpop.eup %6650  ;;  %v3627_v54 = vpop.xlane.xlu0 %3626  ;;  %v3654_v2 = vmul.f32 %v6649_v40, %v8973_v34 }
0x13f9   :  { %v6653_v24 = vpop.eup %6652  ;;  %v3625_v14 = vpop.xlane.xlu1 %3624  ;;  %v3655_v41 = vmul.f32 %v6651_v63, %v8975_v18 }
0x13fa   :  { %6656 = vrcp.f32 %v3625_v14  ;;  %v3656_v29 = vmul.f32 %v6653_v24, %v8967_v23 }
0x13fb   :  { %v6655_v17 = vpop.eup %6654  ;;  %v3668_v38 = vpack.c.bf16 %v3655_v41, %v3654_v2  ;;  %6658 = vrcp.f32 %v3619_v60 }
0x13fc   :  { %v3633_v43 = vpop.xlane.xlu0 %3632  ;;  %v3657_v53 = vmul.f32 %v6655_v17, %v8980_v19  ;;  %6660 = vrcp.f32 %v3623_v42 }
0x13fd   :  { %v3621_v27 = vpop.xlane.xlu1 %3620  ;;  %6087 = vmatprep.mubr.bf16.mxu0 %v3668_v38 }
0x13fe   :  { %6662 = vrcp.f32 %v3621_v27  ;;  %v3669_v55 = vpack.c.bf16 %v3657_v53, %v3656_v29 }
0x13ff   :  { %6664 = vrcp.f32 %v3627_v54 }
0x1400   :  { %6088 = vmatmul.mubr.bf16.gmra.mrb[88].mxu0 %v3669_v55  ;;  %v3865_v34 = vpop.permute.xlu0 %3864 }
0x1401   :  { %v3629_v9 = vpop.xlane.xlu1 %3628  ;;  %6281 = vmatprep.subr.msk.bf16.mxu0 %vm977_vm2, %v3865_v34  ;;  %v3911_v18 = vsel %vm977_vm2, %v3865_v34, 0 }
0x1402   :  { %6666 = vrcp.f32 %v3629_v9  ;;  %6112 = vmatpush3.bf16.xpose.msra.mxu0 %v3911_v18 }
0x1403   :  { %6668 = vrcp.f32 %v3633_v43 }
0x1404   :  { %v3837_v26 = vpop.permute.xlu0 %3836  ;;  %v6657_v23 = vpop.eup %6656  ;;  %6670 = vrcp.f32 %v3631_v3 }
0x1405   :  { %v3867_v19 = vpop.permute.xlu1 %3866  ;;  %v6659_v44 = vpop.eup %6658  ;;  %v3661_v39 = vmul.f32 %v6657_v23, %v8995_v0 }
0x1406   :  { %6282 = vmatprep.subr.msk.bf16.mxu0 %vm977_vm2, %v3867_v19  ;;  %v6661_v59 = vpop.eup %6660  ;;  %v3914_v61 = vsel %vm977_vm2, %v3867_v19, 0  ;;  %v3658_v13 = vmul.f32 %v6659_v44, %v8989_v22  ;;  %v5458_v19 = vld [vmem:[%s9811_s5 + $0x190] sm:$0xff] }
0x1407   :  { %v3660_v36 = vmul.f32 %v6661_v59, %v8982_v31 }
0x1408   :  { %v6663_v50 = vpop.eup %6662  ;;  %v3841_v6 = vpop.permute.xlu0 %3840 }
0x1409   :  { %v3839_v16 = vpop.permute.xlu1 %3838  ;;  %v3659_v48 = vmul.f32 %v6663_v50, %v9001_v28  ;;  %v6665_v21 = vpop.eup %6664  ;;  %v3671_v7 = vpack.c.bf16 %v3661_v39, %v3660_v36  ;;  %v5456_v39 = vld [vmem:[%s9811_s5 + $0x180] sm:$0xff] }
0x140a   :  { %6114 = vmatpush3.bf16.xpose.msra.mxu0 %v3914_v61  ;;  %v3662_v0 = vmul.f32 %v6665_v21, %v8993_v57  ;;  %v5459_v21 = vld [vmem:[%s9811_s5 + $0x198] sm:$0xff] }
0x140b   :  { %v3670_v45 = vpack.c.bf16 %v3659_v48, %v3658_v13 }
0x140c   :  { %v6667_v32 = vpop.eup %6666  ;;  %v3845_v10 = vpop.permute.xlu0 %3844 }
0x140d   :  { %v6669_v12 = vpop.eup %6668  ;;  %v3843_v42 = vpop.permute.xlu1 %3842  ;;  %6091 = vmatprep.mubr.bf16.mxu0 %v3670_v45  ;;  %v3663_v3 = vmul.f32 %v6667_v32, %v9005_v20  ;;  %v5463_v45 = vld [vmem:[%s9811_s5 + $0x1b8] sm:$0xff] }
0x140e   :  { %6092 = vmatmul.mubr.bf16.gmra.mrb[92].mxu0 %v3671_v7  ;;  %v6671_v60 = vpop.eup %6670  ;;  %v3665_v28 = vmul.f32 %v6669_v12, %v8999_v25  ;;  %v5462_v7 = vld [vmem:[%s9811_s5 + $0x1b0] sm:$0xff] }
0x140f   :  { %v3672_v22 = vpack.c.bf16 %v3663_v3, %v3662_v0  ;;  %v3664_v31 = vmul.f32 %v6671_v60, %v8987_v5  ;;  %v5461_v3 = vld [vmem:[%s9811_s5 + $0x1a8] sm:$0xff] }
0x1410   :  { %v3849_v40 = vpop.permute.xlu0 %3848 }
0x1411   :  { %v3847_v63 = vpop.permute.xlu1 %3846  ;;  %6095 = vmatprep.mubr.bf16.mxu0 %v3672_v22  ;;  %v3673_v2 = vpack.c.bf16 %v3665_v28, %v3664_v31  ;;  %v5460_v22 = vld [vmem:[%s9811_s5 + $0x1a0] sm:$0xff] }
0x1414   :  { %v4166_v54 = vpop.permute.xlu0 %4165 }
0x1415   :  { %v3851_v24 = vpop.permute.xlu1 %3850  ;;  %6131 = vmatprep.subr.bf16.mxu1 %v4166_v54 }
0x1416   :  { %6096 = vmatmul.mubr.bf16.gmra.mrb[96].mxu0 %v3673_v2  ;;  %6132 = vmatpush3.bf16.msra.mxu1 %v4166_v54  ;;  %v5466_v2 = vld [vmem:[%s9811_s5 + $0x1d0] sm:$0xff] }
0x1417   :  { %6115 = vmatprep.mubr.msk.bf16.mxu0 %vm977_vm2, %v3837_v26 }
0x1418   :  { %v4170_v20 = vpop.permute.xlu0 %4169 }
0x1419   :  { %v4168_v57 = vpop.permute.xlu1 %4167 }
0x141a   :  { %6133 = vmatprep.subr.bf16.mxu1 %v4168_v57 }
0x141b   :  { %6134 = vmatpush3.bf16.msra.mxu1 %v4168_v57 }
0x141c   :  { %6135 = vmatprep.subr.bf16.mxu1 %v4170_v20 }
0x141e   :  { %6116 = vmatmul.mubr.msk.bf16.vlgmr.msra.gmra.mrb[100].mxu0 %vm977_vm2, %v3839_v16 }
0x141f   :  { %6119 = vmatprep.mubr.msk.bf16.mxu0 %vm977_vm2, %v3841_v6  ;;  %6136 = vmatpush3.bf16.msra.mxu1 %v4170_v20  ;;  %v5457_v6 = vld [vmem:[%s9811_s5 + $0x188] sm:$0xff] }
0x1426   :  { %6120 = vmatmul.mubr.msk.bf16.gmra.mrb[104].mxu0 %vm977_vm2, %v3843_v42 }
0x1427   :  { %6123 = vmatprep.mubr.msk.bf16.mxu0 %vm977_vm2, %v3845_v10 }
0x142e   :  { %6124 = vmatmul.mubr.msk.bf16.gmra.mrb[108].mxu0 %vm977_vm2, %v3847_v63  ;;  %v5467_v63 = vld [vmem:[%s9811_s5 + $0x1d8] sm:$0xff] }
0x142f   :  { %6127 = vmatprep.mubr.msk.bf16.mxu0 %vm977_vm2, %v3849_v40 }
0x1436   :  { %6128 = vmatmul.mubr.msk.bf16.gmra.mrb[112].mxu0 %vm977_vm2, %v3851_v24 }
0x149b   :  { %v6085_v5 = vpop.f32.mrb[84].mxu0 }
0x149c   :  { %3797 = vst.msk [vmem:[#allocation2 + $0x10] sm:$0xff] %vm977_vm2, %v6085_v5  ;;  %v3732_v25 = vpop.f32.mrb[85].mxu0  ;;  %v5465_v5 = vld [vmem:[%s9811_s5 + $0x1c8] sm:$0xff] }
0x149d   :  { %3795 = vst.msk [vmem:[#allocation2] sm:$0xff] %vm977_vm2, %v3732_v25  ;;  %v6086_v14 = vpop.f32.mrb[86].mxu0 }
0x149e   :  { %3798 = vst.msk [vmem:[#allocation2 + $0x18] sm:$0xff] %vm977_vm2, %v6086_v14  ;;  %v3735_v41 = vpop.f32.mrb[87].mxu0  ;;  %v5464_v14 = vld [vmem:[%s9811_s5 + $0x1c0] sm:$0xff] }
0x149f   :  { %3796 = vst.msk [vmem:[#allocation2 + $0x8] sm:$0xff] %vm977_vm2, %v3735_v41 }
0x14d3   :  { %v6089_v17 = vpop.f32.mrb[88].mxu0 }
0x14d4   :  { %3801 = vst.msk [vmem:[#allocation2 + $0x30] sm:$0xff] %vm977_vm2, %v6089_v17  ;;  %v3748_v38 = vpop.f32.mrb[89].mxu0 }
0x14d5   :  { %3799 = vst.msk [vmem:[#allocation2 + $0x20] sm:$0xff] %vm977_vm2, %v3748_v38  ;;  %v6090_v43 = vpop.f32.mrb[90].mxu0 }
0x14d6   :  { %3802 = vst.msk [vmem:[#allocation2 + $0x38] sm:$0xff] %vm977_vm2, %v6090_v43  ;;  %v3751_v29 = vpop.f32.mrb[91].mxu0 }
0x14d7   :  { %3800 = vst.msk [vmem:[#allocation2 + $0x28] sm:$0xff] %vm977_vm2, %v3751_v29  ;;  %v5470_v29 = vld [vmem:[%s9811_s5 + $0x1f0] sm:$0xff] }
0x14e1   :  { %v6093_v53 = vpop.f32.mrb[92].mxu0 }
0x14e2   :  { %3805 = vst.msk [vmem:[#allocation2 + $0x50] sm:$0xff] %vm977_vm2, %v6093_v53  ;;  %v3764_v27 = vpop.f32.mrb[93].mxu0 }
0x14e3   :  { %3803 = vst.msk [vmem:[#allocation2 + $0x40] sm:$0xff] %vm977_vm2, %v3764_v27  ;;  %v6094_v55 = vpop.f32.mrb[94].mxu0 }
0x14e4   :  { %3806 = vst.msk [vmem:[#allocation2 + $0x58] sm:$0xff] %vm977_vm2, %v6094_v55  ;;  %v3767_v34 = vpop.f32.mrb[95].mxu0 }
0x14e5   :  { %3804 = vst.msk [vmem:[#allocation2 + $0x48] sm:$0xff] %vm977_vm2, %v3767_v34  ;;  %v5468_v34 = vld [vmem:[%s9811_s5 + $0x1e0] sm:$0xff] }
0x14e9   :  { %v6097_v9 = vpop.f32.mrb[96].mxu0 }
0x14ea   :  { %3809 = vst.msk [vmem:[#allocation2 + $0x70] sm:$0xff] %vm977_vm2, %v6097_v9  ;;  %v3780_v18 = vpop.f32.mrb[97].mxu0 }
0x14eb   :  { %3807 = vst.msk [vmem:[#allocation2 + $0x60] sm:$0xff] %vm977_vm2, %v3780_v18  ;;  %v6098_v26 = vpop.f32.mrb[98].mxu0  ;;  %v5471_v18 = vld [vmem:[%s9811_s5 + $0x1f8] sm:$0xff] }
0x14ec   :  { %3810 = vst.msk [vmem:[#allocation2 + $0x78] sm:$0xff] %vm977_vm2, %v6098_v26  ;;  %v3783_v23 = vpop.f32.mrb[99].mxu0 }
0x14ed   :  { %3808 = vst.msk [vmem:[#allocation2 + $0x68] sm:$0xff] %vm977_vm2, %v3783_v23  ;;  %v5469_v23 = vld [vmem:[%s9811_s5 + $0x1e8] sm:$0xff] }
0x14f1   :  { %v6117_v44 = vpop.f32.mrb[100].mxu0 }
0x14f2   :  { %v9097_v59 = vadd.f32 %v6117_v44, %v5458_v19  ;;  %v3950_v50 = vpop.f32.mrb[101].mxu0 }
0x14f3   :  { %v6118_v61 = vpop.f32.mrb[102].mxu0  ;;  %v9108_v48 = vadd.f32 %v5456_v39, %v3950_v50 }
0x14f4   :  { %4017 = vmax.xlane.f32.xlu0 %v9097_v59  ;;  %v3953_v16 = vpop.f32.mrb[103].mxu0  ;;  %v9118_v32 = vadd.f32 %v6118_v61, %v5459_v21 }
0x14f5   :  { %v9106_v13 = vadd.f32 %v5457_v6, %v3953_v16 }
0x14f7   :  { %4015 = vmax.xlane.f32.xlu1 %v9106_v13 }
0x14f8   :  { %4013 = vmax.xlane.f32.xlu0 %v9108_v48 }
0x14f9   :  { %v6121_v36 = vpop.f32.mrb[104].mxu0 }
0x14fa   :  { %v3966_v10 = vpop.f32.mrb[105].mxu0  ;;  %v9129_v60 = vadd.f32 %v6121_v36, %v5462_v7 }
0x14fb   :  { %v6122_v12 = vpop.f32.mrb[106].mxu0  ;;  %v9141_v31 = vadd.f32 %v5460_v22, %v3966_v10 }
0x14fc   :  { %v9123_v42 = vadd.f32 %v6122_v12, %v5463_v45  ;;  %4019 = vmax.xlane.f32.xlu0 %v9118_v32  ;;  %v3969_v0 = vpop.f32.mrb[107].mxu0 }
0x14fd   :  { %v9135_v40 = vadd.f32 %v5461_v3, %v3969_v0 }
0x14fe   :  { %4027 = vmax.xlane.f32.xlu1 %v9123_v42 }
0x1500   :  { %4025 = vmax.xlane.f32.xlu0 %v9129_v60 }
0x1501   :  { %v6125_v28 = vpop.f32.mrb[108].mxu0 }
0x1502   :  { %4023 = vmax.xlane.f32.xlu1 %v9135_v40  ;;  %v3982_v54 = vpop.f32.mrb[109].mxu0  ;;  %v9153_v25 = vadd.f32 %v6125_v28, %v5466_v2 }
0x1503   :  { %v6126_v24 = vpop.f32.mrb[110].mxu0  ;;  %v9162_v38 = vadd.f32 %v5464_v14, %v3982_v54 }
0x1504   :  { %v9147_v57 = vadd.f32 %v6126_v24, %v5467_v63  ;;  %4021 = vmax.xlane.f32.xlu0 %v9141_v31  ;;  %v3985_v20 = vpop.f32.mrb[111].mxu0 }
0x1505   :  { %v9159_v41 = vadd.f32 %v5465_v5, %v3985_v20 }
0x1506   :  { %4035 = vmax.xlane.f32.xlu1 %v9147_v57 }
0x1508   :  { %4033 = vmax.xlane.f32.xlu0 %v9153_v25 }
0x1509   :  { %v6129_v17 = vpop.f32.mrb[112].mxu0 }
0x150a   :  { %4031 = vmax.xlane.f32.xlu1 %v9159_v41  ;;  %v3998_v43 = vpop.f32.mrb[113].mxu0  ;;  %v9169_v55 = vadd.f32 %v6129_v17, %v5470_v29 }
0x150b   :  { %v6130_v53 = vpop.f32.mrb[114].mxu0  ;;  %v9175_v9 = vadd.f32 %v5468_v34, %v3998_v43 }
0x150c   :  { %4029 = vmax.xlane.f32.xlu0 %v9162_v38  ;;  %v4001_v27 = vpop.f32.mrb[115].mxu0  ;;  %v9185_v26 = vadd.f32 %v6130_v53, %v5471_v18 }
0x150d   :  { %v9191_v19 = vadd.f32 %v5469_v23, %v4001_v27 }
0x1510   :  { %4041 = vmax.xlane.f32.xlu0 %v9169_v55 }
0x1514   :  { %4037 = vmax.xlane.f32.xlu0 %v9175_v9 }
0x151b   :  { %4173 = vrot.lane.b32.xlu1 %v8756_v37, %s6804_s4 }
0x152a   :  { %4171 = vrot.lane.b32.xlu0 %v8738_v52, %s6804_s4 }
0x153f   :  { %4043 = vmax.xlane.f32.xlu1 %v9185_v26 }
0x1543   :  { %4039 = vmax.xlane.f32.xlu1 %v9191_v19 }
0x1554   :  { %4175 = vrot.lane.b32.xlu1 %v8754_v51, %s6804_s4 }
0x1581   :  { %v4018_v52 = vpop.xlane.xlu0 %4017 }
0x1582   :  { %v4047_v37 = vsub.f32 %v9097_v59, %v4018_v52 }
0x1584   :  { %v4065_v44 = vmul.f32 1.442695, %v4047_v37  ;;  %v4016_v6 = vpop.xlane.xlu1 %4015 }
0x1585   :  { %v4014_v50 = vpop.xlane.xlu0 %4013  ;;  %v4046_v16 = vsub.f32 %v9106_v13, %v4016_v6 }
0x1586   :  { %6672 = vpow2.f32 %v4065_v44  ;;  %v4045_v39 = vsub.f32 %v9108_v48, %v4014_v50 }
0x1587   :  { %v4063_v7 = vmul.f32 1.442695, %v4046_v16 }
0x1588   :  { %v4061_v61 = vmul.f32 1.442695, %v4045_v39 }
0x1589   :  { %v4020_v21 = vpop.xlane.xlu0 %4019 }
0x158a   :  { %6674 = vpow2.f32 %v4061_v61  ;;  %v4048_v36 = vsub.f32 %v9118_v32, %v4020_v21 }
0x158b   :  { %v4028_v45 = vpop.xlane.xlu1 %4027 }
0x158c   :  { %v4067_v10 = vmul.f32 1.442695, %v4048_v36  ;;  %v4052_v22 = vsub.f32 %v9123_v42, %v4028_v45 }
0x158d   :  { %v4026_v51 = vpop.xlane.xlu0 %4025 }
0x158e   :  { %6676 = vpow2.f32 %v4067_v10  ;;  %v4051_v59 = vsub.f32 %v9129_v60, %v4026_v51  ;;  %v4075_v24 = vmul.f32 1.442695, %v4052_v22 }
0x158f   :  { %v4024_v12 = vpop.xlane.xlu1 %4023  ;;  %6678 = vpow2.f32 %v4063_v7 }
0x1590   :  { %v9201_v0 = vpop.eup %6672  ;;  %v4073_v3 = vmul.f32 1.442695, %v4051_v59  ;;  %v4050_v48 = vsub.f32 %v9135_v40, %v4024_v12 }
0x1591   :  { %4097 = vadd.xlane.f32.xlu1 %v9201_v0  ;;  %v4022_v13 = vpop.xlane.xlu0 %4021 }
0x1592   :  { %6680 = vpow2.f32 %v4073_v3  ;;  %v4071_v32 = vmul.f32 1.442695, %v4050_v48  ;;  %v4049_v28 = vsub.f32 %v9141_v31, %v4022_v13 }
0x1593   :  { %v4036_v60 = vpop.xlane.xlu1 %4035 }
0x1594   :  { %v9207_v63 = vpop.eup %6674  ;;  %v4069_v54 = vmul.f32 1.442695, %v4049_v28  ;;  %6682 = vpow2.f32 %v4071_v32  ;;  %v4056_v42 = vsub.f32 %v9147_v57, %v4036_v60 }
0x1595   :  { %4093 = vadd.xlane.f32.xlu1 %v9207_v63  ;;  %v4034_v2 = vpop.xlane.xlu0 %4033 }
0x1596   :  { %6684 = vpow2.f32 %v4069_v54  ;;  %v4055_v40 = vsub.f32 %v9153_v25, %v4034_v2  ;;  %v4083_v27 = vmul.f32 1.442695, %v4056_v42 }
0x1597   :  { %6686 = vpow2.f32 %v4075_v24  ;;  %v4032_v14 = vpop.xlane.xlu1 %4031 }
0x1598   :  { %v9211_v20 = vpop.eup %6676  ;;  %v4081_v5 = vmul.f32 1.442695, %v4055_v40  ;;  %v4054_v25 = vsub.f32 %v9159_v41, %v4032_v14 }
0x1599   :  { %4099 = vadd.xlane.f32.xlu1 %v9211_v20  ;;  %v4030_v31 = vpop.xlane.xlu0 %4029  ;;  %v9216_v43 = vpop.eup %6678 }
0x159a   :  { %v4053_v17 = vsub.f32 %v9162_v38, %v4030_v31  ;;  %6688 = vpow2.f32 %v4081_v5  ;;  %v4079_v52 = vmul.f32 1.442695, %v4054_v25 }
0x159b   :  { %v4174_v39 = vpop.permute.xlu1 %4173 }
0x159c   :  { %v9218_v29 = vpop.eup %6680  ;;  %v4077_v53 = vmul.f32 1.442695, %v4053_v17 }
0x159d   :  { %4095 = vadd.xlane.f32.xlu1 %v9216_v43  ;;  %4105 = vadd.xlane.f32.xlu0 %v9218_v29  ;;  %v4042_v57 = vpop.xlane.xlu0 %4041 }
0x159e   :  { %6690 = vpow2.f32 %v4077_v53  ;;  %v4059_v34 = vsub.f32 %v9169_v55, %v4042_v57  ;;  %v9224_v18 = vpop.eup %6682 }
0x159f   :  { %6692 = vpow2.f32 %v4083_v27 }
0x15a0   :  { %v9226_v38 = vpop.eup %6684  ;;  %v4089_v23 = vmul.f32 1.442695, %v4059_v34 }
0x15a1   :  { %4103 = vadd.xlane.f32.xlu1 %v9224_v18  ;;  %4101 = vadd.xlane.f32.xlu0 %v9226_v38  ;;  %v4038_v41 = vpop.xlane.xlu0 %4037  ;;  %v9231_v44 = vpop.eup %6686 }
0x15a2   :  { %6694 = vpow2.f32 %v4089_v23  ;;  %v4057_v37 = vsub.f32 %v9175_v9, %v4038_v41 }
0x15a3   :  { %6696 = vpow2.f32 %v4079_v52 }
0x15a4   :  { %v4085_v50 = vmul.f32 1.442695, %v4057_v37  ;;  %v9234_v6 = vpop.eup %6688 }
0x15a5   :  { %4107 = vadd.xlane.f32.xlu0 %v9231_v44  ;;  %v4172_v55 = vpop.permute.xlu0 %4171 }
0x15a6   :  { %6698 = vpow2.f32 %v4085_v50  ;;  %6137 = vmatprep.subr.bf16.mxu1 %v4172_v55 }
0x15a7   :  { %6138 = vmatpush3.bf16.msra.mxu1 %v4172_v55 }
0x15a8   :  { %v9236_v61 = vpop.eup %6690  ;;  %6139 = vmatprep.subr.bf16.mxu1 %v4174_v39 }
0x15a9   :  { %4113 = vadd.xlane.f32.xlu0 %v9234_v6  ;;  %4109 = vadd.xlane.f32.xlu1 %v9236_v61  ;;  %v9240_v9 = vpop.eup %6692 }
0x15ab   :  { %6140 = vmatpush3.bf16.msra.mxu1 %v4174_v39 }
0x15ac   :  { %v9242_v16 = vpop.eup %6694 }
0x15ad   :  { %4115 = vadd.xlane.f32.xlu0 %v9240_v9  ;;  %4121 = vadd.xlane.f32.xlu1 %v9242_v16  ;;  %v9246_v21 = vpop.eup %6696 }
0x15b0   :  { %v9248_v36 = vpop.eup %6698 }
0x15b1   :  { %4111 = vadd.xlane.f32.xlu0 %v9246_v21  ;;  %4117 = vadd.xlane.f32.xlu1 %v9248_v36 }
0x15c2   :  { %4179 = vrot.lane.b32.xlu1 %v8770_v30, %s6804_s4 }
0x15c7   :  { %4177 = vrot.lane.b32.xlu0 %v8772_v47, %s6804_s4 }
0x15cc   :  { %v4044_v45 = vpop.xlane.xlu1 %4043 }
0x15cd   :  { %v4060_v59 = vsub.f32 %v9185_v26, %v4044_v45 }
0x15cf   :  { %v4091_v3 = vmul.f32 1.442695, %v4060_v59 }
0x15d0   :  { %v4040_v10 = vpop.xlane.xlu1 %4039 }
0x15d1   :  { %v4058_v7 = vsub.f32 %v9191_v19, %v4040_v10 }
0x15d3   :  { %v4087_v12 = vmul.f32 1.442695, %v4058_v7 }
0x15d4   :  { %v4176_v51 = vpop.permute.xlu1 %4175 }
0x15d5   :  { %6141 = vmatprep.subr.bf16.mxu1 %v4176_v51  ;;  %6700 = vpow2.f32 %v4087_v12 }
0x15d6   :  { %6142 = vmatpush3.bf16.msra.mxu1 %v4176_v51  ;;  %6702 = vpow2.f32 %v4091_v3 }
0x15df   :  { %v9258_v48 = vpop.eup %6700 }
0x15e0   :  { %v9261_v30 = vpop.eup %6702 }
0x15e6   :  { %4119 = vadd.xlane.f32.xlu0 %v9258_v48 }
0x15ea   :  { %4123 = vadd.xlane.f32.xlu0 %v9261_v30 }
0x161e   :  { %v4098_v47 = vpop.xlane.xlu1 %4097 }
0x1622   :  { %v4094_v13 = vpop.xlane.xlu1 %4093 }
0x1623   :  { %6704 = vrcp.f32 %v4094_v13 }
0x1626   :  { %v4100_v19 = vpop.xlane.xlu1 %4099 }
0x162a   :  { %v4096_v22 = vpop.xlane.xlu1 %4095  ;;  %v4106_v32 = vpop.xlane.xlu0 %4105 }
0x162b   :  { %6706 = vrcp.f32 %v4096_v22 }
0x162c   :  { %6708 = vrcp.f32 %v4100_v19 }
0x162d   :  { %v6705_v60 = vpop.eup %6704 }
0x162e   :  { %v4102_v26 = vpop.xlane.xlu0 %4101  ;;  %v4104_v28 = vpop.xlane.xlu1 %4103  ;;  %v4141_v42 = vmul.f32 %v6705_v60, %v9207_v63 }
0x162f   :  { %6710 = vrcp.f32 %v4104_v28 }
0x1630   :  { %6712 = vrcp.f32 %v4102_v26 }
0x1631   :  { %6714 = vrcp.f32 %v4098_v47 }
0x1632   :  { %v4108_v54 = vpop.xlane.xlu0 %4107 }
0x1633   :  { %6716 = vrcp.f32 %v4108_v54 }
0x1635   :  { %v6707_v2 = vpop.eup %6706 }
0x1636   :  { %v4110_v24 = vpop.xlane.xlu1 %4109  ;;  %v4114_v40 = vpop.xlane.xlu0 %4113  ;;  %v4142_v5 = vmul.f32 %v6707_v2, %v9216_v43 }
0x1637   :  { %v6709_v25 = vpop.eup %6708 }
0x1638   :  { %v4157_v31 = vpack.c.bf16 %v4142_v5, %v4141_v42  ;;  %v4144_v52 = vmul.f32 %v6709_v25, %v9211_v20 }
0x1639   :  { %v6711_v57 = vpop.eup %6710 }
0x163a   :  { %6147 = vmatprep.mubr.bf16.mxu1 %v4157_v31  ;;  %v4122_v14 = vpop.xlane.xlu1 %4121  ;;  %v4116_v17 = vpop.xlane.xlu0 %4115  ;;  %v4146_v37 = vmul.f32 %v6711_v57, %v9224_v18 }
0x163b   :  { %v6713_v23 = vpop.eup %6712 }
0x163c   :  { %v6715_v63 = vpop.eup %6714  ;;  %v4145_v41 = vmul.f32 %v6713_v23, %v9226_v38 }
0x163d   :  { %v4143_v50 = vmul.f32 %v6715_v63, %v9201_v0  ;;  %v6717_v39 = vpop.eup %6716 }
0x163e   :  { %v4118_v53 = vpop.xlane.xlu1 %4117  ;;  %v4112_v27 = vpop.xlane.xlu0 %4111  ;;  %v4159_v45 = vpack.c.bf16 %v4146_v37, %v4145_v41  ;;  %v4148_v20 = vmul.f32 %v6717_v39, %v9231_v44 }
0x163f   :  { %6718 = vrcp.f32 %v4112_v27  ;;  %v4158_v55 = vpack.c.bf16 %v4144_v52, %v4143_v50 }
0x1640   :  { %6720 = vrcp.f32 %v4106_v32 }
0x1641   :  { %6722 = vrcp.f32 %v4110_v24  ;;  %v6308_v24 = vld [vmem:[%s9812_s10 + $0x10] sm:$0xff]  }
0x1642   :  { %v4178_v34 = vpop.permute.xlu0 %4177  ;;  %v4180_v43 = vpop.permute.xlu1 %4179  ;;  %6724 = vrcp.f32 %v4116_v17 }
0x1643   :  { %6143 = vmatprep.subr.bf16.mxu1 %v4178_v34  ;;  %6726 = vrcp.f32 %v4114_v40 }
0x1644   :  { %6144 = vmatpush3.bf16.msra.mxu1 %v4178_v34  ;;  %6728 = vrcp.f32 %v4118_v53 }
0x1645   :  { %6145 = vmatprep.subr.bf16.mxu1 %v4180_v43 }
0x1648   :  { %6146 = vmatpush3.bf16.msra.mxu1 %v4180_v43 }
0x1649   :  { %v6719_v10 = vpop.eup %6718  ;;  %6163 = vmatprep.subr.bf16.mxu1 %v6308_v24 }
0x164a   :  { %v6721_v7 = vpop.eup %6720  ;;  %v4150_v59 = vmul.f32 %v6719_v10, %v9246_v21 }
0x164b   :  { %6148 = vmatmul.mubr.bf16.vlgmr.msra.gmra.mrb[92].mxu1 %v4158_v55  ;;  %v6723_v51 = vpop.eup %6722  ;;  %v4147_v38 = vmul.f32 %v6721_v7, %v9218_v29 }
0x164c   :  { %6151 = vmatprep.mubr.bf16.mxu1 %v4159_v45  ;;  %v4149_v18 = vmul.f32 %v6723_v51, %v9236_v61  ;;  %v6725_v12 = vpop.eup %6724  ;;  %6164 = vmatpush3.bf16.msra.mxu1 %v6308_v24 }
0x164d   :  { %v4160_v0 = vpack.c.bf16 %v4148_v20, %v4147_v38  ;;  %v6727_v47 = vpop.eup %6726  ;;  %v4152_v13 = vmul.f32 %v6725_v12, %v9240_v9 }
0x164e   :  { %v4161_v3 = vpack.c.bf16 %v4150_v59, %v4149_v18  ;;  %v4151_v19 = vmul.f32 %v6727_v47, %v9234_v6  ;;  %v6729_v29 = vpop.eup %6728 }
0x164f   :  { %v4153_v32 = vmul.f32 %v6729_v29, %v9248_v36 }
0x1650   :  { %v4162_v22 = vpack.c.bf16 %v4152_v13, %v4151_v19 }
0x1653   :  { %6152 = vmatmul.mubr.bf16.gmra.mrb[96].mxu1 %v4160_v0 }
0x1654   :  { %6155 = vmatprep.mubr.bf16.mxu1 %v4161_v3 }
0x165b   :  { %6156 = vmatmul.mubr.bf16.gmra.mrb[100].mxu1 %v4162_v22 }
0x1673   :  { %v4120_v44 = vpop.xlane.xlu0 %4119 }
0x1674   :  { %6730 = vrcp.f32 %v4120_v44 }
0x1675   :  { %6732 = vrcp.f32 %v4122_v14 }
0x1677   :  { %v4124_v21 = vpop.xlane.xlu0 %4123 }
0x1678   :  { %6734 = vrcp.f32 %v4124_v21 }
0x167e   :  { %v6731_v61 = vpop.eup %6730 }
0x167f   :  { %v4154_v26 = vmul.f32 %v6731_v61, %v9258_v48  ;;  %v6733_v28 = vpop.eup %6732  ;;  %v6309_v48 = vld [vmem:[%s9812_s10 + $0x18] sm:$0xff]  }
0x1680   :  { %v4155_v6 = vmul.f32 %v6733_v28, %v9242_v16  ;;  %6165 = vmatprep.subr.bf16.mxu1 %v6309_v48 }
0x1681   :  { %v4163_v54 = vpack.c.bf16 %v4154_v26, %v4153_v32  ;;  %6166 = vmatpush3.bf16.msra.mxu1 %v6309_v48 }
0x1682   :  { %v6735_v60 = vpop.eup %6734 }
0x1683   :  { %6159 = vmatprep.mubr.bf16.mxu1 %v4163_v54  ;;  %v4156_v9 = vmul.f32 %v6735_v60, %v9261_v30 }
0x1685   :  { %v4164_v2 = vpack.c.bf16 %v4156_v9, %v4155_v6 }
0x1687   :  { %6160 = vmatmul.mubr.bf16.gmra.mrb[104].mxu1 %v4164_v2 }
0x171e   :  { %v6149_v40 = vpop.f32.mrb[92].mxu1 }
0x171f   :  { %4306 = vrot.lane.b32.xlu1 %v6149_v40, %s6805_s19  ;;  %v4223_v36 = vpop.f32.mrb[93].mxu1 }
0x1720   :  { %4302 = vrot.lane.b32.xlu0 %v4223_v36, %s6805_s19  ;;  %v6150_v16 = vpop.f32.mrb[94].mxu1 }
0x1721   :  { %v4226_v30 = vpop.f32.mrb[95].mxu1 }
0x1723   :  { %4304 = vrot.lane.b32.xlu1 %v4226_v30, %s6805_s19 }
0x1726   :  { %v6153_v42 = vpop.f32.mrb[96].mxu1 }
0x1727   :  { %4308 = vrot.lane.b32.xlu1 %v6150_v16, %s6805_s19  ;;  %v4239_v5 = vpop.f32.mrb[97].mxu1 }
0x1728   :  { %4310 = vrot.lane.b32.xlu0 %v4239_v5, %s6805_s19  ;;  %v6154_v31 = vpop.f32.mrb[98].mxu1 }
0x1729   :  { %v4242_v14 = vpop.f32.mrb[99].mxu1 }
0x172b   :  { %4312 = vrot.lane.b32.xlu1 %v4242_v14, %s6805_s19 }
0x172c   :  { %4314 = vrot.lane.b32.xlu0 %v6153_v42, %s6805_s19  ;;  %v9329_v42 = vld [vmem:[%s9813_s11 + $0x1] ss:$0 sm:$0xff] }
0x172e   :  { %v6157_v17 = vpop.f32.mrb[100].mxu1 }
0x172f   :  { %4316 = vrot.lane.b32.xlu1 %v6154_v31, %s6805_s19  ;;  %v4255_v53 = vpop.f32.mrb[101].mxu1 }
0x1730   :  { %4318 = vrot.lane.b32.xlu0 %v4255_v53, %s6805_s19  ;;  %v6158_v27 = vpop.f32.mrb[102].mxu1 }
0x1731   :  { %v4258_v25 = vpop.f32.mrb[103].mxu1 }
0x1733   :  { %4320 = vrot.lane.b32.xlu1 %v4258_v25, %s6805_s19 }
0x1734   :  { %4322 = vrot.lane.b32.xlu0 %v6157_v17, %s6805_s19 }
0x1737   :  { %4324 = vrot.lane.b32.xlu1 %v6158_v27, %s6805_s19 }
0x175a   :  { %v6161_v57 = vpop.f32.mrb[104].mxu1 }
0x175b   :  { %v4271_v34 = vpop.f32.mrb[105].mxu1 }
0x175c   :  { %4326 = vrot.lane.b32.xlu0 %v4271_v34, %s6805_s19  ;;  %v6162_v23 = vpop.f32.mrb[106].mxu1 }
0x175d   :  { %v4274_v63 = vpop.f32.mrb[107].mxu1 }
0x175e   :  { %4328 = vrot.lane.b32.xlu1 %v4274_v63, %s6805_s19 }
0x1760   :  { %4330 = vrot.lane.b32.xlu0 %v6161_v57, %s6805_s19 }
0x1762   :  { %4332 = vrot.lane.b32.xlu1 %v6162_v23, %s6805_s19 }
0x1791   :  { %v4307_v43 = vpop.permute.xlu1 %4306 }
0x1792   :  { %4352 = vst.msk [vmem:[#allocation2 + $0x10] sm:$0xff] %vm1951_vm3, %v4307_v43  ;;  %v4303_v52 = vpop.permute.xlu0 %4302 }
0x1793   :  { %4350 = vst.msk [vmem:[#allocation2] sm:$0xff] %vm1951_vm3, %v4303_v52 }
0x1795   :  { %v4305_v41 = vpop.permute.xlu1 %4304 }
0x1796   :  { %4351 = vst.msk [vmem:[#allocation2 + $0x8] sm:$0xff] %vm1951_vm3, %v4305_v41 }
0x1799   :  { %v4309_v37 = vpop.permute.xlu1 %4308  ;;  %v4368_v20 = vld [vmem:[#allocation2 + $0x10] sm:$0xff] }
0x179a   :  { %4353 = vst.msk [vmem:[#allocation2 + $0x18] sm:$0xff] %vm1951_vm3, %v4309_v37  ;;  %v4311_v50 = vpop.permute.xlu0 %4310  ;;  %v4366_v39 = vld [vmem:[#allocation2] sm:$0xff] }
0x179b   :  { %4354 = vst.msk [vmem:[#allocation2 + $0x20] sm:$0xff] %vm1951_vm3, %v4311_v50 }
0x179d   :  { %v4313_v55 = vpop.permute.xlu1 %4312  ;;  %v4367_v45 = vld [vmem:[#allocation2 + $0x8] sm:$0xff] }
0x179e   :  { %4355 = vst.msk [vmem:[#allocation2 + $0x28] sm:$0xff] %vm1951_vm3, %v4313_v55  ;;  %v4315_v10 = vpop.permute.xlu0 %4314  ;;  %v4382_v7 = vpack.c.bf16 %v4367_v45, %v4366_v39 }
0x179f   :  { %4356 = vst.msk [vmem:[#allocation2 + $0x30] sm:$0xff] %vm1951_vm3, %v4315_v10 }
0x17a0   :  { %6167 = vmatprep.mubr.msk.bf16.mxu1 %vm245_vm1, %v4382_v7 }
0x17a1   :  { %v4317_v51 = vpop.permute.xlu1 %4316  ;;  %v4369_v59 = vld [vmem:[#allocation2 + $0x18] sm:$0xff] }
0x17a2   :  { %4357 = vst.msk [vmem:[#allocation2 + $0x38] sm:$0xff] %vm1951_vm3, %v4317_v51  ;;  %v4319_v38 = vpop.permute.xlu0 %4318  ;;  %v4383_v18 = vpack.c.bf16 %v4369_v59, %v4368_v20  ;;  %v4370_v12 = vld [vmem:[#allocation2 + $0x20] sm:$0xff] }
0x17a3   :  { %4358 = vst.msk [vmem:[#allocation2 + $0x40] sm:$0xff] %vm1951_vm3, %v4319_v38 }
0x17a4   :  { %6168 = vmatmul.mubr.msk.bf16.vlgmr.msra.gmra.mrb[108].mxu1 %vm245_vm1, %v4383_v18 }
0x17a5   :  { %v4321_v0 = vpop.permute.xlu1 %4320  ;;  %v4371_v3 = vld [vmem:[#allocation2 + $0x28] sm:$0xff] }
0x17a6   :  { %4359 = vst.msk [vmem:[#allocation2 + $0x48] sm:$0xff] %vm1951_vm3, %v4321_v0  ;;  %v4323_v47 = vpop.permute.xlu0 %4322  ;;  %v4384_v13 = vpack.c.bf16 %v4371_v3, %v4370_v12  ;;  %v4372_v22 = vld [vmem:[#allocation2 + $0x30] sm:$0xff] }
0x17a7   :  { %4360 = vst.msk [vmem:[#allocation2 + $0x50] sm:$0xff] %vm1951_vm3, %v4323_v47 }
0x17a8   :  { %6171 = vmatprep.mubr.msk.bf16.mxu1 %vm245_vm1, %v4384_v13 }
0x17a9   :  { %v4325_v19 = vpop.permute.xlu1 %4324  ;;  %v4373_v44 = vld [vmem:[#allocation2 + $0x38] sm:$0xff] }
0x17aa   :  { %4361 = vst.msk [vmem:[#allocation2 + $0x58] sm:$0xff] %vm1951_vm3, %v4325_v19  ;;  %v4385_v21 = vpack.c.bf16 %v4373_v44, %v4372_v22  ;;  %v4374_v29 = vld [vmem:[#allocation2 + $0x40] sm:$0xff] }
0x17ac   :  { %6172 = vmatmul.mubr.msk.bf16.gmra.mrb[112].mxu1 %vm245_vm1, %v4385_v21 }
0x17ad   :  { %v4375_v61 = vld [vmem:[#allocation2 + $0x48] sm:$0xff] }
0x17ae   :  { %v4386_v32 = vpack.c.bf16 %v4375_v61, %v4374_v29  ;;  %v4376_v26 = vld [vmem:[#allocation2 + $0x50] sm:$0xff] }
0x17b0   :  { %6175 = vmatprep.mubr.msk.bf16.mxu1 %vm245_vm1, %v4386_v32 }
0x17b1   :  { %v4377_v28 = vld [vmem:[#allocation2 + $0x58] sm:$0xff] }
0x17b2   :  { %v4387_v54 = vpack.c.bf16 %v4377_v28, %v4376_v26 }
0x17b4   :  { %6176 = vmatmul.mubr.msk.bf16.gmra.mrb[116].mxu1 %vm245_vm1, %v4387_v54 }
0x17ce   :  { %v4327_v60 = vpop.permute.xlu0 %4326 }
0x17cf   :  { %4362 = vst.msk [vmem:[#allocation2 + $0x60] sm:$0xff] %vm1951_vm3, %v4327_v60 }
0x17d0   :  { %v4329_v6 = vpop.permute.xlu1 %4328 }
0x17d1   :  { %4363 = vst.msk [vmem:[#allocation2 + $0x68] sm:$0xff] %vm1951_vm3, %v4329_v6 }
0x17d2   :  { %v4331_v9 = vpop.permute.xlu0 %4330 }
0x17d3   :  { %4364 = vst.msk [vmem:[#allocation2 + $0x70] sm:$0xff] %vm1951_vm3, %v4331_v9  ;;  %v9849_v9 = vld [vmem:[#allocation3_spill] sm:$0xff] }
0x17d4   :  { %v4333_v2 = vpop.permute.xlu1 %4332 }
0x17d5   :  { %4365 = vst.msk [vmem:[#allocation2 + $0x78] sm:$0xff] %vm1951_vm3, %v4333_v2 }
0x17d6   :  { %v4378_v24 = vld [vmem:[#allocation2 + $0x60] sm:$0xff] }
0x17d8   :  { %v4379_v40 = vld [vmem:[#allocation2 + $0x68] sm:$0xff] }
0x17d9   :  { %v4388_v36 = vpack.c.bf16 %v4379_v40, %v4378_v24  ;;  %v9850_v40 = vld [vmem:[#allocation5_spill] sm:$0xff] }
0x17da   :  { %v4380_v48 = vld [vmem:[#allocation2 + $0x70] sm:$0xff] }
0x17db   :  { %6179 = vmatprep.mubr.msk.bf16.mxu1 %vm245_vm1, %v4388_v36 }
0x17dc   :  { %v4381_v16 = vld [vmem:[#allocation2 + $0x78] sm:$0xff] }
0x17dd   :  { %v4389_v30 = vpack.c.bf16 %v4381_v16, %v4380_v48  ;;  %v9851_v48 = vld [vmem:[#allocation4_spill] sm:$0xff] }
0x17df   :  { %6180 = vmatmul.mubr.msk.bf16.gmra.mrb[120].mxu1 %vm245_vm1, %v4389_v30 }
0x1877   :  { %v6169_v5 = vpop.f32.mrb[108].mxu1 }
0x1878   :  { %v4473_v31 = vpop.f32.mrb[109].mxu1  ;;  %v4482_v14 = vadd.f32 %v6169_v5, %v9329_v42  ;;  %v9852_v5 = vld [vmem:[#allocation6_spill] sm:$0xff] }
0x1879   :  { %v4474_v17 = vadd.f32 %v9329_v42, %v4473_v31  ;;  %v6170_v53 = vpop.f32.mrb[110].mxu1 }
0x187a   :  { %v4476_v27 = vpop.f32.mrb[111].mxu1  ;;  %v9338_v34 = vadd.f32 %v4482_v14, %v8455_v62  ;;  %v4485_v23 = vadd.f32 %v6170_v53, %v9329_v42 }
0x187b   :  { %v9334_v25 = vadd.f32 %v4474_v17, %v8450_v49  ;;  %v4477_v57 = vadd.f32 %v9329_v42, %v4476_v27 }
0x187c   :  { %v9349_v37 = vadd.f32 %v4485_v23, %v8463_v56 }
0x187d   :  { %v9342_v63 = vadd.f32 %v4477_v57, %v8458_v58  ;;  %v4556_v43 = vsel %vm245_vm1, %v9334_v25, 0.0  ;;  %v4562_v58 = vsel %vm245_vm1, %v9338_v34, 0.0 }
0x187e   :  { %4557 = vadd.xlane.f32.xlu0 %v4556_v43  ;;  %v4565_v51 = vsel %vm245_vm1, %v9349_v37, 0.0 }
0x187f   :  { %v6173_v52 = vpop.f32.mrb[112].mxu1  ;;  %v4559_v41 = vsel %vm245_vm1, %v9342_v63, 0.0 }
0x1880   :  { %4560 = vadd.xlane.f32.xlu1 %v4559_v41  ;;  %v4489_v49 = vpop.f32.mrb[113].mxu1  ;;  %v4498_v10 = vadd.f32 %v6173_v52, %v9329_v42 }
0x1881   :  { %v4490_v62 = vadd.f32 %v9329_v42, %v4489_v49  ;;  %v6174_v50 = vpop.f32.mrb[114].mxu1 }
0x1882   :  { %4563 = vadd.xlane.f32.xlu0 %v4562_v58  ;;  %v4492_v55 = vpop.f32.mrb[115].mxu1  ;;  %v4501_v39 = vadd.f32 %v6174_v50, %v9329_v42  ;;  %v9371_v0 = vadd.f32 %v4498_v10, %v8479_v1 }
0x1883   :  { %v4493_v45 = vadd.f32 %v9329_v42, %v4492_v55  ;;  %v9358_v7 = vadd.f32 %v4490_v62, %v8474_v4 }
0x1884   :  { %v9366_v20 = vadd.f32 %v4501_v39, %v8487_v8  ;;  %v4574_v44 = vsel %vm245_vm1, %v9371_v0, 0.0 }
0x1885   :  { %v9361_v56 = vadd.f32 %v4493_v45, %v8482_v35  ;;  %v4568_v12 = vsel %vm245_vm1, %v9358_v7, 0.0 }
0x1886   :  { %4566 = vadd.xlane.f32.xlu0 %v4565_v51  ;;  %v4577_v13 = vsel %vm245_vm1, %v9366_v20, 0.0 }
0x1887   :  { %v6177_v59 = vpop.f32.mrb[116].mxu1  ;;  %v4571_v38 = vsel %vm245_vm1, %v9361_v56, 0.0 }
0x1888   :  { %4572 = vadd.xlane.f32.xlu1 %v4571_v38  ;;  %v4505_v18 = vpop.f32.mrb[117].mxu1  ;;  %v4514_v19 = vadd.f32 %v6177_v59, %v9329_v42 }
0x1889   :  { %v4506_v4 = vadd.f32 %v9329_v42, %v4505_v18  ;;  %v6178_v35 = vpop.f32.mrb[118].mxu1 }
0x188a   :  { %4569 = vadd.xlane.f32.xlu0 %v4568_v12  ;;  %v4508_v3 = vpop.f32.mrb[119].mxu1  ;;  %v4517_v8 = vadd.f32 %v6178_v35, %v9329_v42  ;;  %v9395_v61 = vadd.f32 %v4514_v19, %v8503_v46 }
0x188b   :  { %v4509_v47 = vadd.f32 %v9329_v42, %v4508_v3  ;;  %v9382_v1 = vadd.f32 %v4506_v4, %v8498_v11 }
0x188c   :  { %4578 = vadd.xlane.f32.xlu1 %v4577_v13  ;;  %v9390_v21 = vadd.f32 %v4517_v8, %v8511_v33  ;;  %v4586_v32 = vsel %vm245_vm1, %v9395_v61, 0.0 }
0x188d   :  { %v9385_v22 = vadd.f32 %v4509_v47, %v8506_v15  ;;  %v4580_v11 = vsel %vm245_vm1, %v9382_v1, 0.0 }
0x188e   :  { %4575 = vadd.xlane.f32.xlu0 %v4574_v44  ;;  %v4589_v15 = vsel %vm245_vm1, %v9390_v21, 0.0 }
0x188f   :  { %v4583_v29 = vsel %vm245_vm1, %v9385_v22, 0.0 }
0x1890   :  { %4584 = vadd.xlane.f32.xlu1 %v4583_v29 }
0x1892   :  { %4581 = vadd.xlane.f32.xlu0 %v4580_v11 }
0x1894   :  { %4590 = vadd.xlane.f32.xlu1 %v4589_v15 }
0x1896   :  { %4587 = vadd.xlane.f32.xlu0 %v4586_v32 }
0x18b2   :  { %v6181_v33 = vpop.f32.mrb[120].mxu1 }
0x18b3   :  { %v4521_v26 = vpop.f32.mrb[121].mxu1  ;;  %v4530_v28 = vadd.f32 %v6181_v33, %v9329_v42 }
0x18b4   :  { %v4522_v54 = vadd.f32 %v9329_v42, %v4521_v26  ;;  %v6182_v46 = vpop.f32.mrb[122].mxu1 }
0x18b5   :  { %v4533_v60 = vadd.f32 %v6182_v46, %v9329_v42  ;;  %v4524_v6 = vpop.f32.mrb[123].mxu1  ;;  %v9411_v36 = vadd.f32 %v4530_v28, %v9850_v40 }
0x18b6   :  { %v9407_v2 = vadd.f32 %v4522_v54, %v9849_v9  ;;  %v4525_v24 = vadd.f32 %v9329_v42, %v4524_v6 }
0x18b7   :  { %v9419_v31 = vadd.f32 %v4533_v60, %v9852_v5  ;;  %v4598_v42 = vsel %vm245_vm1, %v9411_v36, 0.0 }
0x18b8   :  { %v9414_v16 = vadd.f32 %v4525_v24, %v9851_v48  ;;  %v4592_v30 = vsel %vm245_vm1, %v9407_v2, 0.0 }
0x18b9   :  { %4593 = vadd.xlane.f32.xlu0 %v4592_v30  ;;  %v4601_v17 = vsel %vm245_vm1, %v9419_v31, 0.0 }
0x18ba   :  { %v4595_v14 = vsel %vm245_vm1, %v9414_v16, 0.0 }
0x18bb   :  { %4596 = vadd.xlane.f32.xlu1 %v4595_v14 }
0x18bd   :  { %4599 = vadd.xlane.f32.xlu0 %v4598_v42 }
0x18bf   :  { %4602 = vadd.xlane.f32.xlu1 %v4601_v17 }
0x190b   :  { %v4558_v53 = vpop.xlane.xlu0 %4557 }
0x190c   :  { %v4604_v27 = vmul.f32 0.03125, %v4558_v53 }
0x190d   :  { %v4561_v57 = vpop.xlane.xlu1 %4560 }
0x190e   :  { %v9428_v23 = vsub.f32 %v9334_v25, %v4604_v27  ;;  %v4605_v43 = vmul.f32 0.03125, %v4561_v57 }
0x190f   :  { %v4564_v52 = vpop.xlane.xlu0 %4563 }
0x1910   :  { %v9431_v41 = vsub.f32 %v9342_v63, %v4605_v43  ;;  %v4606_v49 = vmul.f32 0.03125, %v4564_v52  ;;  %v4636_v62 = vmul.f32 %v9428_v23, %v9428_v23 }
0x1912   :  { %v9436_v50 = vsub.f32 %v9338_v34, %v4606_v49  ;;  %v4652_v58 = vsel %vm245_vm1, %v4636_v62, 0.0  ;;  %v4637_v55 = vmul.f32 %v9431_v41, %v9431_v41 }
0x1913   :  { %4653 = vadd.xlane.f32.xlu0 %v4652_v58  ;;  %v4567_v39 = vpop.xlane.xlu0 %4566 }
0x1914   :  { %v4607_v45 = vmul.f32 0.03125, %v4567_v39  ;;  %v4655_v10 = vsel %vm245_vm1, %v4637_v55, 0.0  ;;  %v4638_v51 = vmul.f32 %v9436_v50, %v9436_v50 }
0x1915   :  { %v4573_v59 = vpop.xlane.xlu1 %4572  ;;  %4656 = vadd.xlane.f32.xlu1 %v4655_v10 }
0x1916   :  { %v9445_v38 = vsub.f32 %v9349_v37, %v4607_v45  ;;  %v4609_v18 = vmul.f32 0.03125, %v4573_v59  ;;  %v4658_v4 = vsel %vm245_vm1, %v4638_v51, 0.0  ;;  %v6310_v51 = vld [vmem:[%s9814_s14 + $0x10] sm:$0xff]   ;;  %v6311_v59 = vld [vmem:[%s9814_s14 + $0x18] sm:$0xff]  }
0x1917   :  { %4659 = vadd.xlane.f32.xlu0 %v4658_v4  ;;  %v4570_v35 = vpop.xlane.xlu0 %4569  ;;  %6183 = vmatprep.subr.bf16.mxu0 %v6310_v51 }
0x1918   :  { %v9449_v12 = vsub.f32 %v9361_v56, %v4609_v18  ;;  %v4608_v3 = vmul.f32 0.03125, %v4570_v35  ;;  %v4639_v8 = vmul.f32 %v9445_v38, %v9445_v38  ;;  %6184 = vmatpush3.bf16.msra.mxu0 %v6310_v51 }
0x1919   :  { %v4579_v47 = vpop.xlane.xlu1 %4578  ;;  %6185 = vmatprep.subr.bf16.mxu0 %v6311_v59 }
0x191a   :  { %v9454_v13 = vsub.f32 %v9358_v7, %v4608_v3  ;;  %v4611_v19 = vmul.f32 0.03125, %v4579_v47  ;;  %v4661_v44 = vsel %vm245_vm1, %v4639_v8, 0.0  ;;  %v4641_v29 = vmul.f32 %v9449_v12, %v9449_v12 }
0x191b   :  { %4662 = vadd.xlane.f32.xlu1 %v4661_v44  ;;  %v4576_v11 = vpop.xlane.xlu0 %4575 }
0x191c   :  { %v9460_v15 = vsub.f32 %v9366_v20, %v4611_v19  ;;  %v4610_v32 = vmul.f32 0.03125, %v4576_v11  ;;  %v4640_v33 = vmul.f32 %v9454_v13, %v9454_v13  ;;  %v4667_v28 = vsel %vm245_vm1, %v4641_v29, 0.0  ;;  %6186 = vmatpush3.bf16.msra.mxu0 %v6311_v59 }
0x191d   :  { %v4585_v26 = vpop.xlane.xlu1 %4584 }
0x191e   :  { %v9466_v54 = vsub.f32 %v9371_v0, %v4610_v32  ;;  %v4613_v46 = vmul.f32 0.03125, %v4585_v26  ;;  %v4664_v60 = vsel %vm245_vm1, %v4640_v33, 0.0  ;;  %v4643_v6 = vmul.f32 %v9460_v15, %v9460_v15 }
0x191f   :  { %4668 = vadd.xlane.f32.xlu1 %v4667_v28  ;;  %4665 = vadd.xlane.f32.xlu0 %v4664_v60  ;;  %v4582_v9 = vpop.xlane.xlu0 %4581 }
0x1920   :  { %v9472_v24 = vsub.f32 %v9385_v22, %v4613_v46  ;;  %v4612_v40 = vmul.f32 0.03125, %v4582_v9  ;;  %v4642_v48 = vmul.f32 %v9466_v54, %v9466_v54  ;;  %v4673_v5 = vsel %vm245_vm1, %v4643_v6, 0.0 }
0x1921   :  { %v4591_v30 = vpop.xlane.xlu1 %4590 }
0x1922   :  { %v9478_v14 = vsub.f32 %v9382_v1, %v4612_v40  ;;  %v4615_v42 = vmul.f32 0.03125, %v4591_v30  ;;  %v4670_v17 = vsel %vm245_vm1, %v4642_v48, 0.0  ;;  %v4645_v53 = vmul.f32 %v9472_v24, %v9472_v24 }
0x1923   :  { %4674 = vadd.xlane.f32.xlu1 %v4673_v5  ;;  %4671 = vadd.xlane.f32.xlu0 %v4670_v17  ;;  %v4588_v27 = vpop.xlane.xlu0 %4587 }
0x1924   :  { %v9484_v57 = vsub.f32 %v9390_v21, %v4615_v42  ;;  %v4614_v43 = vmul.f32 0.03125, %v4588_v27  ;;  %v4644_v52 = vmul.f32 %v9478_v14, %v9478_v14  ;;  %v4679_v62 = vsel %vm245_vm1, %v4645_v53, 0.0 }
0x1926   :  { %v9489_v49 = vsub.f32 %v9395_v61, %v4614_v43  ;;  %v4676_v58 = vsel %vm245_vm1, %v4644_v52, 0.0  ;;  %v4647_v55 = vmul.f32 %v9484_v57, %v9484_v57 }
0x1927   :  { %4680 = vadd.xlane.f32.xlu1 %v4679_v62  ;;  %4677 = vadd.xlane.f32.xlu0 %v4676_v58 }
0x1928   :  { %v4646_v39 = vmul.f32 %v9489_v49, %v9489_v49  ;;  %v4685_v45 = vsel %vm245_vm1, %v4647_v55, 0.0 }
0x192a   :  { %v4682_v10 = vsel %vm245_vm1, %v4646_v39, 0.0 }
0x192b   :  { %4686 = vadd.xlane.f32.xlu1 %v4685_v45  ;;  %4683 = vadd.xlane.f32.xlu0 %v4682_v10 }
0x1946   :  { %v4594_v18 = vpop.xlane.xlu0 %4593 }
0x1947   :  { %v4616_v4 = vmul.f32 0.03125, %v4594_v18 }
0x1948   :  { %v4597_v35 = vpop.xlane.xlu1 %4596 }
0x1949   :  { %v9506_v3 = vsub.f32 %v9407_v2, %v4616_v4  ;;  %v4617_v8 = vmul.f32 0.03125, %v4597_v35  ;;  %v9532_v4 = vld [vmem:[%s9815_s12 + $0x1] ss:$0 sm:$0xff] }
0x194a   :  { %v4600_v47 = vpop.xlane.xlu0 %4599 }
0x194b   :  { %v9509_v19 = vsub.f32 %v9414_v16, %v4617_v8  ;;  %v4618_v44 = vmul.f32 0.03125, %v4600_v47  ;;  %v4648_v29 = vmul.f32 %v9506_v3, %v9506_v3 }
0x194c   :  { %v4603_v11 = vpop.xlane.xlu1 %4602 }
0x194d   :  { %v9514_v32 = vsub.f32 %v9411_v36, %v4618_v44  ;;  %v4619_v33 = vmul.f32 0.03125, %v4603_v11  ;;  %v4688_v26 = vsel %vm245_vm1, %v4648_v29, 0.0  ;;  %v4649_v28 = vmul.f32 %v9509_v19, %v9509_v19 }
0x194e   :  { %4689 = vadd.xlane.f32.xlu0 %v4688_v26 }
0x194f   :  { %v9520_v46 = vsub.f32 %v9419_v31, %v4619_v33  ;;  %v4691_v60 = vsel %vm245_vm1, %v4649_v28, 0.0  ;;  %v4650_v6 = vmul.f32 %v9514_v32, %v9514_v32 }
0x1950   :  { %4692 = vadd.xlane.f32.xlu1 %v4691_v60 }
0x1951   :  { %v4694_v9 = vsel %vm245_vm1, %v4650_v6, 0.0  ;;  %v4651_v40 = vmul.f32 %v9520_v46, %v9520_v46 }
0x1952   :  { %4695 = vadd.xlane.f32.xlu0 %v4694_v9  ;;  %v9540_v9 = vld [vmem:[%s9816_s13 + $0x1] ss:$0 sm:$0xff] }
0x1953   :  { %v4697_v48 = vsel %vm245_vm1, %v4651_v40, 0.0 }
0x1954   :  { %4698 = vadd.xlane.f32.xlu1 %v4697_v48 }
0x19a0   :  { %v4654_v30 = vpop.xlane.xlu0 %4653 }
0x19a1   :  { %v4700_v5 = vmul.f32 0.03125, %v4654_v30 }
0x19a2   :  { %v4657_v42 = vpop.xlane.xlu1 %4656 }
0x19a3   :  { %v4716_v17 = vadd.f32 1e-05, %v4700_v5  ;;  %v4701_v53 = vmul.f32 0.03125, %v4657_v42 }
0x19a4   :  { %v4660_v27 = vpop.xlane.xlu0 %4659 }
0x19a5   :  { %6736 = vrsqrt.f32 %v4716_v17  ;;  %v4717_v43 = vadd.f32 1e-05, %v4701_v53  ;;  %v4702_v52 = vmul.f32 0.03125, %v4660_v27 }
0x19a7   :  { %6738 = vrsqrt.f32 %v4717_v43  ;;  %v4718_v62 = vadd.f32 1e-05, %v4702_v52 }
0x19a8   :  { %v4663_v58 = vpop.xlane.xlu1 %4662 }
0x19a9   :  { %6740 = vrsqrt.f32 %v4718_v62  ;;  %v4703_v55 = vmul.f32 0.03125, %v4663_v58 }
0x19ab   :  { %v4719_v39 = vadd.f32 1e-05, %v4703_v55 }
0x19ac   :  { %v4669_v45 = vpop.xlane.xlu1 %4668  ;;  %v4666_v10 = vpop.xlane.xlu0 %4665 }
0x19ad   :  { %6742 = vrsqrt.f32 %v4719_v39  ;;  %v4705_v51 = vmul.f32 0.03125, %v4669_v45  ;;  %v4704_v59 = vmul.f32 0.03125, %v4666_v10 }
0x19af   :  { %v6737_v18 = vpop.eup %6736  ;;  %v4721_v35 = vadd.f32 1e-05, %v4705_v51  ;;  %v4720_v8 = vadd.f32 1e-05, %v4704_v59 }
0x19b0   :  { %v4748_v47 = vmul.f32 %v6737_v18, %v9428_v23  ;;  %v4675_v44 = vpop.xlane.xlu1 %4674  ;;  %v4672_v29 = vpop.xlane.xlu0 %4671 }
0x19b1   :  { %v6739_v11 = vpop.eup %6738  ;;  %6744 = vrsqrt.f32 %v4721_v35  ;;  %v4707_v33 = vmul.f32 0.03125, %v4675_v44  ;;  %v4706_v26 = vmul.f32 0.03125, %v4672_v29 }
0x19b2   :  { %v4749_v28 = vmul.f32 %v6739_v11, %v9431_v41  ;;  %6746 = vrsqrt.f32 %v4720_v8  ;;  %v4770_v60 = vmul.f32 %v9532_v4, %v4748_v47 }
0x19b3   :  { %v6741_v6 = vpop.eup %6740  ;;  %v4723_v40 = vadd.f32 1e-05, %v4707_v33  ;;  %v4722_v48 = vadd.f32 1e-05, %v4706_v26 }
0x19b4   :  { %v4750_v23 = vmul.f32 %v6741_v6, %v9436_v50  ;;  %v4681_v30 = vpop.xlane.xlu1 %4680  ;;  %v4678_v5 = vpop.xlane.xlu0 %4677  ;;  %v4771_v42 = vmul.f32 %v9532_v4, %v4749_v28  ;;  %v4792_v53 = vadd.f32 %v9540_v9, %v4770_v60 }
0x19b5   :  { %6748 = vrsqrt.f32 %v4723_v40  ;;  %v4709_v17 = vmul.f32 0.03125, %v4681_v30  ;;  %v4708_v41 = vmul.f32 0.03125, %v4678_v5 }
0x19b6   :  { %6750 = vrsqrt.f32 %v4722_v48  ;;  %v4793_v27 = vadd.f32 %v9540_v9, %v4771_v42  ;;  %v4772_v58 = vmul.f32 %v9532_v4, %v4750_v23 }
0x19b7   :  { %v6743_v43 = vpop.eup %6742  ;;  %v4725_v52 = vadd.f32 1e-05, %v4709_v17  ;;  %v4724_v62 = vadd.f32 1e-05, %v4708_v41 }
0x19b8   :  { %v4751_v55 = vmul.f32 %v6743_v43, %v9445_v38  ;;  %v4687_v50 = vpop.xlane.xlu1 %4686  ;;  %v4684_v39 = vpop.xlane.xlu0 %4683  ;;  %v4808_v45 = vpack.c.bf16 %v4793_v27, %v4792_v53  ;;  %v4794_v44 = vadd.f32 %v9540_v9, %v4772_v58 }
0x19b9   :  { %6752 = vrsqrt.f32 %v4725_v52  ;;  %v4711_v10 = vmul.f32 0.03125, %v4687_v50  ;;  %v4710_v51 = vmul.f32 0.03125, %v4684_v39 }
0x19ba   :  { %v4773_v59 = vmul.f32 %v9532_v4, %v4751_v55  ;;  %6754 = vrsqrt.f32 %v4724_v62  ;;  %6187 = vmatprep.mubr.msk.bf16.mxu0 %vm245_vm1, %v4808_v45 }
0x19bb   :  { %v6745_v18 = vpop.eup %6744  ;;  %v4727_v35 = vadd.f32 1e-05, %v4711_v10  ;;  %v4726_v8 = vadd.f32 1e-05, %v4710_v51 }
0x19bc   :  { %v6747_v47 = vpop.eup %6746  ;;  %v4795_v29 = vadd.f32 %v9540_v9, %v4773_v59  ;;  %v4753_v38 = vmul.f32 %v6745_v18, %v9449_v12 }
0x19bd   :  { %v4752_v11 = vmul.f32 %v6747_v47, %v9454_v13  ;;  %6756 = vrsqrt.f32 %v4727_v35 }
0x19be   :  { %6758 = vrsqrt.f32 %v4726_v8  ;;  %v4809_v33 = vpack.c.bf16 %v4795_v29, %v4794_v44  ;;  %v4775_v26 = vmul.f32 %v9532_v4, %v4753_v38 }
0x19bf   :  { %v6749_v28 = vpop.eup %6748  ;;  %v4774_v60 = vmul.f32 %v9532_v4, %v4752_v11 }
0x19c0   :  { %v6751_v6 = vpop.eup %6750  ;;  %v4755_v40 = vmul.f32 %v6749_v28, %v9460_v15  ;;  %6188 = vmatmul.mubr.msk.bf16.vlgmr.msra.gmra.mrb[116].mxu0 %vm245_vm1, %v4809_v33  ;;  %v4797_v48 = vadd.f32 %v9540_v9, %v4775_v26 }
0x19c1   :  { %v4754_v23 = vmul.f32 %v6751_v6, %v9466_v54  ;;  %v4796_v12 = vadd.f32 %v9540_v9, %v4774_v60 }
0x19c2   :  { %v4777_v13 = vmul.f32 %v9532_v4, %v4755_v40 }
0x19c3   :  { %v6753_v30 = vpop.eup %6752  ;;  %v4810_v5 = vpack.c.bf16 %v4797_v48, %v4796_v12  ;;  %v4776_v42 = vmul.f32 %v9532_v4, %v4754_v23 }
0x19c4   :  { %v6755_v17 = vpop.eup %6754  ;;  %v4757_v41 = vmul.f32 %v6753_v30, %v9472_v24  ;;  %v4799_v53 = vadd.f32 %v9540_v9, %v4777_v13 }
0x19c5   :  { %v4756_v15 = vmul.f32 %v6755_v17, %v9478_v14  ;;  %6191 = vmatprep.mubr.msk.bf16.mxu0 %vm245_vm1, %v4810_v5  ;;  %v4798_v27 = vadd.f32 %v9540_v9, %v4776_v42 }
0x19c6   :  { %v4779_v54 = vmul.f32 %v9532_v4, %v4757_v41 }
0x19c7   :  { %v6757_v43 = vpop.eup %6756  ;;  %v4811_v52 = vpack.c.bf16 %v4799_v53, %v4798_v27  ;;  %v4778_v62 = vmul.f32 %v9532_v4, %v4756_v15 }
0x19c8   :  { %v6759_v58 = vpop.eup %6758  ;;  %v4759_v55 = vmul.f32 %v6757_v43, %v9484_v57  ;;  %v4801_v50 = vadd.f32 %v9540_v9, %v4779_v54  ;;  %v6313_v54 = vld [vmem:[%s9817_s16 + $0x48] sm:$0xff]   ;;  %v6316_v43 = vld [vmem:[%s9817_s16 + $0x60] sm:$0xff]  }
0x19c9   :  { %v4758_v24 = vmul.f32 %v6759_v58, %v9489_v49  ;;  %6192 = vmatmul.mubr.msk.bf16.gmra.mrb[120].mxu0 %vm245_vm1, %v4811_v52  ;;  %v4800_v14 = vadd.f32 %v9540_v9, %v4778_v62  ;;  %v6317_v52 = vld [vmem:[%s9817_s16 + $0x68] sm:$0xff]   ;;  %v6318_v62 = vld [vmem:[%s9817_s16 + $0x70] sm:$0xff]   ;;  %v6319_v58 = vld [vmem:[%s9817_s16 + $0x78] sm:$0xff]  }
0x19ca   :  { %v4781_v39 = vmul.f32 %v9532_v4, %v4759_v55  ;;  %v9622_v55 = vld [vmem:[%s9818_s15 + $0x1] ss:$0 sm:$0xff] }
0x19cb   :  { %v4812_v45 = vpack.c.bf16 %v4801_v50, %v4800_v14  ;;  %v4780_v10 = vmul.f32 %v9532_v4, %v4758_v24 }
0x19cc   :  { %v4803_v51 = vadd.f32 %v9540_v9, %v4781_v39 }
0x19cd   :  { %6195 = vmatprep.mubr.msk.bf16.mxu0 %vm245_vm1, %v4812_v45  ;;  %v4802_v59 = vadd.f32 %v9540_v9, %v4780_v10 }
0x19cf   :  { %v4813_v57 = vpack.c.bf16 %v4803_v51, %v4802_v59 }
0x19d1   :  { %6196 = vmatmul.mubr.msk.bf16.gmra.mrb[124].mxu0 %vm245_vm1, %v4813_v57 }
0x19db   :  { %v4690_v18 = vpop.xlane.xlu0 %4689 }
0x19dc   :  { %v4712_v49 = vmul.f32 0.03125, %v4690_v18 }
0x19dd   :  { %v4693_v35 = vpop.xlane.xlu1 %4692 }
0x19de   :  { %v4728_v8 = vadd.f32 1e-05, %v4712_v49  ;;  %v4713_v47 = vmul.f32 0.03125, %v4693_v35 }
0x19df   :  { %v4696_v44 = vpop.xlane.xlu0 %4695 }
0x19e0   :  { %6760 = vrsqrt.f32 %v4728_v8  ;;  %v4729_v29 = vadd.f32 1e-05, %v4713_v47  ;;  %v4714_v38 = vmul.f32 0.03125, %v4696_v44 }
0x19e1   :  { %v4699_v11 = vpop.xlane.xlu1 %4698 }
0x19e2   :  { %6762 = vrsqrt.f32 %v4729_v29  ;;  %v4730_v33 = vadd.f32 1e-05, %v4714_v38  ;;  %v4715_v26 = vmul.f32 0.03125, %v4699_v11 }
0x19e4   :  { %6764 = vrsqrt.f32 %v4730_v33  ;;  %v4731_v28 = vadd.f32 1e-05, %v4715_v26 }
0x19e6   :  { %6766 = vrsqrt.f32 %v4731_v28 }
0x19ea   :  { %v6761_v60 = vpop.eup %6760 }
0x19eb   :  { %v4760_v6 = vmul.f32 %v6761_v60, %v9506_v3 }
0x19ec   :  { %v6763_v40 = vpop.eup %6762 }
0x19ed   :  { %v4761_v48 = vmul.f32 %v6763_v40, %v9509_v19  ;;  %v4782_v23 = vmul.f32 %v9532_v4, %v4760_v6 }
0x19ee   :  { %v6765_v12 = vpop.eup %6764 }
0x19ef   :  { %v4762_v13 = vmul.f32 %v6765_v12, %v9514_v32  ;;  %v4783_v30 = vmul.f32 %v9532_v4, %v4761_v48  ;;  %v4804_v17 = vadd.f32 %v9540_v9, %v4782_v23 }
0x19f0   :  { %v6767_v5 = vpop.eup %6766 }
0x19f1   :  { %v4763_v42 = vmul.f32 %v6767_v5, %v9520_v46  ;;  %v4805_v41 = vadd.f32 %v9540_v9, %v4783_v30  ;;  %v4784_v53 = vmul.f32 %v9532_v4, %v4762_v13  ;;  %v6312_v46 = vld [vmem:[%s9817_s16 + $0x40] sm:$0xff]  }
0x19f2   :  { %6203 = vmatprep.subr.bf16.mxu1 %v6312_v46 }
0x19f3   :  { %v4814_v3 = vpack.c.bf16 %v4805_v41, %v4804_v17  ;;  %v4785_v15 = vmul.f32 %v9532_v4, %v4763_v42  ;;  %v4806_v19 = vadd.f32 %v9540_v9, %v4784_v53  ;;  %6204 = vmatpush3.bf16.msra.mxu1 %v6312_v46  ;;  %v6314_v4 = vld [vmem:[%s9817_s16 + $0x50] sm:$0xff]  }
0x19f4   :  { %6205 = vmatprep.subr.bf16.mxu1 %v6313_v54 }
0x19f5   :  { %6199 = vmatprep.mubr.msk.bf16.mxu0 %vm245_vm1, %v4814_v3  ;;  %v4807_v32 = vadd.f32 %v9540_v9, %v4785_v15  ;;  %v6315_v9 = vld [vmem:[%s9817_s16 + $0x58] sm:$0xff]  }
0x19f7   :  { %v4815_v27 = vpack.c.bf16 %v4807_v32, %v4806_v19  ;;  %6206 = vmatpush3.bf16.msra.mxu1 %v6313_v54 }
0x19f8   :  { %6207 = vmatprep.subr.bf16.mxu1 %v6314_v4 }
0x19f9   :  { %6200 = vmatmul.mubr.msk.bf16.gmra.mrb[128].mxu0 %vm245_vm1, %v4815_v27 }
0x19fb   :  { %6208 = vmatpush3.bf16.msra.mxu1 %v6314_v4 }
0x19fc   :  { %6209 = vmatprep.subr.bf16.mxu1 %v6315_v9 }
0x19ff   :  { %6210 = vmatpush3.bf16.msra.mxu1 %v6315_v9 }
0x1a00   :  { %6211 = vmatprep.subr.bf16.mxu1 %v6316_v43 }
0x1a03   :  { %6212 = vmatpush3.bf16.msra.mxu1 %v6316_v43 }
0x1a04   :  { %6213 = vmatprep.subr.bf16.mxu1 %v6317_v52 }
0x1a07   :  { %6214 = vmatpush3.bf16.msra.mxu1 %v6317_v52 }
0x1a08   :  { %6215 = vmatprep.subr.bf16.mxu1 %v6318_v62 }
0x1a0b   :  { %6216 = vmatpush3.bf16.msra.mxu1 %v6318_v62 }
0x1a0c   :  { %6217 = vmatprep.subr.bf16.mxu1 %v6319_v58 }
0x1a0f   :  { %6218 = vmatpush3.bf16.msra.mxu1 %v6319_v58 }
0x1a93   :  { %v6189_v50 = vpop.f32.mrb[116].mxu0 }
0x1a94   :  { %v4908_v24 = vadd.f32 %v6189_v50, %v9622_v55  ;;  %v4899_v14 = vpop.f32.mrb[117].mxu0 }
0x1a95   :  { %v9626_v39 = vadd.f32 %v9622_v55, %v4899_v14  ;;  %v6190_v45 = vpop.f32.mrb[118].mxu0 }
0x1a96   :  { %v4980_v10 = vmul.f32 0.044715, %v4908_v24  ;;  %v9629_v51 = vadd.f32 %v6190_v45, %v9622_v55  ;;  %v4902_v59 = vpop.f32.mrb[119].mxu0 }
0x1a97   :  { %v4978_v57 = vmul.f32 0.044715, %v9626_v39  ;;  %v9633_v18 = vadd.f32 %v9622_v55, %v4902_v59  ;;  %v4964_v59 = vmul.f32 0.5, %v4908_v24 }
0x1a98   :  { %v4996_v49 = vmul.f32 %v4980_v10, %v4908_v24  ;;  %v4981_v35 = vmul.f32 0.044715, %v9629_v51 }
0x1a99   :  { %v4994_v8 = vmul.f32 %v4978_v57, %v9626_v39  ;;  %v4979_v47 = vmul.f32 0.044715, %v9633_v18 }
0x1a9a   :  { %v5012_v44 = vmul.f32 %v4996_v49, %v4908_v24  ;;  %v4997_v29 = vmul.f32 %v4981_v35, %v9629_v51 }
0x1a9b   :  { %v5010_v38 = vmul.f32 %v4994_v8, %v9626_v39  ;;  %v4995_v11 = vmul.f32 %v4979_v47, %v9633_v18 }
0x1a9c   :  { %v5028_v33 = vadd.f32 %v5012_v44, %v4908_v24  ;;  %v5013_v26 = vmul.f32 %v4997_v29, %v9629_v51  ;;  %v6193_v28 = vpop.f32.mrb[120].mxu0 }
0x1a9d   :  { %v5011_v60 = vmul.f32 %v4995_v11, %v9633_v18  ;;  %v9644_v6 = vadd.f32 %v6193_v28, %v9622_v55  ;;  %v4915_v40 = vpop.f32.mrb[121].mxu0  ;;  %v5026_v48 = vadd.f32 %v5010_v38, %v9626_v39 }
0x1a9e   :  { %v5044_v23 = vmul.f32 0.7978846, %v5028_v33  ;;  %v5029_v12 = vadd.f32 %v5013_v26, %v9629_v51  ;;  %v9649_v13 = vadd.f32 %v9622_v55, %v4915_v40  ;;  %v6194_v30 = vpop.f32.mrb[122].mxu0 }
0x1a9f   :  { %v4984_v5 = vmul.f32 0.044715, %v9644_v6  ;;  %v9653_v42 = vadd.f32 %v6194_v30, %v9622_v55  ;;  %v4918_v17 = vpop.f32.mrb[123].mxu0  ;;  %v5027_v41 = vadd.f32 %v5011_v60, %v9633_v18  ;;  %v5042_v53 = vmul.f32 0.7978846, %v5026_v48 }
0x1aa0   :  { %6768 = vtanh.f32 %v5044_v23  ;;  %v5045_v3 = vmul.f32 0.7978846, %v5029_v12  ;;  %v4982_v15 = vmul.f32 0.044715, %v9649_v13  ;;  %v9658_v19 = vadd.f32 %v9622_v55, %v4918_v17 }
0x1aa1   :  { %v5000_v32 = vmul.f32 %v4984_v5, %v9644_v6  ;;  %v4985_v27 = vmul.f32 0.044715, %v9653_v42  ;;  %v5043_v46 = vmul.f32 0.7978846, %v5027_v41  ;;  %6770 = vtanh.f32 %v5042_v53 }
0x1aa2   :  { %6772 = vtanh.f32 %v5045_v3  ;;  %v4998_v54 = vmul.f32 %v4982_v15, %v9649_v13  ;;  %v4983_v4 = vmul.f32 0.044715, %v9658_v19 }
0x1aa3   :  { %v5016_v9 = vmul.f32 %v5000_v32, %v9644_v6  ;;  %v5001_v43 = vmul.f32 %v4985_v27, %v9653_v42  ;;  %6774 = vtanh.f32 %v5043_v46 }
0x1aa4   :  { %v5014_v52 = vmul.f32 %v4998_v54, %v9649_v13  ;;  %v4999_v62 = vmul.f32 %v4983_v4, %v9658_v19  ;;  %v6197_v58 = vpop.f32.mrb[124].mxu0  ;;  %v4965_v4 = vmul.f32 0.5, %v9629_v51 }
0x1aa5   :  { %v5017_v50 = vmul.f32 %v5001_v43, %v9653_v42  ;;  %v9670_v14 = vadd.f32 %v6197_v58, %v9622_v55  ;;  %v4931_v45 = vpop.f32.mrb[125].mxu0  ;;  %v5032_v10 = vadd.f32 %v5016_v9, %v9644_v6  ;;  %v4962_v43 = vmul.f32 0.5, %v9626_v39 }
0x1aa6   :  { %v5015_v57 = vmul.f32 %v4999_v62, %v9658_v19  ;;  %v9675_v49 = vadd.f32 %v9622_v55, %v4931_v45  ;;  %v6198_v35 = vpop.f32.mrb[126].mxu0  ;;  %v5030_v8 = vadd.f32 %v5014_v52, %v9649_v13  ;;  %v4963_v58 = vmul.f32 0.5, %v9633_v18 }
0x1aa7   :  { %v4988_v47 = vmul.f32 0.044715, %v9670_v14  ;;  %v9680_v44 = vadd.f32 %v6198_v35, %v9622_v55  ;;  %v4934_v29 = vpop.f32.mrb[127].mxu0  ;;  %v5033_v38 = vadd.f32 %v5017_v50, %v9653_v42  ;;  %v5048_v11 = vmul.f32 0.7978846, %v5032_v10 }
0x1aa8   :  { %v4986_v33 = vmul.f32 0.044715, %v9675_v49  ;;  %v9685_v24 = vadd.f32 %v9622_v55, %v4934_v29  ;;  %v5031_v26 = vadd.f32 %v5015_v57, %v9658_v19  ;;  %v5046_v28 = vmul.f32 0.7978846, %v5030_v8 }
0x1aa9   :  { %v5004_v60 = vmul.f32 %v4988_v47, %v9670_v14  ;;  %v4989_v40 = vmul.f32 0.044715, %v9680_v44  ;;  %v5049_v48 = vmul.f32 0.7978846, %v5033_v38  ;;  %6776 = vtanh.f32 %v5048_v11 }
0x1aaa   :  { %v6769_v23 = vpop.eup %6768  ;;  %v5002_v12 = vmul.f32 %v4986_v33, %v9675_v49  ;;  %v4987_v30 = vmul.f32 0.044715, %v9685_v24  ;;  %v5047_v5 = vmul.f32 0.7978846, %v5031_v26  ;;  %6778 = vtanh.f32 %v5046_v28 }
0x1aab   :  { %v6771_v17 = vpop.eup %6770  ;;  %v5020_v41 = vmul.f32 %v5004_v60, %v9670_v14  ;;  %v5005_v53 = vmul.f32 %v4989_v40, %v9680_v44  ;;  %v5076_v3 = vadd.f32 1.0, %v6769_v23  ;;  %6780 = vtanh.f32 %v5049_v48 }
0x1aac   :  { %v6773_v15 = vpop.eup %6772  ;;  %v5018_v32 = vmul.f32 %v5002_v12, %v9675_v49  ;;  %v5003_v27 = vmul.f32 %v4987_v30, %v9685_v24  ;;  %v5074_v46 = vadd.f32 1.0, %v6771_v17  ;;  %6782 = vtanh.f32 %v5047_v5 }
0x1aad   :  { %v6775_v54 = vpop.eup %6774  ;;  %v5021_v9 = vmul.f32 %v5005_v53, %v9680_v44  ;;  %v5077_v52 = vadd.f32 1.0, %v6773_v15  ;;  %v5092_v10 = vmul.f32 %v5076_v3, %v4964_v59  ;;  %v5036_v51 = vadd.f32 %v5020_v41, %v9670_v14 }
0x1aae   :  { %v5019_v62 = vmul.f32 %v5003_v27, %v9685_v24  ;;  %v5075_v50 = vadd.f32 1.0, %v6775_v54  ;;  %v5090_v45 = vmul.f32 %v5074_v46, %v4962_v43  ;;  %v5034_v35 = vadd.f32 %v5018_v32, %v9675_v49 }
0x1aaf   :  { %v5093_v57 = vmul.f32 %v5077_v52, %v4965_v4  ;;  %v5037_v29 = vadd.f32 %v5021_v9, %v9680_v44  ;;  %v5052_v26 = vmul.f32 0.7978846, %v5036_v51  ;;  %v4968_v12 = vmul.f32 0.5, %v9644_v6 }
0x1ab0   :  { %v5091_v8 = vmul.f32 %v5075_v50, %v4963_v58  ;;  %v5035_v47 = vadd.f32 %v5019_v62, %v9685_v24  ;;  %v5050_v39 = vmul.f32 0.7978846, %v5034_v35  ;;  %v4969_v30 = vmul.f32 0.5, %v9653_v42 }
0x1ab1   :  { %v5107_v38 = vpack.c.bf16 %v5093_v57, %v5092_v10  ;;  %v5053_v28 = vmul.f32 0.7978846, %v5037_v29  ;;  %v4966_v17 = vmul.f32 0.5, %v9649_v13  ;;  %v4967_v41 = vmul.f32 0.5, %v9658_v19 }
0x1ab2   :  { %v5106_v11 = vpack.c.bf16 %v5091_v8, %v5090_v45  ;;  %v5051_v33 = vmul.f32 0.7978846, %v5035_v47  ;;  %6784 = vtanh.f32 %v5050_v39  ;;  %v4970_v42 = vmul.f32 0.5, %v9675_v49 }
0x1ab3   :  { %v6777_v18 = vpop.eup %6776  ;;  %v4971_v52 = vmul.f32 0.5, %v9685_v24  ;;  %v4972_v19 = vmul.f32 0.5, %v9670_v14  ;;  %v4973_v10 = vmul.f32 0.5, %v9680_v44 }
0x1ab4   :  { %v6779_v60 = vpop.eup %6778  ;;  %6219 = vmatprep.mubr.bf16.mxu1 %v5106_v11  ;;  %v5080_v59 = vadd.f32 1.0, %v6777_v18  ;;  %6786 = vtanh.f32 %v5051_v33 }
0x1ab5   :  { %v6781_v40 = vpop.eup %6780  ;;  %6220 = vmatmul.mubr.bf16.vlgmr.msra.gmra.mrb[124].mxu1 %v5107_v38  ;;  %v5078_v48 = vadd.f32 1.0, %v6779_v60  ;;  %6788 = vtanh.f32 %v5052_v26 }
0x1ab6   :  { %v6783_v23 = vpop.eup %6782  ;;  %v5081_v5 = vadd.f32 1.0, %v6781_v40  ;;  %6790 = vtanh.f32 %v5053_v28  ;;  %v5096_v3 = vmul.f32 %v5080_v59, %v4968_v12 }
0x1ab7   :  { %v5079_v53 = vadd.f32 1.0, %v6783_v23  ;;  %v5094_v32 = vmul.f32 %v5078_v48, %v4966_v17 }
0x1ab8   :  { %v5097_v15 = vmul.f32 %v5081_v5, %v4969_v30 }
0x1ab9   :  { %v5095_v27 = vmul.f32 %v5079_v53, %v4967_v41 }
0x1aba   :  { %v5109_v46 = vpack.c.bf16 %v5097_v15, %v5096_v3 }
0x1abb   :  { %v5108_v54 = vpack.c.bf16 %v5095_v27, %v5094_v32 }
0x1abc   :  { %v6785_v4 = vpop.eup %6784 }
0x1abd   :  { %6223 = vmatprep.mubr.bf16.mxu1 %v5108_v54  ;;  %v5082_v6 = vadd.f32 1.0, %v6785_v4 }
0x1abe   :  { %v6787_v9 = vpop.eup %6786  ;;  %6224 = vmatmul.mubr.bf16.gmra.mrb[128].mxu1 %v5109_v46 }
0x1abf   :  { %v6789_v43 = vpop.eup %6788  ;;  %v5083_v13 = vadd.f32 1.0, %v6787_v9  ;;  %v5098_v50 = vmul.f32 %v5082_v6, %v4970_v42 }
0x1ac0   :  { %v6791_v62 = vpop.eup %6790  ;;  %v5084_v58 = vadd.f32 1.0, %v6789_v43 }
0x1ac1   :  { %v5099_v45 = vmul.f32 %v5083_v13, %v4971_v52  ;;  %v5085_v57 = vadd.f32 1.0, %v6791_v62 }
0x1ac2   :  { %v5100_v8 = vmul.f32 %v5084_v58, %v4972_v19 }
0x1ac3   :  { %v5110_v35 = vpack.c.bf16 %v5099_v45, %v5098_v50  ;;  %v5101_v47 = vmul.f32 %v5085_v57, %v4973_v10 }
0x1ac5   :  { %6227 = vmatprep.mubr.bf16.mxu1 %v5110_v35  ;;  %v5111_v51 = vpack.c.bf16 %v5101_v47, %v5100_v8  ;;  %v5533_v47 = vld [vmem:[%s9819_s17 + $0x1] ss:$0 sm:$0xff] }
0x1ac7   :  { %6228 = vmatmul.mubr.bf16.gmra.mrb[132].mxu1 %v5111_v51 }
0x1acc   :  { %v6201_v29 = vpop.f32.mrb[128].mxu0 }
0x1acd   :  { %v4956_v49 = vadd.f32 %v6201_v29, %v9622_v55  ;;  %v4947_v24 = vpop.f32.mrb[129].mxu0 }
0x1ace   :  { %v4948_v38 = vadd.f32 %v9622_v55, %v4947_v24  ;;  %v6202_v39 = vpop.f32.mrb[130].mxu0 }
0x1acf   :  { %v4992_v14 = vmul.f32 0.044715, %v4956_v49  ;;  %v4959_v11 = vadd.f32 %v6202_v39, %v9622_v55  ;;  %v4950_v33 = vpop.f32.mrb[131].mxu0  ;;  %v4976_v42 = vmul.f32 0.5, %v4956_v49 }
0x1ad0   :  { %v4990_v26 = vmul.f32 0.044715, %v4948_v38  ;;  %v4951_v44 = vadd.f32 %v9622_v55, %v4950_v33  ;;  %v4974_v62 = vmul.f32 0.5, %v4948_v38 }
0x1ad1   :  { %v5008_v28 = vmul.f32 %v4992_v14, %v4956_v49  ;;  %v4993_v18 = vmul.f32 0.044715, %v4959_v11  ;;  %v4977_v52 = vmul.f32 0.5, %v4959_v11 }
0x1ad2   :  { %v5006_v60 = vmul.f32 %v4990_v26, %v4948_v38  ;;  %v4991_v59 = vmul.f32 0.044715, %v4951_v44  ;;  %v4975_v19 = vmul.f32 0.5, %v4951_v44 }
0x1ad3   :  { %v5024_v40 = vmul.f32 %v5008_v28, %v4956_v49  ;;  %v5009_v48 = vmul.f32 %v4993_v18, %v4959_v11 }
0x1ad4   :  { %v5022_v23 = vmul.f32 %v5006_v60, %v4948_v38  ;;  %v5007_v12 = vmul.f32 %v4991_v59, %v4951_v44 }
0x1ad5   :  { %v5025_v30 = vmul.f32 %v5009_v48, %v4959_v11  ;;  %v5040_v5 = vadd.f32 %v5024_v40, %v4956_v49 }
0x1ad6   :  { %v5023_v17 = vmul.f32 %v5007_v12, %v4951_v44  ;;  %v5038_v41 = vadd.f32 %v5022_v23, %v4948_v38 }
0x1ad7   :  { %v5041_v53 = vadd.f32 %v5025_v30, %v4959_v11  ;;  %v5056_v3 = vmul.f32 0.7978846, %v5040_v5 }
0x1ad8   :  { %v5039_v15 = vadd.f32 %v5023_v17, %v4951_v44  ;;  %v5054_v32 = vmul.f32 0.7978846, %v5038_v41 }
0x1ad9   :  { %v5057_v27 = vmul.f32 0.7978846, %v5041_v53  ;;  %6792 = vtanh.f32 %v5056_v3 }
0x1ada   :  { %v5055_v46 = vmul.f32 0.7978846, %v5039_v15  ;;  %6794 = vtanh.f32 %v5054_v32 }
0x1adb   :  { %6796 = vtanh.f32 %v5057_v27 }
0x1adc   :  { %6798 = vtanh.f32 %v5055_v46 }
0x1ae3   :  { %v6793_v55 = vpop.eup %6792 }
0x1ae4   :  { %v6795_v54 = vpop.eup %6794  ;;  %v5088_v4 = vadd.f32 1.0, %v6793_v55 }
0x1ae5   :  { %v6797_v9 = vpop.eup %6796  ;;  %v5086_v6 = vadd.f32 1.0, %v6795_v54 }
0x1ae6   :  { %v6799_v43 = vpop.eup %6798  ;;  %v5089_v13 = vadd.f32 1.0, %v6797_v9  ;;  %v5104_v50 = vmul.f32 %v5088_v4, %v4976_v42 }
0x1ae7   :  { %v5087_v58 = vadd.f32 1.0, %v6799_v43  ;;  %v5102_v10 = vmul.f32 %v5086_v6, %v4974_v62 }
0x1ae8   :  { %v5105_v45 = vmul.f32 %v5089_v13, %v4977_v52 }
0x1ae9   :  { %v5103_v57 = vmul.f32 %v5087_v58, %v4975_v19 }
0x1aea   :  { %v5113_v35 = vpack.c.bf16 %v5105_v45, %v5104_v50 }
0x1aeb   :  { %v5112_v8 = vpack.c.bf16 %v5103_v57, %v5102_v10 }
0x1aed   :  { %6231 = vmatprep.mubr.bf16.mxu1 %v5112_v8 }
0x1aee   :  { %6232 = vmatmul.mubr.bf16.gmra.mrb[136].mxu1 %v5113_v35 }
0x1b88   :  { %v6221_v51 = vpop.f32.mrb[124].mxu1 }
0x1b89   :  { %v5230_v29 = vadd.f32 %v6221_v51, %v5533_v47  ;;  %v5221_v49 = vpop.f32.mrb[125].mxu1 }
0x1b8a   :  { %v5222_v24 = vadd.f32 %v5533_v47, %v5221_v49  ;;  %v6222_v39 = vpop.f32.mrb[126].mxu1 }
0x1b8b   :  { %v5286_v38 = vadd.f32 %v5230_v29, %v9338_v34  ;;  %v5233_v14 = vadd.f32 %v6222_v39, %v5533_v47  ;;  %v5224_v11 = vpop.f32.mrb[127].mxu1 }
0x1b8c   :  { %v5284_v33 = vadd.f32 %v5222_v24, %v9334_v25  ;;  %v5225_v26 = vadd.f32 %v5533_v47, %v5224_v11 }
0x1b8d   :  { %5302 = vst.msk [vmem:[%s9820_s20 + $0x10] sm:$0xff] %vm245_vm1, %v5286_v38  ;;  %v5287_v44 = vadd.f32 %v5233_v14, %v9349_v37 }
0x1b8e   :  { %5300 = vst.msk [vmem:[%s9820_s20] sm:$0xff] %vm245_vm1, %v5284_v33  ;;  %v5285_v28 = vadd.f32 %v5225_v26, %v9342_v63 }
0x1b8f   :  { %5303 = vst.msk [vmem:[%s9820_s20 + $0x18] sm:$0xff] %vm245_vm1, %v5287_v44 }
0x1b90   :  { %5301 = vst.msk [vmem:[%s9820_s20 + $0x8] sm:$0xff] %vm245_vm1, %v5285_v28 }
0x1b91   :  { %v6225_v25 = vpop.f32.mrb[128].mxu1 }
0x1b92   :  { %v5246_v34 = vadd.f32 %v6225_v25, %v5533_v47  ;;  %v5237_v37 = vpop.f32.mrb[129].mxu1 }
0x1b93   :  { %v5238_v18 = vadd.f32 %v5533_v47, %v5237_v37  ;;  %v6226_v60 = vpop.f32.mrb[130].mxu1 }
0x1b94   :  { %v5290_v59 = vadd.f32 %v5246_v34, %v9371_v0  ;;  %v5249_v40 = vadd.f32 %v6226_v60, %v5533_v47  ;;  %v5240_v48 = vpop.f32.mrb[131].mxu1 }
0x1b95   :  { %v5288_v63 = vadd.f32 %v5238_v18, %v9358_v7  ;;  %v5241_v23 = vadd.f32 %v5533_v47, %v5240_v48 }
0x1b96   :  { %5306 = vst.msk [vmem:[%s9820_s20 + $0x30] sm:$0xff] %vm245_vm1, %v5290_v59  ;;  %v5291_v12 = vadd.f32 %v5249_v40, %v9366_v20 }
0x1b97   :  { %5304 = vst.msk [vmem:[%s9820_s20 + $0x20] sm:$0xff] %vm245_vm1, %v5288_v63  ;;  %v5289_v30 = vadd.f32 %v5241_v23, %v9361_v56 }
0x1b98   :  { %5307 = vst.msk [vmem:[%s9820_s20 + $0x38] sm:$0xff] %vm245_vm1, %v5291_v12 }
0x1b99   :  { %5305 = vst.msk [vmem:[%s9820_s20 + $0x28] sm:$0xff] %vm245_vm1, %v5289_v30 }
0x1b9a   :  { %v6229_v7 = vpop.f32.mrb[132].mxu1 }
0x1b9b   :  { %v5262_v0 = vadd.f32 %v6229_v7, %v5533_v47  ;;  %v5253_v20 = vpop.f32.mrb[133].mxu1 }
0x1b9c   :  { %v5254_v5 = vadd.f32 %v5533_v47, %v5253_v20  ;;  %v6230_v17 = vpop.f32.mrb[134].mxu1 }
0x1b9d   :  { %v5294_v41 = vadd.f32 %v5262_v0, %v9395_v61  ;;  %v5265_v53 = vadd.f32 %v6230_v17, %v5533_v47  ;;  %v5256_v3 = vpop.f32.mrb[135].mxu1 }
0x1b9e   :  { %v5292_v56 = vadd.f32 %v5254_v5, %v9382_v1  ;;  %v5257_v15 = vadd.f32 %v5533_v47, %v5256_v3 }
0x1b9f   :  { %5310 = vst.msk [vmem:[%s9820_s20 + $0x50] sm:$0xff] %vm245_vm1, %v5294_v41  ;;  %v5295_v32 = vadd.f32 %v5265_v53, %v9390_v21 }
0x1ba0   :  { %5308 = vst.msk [vmem:[%s9820_s20 + $0x40] sm:$0xff] %vm245_vm1, %v5292_v56  ;;  %v5293_v27 = vadd.f32 %v5257_v15, %v9385_v22 }
0x1ba1   :  { %5311 = vst.msk [vmem:[%s9820_s20 + $0x58] sm:$0xff] %vm245_vm1, %v5295_v32 }
0x1ba2   :  { %5309 = vst.msk [vmem:[%s9820_s20 + $0x48] sm:$0xff] %vm245_vm1, %v5293_v27 }
0x1bc1   :  { %v6233_v1 = vpop.f32.mrb[136].mxu1 }
0x1bc2   :  { %v5278_v61 = vadd.f32 %v6233_v1, %v5533_v47  ;;  %v5269_v21 = vpop.f32.mrb[137].mxu1 }
0x1bc3   :  { %v5270_v46 = vadd.f32 %v5533_v47, %v5269_v21  ;;  %v6234_v55 = vpop.f32.mrb[138].mxu1 }
0x1bc4   :  { %v5298_v54 = vadd.f32 %v5278_v61, %v9411_v36  ;;  %v5281_v4 = vadd.f32 %v6234_v55, %v5533_v47  ;;  %v5272_v9 = vpop.f32.mrb[139].mxu1 }
0x1bc5   :  { %v5296_v22 = vadd.f32 %v5270_v46, %v9407_v2  ;;  %v5273_v6 = vadd.f32 %v5533_v47, %v5272_v9 }
0x1bc6   :  { %5314 = vst.msk [vmem:[%s9820_s20 + $0x70] sm:$0xff] %vm245_vm1, %v5298_v54  ;;  %v5299_v43 = vadd.f32 %v5281_v4, %v9419_v31 }
0x1bc7   :  { %5312 = vst.msk [vmem:[%s9820_s20 + $0x60] sm:$0xff] %vm245_vm1, %v5296_v22  ;;  %v5297_v42 = vadd.f32 %v5273_v6, %v9414_v16 }
0x1bc8   :  { %5315 = vst.msk [vmem:[%s9820_s20 + $0x78] sm:$0xff] %vm245_vm1, %v5299_v43 }
0x1bc9   :  { %5313 = vst.msk [vmem:[%s9820_s20 + $0x68] sm:$0xff] %vm245_vm1, %v5297_v42 }

// kernel: swin_forward.3
= control target key start
LH: loop header
LB: loop body
LE: loop exit
PB: predicated region body
PF: predicated region fallthrough
CT: control target
= control target key end

     0   :  { %vm261_vm0 = vcmask 523264   ;;  %vm474_vm1 = vcmask 130048   ;;  %s4356_s30 = smov 64   ;;  %s4358_s21 = smov 48   ;;  %vm536_vm2 = vcmask 261120   ;;  %vm845_vm3 = vcmask 261248   ;;  %s5636_s0 = inlined_call_operand.vmem [shape: f32[32,128], index: 0, kind: input, shape index: {}]   ;;  %s5637_s1 = inlined_call_operand.vmem [shape: bf16[128,64], index: 1, kind: input, shape index: {}]   ;;  %s5638_s3 = inlined_call_operand.vmem [shape: f32[1,128], index: 3, kind: input, shape index: {}]   ;;  %s5639_s4 = inlined_call_operand.vmem [shape: f32[1,128], index: 4, kind: input, shape index: {}]   ;;  %s5640_s2 = inlined_call_operand.vmem [shape: f32[1,64], index: 2, kind: input, shape index: {}]   ;;  %s5641_s8 = inlined_call_operand.vmem [shape: bf16[2,64,192], index: 8, kind: input, shape index: {}]   ;;  %s5642_s6 = inlined_call_operand.vmem [shape: f32[2,1,64], index: 6, kind: input, shape index: {}]   ;;  %s5643_s7 = inlined_call_operand.vmem [shape: f32[2,1,64], index: 7, kind: input, shape index: {}]   ;;  %s5644_s9 = inlined_call_operand.vmem [shape: f32[2,1,192], index: 9, kind: input, shape index: {}]   ;;  %s5645_s5 = inlined_call_operand.vmem [shape: f32[2,4,32,32], index: 5, kind: input, shape index: {}]   ;;  %s5646_s10 = inlined_call_operand.vmem [shape: bf16[2,64,64], index: 10, kind: input, shape index: {}]   ;;  %s5647_s11 = inlined_call_operand.vmem [shape: f32[2,1,64], index: 11, kind: input, shape index: {}]   ;;  %s5648_s14 = inlined_call_operand.vmem [shape: bf16[2,64,256], index: 14, kind: input, shape index: {}]   ;;  %s5649_s12 = inlined_call_operand.vmem [shape: f32[2,1,64], index: 12, kind: input, shape index: {}]   ;;  %s5650_s13 = inlined_call_operand.vmem [shape: f32[2,1,64], index: 13, kind: input, shape index: {}]   ;;  %s5651_s16 = inlined_call_operand.vmem [shape: bf16[2,256,64], index: 16, kind: input, shape index: {}]   ;;  %s5652_s15 = inlined_call_operand.vmem [shape: f32[2,1,256], index: 15, kind: input, shape index: {}]   ;;  %s5653_s17 = inlined_call_operand.vmem [shape: f32[2,1,64], index: 17, kind: input, shape index: {}]   ;;  %s5654_s18 = inlined_call_operand.vmem [shape: f32[1,64], index: 18, kind: input, shape index: {}]   ;;  %s5655_s19 = inlined_call_operand.vmem [shape: f32[1,64], index: 19, kind: input, shape index: {}]   ;;  %s5656_s20 = inlined_call_operand.vmem [shape: f32[32,1], index: 20, kind: output, shape index: {}]  }
   0x1   :  { %5663 = sst [smem:[#allocation3_spill]] %s5636_s0  ;;  %vm1047_vm4 = vcmask 392448   ;;  %vm1249_vm5 = vcmask 523648   ;;  %vm3471_vm6 = vcmask 7168  }
   0x2   :  { %5664 = sst [smem:[#allocation4_spill]] %s5637_s1  ;;  %s5668_s23 = sld [smem:[#allocation3_spill]] }
   0x3   :  { %5665 = sst [smem:[#allocation5_spill]] %s5638_s3  ;;  %s5669_s29 = sld [smem:[#allocation4_spill]] }
   0x4   :  { %5666 = sst [smem:[#allocation6_spill]] %s5639_s4  ;;  %s5670_s0 = sld [smem:[#allocation5_spill]] }
   0x5   :  { %5667 = sst [smem:[#allocation7_spill]] %s5640_s2  ;;  %s5671_s22 = sld [smem:[#allocation6_spill]] }
   0x6   :  { %s5672_s3 = sld [smem:[#allocation7_spill]]  ;;  %s4359_s1 = smov 96  }
   0x7   :  { %s5661_s2 = smov 16   ;;  %s5673_s4 = smov 16  }
   0x8   :  { %v66_v0 = vld [vmem:[%s5668_s23] sm:$0xff]  ;;  %v68_v1 = vld [vmem:[%s5668_s23 + $0x10] sm:$0xff]  ;;  %v67_v2 = vld [vmem:[%s5668_s23 + $0x8] sm:$0xff] }
   0x9   :  { %72 = vadd.xlane.f32.xlu0 %v66_v0  ;;  %76 = vadd.xlane.f32.xlu1 %v68_v1  ;;  %v69_v3 = vld [vmem:[%s5668_s23 + $0x18] sm:$0xff]  ;;  %v4051_v4 = vld [vmem:[%s5669_s29] sm:$0xff]   ;;  %v4052_v21 = vld [vmem:[%s5669_s29 + $0x8] sm:$0xff]  }
   0xa   :  { %3855 = vmatprep.subr.bf16.mxu0 %v4051_v4  ;;  %v4053_v22 = vld [vmem:[%s5669_s29 + $0x10] sm:$0xff]   ;;  %v4054_v23 = vld [vmem:[%s5669_s29 + $0x18] sm:$0xff]   ;;  %v4055_v24 = vld [vmem:[%s5669_s29 + $0x20] sm:$0xff]  }
   0xb   :  { %3856 = vmatpush3.bf16.msra.mxu0 %v4051_v4  ;;  %v4056_v25 = vld [vmem:[%s5669_s29 + $0x28] sm:$0xff]   ;;  %v4057_v26 = vld [vmem:[%s5669_s29 + $0x30] sm:$0xff]   ;;  %v4058_v27 = vld [vmem:[%s5669_s29 + $0x38] sm:$0xff]   ;;  %s5659_s29 = smov 80  }
   0xc   :  { %3857 = vmatprep.subr.bf16.mxu0 %v4052_v21  ;;  %v3480_v42 = vld [vmem:[%s5670_s0] ss:$0 sm:$0xff]  ;;  %s4357_s0 = smov 112  }
   0xd   :  { %74 = vadd.xlane.f32.xlu0 %v67_v2  ;;  %78 = vadd.xlane.f32.xlu1 %v69_v3  ;;  %v3481_v47 = vld [vmem:[%s5671_s22] ss:$0 sm:$0xff]  ;;  %s4360_s22 = smov 32  }
   0xe   :  { %v3482_v60 = vld [vmem:[%s5672_s3] ss:$0 sm:$0xff] }
   0xf   :  { %3858 = vmatpush3.bf16.msra.mxu0 %v4052_v21 }
  0x10   :  { %3859 = vmatprep.subr.bf16.mxu0 %v4053_v22 }
  0x13   :  { %3860 = vmatpush3.bf16.msra.mxu0 %v4053_v22 }
  0x14   :  { %3861 = vmatprep.subr.bf16.mxu0 %v4054_v23 }
  0x17   :  { %3862 = vmatpush3.bf16.msra.mxu0 %v4054_v23 }
  0x18   :  { %3863 = vmatprep.subr.bf16.mxu0 %v4055_v24 }
  0x1b   :  { %3864 = vmatpush3.bf16.msra.mxu0 %v4055_v24 }
  0x1c   :  { %3865 = vmatprep.subr.bf16.mxu0 %v4056_v25 }
  0x1f   :  { %3866 = vmatpush3.bf16.msra.mxu0 %v4056_v25 }
  0x20   :  { %3867 = vmatprep.subr.bf16.mxu0 %v4057_v26 }
  0x23   :  { %3868 = vmatpush3.bf16.msra.mxu0 %v4057_v26 }
  0x24   :  { %3869 = vmatprep.subr.bf16.mxu0 %v4058_v27 }
  0x27   :  { %3870 = vmatpush3.bf16.msra.mxu0 %v4058_v27 }
  0x96   :  { %v73_v5 = vpop.xlane.xlu0 %72  ;;  %v77_v6 = vpop.xlane.xlu1 %76 }
  0x97   :  { %v81_v7 = vmul.f32 0.0078125, %v73_v5  ;;  %v83_v8 = vmul.f32 0.0078125, %v77_v6 }
  0x99   :  { %v85_v9 = vsub.f32 %v66_v0, %v81_v7  ;;  %v87_v10 = vsub.f32 %v68_v1, %v83_v8 }
  0x9a   :  { %v75_v11 = vpop.xlane.xlu0 %74  ;;  %v79_v12 = vpop.xlane.xlu1 %78 }
  0x9b   :  { %v82_v13 = vmul.f32 0.0078125, %v75_v11  ;;  %v89_v14 = vmul.f32 %v85_v9, %v85_v9  ;;  %v84_v15 = vmul.f32 0.0078125, %v79_v12  ;;  %v91_v16 = vmul.f32 %v87_v10, %v87_v10 }
  0x9d   :  { %93 = vadd.xlane.f32.xlu0 %v89_v14  ;;  %v86_v17 = vsub.f32 %v67_v2, %v82_v13  ;;  %v88_v18 = vsub.f32 %v69_v3, %v84_v15 }
  0x9f   :  { %v90_v19 = vmul.f32 %v86_v17, %v86_v17  ;;  %v92_v20 = vmul.f32 %v88_v18, %v88_v18 }
  0xa1   :  { %97 = vadd.xlane.f32.xlu0 %v91_v16  ;;  %95 = vadd.xlane.f32.xlu1 %v90_v19 }
  0xa5   :  { %99 = vadd.xlane.f32.xlu1 %v92_v20 }
 0x12a   :  { %v94_v28 = vpop.xlane.xlu0 %93 }
 0x12b   :  { %v101_v29 = vmul.f32 0.0078125, %v94_v28 }
 0x12d   :  { %v105_v30 = vadd.f32 1e-05, %v101_v29  ;;  %v4059_v29 = vld [vmem:[%s5641_s8 + $0x4] ss:$8 sps:$4 sm:$0xff]  }
 0x12e   :  { %v96_v31 = vpop.xlane.xlu1 %95  ;;  %v98_v32 = vpop.xlane.xlu0 %97  ;;  %403 = vmatprep.subr.bf16.mxu1 %v4059_v29 }
 0x12f   :  { %4147 = vrsqrt.f32 %v105_v30  ;;  %v102_v33 = vmul.f32 0.0078125, %v96_v31  ;;  %v103_v34 = vmul.f32 0.0078125, %v98_v32  ;;  %v4061_v30 = vld [vmem:[%s5641_s8] ss:$8 sps:$4 sm:$0xff]   ;;  %v4062_v31 = vld [vmem:[%s5641_s8 + $0x14] ss:$8 sps:$4 sm:$0xff]  }
 0x130   :  { %404 = vmatpush1.bf16.msra.mxu1 %v4061_v30  ;;  %v4064_v32 = vld [vmem:[%s5641_s8 + $0x10] ss:$8 sps:$4 sm:$0xff]  }
 0x131   :  { %v106_v35 = vadd.f32 1e-05, %v102_v33  ;;  %v107_v36 = vadd.f32 1e-05, %v103_v34  ;;  %v4355_v33 = vmov 0   ;;  %405 = vmatprep.subr.bf16.mxu1 %v4062_v31 }
 0x132   :  { %v100_v37 = vpop.xlane.xlu1 %99  ;;  %435 = vmatprep.mubr.bf16.mxu1 %v4355_v33  ;;  %v4065_v34 = vld [vmem:[%s5641_s8 + $0x24] ss:$8 sps:$4 sm:$0xff]  }
 0x133   :  { %4149 = vrsqrt.f32 %v106_v35  ;;  %v104_v38 = vmul.f32 0.0078125, %v100_v37  ;;  %v4067_v35 = vld [vmem:[%s5641_s8 + $0x20] ss:$8 sps:$4 sm:$0xff]   ;;  %v4070_v37 = vld [vmem:[%s5641_s8 + $0x30] ss:$8 sps:$4 sm:$0xff]  }
 0x134   :  { %4151 = vrsqrt.f32 %v107_v36  ;;  %406 = vmatpush1.bf16.msra.mxu1 %v4064_v32  ;;  %v4068_v36 = vld [vmem:[%s5641_s8 + $0x34] ss:$8 sps:$4 sm:$0xff]  }
 0x135   :  { %v108_v39 = vadd.f32 1e-05, %v104_v38  ;;  %407 = vmatprep.subr.bf16.mxu1 %v4065_v34 }
 0x137   :  { %4153 = vrsqrt.f32 %v108_v39 }
 0x138   :  { %408 = vmatpush1.bf16.msra.mxu1 %v4067_v35 }
 0x139   :  { %v4148_v40 = vpop.eup %4147  ;;  %409 = vmatprep.subr.bf16.mxu1 %v4068_v36 }
 0x13a   :  { %v113_v41 = vmul.f32 %v4148_v40, %v85_v9 }
 0x13c   :  { %v123_v46 = vmul.f32 %v3480_v42, %v113_v41  ;;  %410 = vmatpush1.bf16.msra.mxu1 %v4070_v37 }
 0x13d   :  { %v4150_v43 = vpop.eup %4149 }
 0x13e   :  { %v4152_v44 = vpop.eup %4151  ;;  %v114_v45 = vmul.f32 %v4150_v43, %v86_v17  ;;  %v133_v51 = vadd.f32 %v3481_v47, %v123_v46 }
 0x13f   :  { %v115_v48 = vmul.f32 %v4152_v44, %v87_v10 }
 0x140   :  { %v124_v49 = vmul.f32 %v3480_v42, %v114_v45 }
 0x141   :  { %v4154_v50 = vpop.eup %4153  ;;  %v125_v54 = vmul.f32 %v3480_v42, %v115_v48 }
 0x142   :  { %v134_v52 = vadd.f32 %v3481_v47, %v124_v49  ;;  %v116_v53 = vmul.f32 %v4154_v50, %v88_v18 }
 0x143   :  { %v135_v57 = vadd.f32 %v3481_v47, %v125_v54 }
 0x144   :  { %v137_v55 = vpack.c.bf16 %v134_v52, %v133_v51  ;;  %v126_v56 = vmul.f32 %v3480_v42, %v116_v53  ;;  %v3491_v51 = vld [vmem:[%s5642_s6] ss:$0 sm:$0xff] }
 0x146   :  { %3871 = vmatprep.mubr.bf16.mxu0 %v137_v55  ;;  %v136_v58 = vadd.f32 %v3481_v47, %v126_v56 }
 0x148   :  { %v138_v59 = vpack.c.bf16 %v136_v58, %v135_v57  ;;  %v3492_v57 = vld [vmem:[%s5643_s7] ss:$0 sm:$0xff] }
 0x14a   :  { %3872 = vmatmul.mubr.bf16.vlgmr.msra.gmra.mrb[0].mxu0 %v138_v59 }
 0x21d   :  { %v3873_v61 = vpop.f32.mrb[0].mxu0 }
 0x21e   :  { %v244_v62 = vpop.f32.mrb[1].mxu0  ;;  %v4515_v2 = vadd.f32 %v3873_v61, %v3482_v60 }
 0x21f   :  { %v4513_v63 = vadd.f32 %v3482_v60, %v244_v62  ;;  %v3874_v0 = vpop.f32.mrb[2].mxu0 }
 0x220   :  { %v247_v1 = vpop.f32.mrb[3].mxu0  ;;  %v4521_v5 = vadd.f32 %v3874_v0, %v3482_v60  ;;  %v268_v7 = vsel %vm261_vm0, %v4515_v2, 0.0 }
 0x221   :  { %v4517_v3 = vadd.f32 %v3482_v60, %v247_v1  ;;  %v262_v4 = vsel %vm261_vm0, %v4513_v63, 0.0 }
 0x222   :  { %263 = vadd.xlane.f32.xlu0 %v262_v4  ;;  %v271_v8 = vsel %vm261_vm0, %v4521_v5, 0.0 }
 0x223   :  { %v265_v6 = vsel %vm261_vm0, %v4517_v3, 0.0 }
 0x224   :  { %266 = vadd.xlane.f32.xlu1 %v265_v6 }
 0x226   :  { %269 = vadd.xlane.f32.xlu0 %v268_v7 }
 0x228   :  { %272 = vadd.xlane.f32.xlu1 %v271_v8 }
 0x2af   :  { %v264_v9 = vpop.xlane.xlu0 %263 }
 0x2b0   :  { %v275_v10 = vmul.f32 0.015625, %v264_v9 }
 0x2b1   :  { %v267_v11 = vpop.xlane.xlu1 %266 }
 0x2b2   :  { %v279_v12 = vsub.f32 %v4513_v63, %v275_v10  ;;  %v276_v13 = vmul.f32 0.015625, %v267_v11  ;;  %v347_v10 = vlaneseq }
 0x2b3   :  { %v270_v14 = vpop.xlane.xlu0 %269 }
 0x2b4   :  { %v280_v15 = vsub.f32 %v4517_v3, %v276_v13  ;;  %v277_v16 = vmul.f32 0.015625, %v270_v14  ;;  %v283_v17 = vmul.f32 %v279_v12, %v279_v12  ;;  %v348_v11 = vshrl.u32 %v347_v10, 7  ;;  %v345_v13 = vld [vmem:[%s5644_s9] sm:$0x3]  ;;  %v3517_v10 = vld [vmem:[%s5645_s5 + $0x50] sm:$0xff] }
 0x2b5   :  { %v273_v18 = vpop.xlane.xlu1 %272 }
 0x2b6   :  { %v4532_v19 = vsub.f32 %v4515_v2, %v277_v16  ;;  %v278_v20 = vmul.f32 0.015625, %v273_v18  ;;  %v287_v21 = vsel %vm261_vm0, %v283_v17, 0.0  ;;  %v284_v22 = vmul.f32 %v280_v15, %v280_v15 }
 0x2b7   :  { %288 = vadd.xlane.f32.xlu0 %v287_v21  ;;  %v4581_v14 = vsub.s32 1, %v348_v11 }
 0x2b8   :  { %v282_v23 = vsub.f32 %v4521_v5, %v278_v20  ;;  %v290_v24 = vsel %vm261_vm0, %v284_v22, 0.0  ;;  %v285_v25 = vmul.f32 %v4532_v19, %v4532_v19 }
 0x2b9   :  { %291 = vadd.xlane.f32.xlu1 %v290_v24  ;;  %v354_v17 = vrot.slane %v345_v13, %v4581_v14 }
 0x2ba   :  { %v293_v26 = vsel %vm261_vm0, %v285_v25, 0.0  ;;  %v286_v27 = vmul.f32 %v282_v23, %v282_v23 }
 0x2bb   :  { %294 = vadd.xlane.f32.xlu0 %v293_v26 }
 0x2bc   :  { %v296_v28 = vsel %vm261_vm0, %v286_v27, 0.0 }
 0x2bd   :  { %297 = vadd.xlane.f32.xlu1 %v296_v28 }
 0x344   :  { %v289_v38 = vpop.xlane.xlu0 %288 }
 0x345   :  { %v299_v39 = vmul.f32 0.015625, %v289_v38 }
 0x346   :  { %v292_v40 = vpop.xlane.xlu1 %291 }
 0x347   :  { %v303_v41 = vadd.f32 1e-05, %v299_v39  ;;  %v300_v42 = vmul.f32 0.015625, %v292_v40 }
 0x348   :  { %v295_v43 = vpop.xlane.xlu0 %294 }
 0x349   :  { %4155 = vrsqrt.f32 %v303_v41  ;;  %v304_v44 = vadd.f32 1e-05, %v300_v42  ;;  %v301_v45 = vmul.f32 0.015625, %v295_v43 }
 0x34a   :  { %v298_v46 = vpop.xlane.xlu1 %297 }
 0x34b   :  { %4157 = vrsqrt.f32 %v304_v44  ;;  %v305_v47 = vadd.f32 1e-05, %v301_v45  ;;  %v302_v48 = vmul.f32 0.015625, %v298_v46 }
 0x34d   :  { %4159 = vrsqrt.f32 %v305_v47  ;;  %v306_v49 = vadd.f32 1e-05, %v302_v48 }
 0x34f   :  { %4161 = vrsqrt.f32 %v306_v49 }
 0x353   :  { %v4156_v50 = vpop.eup %4155 }
 0x354   :  { %v311_v52 = vmul.f32 %v4156_v50, %v279_v12  ;;  %v4576_v12 = vsub.s32 0, %v348_v11 }
 0x355   :  { %v4158_v53 = vpop.eup %4157 }
 0x356   :  { %v312_v54 = vmul.f32 %v4158_v53, %v280_v15  ;;  %v321_v55 = vmul.f32 %v3491_v51, %v311_v52  ;;  %v350_v15 = vrot.slane %v345_v13, %v4576_v12  ;;  %v3516_v13 = vld [vmem:[%s5645_s5 + $0x48] sm:$0xff] }
 0x357   :  { %v4160_v56 = vpop.eup %4159 }
 0x358   :  { %v322_v58 = vmul.f32 %v3491_v51, %v312_v54  ;;  %v331_v60 = vadd.f32 %v3492_v57, %v321_v55  ;;  %v313_v62 = vmul.f32 %v4160_v56, %v4532_v19 }
 0x359   :  { %v4162_v59 = vpop.eup %4161 }
 0x35a   :  { %v332_v61 = vadd.f32 %v3492_v57, %v322_v58  ;;  %v314_v0 = vmul.f32 %v4162_v59, %v282_v23  ;;  %v323_v6 = vmul.f32 %v3491_v51, %v313_v62 }
 0x35c   :  { %v335_v1 = vpack.c.bf16 %v332_v61, %v331_v60  ;;  %v324_v4 = vmul.f32 %v3491_v51, %v314_v0  ;;  %v333_v8 = vadd.f32 %v3492_v57, %v323_v6 }
 0x35e   :  { %3501 = vmatmul.mubr.msk.bf16.vlgmr.msra.gmra.mrb[0].mxu1 %vm261_vm0, %v335_v1  ;;  %v334_v7 = vadd.f32 %v3492_v57, %v324_v4 }
 0x35f   :  { %445 = vmatprep.mubr.bf16.mxu1 %v4355_v33 }
 0x360   :  { %v336_v9 = vpack.c.bf16 %v334_v7, %v333_v8  ;;  %v3515_v8 = vld [vmem:[%s5645_s5 + $0x40] sm:$0xff] }
 0x366   :  { %3502 = vmatmul.mubr.msk.bf16.gmra.mrb[4].mxu1 %vm261_vm0, %v336_v9 }
 0x431   :  { %v437_v16 = vpop.f32.mrb[0].mxu1 }
 0x432   :  { %v438_v18 = vadd.f32 %v437_v16, %v350_v15  ;;  %v439_v19 = vpop.f32.mrb[1].mxu1 }
 0x433   :  { %v441_v20 = vpop.f32.mrb[2].mxu1  ;;  %v440_v23 = vadd.f32 %v439_v19, %v354_v17 }
 0x434   :  { %v442_v21 = vadd.f32 %v441_v20, %v350_v15  ;;  %v443_v22 = vpop.f32.mrb[3].mxu1  ;;  %v456_v25 = vmul.f32 0.25, %v438_v18 }
 0x435   :  { %v444_v24 = vadd.f32 %v443_v22, %v354_v17 }
 0x436   :  { %v457_v26 = vmul.f32 0.25, %v442_v21  ;;  %v4585_v27 = vpack.c.bf16 %v442_v21, %v438_v18  ;;  %v3518_v21 = vld [vmem:[%s5645_s5 + $0x58] sm:$0xff] }
 0x437   :  { %v4587_v28 = vpack.c.bf16 %v444_v24, %v440_v23 }
 0x438   :  { %v4589_v29 = vpack.c.bf16 %v457_v26, %v456_v25  ;;  %470 = vrot.lane.b32.xlu0 %v4585_v27, %s4356_s30 }
 0x439   :  { %v447_v30 = vpop.f32.mrb[4].mxu1  ;;  %3883 = vmatprep.subr.bf16.mxu0 %v4587_v28 }
 0x43a   :  { %v448_v31 = vadd.f32 %v447_v30, %v350_v15  ;;  %v449_v32 = vpop.f32.mrb[5].mxu1  ;;  %3879 = vmatprep.mubr.msk.bf16.mxu1 %vm474_vm1, %v4589_v29  ;;  %3884 = vmatpush3.bf16.msra.mxu0 %v4587_v28 }
 0x43b   :  { %v451_v34 = vpop.f32.mrb[6].mxu1  ;;  %v450_v37 = vadd.f32 %v449_v32, %v354_v17 }
 0x43c   :  { %v452_v35 = vadd.f32 %v451_v34, %v350_v15  ;;  %651 = vrot.lane.b32.xlu0 %v4589_v29, %s4357_s0  ;;  %v453_v36 = vpop.f32.mrb[7].mxu1  ;;  %v458_v39 = vmul.f32 0.25, %v448_v31 }
 0x43d   :  { %v454_v38 = vadd.f32 %v453_v36, %v354_v17 }
 0x43e   :  { %v459_v40 = vmul.f32 0.25, %v452_v35  ;;  %v4599_v41 = vpack.c.bf16 %v452_v35, %v448_v31 }
 0x43f   :  { %v4601_v42 = vpack.c.bf16 %v454_v38, %v450_v37 }
 0x440   :  { %v4603_v43 = vpack.c.bf16 %v459_v40, %v458_v39  ;;  %472 = vrot.lane.b32.xlu1 %v4599_v41, %s4356_s30 }
 0x441   :  { %3885 = vmatprep.subr.bf16.mxu0 %v4601_v42 }
 0x442   :  { %3886 = vmatpush3.bf16.msra.mxu0 %v4601_v42  ;;  %653 = vrot.lane.b32.xlu0 %v4603_v43, %s4357_s0 }
 0x444   :  { %655 = vrot.lane.b32.xlu1 %v4585_v27, %s4358_s21 }
 0x446   :  { %855 = vrot.lane.b32.xlu0 %v4589_v29, %s4359_s1 }
 0x448   :  { %657 = vrot.lane.b32.xlu1 %v4599_v41, %s4358_s21 }
 0x44c   :  { %859 = vrot.lane.b32.xlu1 %v4585_v27, %s4360_s22 }
 0x450   :  { %861 = vrot.lane.b32.xlu1 %v4599_v41, %s4360_s22 }
 0x454   :  { %857 = vrot.lane.b32.xlu1 %v4603_v43, %s4359_s1 }
 0x4aa   :  { %v471_v44 = vpop.permute.xlu0 %470 }
 0x4ab   :  { %4027 = vmatprep.subr.msk.bf16.mxu1 %vm474_vm1, %v471_v44  ;;  %v482_v45 = vsel %vm474_vm1, %v471_v44, 0 }
 0x4ac   :  { %3876 = vmatpush3.bf16.xpose.msra.mxu1 %v482_v45 }
 0x4ae   :  { %v652_v49 = vpop.permute.xlu0 %651 }
 0x4b2   :  { %v473_v46 = vpop.permute.xlu1 %472 }
 0x4b3   :  { %4028 = vmatprep.subr.msk.bf16.mxu1 %vm474_vm1, %v473_v46  ;;  %v485_v47 = vsel %vm474_vm1, %v473_v46, 0 }
 0x4b4   :  { %3878 = vmatpush3.bf16.xpose.msra.mxu1 %v485_v47  ;;  %v654_v54 = vpop.permute.xlu0 %653 }
 0x4b6   :  { %v656_v48 = vpop.permute.xlu1 %655 }
 0x4b7   :  { %4029 = vmatprep.subr.msk.bf16.mxu1 %vm474_vm1, %v656_v48  ;;  %v666_v50 = vsel %vm474_vm1, %v656_v48, 0 }
 0x4b8   :  { %v856_v55 = vpop.permute.xlu0 %855 }
 0x4ba   :  { %v658_v51 = vpop.permute.xlu1 %657 }
 0x4bb   :  { %3880 = vmatmul.mubr.msk.bf16.vlgmr.msra.gmra.mrb[8].mxu1 %vm474_vm1, %v4603_v43  ;;  %v669_v52 = vsel %vm474_vm1, %v658_v51, 0 }
 0x4bc   :  { %3892 = vmatpush3.bf16.xpose.msra.mxu1 %v666_v50  ;;  %3895 = vmatprep.mubr.msk.bf16.mxu1 %vm474_vm1, %v652_v49 }
 0x4bd   :  { %4030 = vmatprep.subr.msk.bf16.mxu1 %vm474_vm1, %v658_v51 }
 0x4be   :  { %v860_v53 = vpop.permute.xlu1 %859 }
 0x4bf   :  { %v870_v56 = vsel %vm474_vm1, %v860_v53, 0 }
 0x4c2   :  { %v862_v57 = vpop.permute.xlu1 %861 }
 0x4c3   :  { %v873_v58 = vsel %vm474_vm1, %v862_v57, 0 }
 0x4c4   :  { %3894 = vmatpush3.bf16.xpose.msra.mxu1 %v669_v52 }
 0x4c5   :  { %4031 = vmatprep.subr.msk.bf16.mxu1 %vm474_vm1, %v860_v53  ;;  %v464_v53 = vld [vmem:[%s5645_s5] sm:$0xff] }
 0x4c6   :  { %v858_v59 = vpop.permute.xlu1 %857 }
 0x4cb   :  { %3896 = vmatmul.mubr.msk.bf16.vlgmr.msra.gmra.mrb[12].mxu1 %vm474_vm1, %v654_v54 }
 0x4cc   :  { %3908 = vmatpush3.bf16.xpose.msra.mxu1 %v870_v56  ;;  %3911 = vmatprep.mubr.msk.bf16.mxu1 %vm474_vm1, %v856_v55  ;;  %v465_v55 = vld [vmem:[%s5645_s5 + $0x8] sm:$0xff] }
 0x4cd   :  { %4032 = vmatprep.subr.msk.bf16.mxu1 %vm474_vm1, %v862_v57 }
 0x4d4   :  { %3910 = vmatpush3.bf16.xpose.msra.mxu1 %v873_v58 }
 0x4db   :  { %3912 = vmatmul.mubr.msk.bf16.vlgmr.msra.gmra.mrb[16].mxu1 %vm474_vm1, %v858_v59  ;;  %v3507_v59 = vld [vmem:[%s5645_s5 + $0x20] sm:$0xff] }
 0x58e   :  { %v4641_v60 = vpop.f32.mrb[8].mxu1 }
 0x58f   :  { %v4643_v61 = vpop.f32.mrb[9].mxu1 }
 0x590   :  { %v4645_v62 = vpop.f32.mrb[10].mxu1  ;;  %v4705_v54 = vadd.f32 %v4643_v61, %v464_v53 }
 0x591   :  { %v4647_v0 = vpop.f32.mrb[11].mxu1 }
 0x592   :  { %v4725_v57 = vadd.f32 %v4647_v0, %v465_v55 }
 0x59e   :  { %v4649_v1 = vpop.f32.mrb[12].mxu1 }
 0x59f   :  { %v4651_v4 = vpop.f32.mrb[13].mxu1 }
 0x5a0   :  { %v4653_v6 = vpop.f32.mrb[14].mxu1  ;;  %v4736_v61 = vadd.f32 %v3507_v59, %v4651_v4 }
 0x5a1   :  { %v4655_v7 = vpop.f32.mrb[15].mxu1 }
 0x5ae   :  { %v3913_v9 = vpop.f32.mrb[16].mxu1 }
 0x5af   :  { %v909_v11 = vpop.f32.mrb[17].mxu1  ;;  %v918_v18 = vadd.f32 %v3913_v9, %v3517_v10  ;;  %v3509_v9 = vld [vmem:[%s5645_s5 + $0x30] sm:$0xff]  ;;  %v3510_v10 = vld [vmem:[%s5645_s5 + $0x38] sm:$0xff] }
 0x5b0   :  { %v910_v15 = vadd.f32 %v3515_v8, %v909_v11  ;;  %v3914_v16 = vpop.f32.mrb[18].mxu1  ;;  %v540_v8 = vsel %vm536_vm2, %v4725_v57, -inf  ;;  %v4752_v4 = vadd.f32 %v4649_v1, %v3509_v9  ;;  %v720_v11 = vsel %vm536_vm2, %v4736_v61, -inf }
 0x5b1   :  { %v912_v17 = vpop.f32.mrb[19].mxu1  ;;  %v921_v23 = vadd.f32 %v3914_v16, %v3518_v21  ;;  %v930_v24 = vsel %vm536_vm2, %v918_v18, -inf }
 0x5b2   :  { %v913_v19 = vadd.f32 %v3516_v13, %v912_v17  ;;  %v924_v20 = vsel %vm536_vm2, %v910_v15, -inf }
 0x5b3   :  { %925 = vmax.xlane.f32.xlu0 %v924_v20  ;;  %v933_v25 = vsel %vm536_vm2, %v921_v23, -inf }
 0x5b4   :  { %v927_v22 = vsel %vm536_vm2, %v913_v19, -inf }
 0x5b5   :  { %928 = vmax.xlane.f32.xlu1 %v927_v22 }
 0x5b7   :  { %931 = vmax.xlane.f32.xlu0 %v930_v24 }
 0x5bb   :  { %934 = vmax.xlane.f32.xlu0 %v933_v25 }
 0x5c6   :  { %972 = vrot.lane.b32.xlu1 %v4601_v42, %s4359_s1 }
 0x640   :  { %v926_v26 = vpop.xlane.xlu0 %925 }
 0x641   :  { %v936_v30 = vsub.f32 %v910_v15, %v926_v26  ;;  %v726_v15 = vsel %vm536_vm2, %v4752_v4, -inf }
 0x642   :  { %v929_v31 = vpop.xlane.xlu1 %928 }
 0x643   :  { %v940_v35 = vmul.f32 1.442695, %v936_v30  ;;  %v937_v36 = vsub.f32 %v913_v19, %v929_v31 }
 0x644   :  { %v932_v32 = vpop.xlane.xlu0 %931 }
 0x645   :  { %v938_v34 = vsub.f32 %v918_v18, %v932_v32  ;;  %v942_v40 = vmul.f32 1.442695, %v937_v36 }
 0x646   :  { %v973_v1 = vpop.permute.xlu1 %972 }
 0x647   :  { %v944_v37 = vmul.f32 1.442695, %v938_v34 }
 0x648   :  { %v935_v38 = vpop.xlane.xlu0 %934 }
 0x649   :  { %4163 = vpow2.f32 %v944_v37  ;;  %v939_v39 = vsub.f32 %v921_v23, %v935_v38 }
 0x64a   :  { %4165 = vpow2.f32 %v940_v35 }
 0x64b   :  { %v946_v44 = vmul.f32 1.442695, %v939_v39 }
 0x64d   :  { %4167 = vpow2.f32 %v946_v44 }
 0x64e   :  { %4169 = vpow2.f32 %v942_v40 }
 0x653   :  { %v4675_v45 = vpop.eup %4163 }
 0x654   :  { %v954_v46 = vsel %vm536_vm2, %v4675_v45, 0.0  ;;  %v4679_v47 = vpop.eup %4165 }
 0x655   :  { %955 = vadd.xlane.f32.xlu0 %v954_v46  ;;  %v948_v49 = vsel %vm536_vm2, %v4679_v47, 0.0 }
 0x657   :  { %v4681_v48 = vpop.eup %4167 }
 0x658   :  { %v957_v50 = vsel %vm536_vm2, %v4681_v48, 0.0  ;;  %v4687_v51 = vpop.eup %4169 }
 0x659   :  { %949 = vadd.xlane.f32.xlu0 %v948_v49  ;;  %958 = vadd.xlane.f32.xlu1 %v957_v50  ;;  %v951_v52 = vsel %vm536_vm2, %v4687_v51, 0.0 }
 0x65d   :  { %952 = vadd.xlane.f32.xlu1 %v951_v52 }
 0x66e   :  { %1061 = vrot.lane.b32.xlu1 %v4585_v27, %s5661_s2  ;;  %v466_v27 = vld [vmem:[%s5645_s5 + $0x10] sm:$0xff] }
 0x66f   :  { %970 = vrot.lane.b32.xlu0 %v4587_v28, %s4359_s1 }
 0x672   :  { %1063 = vrot.lane.b32.xlu1 %v4599_v41, %s5661_s2  ;;  %v4711_v41 = vadd.f32 %v4641_v60, %v466_v27  ;;  %v3508_v60 = vld [vmem:[%s5645_s5 + $0x28] sm:$0xff] }
 0x673   :  { %1057 = vrot.lane.b32.xlu0 %v4589_v29, %s5659_s29  ;;  %v537_v29 = vsel %vm536_vm2, %v4705_v54, -inf }
 0x674   :  { %v543_v58 = vsel %vm536_vm2, %v4711_v41, -inf }
 0x676   :  { %1059 = vrot.lane.b32.xlu1 %v4603_v43, %s5659_s29  ;;  %v467_v43 = vld [vmem:[%s5645_s5 + $0x18] sm:$0xff] }
 0x677   :  { %v4722_v56 = vadd.f32 %v4645_v62, %v467_v43  ;;  %v4739_v62 = vadd.f32 %v3508_v60, %v4655_v7  ;;  %v4755_v7 = vadd.f32 %v4653_v6, %v3510_v10 }
 0x679   :  { %v546_v0 = vsel %vm536_vm2, %v4722_v56, -inf  ;;  %v723_v13 = vsel %vm536_vm2, %v4739_v62, -inf  ;;  %v729_v16 = vsel %vm536_vm2, %v4755_v7, -inf }
 0x692   :  { %538 = vmax.xlane.f32.xlu0 %v537_v29 }
 0x696   :  { %544 = vmax.xlane.f32.xlu0 %v543_v58 }
 0x69a   :  { %547 = vmax.xlane.f32.xlu0 %v546_v0  ;;  %541 = vmax.xlane.f32.xlu1 %v540_v8  ;;  %v3523_v8 = vld [vmem:[%s5645_s5 + $0x60] sm:$0xff] }
 0x69e   :  { %721 = vmax.xlane.f32.xlu0 %v720_v11  ;;  %724 = vmax.xlane.f32.xlu1 %v723_v13 }
 0x6a2   :  { %727 = vmax.xlane.f32.xlu0 %v726_v15  ;;  %730 = vmax.xlane.f32.xlu1 %v729_v16 }
 0x6e2   :  { %v956_v17 = vpop.xlane.xlu0 %955 }
 0x6e6   :  { %v959_v6 = vpop.xlane.xlu1 %958  ;;  %v950_v18 = vpop.xlane.xlu0 %949 }
 0x6e7   :  { %4171 = vrcp.f32 %v959_v6 }
 0x6e8   :  { %4173 = vrcp.f32 %v950_v18 }
 0x6e9   :  { %4175 = vrcp.f32 %v956_v17 }
 0x6ea   :  { %v953_v19 = vpop.xlane.xlu1 %952  ;;  %v971_v20 = vpop.permute.xlu0 %970 }
 0x6eb   :  { %4177 = vrcp.f32 %v953_v19  ;;  %3915 = vmatprep.subr.bf16.mxu1 %v971_v20 }
 0x6ec   :  { %3916 = vmatpush3.bf16.msra.mxu1 %v971_v20 }
 0x6ed   :  { %3917 = vmatprep.subr.bf16.mxu1 %v973_v1 }
 0x6ee   :  { %v1062_v21 = vpop.permute.xlu1 %1061  ;;  %v1058_v36 = vpop.permute.xlu0 %1057 }
 0x6ef   :  { %v1072_v37 = vsel %vm474_vm1, %v1062_v21, 0 }
 0x6f0   :  { %3918 = vmatpush3.bf16.msra.mxu1 %v973_v1 }
 0x6f1   :  { %4033 = vmatprep.subr.msk.bf16.mxu1 %vm474_vm1, %v1062_v21  ;;  %v4172_v22 = vpop.eup %4171 }
 0x6f2   :  { %v4174_v23 = vpop.eup %4173  ;;  %v967_v26 = vmul.f32 %v4172_v22, %v4681_v48  ;;  %v1064_v38 = vpop.permute.xlu1 %1063 }
 0x6f3   :  { %v4176_v24 = vpop.eup %4175  ;;  %v964_v30 = vmul.f32 %v4174_v23, %v4679_v47  ;;  %v1075_v39 = vsel %vm474_vm1, %v1064_v38, 0 }
 0x6f4   :  { %v966_v32 = vmul.f32 %v4176_v24, %v4675_v45 }
 0x6f5   :  { %v4178_v25 = vpop.eup %4177 }
 0x6f6   :  { %v965_v31 = vmul.f32 %v4178_v25, %v4687_v51  ;;  %v969_v35 = vpack.c.bf16 %v967_v26, %v966_v32  ;;  %v1060_v40 = vpop.permute.xlu1 %1059 }
 0x6f8   :  { %v968_v34 = vpack.c.bf16 %v965_v31, %v964_v30 }
 0x6fa   :  { %3919 = vmatprep.mubr.msk.bf16.mxu1 %vm536_vm2, %v968_v34 }
 0x6fb   :  { %3920 = vmatmul.mubr.msk.bf16.vlgmr.msra.gmra.mrb[20].mxu1 %vm536_vm2, %v969_v35 }
 0x6fc   :  { %3924 = vmatpush3.bf16.xpose.msra.mxu1 %v1072_v37  ;;  %3927 = vmatprep.mubr.msk.bf16.mxu1 %vm474_vm1, %v1058_v36 }
 0x6fd   :  { %4034 = vmatprep.subr.msk.bf16.mxu1 %vm474_vm1, %v1064_v38 }
 0x704   :  { %3926 = vmatpush3.bf16.xpose.msra.mxu1 %v1075_v39 }
 0x70b   :  { %3928 = vmatmul.mubr.msk.bf16.vlgmr.msra.gmra.mrb[24].mxu1 %vm474_vm1, %v1060_v40 }
 0x70c   :  { %1532 = vmatprep.mubr.bf16.mxu1 %v4355_v33 }
 0x71f   :  { %v539_v44 = vpop.xlane.xlu0 %538 }
 0x720   :  { %v549_v52 = vsub.f32 %v4705_v54, %v539_v44 }
 0x722   :  { %v553_v29 = vmul.f32 1.442695, %v549_v52 }
 0x723   :  { %v545_v45 = vpop.xlane.xlu0 %544 }
 0x724   :  { %v551_v43 = vsub.f32 %v4711_v41, %v545_v45  ;;  %4179 = vpow2.f32 %v553_v29  ;;  %v3525_v41 = vld [vmem:[%s5645_s5 + $0x70] sm:$0xff] }
 0x726   :  { %v557_v60 = vmul.f32 1.442695, %v551_v43 }
 0x727   :  { %v548_v50 = vpop.xlane.xlu0 %547  ;;  %v542_v51 = vpop.xlane.xlu1 %541 }
 0x728   :  { %v550_v53 = vsub.f32 %v4725_v57, %v542_v51  ;;  %v552_v59 = vsub.f32 %v4722_v56, %v548_v50  ;;  %v3524_v56 = vld [vmem:[%s5645_s5 + $0x68] sm:$0xff] }
 0x72a   :  { %v555_v58 = vmul.f32 1.442695, %v550_v53  ;;  %v559_v57 = vmul.f32 1.442695, %v552_v59 }
 0x72b   :  { %v722_v27 = vpop.xlane.xlu0 %721  ;;  %v725_v55 = vpop.xlane.xlu1 %724 }
 0x72c   :  { %v732_v0 = vsub.f32 %v4736_v61, %v722_v27  ;;  %4181 = vpow2.f32 %v555_v58  ;;  %v733_v10 = vsub.f32 %v4739_v62, %v725_v55  ;;  %v3526_v62 = vld [vmem:[%s5645_s5 + $0x78] sm:$0xff] }
 0x72d   :  { %4183 = vpow2.f32 %v557_v60 }
 0x72e   :  { %v736_v16 = vmul.f32 1.442695, %v732_v0  ;;  %4185 = vpow2.f32 %v559_v57  ;;  %v738_v20 = vmul.f32 1.442695, %v733_v10  ;;  %v4809_v25 = vpop.eup %4179 }
 0x72f   :  { %v728_v9 = vpop.xlane.xlu0 %727  ;;  %v731_v61 = vpop.xlane.xlu1 %730 }
 0x730   :  { %v734_v1 = vsub.f32 %v4752_v4, %v728_v9  ;;  %v735_v21 = vsub.f32 %v4755_v7, %v731_v61  ;;  %4187 = vpow2.f32 %v736_v16  ;;  %v561_v7 = vsel %vm536_vm2, %v4809_v25, 0.0 }
 0x731   :  { %4189 = vpow2.f32 %v738_v20 }
 0x732   :  { %v740_v24 = vmul.f32 1.442695, %v734_v1  ;;  %v742_v26 = vmul.f32 1.442695, %v735_v21 }
 0x734   :  { %4191 = vpow2.f32 %v740_v24 }
 0x735   :  { %4193 = vpow2.f32 %v742_v26 }
 0x736   :  { %v4812_v31 = vpop.eup %4181 }
 0x737   :  { %v4816_v32 = vpop.eup %4183  ;;  %v564_v34 = vsel %vm536_vm2, %v4812_v31, 0.0 }
 0x738   :  { %v4820_v35 = vpop.eup %4185  ;;  %v567_v36 = vsel %vm536_vm2, %v4816_v32, 0.0 }
 0x739   :  { %v570_v38 = vsel %vm536_vm2, %v4820_v35, 0.0 }
 0x73a   :  { %v4824_v37 = vpop.eup %4187 }
 0x73b   :  { %v4828_v39 = vpop.eup %4189  ;;  %v744_v40 = vsel %vm536_vm2, %v4824_v37, 0.0 }
 0x73c   :  { %v747_v45 = vsel %vm536_vm2, %v4828_v39, 0.0 }
 0x73e   :  { %v4832_v44 = vpop.eup %4191 }
 0x73f   :  { %v4836_v50 = vpop.eup %4193  ;;  %v750_v51 = vsel %vm536_vm2, %v4832_v44, 0.0 }
 0x740   :  { %v753_v52 = vsel %vm536_vm2, %v4836_v50, 0.0 }
 0x7ce   :  { %v4778_v46 = vpop.f32.mrb[20].mxu1 }
 0x7cf   :  { %v4780_v47 = vpop.f32.mrb[21].mxu1 }
 0x7d0   :  { %v4782_v48 = vpop.f32.mrb[22].mxu1 }
 0x7d1   :  { %v4784_v49 = vpop.f32.mrb[23].mxu1 }
 0x7de   :  { %v3929_v54 = vpop.f32.mrb[24].mxu1 }
 0x7df   :  { %v1111_v11 = vpop.f32.mrb[25].mxu1  ;;  %v1120_v6 = vadd.f32 %v3929_v54, %v3525_v41 }
 0x7e0   :  { %v1112_v13 = vadd.f32 %v3523_v8, %v1111_v11  ;;  %v3930_v15 = vpop.f32.mrb[26].mxu1 }
 0x7e1   :  { %v1114_v17 = vpop.f32.mrb[27].mxu1  ;;  %v1123_v22 = vadd.f32 %v3930_v15, %v3526_v62  ;;  %v1132_v4 = vsel %vm536_vm2, %v1120_v6, -inf }
 0x7e2   :  { %v1115_v18 = vadd.f32 %v3524_v56, %v1114_v17  ;;  %v1126_v19 = vsel %vm536_vm2, %v1112_v13, -inf }
 0x7e3   :  { %1127 = vmax.xlane.f32.xlu0 %v1126_v19  ;;  %v1135_v30 = vsel %vm536_vm2, %v1123_v22, -inf }
 0x7e4   :  { %v1129_v23 = vsel %vm536_vm2, %v1115_v18, -inf }
 0x7e5   :  { %1130 = vmax.xlane.f32.xlu1 %v1129_v23 }
 0x7e7   :  { %1133 = vmax.xlane.f32.xlu0 %v1132_v4 }
 0x7e9   :  { %1136 = vmax.xlane.f32.xlu1 %v1135_v30 }
 0x7eb   :  { %562 = vadd.xlane.f32.xlu0 %v561_v7 }
 0x7ed   :  { %565 = vadd.xlane.f32.xlu1 %v564_v34 }
 0x7ef   :  { %568 = vadd.xlane.f32.xlu0 %v567_v36 }
 0x7f1   :  { %571 = vadd.xlane.f32.xlu1 %v570_v38 }
 0x7f3   :  { %745 = vadd.xlane.f32.xlu0 %v744_v40 }
 0x7f5   :  { %748 = vadd.xlane.f32.xlu1 %v747_v45 }
 0x7f7   :  { %751 = vadd.xlane.f32.xlu0 %v750_v51 }
 0x7f9   :  { %754 = vadd.xlane.f32.xlu1 %v753_v52 }
 0x80a   :  { %770 = vrot.lane.b32.xlu1 %v4601_v42, %s4357_s0 }
 0x80e   :  { %1172 = vrot.lane.b32.xlu1 %v4587_v28, %s5659_s29 }
 0x870   :  { %v1128_v53 = vpop.xlane.xlu0 %1127 }
 0x871   :  { %v1138_v27 = vsub.f32 %v1112_v13, %v1128_v53 }
 0x872   :  { %v1131_v29 = vpop.xlane.xlu1 %1130 }
 0x873   :  { %v1142_v43 = vmul.f32 1.442695, %v1138_v27  ;;  %v1139_v55 = vsub.f32 %v1115_v18, %v1131_v29 }
 0x874   :  { %v1134_v58 = vpop.xlane.xlu0 %1133 }
 0x875   :  { %v1144_v59 = vmul.f32 1.442695, %v1139_v55  ;;  %v1140_v60 = vsub.f32 %v1120_v6, %v1134_v58  ;;  %4195 = vpow2.f32 %v1142_v43 }
 0x876   :  { %v1137_v0 = vpop.xlane.xlu1 %1136 }
 0x877   :  { %v1146_v8 = vmul.f32 1.442695, %v1140_v60  ;;  %v1141_v9 = vsub.f32 %v1123_v22, %v1137_v0  ;;  %4197 = vpow2.f32 %v1144_v59 }
 0x878   :  { %v563_v54 = vpop.xlane.xlu0 %562 }
 0x879   :  { %4199 = vpow2.f32 %v1146_v8  ;;  %v1148_v57 = vmul.f32 1.442695, %v1141_v9 }
 0x87a   :  { %4201 = vrcp.f32 %v563_v54  ;;  %v566_v10 = vpop.xlane.xlu1 %565 }
 0x87b   :  { %4203 = vpow2.f32 %v1148_v57 }
 0x87c   :  { %4205 = vrcp.f32 %v566_v10  ;;  %v569_v41 = vpop.xlane.xlu0 %568 }
 0x87d   :  { %4207 = vrcp.f32 %v569_v41 }
 0x87e   :  { %v572_v11 = vpop.xlane.xlu1 %571 }
 0x87f   :  { %4209 = vrcp.f32 %v572_v11  ;;  %v4846_v61 = vpop.eup %4195 }
 0x880   :  { %v746_v56 = vpop.xlane.xlu0 %745  ;;  %v1150_v22 = vsel %vm536_vm2, %v4846_v61, 0.0 }
 0x881   :  { %4211 = vrcp.f32 %v746_v56  ;;  %v4848_v13 = vpop.eup %4197 }
 0x882   :  { %v749_v15 = vpop.xlane.xlu1 %748  ;;  %v1153_v30 = vsel %vm536_vm2, %v4848_v13, 0.0 }
 0x883   :  { %v4850_v16 = vpop.eup %4199  ;;  %4213 = vrcp.f32 %v749_v15 }
 0x884   :  { %v4202_v1 = vpop.eup %4201  ;;  %v1156_v62 = vsel %vm536_vm2, %v4850_v16, 0.0  ;;  %v752_v40 = vpop.xlane.xlu0 %751 }
 0x885   :  { %v4204_v17 = vpop.eup %4203  ;;  %1157 = vadd.xlane.f32.xlu0 %v1156_v62  ;;  %v577_v20 = vmul.f32 %v4202_v1, %v4809_v25  ;;  %v4071_v1 = vld [vmem:[%s5646_s10] sm:$0xff]  }
 0x886   :  { %v4206_v6 = vpop.eup %4205  ;;  %v1159_v18 = vsel %vm536_vm2, %v4204_v17, 0.0 }
 0x887   :  { %v4208_v19 = vpop.eup %4207  ;;  %1160 = vadd.xlane.f32.xlu1 %v1159_v18  ;;  %v578_v21 = vmul.f32 %v4206_v6, %v4812_v31 }
 0x888   :  { %v579_v4 = vmul.f32 %v4208_v19, %v4816_v32  ;;  %v755_v32 = vpop.xlane.xlu1 %754 }
 0x889   :  { %v4210_v23 = vpop.eup %4209  ;;  %1151 = vadd.xlane.f32.xlu0 %v1150_v22  ;;  %v581_v24 = vpack.c.bf16 %v578_v21, %v577_v20  ;;  %4215 = vrcp.f32 %v755_v32  ;;  %v4073_v20 = vld [vmem:[%s5646_s10 + $0x10] sm:$0xff]   ;;  %v4074_v21 = vld [vmem:[%s5646_s10 + $0x18] sm:$0xff]  }
 0x88a   :  { %v580_v26 = vmul.f32 %v4210_v23, %v4820_v35  ;;  %4217 = vrcp.f32 %v752_v40  ;;  %v3531_v40 = vld [vmem:[%s5647_s11] ss:$0 sm:$0xff] }
 0x88b   :  { %v4212_v7 = vpop.eup %4211  ;;  %3887 = vmatprep.mubr.msk.bf16.mxu0 %vm536_vm2, %v581_v24  ;;  %1154 = vadd.xlane.f32.xlu1 %v1153_v30 }
 0x88c   :  { %v582_v25 = vpack.c.bf16 %v580_v26, %v579_v4  ;;  %v760_v31 = vmul.f32 %v4212_v7, %v4824_v37  ;;  %v771_v35 = vpop.permute.xlu1 %770 }
 0x88d   :  { %v4214_v34 = vpop.eup %4213 }
 0x88e   :  { %3888 = vmatmul.mubr.msk.bf16.vlgmr.msra.gmra.mrb[4].mxu0 %vm536_vm2, %v582_v25  ;;  %v761_v36 = vmul.f32 %v4214_v34, %v4828_v39 }
 0x890   :  { %v764_v38 = vpack.c.bf16 %v761_v36, %v760_v31  ;;  %v1173_v45 = vpop.permute.xlu1 %1172 }
 0x892   :  { %3903 = vmatprep.mubr.msk.bf16.mxu0 %vm536_vm2, %v764_v38 }
 0x893   :  { %v4216_v53 = vpop.eup %4215 }
 0x89c   :  { %1174 = vrot.lane.b32.xlu1 %v4601_v42, %s5659_s29  ;;  %v4218_v42 = vpop.eup %4217 }
 0x89d   :  { %v762_v29 = vmul.f32 %v4218_v42, %v4832_v44 }
 0x89f   :  { %768 = vrot.lane.b32.xlu0 %v4587_v28, %s4357_s0  ;;  %v763_v28 = vmul.f32 %v4216_v53, %v4836_v50 }
 0x8a1   :  { %v765_v55 = vpack.c.bf16 %v763_v28, %v762_v29 }
 0x912   :  { %v1158_v51 = vpop.xlane.xlu0 %1157 }
 0x914   :  { %v1161_v52 = vpop.xlane.xlu1 %1160 }
 0x916   :  { %v1152_v37 = vpop.xlane.xlu0 %1151 }
 0x917   :  { %4219 = vrcp.f32 %v1152_v37 }
 0x918   :  { %4221 = vrcp.f32 %v1161_v52  ;;  %v1155_v39 = vpop.xlane.xlu1 %1154 }
 0x919   :  { %4223 = vrcp.f32 %v1155_v39 }
 0x91a   :  { %4225 = vrcp.f32 %v1158_v51  ;;  %v769_v27 = vpop.permute.xlu0 %768 }
 0x91b   :  { %3899 = vmatprep.subr.bf16.mxu0 %v769_v27 }
 0x91c   :  { %3900 = vmatpush3.bf16.msra.mxu0 %v769_v27  ;;  %v1175_v0 = vpop.permute.xlu1 %1174 }
 0x91d   :  { %3901 = vmatprep.subr.bf16.mxu0 %v771_v35 }
 0x920   :  { %3902 = vmatpush3.bf16.msra.mxu0 %v771_v35 }
 0x921   :  { %v4220_v43 = vpop.eup %4219  ;;  %3931 = vmatprep.subr.bf16.mxu0 %v1173_v45 }
 0x922   :  { %v4222_v58 = vpop.eup %4221  ;;  %v1166_v8 = vmul.f32 %v4220_v43, %v4846_v61 }
 0x923   :  { %v4224_v59 = vpop.eup %4223  ;;  %3904 = vmatmul.mubr.msk.bf16.vlgmr.msra.gmra.mrb[8].mxu0 %vm536_vm2, %v765_v55  ;;  %v1169_v54 = vmul.f32 %v4222_v58, %v4204_v17  ;;  %v4072_v17 = vld [vmem:[%s5646_s10 + $0x8] sm:$0xff]  }
 0x924   :  { %v4226_v60 = vpop.eup %4225  ;;  %3932 = vmatpush3.bf16.msra.mxu0 %v1173_v45  ;;  %v1167_v9 = vmul.f32 %v4224_v59, %v4848_v13 }
 0x925   :  { %3933 = vmatprep.subr.bf16.mxu0 %v1175_v0  ;;  %v1168_v44 = vmul.f32 %v4226_v60, %v4850_v16 }
 0x926   :  { %v1170_v50 = vpack.c.bf16 %v1167_v9, %v1166_v8 }
 0x927   :  { %v1171_v57 = vpack.c.bf16 %v1169_v54, %v1168_v44 }
 0x928   :  { %3934 = vmatpush3.bf16.msra.mxu0 %v1175_v0  ;;  %3935 = vmatprep.mubr.msk.bf16.mxu0 %vm536_vm2, %v1170_v50 }
 0x929   :  { %3939 = vmatprep.subr.bf16.mxu0 %v4071_v1 }
 0x92b   :  { %3936 = vmatmul.mubr.msk.bf16.vlgmr.msra.gmra.mrb[12].mxu0 %vm536_vm2, %v1171_v57 }
 0x92c   :  { %3940 = vmatpush3.bf16.msra.mxu0 %v4071_v1 }
 0x92d   :  { %3941 = vmatprep.subr.bf16.mxu0 %v4072_v17 }
 0x930   :  { %3942 = vmatpush3.bf16.msra.mxu0 %v4072_v17  ;;  %v4077_v17 = vld [vmem:[%s5648_s14 + $0x4] ss:$8 sps:$4 sm:$0xff]  }
 0x931   :  { %3943 = vmatprep.subr.bf16.mxu0 %v4073_v20  ;;  %1500 = vmatprep.subr.bf16.mxu1 %v4077_v17 }
 0x934   :  { %3944 = vmatpush3.bf16.msra.mxu0 %v4073_v20  ;;  %v4083_v20 = vld [vmem:[%s5648_s14 + $0x24] ss:$8 sps:$4 sm:$0xff]  }
 0x935   :  { %3945 = vmatprep.subr.bf16.mxu0 %v4074_v21 }
 0x938   :  { %3946 = vmatpush3.bf16.msra.mxu0 %v4074_v21  ;;  %v4081_v21 = vld [vmem:[%s5648_s14 + $0x20] ss:$8 sps:$4 sm:$0xff]  }
 0x961   :  { %v3889_v10 = vpop.f32.mrb[4].mxu0 }
 0x962   :  { %642 = vst.msk [vmem:[#allocation2 + $0x10] sm:$0xff] %vm474_vm1, %v3889_v10  ;;  %v625_v41 = vpop.f32.mrb[5].mxu0 }
 0x963   :  { %640 = vst.msk [vmem:[#allocation2] sm:$0xff] %vm474_vm1, %v625_v41  ;;  %v3890_v11 = vpop.f32.mrb[6].mxu0 }
 0x964   :  { %643 = vst.msk [vmem:[#allocation2 + $0x18] sm:$0xff] %vm474_vm1, %v3890_v11  ;;  %v628_v56 = vpop.f32.mrb[7].mxu0 }
 0x965   :  { %641 = vst.msk [vmem:[#allocation2 + $0x8] sm:$0xff] %vm474_vm1, %v628_v56 }
 0x9f6   :  { %v3905_v61 = vpop.f32.mrb[8].mxu0 }
 0x9f7   :  { %v814_v13 = vpop.f32.mrb[9].mxu0 }
 0x9f8   :  { %833 = vrot.lane.b32.xlu0 %v814_v13, %s5661_s2  ;;  %v3906_v15 = vpop.f32.mrb[10].mxu0 }
 0x9f9   :  { %v817_v16 = vpop.f32.mrb[11].mxu0 }
 0x9fa   :  { %835 = vrot.lane.b32.xlu1 %v817_v16, %s5661_s2 }
 0x9fc   :  { %837 = vrot.lane.b32.xlu0 %v3905_v61, %s5661_s2 }
 0x9fe   :  { %839 = vrot.lane.b32.xlu1 %v3906_v15, %s5661_s2  ;;  %v3937_v62 = vpop.f32.mrb[12].mxu0 }
 0x9ff   :  { %v1218_v6 = vpop.f32.mrb[13].mxu0 }
 0xa00   :  { %1035 = vrot.lane.b32.xlu0 %v4780_v47, %s4360_s22  ;;  %v3938_v18 = vpop.f32.mrb[14].mxu0 }
 0xa01   :  { %v1221_v19 = vpop.f32.mrb[15].mxu0 }
 0xa02   :  { %1037 = vrot.lane.b32.xlu1 %v4784_v49, %s4360_s22 }
 0xa04   :  { %1039 = vrot.lane.b32.xlu0 %v4778_v46, %s4360_s22 }
 0xa06   :  { %1041 = vrot.lane.b32.xlu1 %v4782_v48, %s4360_s22 }
 0xa08   :  { %1237 = vrot.lane.b32.xlu0 %v1218_v6, %s4358_s21  ;;  %v4075_v6 = vld [vmem:[%s5648_s14] ss:$8 sps:$4 sm:$0xff]  }
 0xa09   :  { %1501 = vmatpush1.bf16.msra.mxu1 %v4075_v6 }
 0xa0a   :  { %1239 = vrot.lane.b32.xlu1 %v1221_v19, %s4358_s21  ;;  %v4078_v19 = vld [vmem:[%s5648_s14 + $0x10] ss:$8 sps:$4 sm:$0xff]  }
 0xa0c   :  { %1241 = vrot.lane.b32.xlu0 %v3937_v62, %s4358_s21 }
 0xa0e   :  { %1243 = vrot.lane.b32.xlu1 %v3938_v18, %s4358_s21  ;;  %v4080_v18 = vld [vmem:[%s5648_s14 + $0x14] ss:$8 sps:$4 sm:$0xff]  }
 0xa0f   :  { %1502 = vmatprep.subr.bf16.mxu1 %v4080_v18 }
 0xa10   :  { %1503 = vmatpush1.bf16.msra.mxu1 %v4078_v19 }
 0xa11   :  { %1504 = vmatprep.subr.bf16.mxu1 %v4083_v20 }
 0xa14   :  { %1505 = vmatpush1.bf16.msra.mxu1 %v4081_v21 }
 0xa6a   :  { %v834_v47 = vpop.permute.xlu0 %833 }
 0xa6b   :  { %846 = vst.msk [vmem:[#allocation2] sm:$0xff] %vm845_vm3, %v834_v47  ;;  %v4086_v47 = vld [vmem:[%s5648_s14 + $0x34] ss:$8 sps:$4 sm:$0xff]  }
 0xa6c   :  { %v836_v49 = vpop.permute.xlu1 %835  ;;  %1506 = vmatprep.subr.bf16.mxu1 %v4086_v47 }
 0xa6d   :  { %847 = vst.msk [vmem:[#allocation2 + $0x8] sm:$0xff] %vm845_vm3, %v836_v49  ;;  %v4084_v49 = vld [vmem:[%s5648_s14 + $0x30] ss:$8 sps:$4 sm:$0xff]  }
 0xa6e   :  { %v838_v46 = vpop.permute.xlu0 %837  ;;  %1507 = vmatpush1.bf16.msra.mxu1 %v4084_v49 }
 0xa6f   :  { %848 = vst.msk [vmem:[#allocation2 + $0x10] sm:$0xff] %vm845_vm3, %v838_v46 }
 0xa70   :  { %v840_v48 = vpop.permute.xlu1 %839 }
 0xa71   :  { %849 = vst.msk [vmem:[#allocation2 + $0x18] sm:$0xff] %vm845_vm3, %v840_v48 }
 0xa72   :  { %v1036_v22 = vpop.permute.xlu0 %1035 }
 0xa73   :  { %1048 = vst.msk [vmem:[#allocation2] sm:$0xff] %vm1047_vm4, %v1036_v22 }
 0xa74   :  { %v1038_v23 = vpop.permute.xlu1 %1037 }
 0xa75   :  { %1049 = vst.msk [vmem:[#allocation2 + $0x8] sm:$0xff] %vm1047_vm4, %v1038_v23 }
 0xa76   :  { %v1040_v24 = vpop.permute.xlu0 %1039 }
 0xa77   :  { %1050 = vst.msk [vmem:[#allocation2 + $0x10] sm:$0xff] %vm1047_vm4, %v1040_v24 }
 0xa78   :  { %v1042_v4 = vpop.permute.xlu1 %1041 }
 0xa79   :  { %1051 = vst.msk [vmem:[#allocation2 + $0x18] sm:$0xff] %vm1047_vm4, %v1042_v4 }
 0xa7a   :  { %v1238_v26 = vpop.permute.xlu0 %1237 }
 0xa7b   :  { %1250 = vst.msk [vmem:[#allocation2] sm:$0xff] %vm1249_vm5, %v1238_v26 }
 0xa7c   :  { %v1240_v30 = vpop.permute.xlu1 %1239 }
 0xa7d   :  { %1251 = vst.msk [vmem:[#allocation2 + $0x8] sm:$0xff] %vm1249_vm5, %v1240_v30 }
 0xa7e   :  { %v1242_v7 = vpop.permute.xlu0 %1241 }
 0xa7f   :  { %1252 = vst.msk [vmem:[#allocation2 + $0x10] sm:$0xff] %vm1249_vm5, %v1242_v7 }
 0xa80   :  { %v1244_v25 = vpop.permute.xlu1 %1243 }
 0xa81   :  { %1253 = vst.msk [vmem:[#allocation2 + $0x18] sm:$0xff] %vm1249_vm5, %v1244_v25 }
 0xa82   :  { %v1254_v34 = vld [vmem:[#allocation2] sm:$0xff] }
 0xa84   :  { %v1255_v31 = vld [vmem:[#allocation2 + $0x8] sm:$0xff] }
 0xa85   :  { %v1258_v36 = vpack.c.bf16 %v1255_v31, %v1254_v34 }
 0xa86   :  { %v1256_v38 = vld [vmem:[#allocation2 + $0x10] sm:$0xff] }
 0xa87   :  { %3947 = vmatprep.mubr.msk.bf16.mxu0 %vm261_vm0, %v1258_v36 }
 0xa88   :  { %v1257_v32 = vld [vmem:[#allocation2 + $0x18] sm:$0xff] }
 0xa89   :  { %v1259_v35 = vpack.c.bf16 %v1257_v32, %v1256_v38  ;;  %v3538_v38 = vld [vmem:[%s5649_s12] ss:$0 sm:$0xff] }
 0xa8b   :  { %3948 = vmatmul.mubr.msk.bf16.vlgmr.msra.gmra.mrb[16].mxu0 %vm261_vm0, %v1259_v35 }
 0xb5e   :  { %v3949_v45 = vpop.f32.mrb[16].mxu0 }
 0xb5f   :  { %v1339_v51 = vpop.f32.mrb[17].mxu0  ;;  %v1348_v52 = vadd.f32 %v3949_v45, %v3531_v40 }
 0xb60   :  { %v1340_v37 = vadd.f32 %v3531_v40, %v1339_v51  ;;  %v3950_v39 = vpop.f32.mrb[18].mxu0 }
 0xb61   :  { %v1342_v53 = vpop.f32.mrb[19].mxu0  ;;  %v4933_v28 = vadd.f32 %v1348_v52, %v4515_v2  ;;  %v1351_v29 = vadd.f32 %v3950_v39, %v3531_v40  ;;  %v3539_v52 = vld [vmem:[%s5650_s13] ss:$0 sm:$0xff] }
 0xb62   :  { %v4930_v27 = vadd.f32 %v1340_v37, %v4513_v63  ;;  %v1343_v42 = vadd.f32 %v3531_v40, %v1342_v53 }
 0xb63   :  { %v4943_v59 = vadd.f32 %v1351_v29, %v4521_v5  ;;  %v1366_v63 = vsel %vm261_vm0, %v4933_v28, 0.0 }
 0xb64   :  { %v4936_v43 = vadd.f32 %v1343_v42, %v4517_v3  ;;  %v1360_v55 = vsel %vm261_vm0, %v4930_v27, 0.0 }
 0xb65   :  { %1361 = vadd.xlane.f32.xlu0 %v1360_v55  ;;  %v1369_v2 = vsel %vm261_vm0, %v4943_v59, 0.0 }
 0xb66   :  { %v1363_v58 = vsel %vm261_vm0, %v4936_v43, 0.0 }
 0xb67   :  { %1364 = vadd.xlane.f32.xlu1 %v1363_v58 }
 0xb69   :  { %1367 = vadd.xlane.f32.xlu0 %v1366_v63 }
 0xb6d   :  { %1370 = vadd.xlane.f32.xlu0 %v1369_v2 }
 0xbf2   :  { %v1362_v3 = vpop.xlane.xlu0 %1361 }
 0xbf3   :  { %v1372_v60 = vmul.f32 0.015625, %v1362_v3 }
 0xbf4   :  { %v1365_v0 = vpop.xlane.xlu1 %1364 }
 0xbf5   :  { %v1376_v8 = vsub.f32 %v4930_v27, %v1372_v60  ;;  %v1373_v9 = vmul.f32 0.015625, %v1365_v0 }
 0xbf6   :  { %v1368_v54 = vpop.xlane.xlu0 %1367 }
 0xbf7   :  { %v1377_v50 = vsub.f32 %v4936_v43, %v1373_v9  ;;  %v1374_v44 = vmul.f32 0.015625, %v1368_v54  ;;  %v1380_v5 = vmul.f32 %v1376_v8, %v1376_v8  ;;  %v4088_v9 = vld [vmem:[%s5651_s16] sm:$0xff]   ;;  %v4089_v54 = vld [vmem:[%s5651_s16 + $0x48] sm:$0xff]  }
 0xbf9   :  { %v1378_v57 = vsub.f32 %v4933_v28, %v1374_v44  ;;  %v1384_v10 = vsel %vm261_vm0, %v1380_v5, 0.0  ;;  %v1381_v41 = vmul.f32 %v1377_v50, %v1377_v50  ;;  %v4091_v44 = vld [vmem:[%s5651_s16 + $0x50] sm:$0xff]  }
 0xbfa   :  { %1385 = vadd.xlane.f32.xlu0 %v1384_v10  ;;  %v1371_v11 = vpop.xlane.xlu0 %1370  ;;  %v4092_v5 = vld [vmem:[%s5651_s16 + $0x10] sm:$0xff]   ;;  %v4094_v10 = vld [vmem:[%s5651_s16 + $0x18] sm:$0xff]  }
 0xbfb   :  { %v1375_v56 = vmul.f32 0.015625, %v1371_v11  ;;  %v1387_v61 = vsel %vm261_vm0, %v1381_v41, 0.0  ;;  %v1382_v13 = vmul.f32 %v1378_v57, %v1378_v57  ;;  %v4095_v41 = vld [vmem:[%s5651_s16 + $0x60] sm:$0xff]  }
 0xbfc   :  { %1388 = vadd.xlane.f32.xlu1 %v1387_v61  ;;  %v4096_v11 = vld [vmem:[%s5651_s16 + $0x20] sm:$0xff]   ;;  %v4098_v61 = vld [vmem:[%s5651_s16 + $0x28] sm:$0xff]  }
 0xbfd   :  { %v1379_v15 = vsub.f32 %v4943_v59, %v1375_v56  ;;  %v1390_v16 = vsel %vm261_vm0, %v1382_v13, 0.0  ;;  %v4097_v56 = vld [vmem:[%s5651_s16 + $0x68] sm:$0xff]   ;;  %v4099_v13 = vld [vmem:[%s5651_s16 + $0x70] sm:$0xff]  }
 0xbfe   :  { %1391 = vadd.xlane.f32.xlu0 %v1390_v16  ;;  %v4101_v16 = vld [vmem:[%s5651_s16 + $0x78] sm:$0xff]  }
 0xbff   :  { %v1383_v1 = vmul.f32 %v1379_v15, %v1379_v15 }
 0xc01   :  { %v1393_v62 = vsel %vm261_vm0, %v1383_v1, 0.0  ;;  %v4102_v1 = vld [vmem:[%s5651_s16 + $0x38] sm:$0xff]  }
 0xc02   :  { %1394 = vadd.xlane.f32.xlu1 %v1393_v62  ;;  %v1442_v62 = vld [vmem:[%s5652_s15] sm:$0x3] }
 0xc03   :  { %v1447_v17 = vrot.slane %v1442_v62, %v4576_v12  ;;  %v1451_v6 = vrot.slane %v1442_v62, %v4581_v14 }
 0xc87   :  { %v1386_v46 = vpop.xlane.xlu0 %1385 }
 0xc88   :  { %v1396_v48 = vmul.f32 0.015625, %v1386_v46 }
 0xc89   :  { %v1389_v22 = vpop.xlane.xlu1 %1388 }
 0xc8a   :  { %v1400_v23 = vadd.f32 1e-05, %v1396_v48  ;;  %v1397_v24 = vmul.f32 0.015625, %v1389_v22 }
 0xc8b   :  { %v1392_v4 = vpop.xlane.xlu0 %1391 }
 0xc8c   :  { %4227 = vrsqrt.f32 %v1400_v23  ;;  %v1401_v26 = vadd.f32 1e-05, %v1397_v24  ;;  %v1398_v30 = vmul.f32 0.015625, %v1392_v4 }
 0xc8e   :  { %4229 = vrsqrt.f32 %v1401_v26  ;;  %v1402_v7 = vadd.f32 1e-05, %v1398_v30 }
 0xc8f   :  { %v1395_v25 = vpop.xlane.xlu1 %1394 }
 0xc90   :  { %4231 = vrsqrt.f32 %v1402_v7  ;;  %v1399_v34 = vmul.f32 0.015625, %v1395_v25 }
 0xc92   :  { %v1403_v31 = vadd.f32 1e-05, %v1399_v34 }
 0xc94   :  { %4233 = vrsqrt.f32 %v1403_v31 }
 0xc96   :  { %v4228_v36 = vpop.eup %4227 }
 0xc97   :  { %v1408_v32 = vmul.f32 %v4228_v36, %v1376_v8  ;;  %v4087_v8 = vld [vmem:[%s5651_s16 + $0x40] sm:$0xff]  }
 0xc98   :  { %v4230_v35 = vpop.eup %4229  ;;  %3761 = vmatprep.subr.bf16.mxu0 %v4087_v8 }
 0xc99   :  { %v1418_v40 = vmul.f32 %v3538_v38, %v1408_v32  ;;  %v1409_v45 = vmul.f32 %v4230_v35, %v1377_v50  ;;  %3762 = vmatpush3.bf16.msra.mxu0 %v4088_v9  ;;  %v4090_v50 = vld [vmem:[%s5651_s16 + $0x8] sm:$0xff]  }
 0xc9a   :  { %v4232_v51 = vpop.eup %4231  ;;  %3763 = vmatprep.subr.bf16.mxu0 %v4089_v54 }
 0xc9b   :  { %v1419_v37 = vmul.f32 %v3538_v38, %v1409_v45  ;;  %v1410_v39 = vmul.f32 %v4232_v51, %v1378_v57  ;;  %v1428_v53 = vadd.f32 %v3539_v52, %v1418_v40  ;;  %v4093_v57 = vld [vmem:[%s5651_s16 + $0x58] sm:$0xff]  }
 0xc9d   :  { %v1429_v42 = vadd.f32 %v3539_v52, %v1419_v37  ;;  %v1420_v63 = vmul.f32 %v3538_v38, %v1410_v39  ;;  %3764 = vmatpush3.bf16.msra.mxu0 %v4090_v50 }
 0xc9e   :  { %v4234_v29 = vpop.eup %4233  ;;  %3765 = vmatprep.subr.bf16.mxu0 %v4091_v44 }
 0xc9f   :  { %v1411_v55 = vmul.f32 %v4234_v29, %v1379_v15  ;;  %v1432_v58 = vpack.c.bf16 %v1429_v42, %v1428_v53  ;;  %v1430_v60 = vadd.f32 %v3539_v52, %v1420_v63  ;;  %v4100_v15 = vld [vmem:[%s5651_s16 + $0x30] sm:$0xff]  }
 0xca1   :  { %3548 = vmatmul.mubr.msk.bf16.vlgmr.msra.gmra.mrb[28].mxu1 %vm261_vm0, %v1432_v58  ;;  %v1421_v2 = vmul.f32 %v3538_v38, %v1411_v55  ;;  %3766 = vmatpush3.bf16.msra.mxu0 %v4092_v5 }
 0xca2   :  { %1542 = vmatprep.mubr.bf16.mxu1 %v4355_v33  ;;  %3767 = vmatprep.subr.bf16.mxu0 %v4093_v57 }
 0xca3   :  { %v1431_v3 = vadd.f32 %v3539_v52, %v1421_v2 }
 0xca5   :  { %v1433_v0 = vpack.c.bf16 %v1431_v3, %v1430_v60  ;;  %3768 = vmatpush3.bf16.msra.mxu0 %v4094_v10 }
 0xca6   :  { %3769 = vmatprep.subr.bf16.mxu0 %v4095_v41 }
 0xca9   :  { %3549 = vmatmul.mubr.msk.bf16.gmra.mrb[32].mxu1 %vm261_vm0, %v1433_v0  ;;  %3770 = vmatpush3.bf16.msra.mxu0 %v4096_v11 }
 0xcaa   :  { %1995 = vmatprep.mubr.bf16.mxu1 %v4355_v33  ;;  %3771 = vmatprep.subr.bf16.mxu0 %v4097_v56 }
 0xcad   :  { %3772 = vmatpush3.bf16.msra.mxu0 %v4098_v61 }
 0xcae   :  { %3773 = vmatprep.subr.bf16.mxu0 %v4099_v13 }
 0xcb1   :  { %3774 = vmatpush3.bf16.msra.mxu0 %v4100_v15 }
 0xcb2   :  { %3775 = vmatprep.subr.bf16.mxu0 %v4101_v16 }
 0xcb5   :  { %3776 = vmatpush3.bf16.msra.mxu0 %v4102_v1 }
 0xd74   :  { %v1534_v18 = vpop.f32.mrb[28].mxu1 }
 0xd75   :  { %v5044_v19 = vadd.f32 %v1534_v18, %v1447_v17  ;;  %v1536_v20 = vpop.f32.mrb[29].mxu1 }
 0xd76   :  { %v5046_v21 = vadd.f32 %v1536_v20, %v1451_v6  ;;  %v1538_v47 = vpop.f32.mrb[30].mxu1 }
 0xd77   :  { %v1561_v49 = vmul.f32 0.044715, %v5044_v19  ;;  %v5049_v46 = vadd.f32 %v1538_v47, %v1447_v17  ;;  %v1540_v48 = vpop.f32.mrb[31].mxu1 }
 0xd78   :  { %v1562_v22 = vmul.f32 0.044715, %v5046_v21  ;;  %v5052_v23 = vadd.f32 %v1540_v48, %v1451_v6 }
 0xd79   :  { %v1569_v24 = vmul.f32 %v1561_v49, %v5044_v19  ;;  %v1563_v4 = vmul.f32 0.044715, %v5049_v46 }
 0xd7a   :  { %v1570_v26 = vmul.f32 %v1562_v22, %v5046_v21  ;;  %v1564_v30 = vmul.f32 0.044715, %v5052_v23  ;;  %v1553_v22 = vmul.f32 0.5, %v5044_v19 }
 0xd7b   :  { %v1577_v7 = vmul.f32 %v1569_v24, %v5044_v19  ;;  %v1571_v25 = vmul.f32 %v1563_v4, %v5049_v46  ;;  %v1555_v24 = vmul.f32 0.5, %v5049_v46 }
 0xd7c   :  { %v1578_v34 = vmul.f32 %v1570_v26, %v5046_v21  ;;  %v1572_v31 = vmul.f32 %v1564_v30, %v5052_v23  ;;  %v1544_v36 = vpop.f32.mrb[32].mxu1  ;;  %v1554_v26 = vmul.f32 0.5, %v5046_v21  ;;  %v1556_v30 = vmul.f32 0.5, %v5052_v23 }
 0xd7d   :  { %v1585_v38 = vadd.f32 %v1577_v7, %v5044_v19  ;;  %v1579_v32 = vmul.f32 %v1571_v25, %v5049_v46  ;;  %v5064_v35 = vadd.f32 %v1544_v36, %v1447_v17  ;;  %v1546_v40 = vpop.f32.mrb[33].mxu1 }
 0xd7e   :  { %v1580_v45 = vmul.f32 %v1572_v31, %v5052_v23  ;;  %v5067_v51 = vadd.f32 %v1546_v40, %v1451_v6  ;;  %v1548_v52 = vpop.f32.mrb[34].mxu1  ;;  %v1586_v37 = vadd.f32 %v1578_v34, %v5046_v21 }
 0xd7f   :  { %v1593_v39 = vmul.f32 0.7978846, %v1585_v38  ;;  %v1587_v53 = vadd.f32 %v1579_v32, %v5049_v46  ;;  %v1565_v42 = vmul.f32 0.044715, %v5064_v35  ;;  %v1549_v29 = vadd.f32 %v1548_v52, %v1447_v17  ;;  %v1550_v55 = vpop.f32.mrb[35].mxu1 }
 0xd80   :  { %v1566_v58 = vmul.f32 0.044715, %v5067_v51  ;;  %v1551_v63 = vadd.f32 %v1550_v55, %v1451_v6  ;;  %v1588_v2 = vadd.f32 %v1580_v45, %v5052_v23  ;;  %v1594_v3 = vmul.f32 0.7978846, %v1586_v37 }
 0xd81   :  { %4235 = vtanh.f32 %v1593_v39  ;;  %v1595_v60 = vmul.f32 0.7978846, %v1587_v53  ;;  %v1573_v0 = vmul.f32 %v1565_v42, %v5064_v35  ;;  %v1567_v8 = vmul.f32 0.044715, %v1549_v29 }
 0xd82   :  { %v1574_v9 = vmul.f32 %v1566_v58, %v5067_v51  ;;  %v1568_v54 = vmul.f32 0.044715, %v1551_v63  ;;  %v1596_v50 = vmul.f32 0.7978846, %v1588_v2  ;;  %4237 = vtanh.f32 %v1594_v3 }
 0xd83   :  { %4239 = vtanh.f32 %v1595_v60  ;;  %v1581_v44 = vmul.f32 %v1573_v0, %v5064_v35  ;;  %v1575_v5 = vmul.f32 %v1567_v8, %v1549_v29  ;;  %v1557_v46 = vmul.f32 0.5, %v5064_v35 }
 0xd84   :  { %v1582_v57 = vmul.f32 %v1574_v9, %v5067_v51  ;;  %v1576_v10 = vmul.f32 %v1568_v54, %v1551_v63  ;;  %4241 = vtanh.f32 %v1596_v50  ;;  %v1559_v21 = vmul.f32 0.5, %v1549_v29  ;;  %v3550_v54 = vld [vmem:[%s5653_s17] ss:$0 sm:$0xff] }
 0xd85   :  { %v1583_v41 = vmul.f32 %v1575_v5, %v1549_v29  ;;  %v1589_v11 = vadd.f32 %v1581_v44, %v5064_v35  ;;  %v1558_v23 = vmul.f32 0.5, %v5067_v51  ;;  %v1560_v42 = vmul.f32 0.5, %v1551_v63 }
 0xd86   :  { %v1584_v56 = vmul.f32 %v1576_v10, %v1551_v63  ;;  %v1590_v61 = vadd.f32 %v1582_v57, %v5067_v51 }
 0xd87   :  { %v1591_v13 = vadd.f32 %v1583_v41, %v1549_v29  ;;  %v1597_v15 = vmul.f32 0.7978846, %v1589_v11 }
 0xd88   :  { %v1592_v16 = vadd.f32 %v1584_v56, %v1551_v63  ;;  %v1598_v1 = vmul.f32 0.7978846, %v1590_v61 }
 0xd89   :  { %v1599_v62 = vmul.f32 0.7978846, %v1591_v13  ;;  %4243 = vtanh.f32 %v1597_v15 }
 0xd8a   :  { %v1600_v17 = vmul.f32 0.7978846, %v1592_v16  ;;  %4245 = vtanh.f32 %v1598_v1 }
 0xd8b   :  { %v4236_v6 = vpop.eup %4235  ;;  %4247 = vtanh.f32 %v1599_v62 }
 0xd8c   :  { %v4238_v18 = vpop.eup %4237  ;;  %v1609_v20 = vadd.f32 1.0, %v4236_v6  ;;  %4249 = vtanh.f32 %v1600_v17 }
 0xd8d   :  { %v4240_v47 = vpop.eup %4239  ;;  %v1610_v49 = vadd.f32 1.0, %v4238_v18 }
 0xd8e   :  { %v4242_v48 = vpop.eup %4241  ;;  %v1611_v4 = vadd.f32 1.0, %v4240_v47  ;;  %v1617_v25 = vmul.f32 %v1609_v20, %v1553_v22 }
 0xd8f   :  { %v1612_v7 = vadd.f32 1.0, %v4242_v48  ;;  %v1618_v31 = vmul.f32 %v1610_v49, %v1554_v26 }
 0xd90   :  { %v1619_v34 = vmul.f32 %v1611_v4, %v1555_v24 }
 0xd91   :  { %v1620_v36 = vmul.f32 %v1612_v7, %v1556_v30 }
 0xd92   :  { %v1625_v38 = vpack.c.bf16 %v1619_v34, %v1617_v25 }
 0xd93   :  { %v4244_v32 = vpop.eup %4243  ;;  %v1626_v40 = vpack.c.bf16 %v1620_v36, %v1618_v31 }
 0xd94   :  { %v4246_v45 = vpop.eup %4245  ;;  %v1613_v52 = vadd.f32 1.0, %v4244_v32 }
 0xd95   :  { %v4248_v37 = vpop.eup %4247  ;;  %1796 = vmatprep.mubr.bf16.mxu0 %v1626_v40  ;;  %v1614_v19 = vadd.f32 1.0, %v4246_v45 }
 0xd96   :  { %v4250_v39 = vpop.eup %4249  ;;  %1797 = vmatmul.mubr.bf16.vlgmr.msra.gmra.mrb[20].mxu0 %v1625_v38  ;;  %v1615_v53 = vadd.f32 1.0, %v4248_v37  ;;  %v1621_v58 = vmul.f32 %v1613_v52, %v1557_v46  ;;  %v4105_v52 = vld [vmem:[%s5641_s8 + $0x44] ss:$8 sps:$4 sm:$0xff]   ;;  %v4103_v37 = vld [vmem:[%s5641_s8 + $0x40] ss:$8 sps:$4 sm:$0xff]  }
 0xd97   :  { %v1616_v55 = vadd.f32 1.0, %v4250_v39  ;;  %v1622_v3 = vmul.f32 %v1614_v19, %v1558_v23  ;;  %1963 = vmatprep.subr.bf16.mxu1 %v4105_v52  ;;  %v4108_v19 = vld [vmem:[%s5641_s8 + $0x54] ss:$8 sps:$4 sm:$0xff]   ;;  %v4106_v39 = vld [vmem:[%s5641_s8 + $0x50] ss:$8 sps:$4 sm:$0xff]  }
 0xd98   :  { %v1623_v2 = vmul.f32 %v1615_v53, %v1559_v21  ;;  %1964 = vmatpush1.bf16.msra.mxu1 %v4103_v37  ;;  %v4111_v46 = vld [vmem:[%s5641_s8 + $0x64] ss:$8 sps:$4 sm:$0xff]   ;;  %v4109_v21 = vld [vmem:[%s5641_s8 + $0x60] ss:$8 sps:$4 sm:$0xff]   ;;  %v4112_v53 = vld [vmem:[%s5641_s8 + $0x70] ss:$8 sps:$4 sm:$0xff]  }
 0xd99   :  { %v1624_v60 = vmul.f32 %v1616_v55, %v1560_v42  ;;  %1965 = vmatprep.subr.bf16.mxu1 %v4108_v19  ;;  %v4114_v23 = vld [vmem:[%s5641_s8 + $0x74] ss:$8 sps:$4 sm:$0xff]   ;;  %s5674_s8 = smov 80  }
 0xd9a   :  { %v1627_v0 = vpack.c.bf16 %v1623_v2, %v1621_v58 }
 0xd9b   :  { %v1628_v8 = vpack.c.bf16 %v1624_v60, %v1622_v3 }
 0xd9c   :  { %1966 = vmatpush1.bf16.msra.mxu1 %v4106_v39 }
 0xd9d   :  { %1804 = vmatprep.mubr.bf16.mxu0 %v1628_v8  ;;  %1967 = vmatprep.subr.bf16.mxu1 %v4111_v46 }
 0xd9e   :  { %1805 = vmatmul.mubr.bf16.gmra.mrb[24].mxu0 %v1627_v0 }
 0xda0   :  { %1968 = vmatpush1.bf16.msra.mxu1 %v4109_v21 }
 0xda1   :  { %1969 = vmatprep.subr.bf16.mxu1 %v4114_v23 }
 0xda4   :  { %1970 = vmatpush1.bf16.msra.mxu1 %v4112_v53 }
 0xe69   :  { %v3777_v9 = vpop.f32.mrb[20].mxu0 }
 0xe6a   :  { %v3778_v35 = vpop.f32.mrb[21].mxu0 }
 0xe6b   :  { %v3779_v29 = vadd.f32 %v3778_v35, %v3777_v9  ;;  %v3780_v50 = vpop.f32.mrb[22].mxu0 }
 0xe6c   :  { %v3781_v44 = vpop.f32.mrb[23].mxu0 }
 0xe6d   :  { %v1799_v51 = vadd.f32 %v3779_v29, %v3550_v54  ;;  %v3782_v63 = vadd.f32 %v3781_v44, %v3780_v50  ;;  %v3569_v44 = vld [vmem:[%s5642_s6 + $0x1] ss:$0 sm:$0xff] }
 0xe6f   :  { %v5090_v5 = vadd.f32 %v1799_v51, %v4930_v27  ;;  %v1802_v57 = vadd.f32 %v3782_v63, %v3550_v54 }
 0xe71   :  { %v5093_v10 = vadd.f32 %v1802_v57, %v4936_v43  ;;  %v3783_v41 = vpop.f32.mrb[24].mxu0  ;;  %v1821_v11 = vsel %vm261_vm0, %v5090_v5, 0.0  ;;  %v3570_v57 = vld [vmem:[%s5643_s7 + $0x1] ss:$0 sm:$0xff] }
 0xe72   :  { %1822 = vadd.xlane.f32.xlu0 %v1821_v11  ;;  %v3784_v56 = vpop.f32.mrb[25].mxu0 }
 0xe73   :  { %v3785_v61 = vadd.f32 %v3784_v56, %v3783_v41  ;;  %v3786_v13 = vpop.f32.mrb[26].mxu0  ;;  %v1824_v15 = vsel %vm261_vm0, %v5093_v10, 0.0 }
 0xe74   :  { %1825 = vadd.xlane.f32.xlu1 %v1824_v15  ;;  %v3787_v16 = vpop.f32.mrb[27].mxu0 }
 0xe75   :  { %v1807_v1 = vadd.f32 %v3785_v61, %v3550_v54  ;;  %v3788_v27 = vadd.f32 %v3787_v16, %v3786_v13 }
 0xe77   :  { %v5100_v62 = vadd.f32 %v1807_v1, %v4933_v28  ;;  %v1810_v43 = vadd.f32 %v3788_v27, %v3550_v54 }
 0xe79   :  { %v5103_v17 = vadd.f32 %v1810_v43, %v4943_v59  ;;  %v1827_v6 = vsel %vm261_vm0, %v5100_v62, 0.0 }
 0xe7a   :  { %1828 = vadd.xlane.f32.xlu0 %v1827_v6 }
 0xe7b   :  { %v1830_v18 = vsel %vm261_vm0, %v5103_v17, 0.0 }
 0xe7c   :  { %1831 = vadd.xlane.f32.xlu1 %v1830_v18 }
 0xeff   :  { %v1823_v20 = vpop.xlane.xlu0 %1822 }
 0xf00   :  { %v1833_v47 = vmul.f32 0.015625, %v1823_v20 }
 0xf01   :  { %v1826_v49 = vpop.xlane.xlu1 %1825 }
 0xf02   :  { %v1837_v48 = vsub.f32 %v5090_v5, %v1833_v47  ;;  %v1834_v22 = vmul.f32 0.015625, %v1826_v49 }
 0xf04   :  { %v1838_v28 = vsub.f32 %v5093_v10, %v1834_v22  ;;  %v1841_v24 = vmul.f32 %v1837_v48, %v1837_v48 }
 0xf06   :  { %v1845_v59 = vsel %vm261_vm0, %v1841_v24, 0.0  ;;  %v1842_v4 = vmul.f32 %v1838_v28, %v1838_v28 }
 0xf07   :  { %1846 = vadd.xlane.f32.xlu0 %v1845_v59  ;;  %v1829_v26 = vpop.xlane.xlu0 %1828 }
 0xf08   :  { %v1835_v30 = vmul.f32 0.015625, %v1829_v26  ;;  %v1848_v7 = vsel %vm261_vm0, %v1842_v4, 0.0 }
 0xf09   :  { %1849 = vadd.xlane.f32.xlu1 %v1848_v7  ;;  %v1832_v25 = vpop.xlane.xlu1 %1831 }
 0xf0a   :  { %v1839_v34 = vsub.f32 %v5100_v62, %v1835_v30  ;;  %v1836_v31 = vmul.f32 0.015625, %v1832_v25 }
 0xf0c   :  { %v1840_v36 = vsub.f32 %v5103_v17, %v1836_v31  ;;  %v1843_v38 = vmul.f32 %v1839_v34, %v1839_v34 }
 0xf0e   :  { %v1851_v32 = vsel %vm261_vm0, %v1843_v38, 0.0  ;;  %v1844_v40 = vmul.f32 %v1840_v36, %v1840_v36 }
 0xf0f   :  { %1852 = vadd.xlane.f32.xlu0 %v1851_v32 }
 0xf10   :  { %v1854_v45 = vsel %vm261_vm0, %v1844_v40, 0.0 }
 0xf11   :  { %1855 = vadd.xlane.f32.xlu1 %v1854_v45 }
 0xf94   :  { %v1847_v42 = vpop.xlane.xlu0 %1846 }
 0xf95   :  { %v1857_v55 = vmul.f32 0.015625, %v1847_v42 }
 0xf96   :  { %v1850_v58 = vpop.xlane.xlu1 %1849 }
 0xf97   :  { %v1861_v2 = vadd.f32 1e-05, %v1857_v55  ;;  %v1858_v3 = vmul.f32 0.015625, %v1850_v58 }
 0xf99   :  { %4251 = vrsqrt.f32 %v1861_v2  ;;  %v1862_v60 = vadd.f32 1e-05, %v1858_v3 }
 0xf9b   :  { %4253 = vrsqrt.f32 %v1862_v60 }
 0xf9c   :  { %v1853_v0 = vpop.xlane.xlu0 %1852 }
 0xf9d   :  { %v1859_v8 = vmul.f32 0.015625, %v1853_v0 }
 0xf9e   :  { %v1856_v9 = vpop.xlane.xlu1 %1855 }
 0xf9f   :  { %v1863_v54 = vadd.f32 1e-05, %v1859_v8  ;;  %v1860_v35 = vmul.f32 0.015625, %v1856_v9 }
 0xfa1   :  { %4255 = vrsqrt.f32 %v1863_v54  ;;  %v1864_v29 = vadd.f32 1e-05, %v1860_v35 }
 0xfa3   :  { %v4252_v50 = vpop.eup %4251  ;;  %4257 = vrsqrt.f32 %v1864_v29 }
 0xfa4   :  { %v1869_v51 = vmul.f32 %v4252_v50, %v1837_v48  ;;  %v3579_v48 = vld [vmem:[%s5644_s9 + $0x2] sm:$0x3] }
 0xfa5   :  { %v4254_v63 = vpop.eup %4253  ;;  %v1910_v22 = vrot.slane %v3579_v48, %v4576_v12  ;;  %v1914_v24 = vrot.slane %v3579_v48, %v4581_v14 }
 0xfa6   :  { %v1879_v41 = vmul.f32 %v3569_v44, %v1869_v51  ;;  %v1870_v11 = vmul.f32 %v4254_v63, %v1838_v28 }
 0xfa8   :  { %v1889_v56 = vadd.f32 %v3570_v57, %v1879_v41  ;;  %v1880_v61 = vmul.f32 %v3569_v44, %v1870_v11 }
 0xfaa   :  { %v1890_v13 = vadd.f32 %v3570_v57, %v1880_v61  ;;  %v3592_v61 = vld [vmem:[%s5645_s5 + $0x90] sm:$0xff] }
 0xfab   :  { %v4256_v15 = vpop.eup %4255 }
 0xfac   :  { %v1871_v16 = vmul.f32 %v4256_v15, %v1839_v34  ;;  %v1893_v1 = vpack.c.bf16 %v1890_v13, %v1889_v56  ;;  %v3590_v15 = vld [vmem:[%s5645_s5 + $0x80] sm:$0xff] }
 0xfad   :  { %v4258_v27 = vpop.eup %4257 }
 0xfae   :  { %v1872_v43 = vmul.f32 %v4258_v27, %v1840_v36  ;;  %3588 = vmatmul.mubr.msk.bf16.vlgmr.msra.gmra.mrb[36].mxu1 %vm261_vm0, %v1893_v1  ;;  %v1881_v6 = vmul.f32 %v3569_v44, %v1871_v16  ;;  %v3591_v27 = vld [vmem:[%s5645_s5 + $0x88] sm:$0xff] }
 0xfaf   :  { %2005 = vmatprep.mubr.bf16.mxu1 %v4355_v33 }
 0xfb0   :  { %v1882_v18 = vmul.f32 %v3569_v44, %v1872_v43  ;;  %v1891_v20 = vadd.f32 %v3570_v57, %v1881_v6 }
 0xfb2   :  { %v1892_v47 = vadd.f32 %v3570_v57, %v1882_v18 }
 0xfb4   :  { %v1894_v49 = vpack.c.bf16 %v1892_v47, %v1891_v20  ;;  %v3593_v47 = vld [vmem:[%s5645_s5 + $0x98] sm:$0xff] }
 0xfb6   :  { %3589 = vmatmul.mubr.msk.bf16.gmra.mrb[40].mxu1 %vm261_vm0, %v1894_v49 }
0x1081   :  { %v1997_v28 = vpop.f32.mrb[36].mxu1 }
0x1082   :  { %v1998_v59 = vadd.f32 %v1997_v28, %v1910_v22  ;;  %v1999_v4 = vpop.f32.mrb[37].mxu1 }
0x1083   :  { %v2001_v26 = vpop.f32.mrb[38].mxu1  ;;  %v2000_v25 = vadd.f32 %v1999_v4, %v1914_v24 }
0x1084   :  { %v2002_v30 = vadd.f32 %v2001_v26, %v1910_v22  ;;  %v2003_v7 = vpop.f32.mrb[39].mxu1  ;;  %v2016_v31 = vmul.f32 0.25, %v1998_v59 }
0x1085   :  { %v2004_v34 = vadd.f32 %v2003_v7, %v1914_v24  ;;  %v3599_v7 = vld [vmem:[%s5645_s5 + $0xa8] sm:$0xff] }
0x1086   :  { %v2017_v36 = vmul.f32 0.25, %v2002_v30  ;;  %v5155_v38 = vpack.c.bf16 %v2002_v30, %v1998_v59 }
0x1087   :  { %v5157_v32 = vpack.c.bf16 %v2004_v34, %v2000_v25  ;;  %v3598_v34 = vld [vmem:[%s5645_s5 + $0xa0] sm:$0xff] }
0x1088   :  { %v5159_v40 = vpack.c.bf16 %v2017_v36, %v2016_v31  ;;  %2214 = vrot.lane.b32.xlu1 %v5155_v38, %s4358_s21  ;;  %2031 = vrot.lane.b32.xlu0 %v5155_v38, %s4356_s30 }
0x1089   :  { %v2007_v45 = vpop.f32.mrb[40].mxu1 }
0x108a   :  { %v2008_v52 = vadd.f32 %v2007_v45, %v1910_v22  ;;  %v2009_v37 = vpop.f32.mrb[41].mxu1  ;;  %3955 = vmatprep.mubr.msk.bf16.mxu1 %vm474_vm1, %v5159_v40 }
0x108b   :  { %v2011_v19 = vpop.f32.mrb[42].mxu1  ;;  %v2010_v21 = vadd.f32 %v2009_v37, %v1914_v24  ;;  %v3600_v37 = vld [vmem:[%s5645_s5 + $0xb0] sm:$0xff] }
0x108c   :  { %v2012_v39 = vadd.f32 %v2011_v19, %v1910_v22  ;;  %2210 = vrot.lane.b32.xlu0 %v5159_v40, %s4357_s0  ;;  %v2013_v46 = vpop.f32.mrb[43].mxu1  ;;  %v2018_v23 = vmul.f32 0.25, %v2008_v52  ;;  %v3601_v22 = vld [vmem:[%s5645_s5 + $0xb8] sm:$0xff] }
0x108d   :  { %v2014_v53 = vadd.f32 %v2013_v46, %v1914_v24 }
0x108e   :  { %v2019_v42 = vmul.f32 0.25, %v2012_v39  ;;  %v5169_v55 = vpack.c.bf16 %v2012_v39, %v2008_v52 }
0x108f   :  { %v5171_v58 = vpack.c.bf16 %v2014_v53, %v2010_v21  ;;  %v3606_v53 = vld [vmem:[%s5645_s5 + $0xc0] sm:$0xff] }
0x1090   :  { %v5173_v2 = vpack.c.bf16 %v2019_v42, %v2018_v23  ;;  %2033 = vrot.lane.b32.xlu1 %v5169_v55, %s4356_s30  ;;  %v3609_v42 = vld [vmem:[%s5645_s5 + $0xd8] sm:$0xff] }
0x1092   :  { %2212 = vrot.lane.b32.xlu0 %v5173_v2, %s4357_s0 }
0x1094   :  { %2216 = vrot.lane.b32.xlu1 %v5169_v55, %s4358_s21 }
0x1096   :  { %2413 = vrot.lane.b32.xlu0 %v5159_v40, %s4359_s1 }
0x1098   :  { %2417 = vrot.lane.b32.xlu1 %v5155_v38, %s4360_s22 }
0x109c   :  { %2419 = vrot.lane.b32.xlu1 %v5169_v55, %s4360_s22 }
0x10a0   :  { %2415 = vrot.lane.b32.xlu1 %v5173_v2, %s4359_s1 }
0x10fa   :  { %v2215_v3 = vpop.permute.xlu1 %2214  ;;  %v2032_v60 = vpop.permute.xlu0 %2031 }
0x10fb   :  { %v2225_v0 = vsel %vm474_vm1, %v2215_v3, 0  ;;  %v2042_v8 = vsel %vm474_vm1, %v2032_v60, 0  ;;  %4035 = vmatprep.subr.msk.bf16.mxu1 %vm474_vm1, %v2032_v60  ;;  %4037 = vmatprep.subr.msk.bf16.mxu0 %vm474_vm1, %v2215_v3  ;;  %v3608_v3 = vld [vmem:[%s5645_s5 + $0xd0] sm:$0xff] }
0x10fc   :  { %3952 = vmatpush3.bf16.xpose.msra.mxu1 %v2042_v8  ;;  %3968 = vmatpush3.bf16.xpose.msra.mxu0 %v2225_v0 }
0x10fe   :  { %v2211_v9 = vpop.permute.xlu0 %2210 }
0x10ff   :  { %3971 = vmatprep.mubr.msk.bf16.mxu0 %vm474_vm1, %v2211_v9  ;;  %v3607_v9 = vld [vmem:[%s5645_s5 + $0xc8] sm:$0xff] }
0x1102   :  { %v2034_v54 = vpop.permute.xlu1 %2033 }
0x1103   :  { %v2045_v35 = vsel %vm474_vm1, %v2034_v54, 0  ;;  %4036 = vmatprep.subr.msk.bf16.mxu1 %vm474_vm1, %v2034_v54 }
0x1104   :  { %3954 = vmatpush3.bf16.xpose.msra.mxu1 %v2045_v35  ;;  %v2213_v44 = vpop.permute.xlu0 %2212 }
0x1105   :  { %3959 = vmatprep.subr.bf16.mxu1 %v5157_v32 }
0x1106   :  { %v2217_v29 = vpop.permute.xlu1 %2216 }
0x1107   :  { %v2228_v50 = vsel %vm474_vm1, %v2217_v29, 0  ;;  %4038 = vmatprep.subr.msk.bf16.mxu0 %vm474_vm1, %v2217_v29 }
0x1108   :  { %3970 = vmatpush3.bf16.xpose.msra.mxu0 %v2228_v50  ;;  %v2414_v57 = vpop.permute.xlu0 %2413 }
0x110a   :  { %v2418_v51 = vpop.permute.xlu1 %2417 }
0x110b   :  { %3956 = vmatmul.mubr.msk.bf16.vlgmr.msra.gmra.mrb[44].mxu1 %vm474_vm1, %v5173_v2  ;;  %4039 = vmatprep.subr.msk.bf16.mxu0 %vm474_vm1, %v2418_v51  ;;  %v2428_v63 = vsel %vm474_vm1, %v2418_v51, 0 }
0x110c   :  { %3960 = vmatpush3.bf16.msra.mxu1 %v5157_v32 }
0x110d   :  { %3961 = vmatprep.subr.bf16.mxu1 %v5171_v58 }
0x110e   :  { %v2420_v41 = vpop.permute.xlu1 %2419 }
0x110f   :  { %3972 = vmatmul.mubr.msk.bf16.vlgmr.msra.gmra.mrb[28].mxu0 %vm474_vm1, %v2213_v44  ;;  %v2431_v11 = vsel %vm474_vm1, %v2420_v41, 0 }
0x1110   :  { %3962 = vmatpush3.bf16.msra.mxu1 %v5171_v58  ;;  %3984 = vmatpush3.bf16.xpose.msra.mxu0 %v2428_v63 }
0x1111   :  { %3987 = vmatprep.mubr.msk.bf16.mxu0 %vm474_vm1, %v2414_v57  ;;  %4040 = vmatprep.subr.msk.bf16.mxu0 %vm474_vm1, %v2420_v41 }
0x1112   :  { %v2416_v56 = vpop.permute.xlu1 %2415 }
0x1118   :  { %3986 = vmatpush3.bf16.xpose.msra.mxu0 %v2431_v11 }
0x111f   :  { %3988 = vmatmul.mubr.msk.bf16.vlgmr.msra.gmra.mrb[32].mxu0 %vm474_vm1, %v2416_v56 }
0x11de   :  { %v3957_v13 = vpop.f32.mrb[44].mxu1 }
0x11df   :  { %v2090_v16 = vadd.f32 %v3957_v13, %v3592_v61  ;;  %v2081_v1 = vpop.f32.mrb[45].mxu1 }
0x11e0   :  { %v3958_v43 = vpop.f32.mrb[46].mxu1  ;;  %v5220_v6 = vadd.f32 %v3590_v15, %v2081_v1 }
0x11e1   :  { %v2084_v18 = vpop.f32.mrb[47].mxu1  ;;  %v2102_v20 = vsel %vm536_vm2, %v2090_v16, -inf  ;;  %v2093_v4 = vadd.f32 %v3958_v43, %v3593_v47 }
0x11e2   :  { %v5226_v49 = vadd.f32 %v3591_v27, %v2084_v18  ;;  %2103 = vmax.xlane.f32.xlu0 %v2102_v20  ;;  %v3973_v48 = vpop.f32.mrb[28].mxu0  ;;  %v2096_v25 = vsel %vm536_vm2, %v5220_v6, -inf }
0x11e3   :  { %v2264_v28 = vpop.f32.mrb[29].mxu0  ;;  %v2105_v52 = vsel %vm536_vm2, %v2093_v4, -inf  ;;  %v2273_v39 = vadd.f32 %v3973_v48, %v3600_v37 }
0x11e4   :  { %v3974_v24 = vpop.f32.mrb[30].mxu0  ;;  %v2099_v59 = vsel %vm536_vm2, %v5226_v49, -inf  ;;  %v5244_v45 = vadd.f32 %v3598_v34, %v2264_v28 }
0x11e5   :  { %v2276_v26 = vadd.f32 %v3974_v24, %v3601_v22  ;;  %2100 = vmax.xlane.f32.xlu1 %v2099_v59  ;;  %v2267_v30 = vpop.f32.mrb[31].mxu0  ;;  %v2285_v21 = vsel %vm536_vm2, %v2273_v39, -inf }
0x11e6   :  { %2097 = vmax.xlane.f32.xlu0 %v2096_v25  ;;  %v5242_v36 = vadd.f32 %v3599_v7, %v2267_v30  ;;  %v2279_v46 = vsel %vm536_vm2, %v5244_v45, -inf }
0x11e7   :  { %v2288_v31 = vsel %vm536_vm2, %v2276_v26, -inf }
0x11e8   :  { %v2282_v19 = vsel %vm536_vm2, %v5242_v36, -inf }
0x11e9   :  { %2289 = vmax.xlane.f32.xlu1 %v2288_v31 }
0x11ea   :  { %2106 = vmax.xlane.f32.xlu0 %v2105_v52 }
0x11ed   :  { %2283 = vmax.xlane.f32.xlu1 %v2282_v19 }
0x11ee   :  { %2280 = vmax.xlane.f32.xlu0 %v2279_v46 }
0x11f2   :  { %2286 = vmax.xlane.f32.xlu0 %v2285_v21  ;;  %v3989_v23 = vpop.f32.mrb[32].mxu0 }
0x11f3   :  { %v2467_v60 = vpop.f32.mrb[33].mxu0  ;;  %v5269_v29 = vadd.f32 %v3989_v23, %v3608_v3 }
0x11f4   :  { %v5264_v0 = vadd.f32 %v3606_v53, %v2467_v60  ;;  %v3990_v8 = vpop.f32.mrb[34].mxu0 }
0x11f5   :  { %v2479_v54 = vadd.f32 %v3990_v8, %v3609_v42  ;;  %v2470_v35 = vpop.f32.mrb[35].mxu0  ;;  %v2488_v63 = vsel %vm536_vm2, %v5269_v29, -inf }
0x11f6   :  { %v2482_v50 = vsel %vm536_vm2, %v5264_v0, -inf  ;;  %v2471_v44 = vadd.f32 %v3607_v9, %v2470_v35 }
0x11f7   :  { %2483 = vmax.xlane.f32.xlu0 %v2482_v50  ;;  %v2491_v51 = vsel %vm536_vm2, %v2479_v54, -inf }
0x11f8   :  { %2492 = vmax.xlane.f32.xlu1 %v2491_v51  ;;  %v2485_v57 = vsel %vm536_vm2, %v2471_v44, -inf }
0x11fb   :  { %2489 = vmax.xlane.f32.xlu0 %v2488_v63 }
0x11fc   :  { %2486 = vmax.xlane.f32.xlu1 %v2485_v57 }
0x120d   :  { %2329 = vrot.lane.b32.xlu1 %v5171_v58, %s4357_s0 }
0x1211   :  { %2528 = vrot.lane.b32.xlu1 %v5157_v32, %s4359_s1 }
0x126f   :  { %v2104_v41 = vpop.xlane.xlu0 %2103 }
0x1270   :  { %v2110_v11 = vsub.f32 %v2090_v16, %v2104_v41 }
0x1272   :  { %v2116_v56 = vmul.f32 1.442695, %v2110_v11  ;;  %v2101_v61 = vpop.xlane.xlu1 %2100 }
0x1273   :  { %v2098_v13 = vpop.xlane.xlu0 %2097  ;;  %v2109_v18 = vsub.f32 %v5226_v49, %v2101_v61 }
0x1274   :  { %4259 = vpow2.f32 %v2116_v56  ;;  %v2108_v28 = vsub.f32 %v5220_v6, %v2098_v13 }
0x1275   :  { %v2114_v16 = vmul.f32 1.442695, %v2109_v18 }
0x1276   :  { %v2290_v15 = vpop.xlane.xlu1 %2289  ;;  %v2112_v49 = vmul.f32 1.442695, %v2108_v28 }
0x1277   :  { %v2294_v1 = vsub.f32 %v2276_v26, %v2290_v15  ;;  %v2107_v27 = vpop.xlane.xlu0 %2106 }
0x1278   :  { %v2111_v43 = vsub.f32 %v2093_v4, %v2107_v27 }
0x1279   :  { %v2301_v20 = vmul.f32 1.442695, %v2294_v1 }
0x127a   :  { %v2118_v47 = vmul.f32 1.442695, %v2111_v43  ;;  %v2284_v48 = vpop.xlane.xlu1 %2283 }
0x127b   :  { %v2281_v22 = vpop.xlane.xlu0 %2280  ;;  %v2292_v59 = vsub.f32 %v5242_v36, %v2284_v48 }
0x127c   :  { %4261 = vpow2.f32 %v2118_v47  ;;  %v2291_v7 = vsub.f32 %v5244_v45, %v2281_v22 }
0x127d   :  { %4263 = vpow2.f32 %v2301_v20  ;;  %v2297_v25 = vmul.f32 1.442695, %v2292_v59 }
0x127e   :  { %v5283_v24 = vpop.eup %4259  ;;  %4265 = vpow2.f32 %v2114_v16  ;;  %v2295_v6 = vmul.f32 1.442695, %v2291_v7 }
0x127f   :  { %v2287_v30 = vpop.xlane.xlu0 %2286  ;;  %v2126_v26 = vsel %vm536_vm2, %v5283_v24, 0.0 }
0x1280   :  { %v2293_v4 = vsub.f32 %v2273_v39, %v2287_v30  ;;  %2127 = vadd.xlane.f32.xlu0 %v2126_v26 }
0x1282   :  { %v2299_v34 = vmul.f32 1.442695, %v2293_v4 }
0x1284   :  { %4267 = vpow2.f32 %v2299_v34  ;;  %v2484_v11 = vpop.xlane.xlu0 %2483 }
0x1285   :  { %4269 = vpow2.f32 %v2112_v49  ;;  %v2493_v31 = vpop.xlane.xlu1 %2492  ;;  %v2494_v13 = vsub.f32 %v5264_v0, %v2484_v11 }
0x1286   :  { %v5289_v52 = vpop.eup %4261  ;;  %4271 = vpow2.f32 %v2297_v25  ;;  %v2497_v36 = vsub.f32 %v2479_v54, %v2493_v31 }
0x1287   :  { %v2129_v37 = vsel %vm536_vm2, %v5289_v52, 0.0  ;;  %v5293_v19 = vpop.eup %4263  ;;  %4273 = vpow2.f32 %v2295_v6  ;;  %v2498_v1 = vmul.f32 1.442695, %v2494_v13 }
0x1288   :  { %v2504_v39 = vmul.f32 1.442695, %v2497_v36  ;;  %2130 = vadd.xlane.f32.xlu1 %v2129_v37  ;;  %v2312_v21 = vsel %vm536_vm2, %v5293_v19, 0.0  ;;  %v5297_v53 = vpop.eup %4265  ;;  %v2490_v56 = vpop.xlane.xlu0 %2489 }
0x1289   :  { %v2487_v45 = vpop.xlane.xlu1 %2486  ;;  %v2123_v60 = vsel %vm536_vm2, %v5297_v53, 0.0  ;;  %v2496_v61 = vsub.f32 %v5269_v29, %v2490_v56 }
0x128a   :  { %4275 = vpow2.f32 %v2504_v39  ;;  %v2495_v46 = vsub.f32 %v2471_v44, %v2487_v45 }
0x128b   :  { %v2502_v15 = vmul.f32 1.442695, %v2496_v61 }
0x128c   :  { %v2500_v23 = vmul.f32 1.442695, %v2495_v46  ;;  %2313 = vadd.xlane.f32.xlu1 %v2312_v21 }
0x128e   :  { %v5299_v42 = vpop.eup %4267  ;;  %4277 = vpow2.f32 %v2500_v23 }
0x128f   :  { %v5301_v3 = vpop.eup %4269  ;;  %v2309_v8 = vsel %vm536_vm2, %v5299_v42, 0.0  ;;  %4279 = vpow2.f32 %v2502_v15 }
0x1290   :  { %v5307_v9 = vpop.eup %4271  ;;  %2124 = vadd.xlane.f32.xlu1 %v2123_v60  ;;  %2310 = vadd.xlane.f32.xlu0 %v2309_v8  ;;  %v2120_v50 = vsel %vm536_vm2, %v5301_v3, 0.0  ;;  %4281 = vpow2.f32 %v2498_v1 }
0x1291   :  { %v5309_v54 = vpop.eup %4273  ;;  %v2306_v35 = vsel %vm536_vm2, %v5307_v9, 0.0 }
0x1292   :  { %v2303_v63 = vsel %vm536_vm2, %v5309_v54, 0.0 }
0x1294   :  { %v5315_v44 = vpop.eup %4275  ;;  %2307 = vadd.xlane.f32.xlu1 %v2306_v35  ;;  %2121 = vadd.xlane.f32.xlu0 %v2120_v50 }
0x1295   :  { %v2515_v51 = vsel %vm536_vm2, %v5315_v44, 0.0 }
0x1298   :  { %v5321_v57 = vpop.eup %4277  ;;  %2516 = vadd.xlane.f32.xlu1 %v2515_v51  ;;  %2304 = vadd.xlane.f32.xlu0 %v2303_v63 }
0x1299   :  { %v2509_v41 = vsel %vm536_vm2, %v5321_v57, 0.0  ;;  %v5335_v27 = vpop.eup %4279 }
0x129a   :  { %v2512_v43 = vsel %vm536_vm2, %v5335_v27, 0.0  ;;  %v5339_v18 = vpop.eup %4281 }
0x129c   :  { %2510 = vadd.xlane.f32.xlu1 %v2509_v41 }
0x12ad   :  { %2530 = vrot.lane.b32.xlu1 %v5171_v58, %s4359_s1 }
0x12ae   :  { %2327 = vrot.lane.b32.xlu0 %v5157_v32, %s4357_s0 }
0x12b1   :  { %2620 = vrot.lane.b32.xlu1 %v5169_v55, %s5673_s4  ;;  %v2506_v55 = vsel %vm536_vm2, %v5339_v18, 0.0 }
0x12b5   :  { %2616 = vrot.lane.b32.xlu1 %v5173_v2, %s5674_s8  ;;  %v2330_v2 = vpop.permute.xlu1 %2329 }
0x12b9   :  { %v2529_v0 = vpop.permute.xlu1 %2528 }
0x12cd   :  { %2513 = vadd.xlane.f32.xlu0 %v2512_v43 }
0x12d1   :  { %2507 = vadd.xlane.f32.xlu0 %v2506_v55 }
0x12e7   :  { %2618 = vrot.lane.b32.xlu0 %v5155_v38, %s5673_s4 }
0x12eb   :  { %2614 = vrot.lane.b32.xlu0 %v5159_v40, %s5674_s8 }
0x130d   :  { %v2128_v20 = vpop.xlane.xlu0 %2127 }
0x1315   :  { %v2131_v29 = vpop.xlane.xlu1 %2130 }
0x1316   :  { %4283 = vrcp.f32 %v2131_v29 }
0x1319   :  { %v2314_v47 = vpop.xlane.xlu1 %2313 }
0x131d   :  { %v2125_v48 = vpop.xlane.xlu1 %2124  ;;  %v2311_v22 = vpop.xlane.xlu0 %2310 }
0x131e   :  { %4285 = vrcp.f32 %v2125_v48 }
0x131f   :  { %4287 = vrcp.f32 %v2128_v20 }
0x1320   :  { %v4284_v30 = vpop.eup %4283 }
0x1321   :  { %v2122_v28 = vpop.xlane.xlu0 %2121  ;;  %v2308_v16 = vpop.xlane.xlu1 %2307  ;;  %v2139_v49 = vmul.f32 %v4284_v30, %v5289_v52  ;;  %v3616_v30 = vld [vmem:[%s5645_s5 + $0xf0] sm:$0xff] }
0x1322   :  { %4289 = vrcp.f32 %v2122_v28 }
0x1323   :  { %4291 = vrcp.f32 %v2308_v16 }
0x1325   :  { %v2305_v59 = vpop.xlane.xlu0 %2304  ;;  %v2517_v31 = vpop.xlane.xlu1 %2516 }
0x1326   :  { %4293 = vrcp.f32 %v2305_v59  ;;  %v3614_v59 = vld [vmem:[%s5645_s5 + $0xe0] sm:$0xff] }
0x1327   :  { %4295 = vrcp.f32 %v2311_v22 }
0x1328   :  { %4297 = vrcp.f32 %v2314_v47  ;;  %v4286_v40 = vpop.eup %4285 }
0x1329   :  { %v2328_v38 = vpop.permute.xlu0 %2327  ;;  %v4288_v26 = vpop.eup %4287  ;;  %v2137_v25 = vmul.f32 %v4286_v40, %v5297_v53 }
0x132a   :  { %3975 = vmatprep.subr.bf16.mxu1 %v2328_v38  ;;  %v2138_v6 = vmul.f32 %v4288_v26, %v5283_v24  ;;  %v2511_v24 = vpop.xlane.xlu1 %2510  ;;  %v3615_v26 = vld [vmem:[%s5645_s5 + $0xe8] sm:$0xff] }
0x132c   :  { %v4290_v4 = vpop.eup %4289  ;;  %v2141_v39 = vpack.c.bf16 %v2139_v49, %v2138_v6 }
0x132d   :  { %v2136_v7 = vmul.f32 %v4290_v4, %v5301_v3  ;;  %v4292_v34 = vpop.eup %4291 }
0x132e   :  { %v2320_v21 = vmul.f32 %v4292_v34, %v5307_v9  ;;  %v2531_v8 = vpop.permute.xlu1 %2530 }
0x132f   :  { %v2140_v36 = vpack.c.bf16 %v2137_v25, %v2136_v7 }
0x1330   :  { %v4294_v37 = vpop.eup %4293 }
0x1331   :  { %v4296_v45 = vpop.eup %4295  ;;  %3963 = vmatprep.mubr.msk.bf16.mxu1 %vm536_vm2, %v2140_v36  ;;  %v2319_v46 = vmul.f32 %v4294_v37, %v5309_v54 }
0x1332   :  { %3964 = vmatmul.mubr.msk.bf16.vlgmr.msra.gmra.mrb[48].mxu1 %vm536_vm2, %v2141_v39  ;;  %v4298_v52 = vpop.eup %4297  ;;  %v2321_v53 = vmul.f32 %v4296_v45, %v5299_v42  ;;  %v2621_v43 = vpop.permute.xlu1 %2620 }
0x1333   :  { %3976 = vmatpush3.bf16.msra.mxu1 %v2328_v38  ;;  %v2323_v23 = vpack.c.bf16 %v2320_v21, %v2319_v46  ;;  %v2322_v3 = vmul.f32 %v4298_v52, %v5293_v19 }
0x1334   :  { %3977 = vmatprep.subr.bf16.mxu1 %v2330_v2 }
0x1335   :  { %3979 = vmatprep.mubr.msk.bf16.mxu1 %vm536_vm2, %v2323_v23  ;;  %v2324_v60 = vpack.c.bf16 %v2322_v3, %v2321_v53 }
0x1337   :  { %3978 = vmatpush3.bf16.msra.mxu1 %v2330_v2 }
0x1338   :  { %3991 = vmatprep.subr.bf16.mxu1 %v2529_v0 }
0x133a   :  { %3980 = vmatmul.mubr.msk.bf16.vlgmr.msra.gmra.mrb[52].mxu1 %vm536_vm2, %v2324_v60 }
0x133b   :  { %3992 = vmatpush3.bf16.msra.mxu1 %v2529_v0 }
0x133c   :  { %3993 = vmatprep.subr.bf16.mxu1 %v2531_v8 }
0x133f   :  { %3994 = vmatpush3.bf16.msra.mxu1 %v2531_v8 }
0x135a   :  { %v2514_v9 = vpop.xlane.xlu0 %2513 }
0x135b   :  { %4299 = vrcp.f32 %v2514_v9 }
0x135c   :  { %4301 = vrcp.f32 %v2511_v24 }
0x135d   :  { %4303 = vrcp.f32 %v2517_v31  ;;  %v3617_v31 = vld [vmem:[%s5645_s5 + $0xf8] sm:$0xff] }
0x135e   :  { %v2508_v42 = vpop.xlane.xlu0 %2507 }
0x135f   :  { %4305 = vrcp.f32 %v2508_v42 }
0x1362   :  { %v2619_v54 = vpop.permute.xlu0 %2618 }
0x1363   :  { %4041 = vmatprep.subr.msk.bf16.mxu1 %vm474_vm1, %v2619_v54  ;;  %v2629_v15 = vsel %vm474_vm1, %v2619_v54, 0 }
0x1365   :  { %v4300_v35 = vpop.eup %4299 }
0x1366   :  { %v4302_v19 = vpop.eup %4301  ;;  %v2524_v63 = vmul.f32 %v4300_v35, %v5335_v27  ;;  %v2615_v1 = vpop.permute.xlu0 %2614  ;;  %v2632_v27 = vsel %vm474_vm1, %v2621_v43, 0 }
0x1367   :  { %v4304_v50 = vpop.eup %4303  ;;  %v2523_v11 = vmul.f32 %v4302_v19, %v5321_v57  ;;  %v2617_v57 = vpop.permute.xlu1 %2616 }
0x1368   :  { %v2525_v56 = vmul.f32 %v4304_v50, %v5315_v44 }
0x1369   :  { %v4306_v51 = vpop.eup %4305 }
0x136a   :  { %v2522_v41 = vmul.f32 %v4306_v51, %v5339_v18  ;;  %v2527_v13 = vpack.c.bf16 %v2525_v56, %v2524_v63 }
0x136c   :  { %v2526_v61 = vpack.c.bf16 %v2523_v11, %v2522_v41 }
0x136e   :  { %3995 = vmatprep.mubr.msk.bf16.mxu1 %vm536_vm2, %v2526_v61 }
0x136f   :  { %3996 = vmatmul.mubr.msk.bf16.vlgmr.msra.gmra.mrb[56].mxu1 %vm536_vm2, %v2527_v13 }
0x1370   :  { %4000 = vmatpush3.bf16.xpose.msra.mxu1 %v2629_v15  ;;  %4003 = vmatprep.mubr.msk.bf16.mxu1 %vm474_vm1, %v2615_v1 }
0x1371   :  { %4042 = vmatprep.subr.msk.bf16.mxu1 %vm474_vm1, %v2621_v43 }
0x1378   :  { %4002 = vmatpush3.bf16.xpose.msra.mxu1 %v2632_v27 }
0x137f   :  { %4004 = vmatmul.mubr.msk.bf16.vlgmr.msra.gmra.mrb[60].mxu1 %vm474_vm1, %v2617_v57 }
0x1380   :  { %3094 = vmatprep.mubr.bf16.mxu1 %v4355_v33 }
0x1405   :  { %v3965_v44 = vpop.f32.mrb[48].mxu1 }
0x1406   :  { %2201 = vst.msk [vmem:[#allocation2 + $0x10] sm:$0xff] %vm474_vm1, %v3965_v44  ;;  %v2184_v18 = vpop.f32.mrb[49].mxu1 }
0x1407   :  { %2199 = vst.msk [vmem:[#allocation2] sm:$0xff] %vm474_vm1, %v2184_v18  ;;  %v3966_v55 = vpop.f32.mrb[50].mxu1 }
0x1408   :  { %2202 = vst.msk [vmem:[#allocation2 + $0x18] sm:$0xff] %vm474_vm1, %v3966_v55  ;;  %v2187_v2 = vpop.f32.mrb[51].mxu1 }
0x1409   :  { %2200 = vst.msk [vmem:[#allocation2 + $0x8] sm:$0xff] %vm474_vm1, %v2187_v2 }
0x140d   :  { %v3981_v0 = vpop.f32.mrb[52].mxu1 }
0x140e   :  { %v2373_v29 = vpop.f32.mrb[53].mxu1 }
0x140f   :  { %v3982_v20 = vpop.f32.mrb[54].mxu1 }
0x1410   :  { %v2376_v47 = vpop.f32.mrb[55].mxu1 }
0x1442   :  { %v3997_v48 = vpop.f32.mrb[56].mxu1 }
0x1443   :  { %v2574_v22 = vpop.f32.mrb[57].mxu1 }
0x1444   :  { %v3998_v28 = vpop.f32.mrb[58].mxu1 }
0x1445   :  { %v2577_v16 = vpop.f32.mrb[59].mxu1 }
0x1452   :  { %v4005_v38 = vpop.f32.mrb[60].mxu1 }
0x1453   :  { %v2668_v40 = vpop.f32.mrb[61].mxu1  ;;  %v2677_v25 = vadd.f32 %v4005_v38, %v3616_v30 }
0x1454   :  { %v2669_v4 = vadd.f32 %v3614_v59, %v2668_v40  ;;  %v4006_v49 = vpop.f32.mrb[62].mxu1  ;;  %v4115_v40 = vld [vmem:[%s5646_s10 + $0x20] sm:$0xff]  }
0x1455   :  { %v2671_v7 = vpop.f32.mrb[63].mxu1  ;;  %v2680_v37 = vadd.f32 %v4006_v49, %v3617_v31  ;;  %v2689_v39 = vsel %vm536_vm2, %v2677_v25, -inf  ;;  %v4118_v49 = vld [vmem:[%s5646_s10 + $0x38] sm:$0xff]  }
0x1456   :  { %v2672_v34 = vadd.f32 %v3615_v26, %v2671_v7  ;;  %v2683_v6 = vsel %vm536_vm2, %v2669_v4, -inf  ;;  %v4116_v26 = vld [vmem:[%s5646_s10 + $0x28] sm:$0xff]  }
0x1457   :  { %2684 = vmax.xlane.f32.xlu0 %v2683_v6  ;;  %v2692_v45 = vsel %vm536_vm2, %v2680_v37, -inf }
0x1458   :  { %v2686_v36 = vsel %vm536_vm2, %v2672_v34, -inf }
0x1459   :  { %2687 = vmax.xlane.f32.xlu1 %v2686_v36 }
0x145b   :  { %2690 = vmax.xlane.f32.xlu0 %v2689_v39 }
0x145f   :  { %2693 = vmax.xlane.f32.xlu0 %v2692_v45 }
0x14e4   :  { %v2685_v46 = vpop.xlane.xlu0 %2684 }
0x14e5   :  { %v2695_v21 = vsub.f32 %v2669_v4, %v2685_v46  ;;  %v4117_v4 = vld [vmem:[%s5646_s10 + $0x30] sm:$0xff]  }
0x14e6   :  { %v2688_v52 = vpop.xlane.xlu1 %2687 }
0x14e7   :  { %v2699_v24 = vmul.f32 1.442695, %v2695_v21  ;;  %v2696_v3 = vsub.f32 %v2672_v34, %v2688_v52 }
0x14e8   :  { %v2691_v23 = vpop.xlane.xlu0 %2690 }
0x14e9   :  { %v2697_v53 = vsub.f32 %v2677_v25, %v2691_v23  ;;  %v2701_v42 = vmul.f32 1.442695, %v2696_v3 }
0x14eb   :  { %v2703_v60 = vmul.f32 1.442695, %v2697_v53 }
0x14ec   :  { %v2694_v8 = vpop.xlane.xlu0 %2693 }
0x14ed   :  { %4307 = vpow2.f32 %v2703_v60  ;;  %v2698_v9 = vsub.f32 %v2680_v37, %v2694_v8 }
0x14ee   :  { %4309 = vpow2.f32 %v2699_v24  ;;  %v3631_v24 = vld [vmem:[%s5647_s11 + $0x1] ss:$0 sm:$0xff] }
0x14ef   :  { %v2705_v54 = vmul.f32 1.442695, %v2698_v9 }
0x14f1   :  { %4311 = vpow2.f32 %v2705_v54 }
0x14f2   :  { %4313 = vpow2.f32 %v2701_v42 }
0x14f7   :  { %v4308_v35 = vpop.eup %4307 }
0x14f8   :  { %v2713_v19 = vsel %vm536_vm2, %v4308_v35, 0.0  ;;  %v4310_v50 = vpop.eup %4309 }
0x14f9   :  { %2714 = vadd.xlane.f32.xlu0 %v2713_v19  ;;  %v2707_v63 = vsel %vm536_vm2, %v4310_v50, 0.0 }
0x14fb   :  { %v4312_v51 = vpop.eup %4311 }
0x14fc   :  { %v2716_v41 = vsel %vm536_vm2, %v4312_v51, 0.0  ;;  %v4314_v11 = vpop.eup %4313 }
0x14fd   :  { %2708 = vadd.xlane.f32.xlu0 %v2707_v63  ;;  %2717 = vadd.xlane.f32.xlu1 %v2716_v41  ;;  %v2710_v56 = vsel %vm536_vm2, %v4314_v11, 0.0 }
0x1501   :  { %2711 = vadd.xlane.f32.xlu1 %v2710_v56 }
0x1512   :  { %2731 = vrot.lane.b32.xlu1 %v5171_v58, %s5674_s8 }
0x1513   :  { %2729 = vrot.lane.b32.xlu0 %v5157_v32, %s5674_s8 }
0x1516   :  { %2392 = vrot.lane.b32.xlu1 %v2373_v29, %s5673_s4 }
0x1517   :  { %2396 = vrot.lane.b32.xlu0 %v3981_v0, %s5673_s4 }
0x151a   :  { %2394 = vrot.lane.b32.xlu1 %v2376_v47, %s5673_s4 }
0x151b   :  { %2593 = vrot.lane.b32.xlu0 %v2574_v22, %s4360_s22 }
0x151e   :  { %2398 = vrot.lane.b32.xlu1 %v3982_v20, %s5673_s4 }
0x151f   :  { %2597 = vrot.lane.b32.xlu0 %v3997_v48, %s4360_s22 }
0x1522   :  { %2595 = vrot.lane.b32.xlu1 %v2577_v16, %s4360_s22 }
0x1526   :  { %2599 = vrot.lane.b32.xlu1 %v3998_v28, %s4360_s22 }
0x1586   :  { %v2715_v58 = vpop.xlane.xlu0 %2714 }
0x158a   :  { %v2718_v61 = vpop.xlane.xlu1 %2717  ;;  %v2709_v13 = vpop.xlane.xlu0 %2708 }
0x158b   :  { %4315 = vrcp.f32 %v2718_v61 }
0x158c   :  { %4317 = vrcp.f32 %v2709_v13 }
0x158d   :  { %4319 = vrcp.f32 %v2715_v58 }
0x158e   :  { %v2712_v32 = vpop.xlane.xlu1 %2711  ;;  %v2730_v15 = vpop.permute.xlu0 %2729 }
0x158f   :  { %4321 = vrcp.f32 %v2712_v32  ;;  %4007 = vmatprep.subr.bf16.mxu0 %v2730_v15 }
0x1590   :  { %4008 = vmatpush3.bf16.msra.mxu0 %v2730_v15 }
0x1592   :  { %v2732_v1 = vpop.permute.xlu1 %2731  ;;  %v2397_v43 = vpop.permute.xlu0 %2396 }
0x1593   :  { %2406 = vst.msk [vmem:[#allocation2 + $0x10] sm:$0xff] %vm845_vm3, %v2397_v43  ;;  %4009 = vmatprep.subr.bf16.mxu0 %v2732_v1 }
0x1594   :  { %4010 = vmatpush3.bf16.msra.mxu0 %v2732_v1 }
0x1595   :  { %v4316_v27 = vpop.eup %4315  ;;  %4015 = vmatprep.subr.bf16.mxu0 %v4115_v40 }
0x1596   :  { %v2393_v57 = vpop.permute.xlu1 %2392  ;;  %v2594_v44 = vpop.permute.xlu0 %2593  ;;  %v2726_v0 = vmul.f32 %v4316_v27, %v4312_v51 }
0x1597   :  { %v4318_v18 = vpop.eup %4317  ;;  %2404 = vst.msk [vmem:[#allocation2] sm:$0xff] %vm845_vm3, %v2393_v57 }
0x1598   :  { %v4320_v55 = vpop.eup %4319  ;;  %2605 = vst.msk [vmem:[#allocation2] sm:$0xff] %vm1047_vm4, %v2594_v44  ;;  %v2723_v47 = vmul.f32 %v4318_v18, %v4310_v50 }
0x1599   :  { %v4322_v2 = vpop.eup %4321  ;;  %v2725_v22 = vmul.f32 %v4320_v55, %v4308_v35 }
0x159a   :  { %v2395_v29 = vpop.permute.xlu1 %2394  ;;  %v2598_v20 = vpop.permute.xlu0 %2597  ;;  %v2724_v48 = vmul.f32 %v4322_v2, %v4314_v11 }
0x159b   :  { %2405 = vst.msk [vmem:[#allocation2 + $0x8] sm:$0xff] %vm845_vm3, %v2395_v29  ;;  %v2728_v16 = vpack.c.bf16 %v2726_v0, %v2725_v22  ;;  %v4121_v22 = vld [vmem:[%s5648_s14 + $0x44] ss:$8 sps:$4 sm:$0xff]  }
0x159c   :  { %2607 = vst.msk [vmem:[#allocation2 + $0x10] sm:$0xff] %vm1047_vm4, %v2598_v20  ;;  %v2727_v28 = vpack.c.bf16 %v2724_v48, %v2723_v47  ;;  %3062 = vmatprep.subr.bf16.mxu1 %v4121_v22 }
0x159e   :  { %v2399_v59 = vpop.permute.xlu1 %2398  ;;  %4011 = vmatprep.mubr.msk.bf16.mxu0 %vm536_vm2, %v2727_v28  ;;  %v4119_v28 = vld [vmem:[%s5648_s14 + $0x40] ss:$8 sps:$4 sm:$0xff]  }
0x159f   :  { %2407 = vst.msk [vmem:[#allocation2 + $0x18] sm:$0xff] %vm845_vm3, %v2399_v59  ;;  %4012 = vmatmul.mubr.msk.bf16.vlgmr.msra.gmra.mrb[36].mxu0 %vm536_vm2, %v2728_v16  ;;  %3063 = vmatpush1.bf16.msra.mxu1 %v4119_v28  ;;  %v4124_v16 = vld [vmem:[%s5648_s14 + $0x54] ss:$8 sps:$4 sm:$0xff]   ;;  %v4122_v59 = vld [vmem:[%s5648_s14 + $0x50] ss:$8 sps:$4 sm:$0xff]  }
0x15a0   :  { %4016 = vmatpush3.bf16.msra.mxu0 %v4115_v40  ;;  %3064 = vmatprep.subr.bf16.mxu1 %v4124_v16  ;;  %v4128_v40 = vld [vmem:[%s5648_s14 + $0x70] ss:$8 sps:$4 sm:$0xff]  }
0x15a1   :  { %4017 = vmatprep.subr.bf16.mxu0 %v4116_v26 }
0x15a2   :  { %v2596_v38 = vpop.permute.xlu1 %2595 }
0x15a3   :  { %2606 = vst.msk [vmem:[#allocation2 + $0x8] sm:$0xff] %vm1047_vm4, %v2596_v38  ;;  %3065 = vmatpush1.bf16.msra.mxu1 %v4122_v59  ;;  %v4127_v38 = vld [vmem:[%s5648_s14 + $0x64] ss:$8 sps:$4 sm:$0xff]  }
0x15a4   :  { %4018 = vmatpush3.bf16.msra.mxu0 %v4116_v26  ;;  %3066 = vmatprep.subr.bf16.mxu1 %v4127_v38  ;;  %v4130_v26 = vld [vmem:[%s5648_s14 + $0x74] ss:$8 sps:$4 sm:$0xff]  }
0x15a5   :  { %4019 = vmatprep.subr.bf16.mxu0 %v4117_v4 }
0x15a6   :  { %v2600_v30 = vpop.permute.xlu1 %2599 }
0x15a7   :  { %2608 = vst.msk [vmem:[#allocation2 + $0x18] sm:$0xff] %vm1047_vm4, %v2600_v30  ;;  %v4125_v30 = vld [vmem:[%s5648_s14 + $0x60] ss:$8 sps:$4 sm:$0xff]  }
0x15a8   :  { %4020 = vmatpush3.bf16.msra.mxu0 %v4117_v4  ;;  %3067 = vmatpush1.bf16.msra.mxu1 %v4125_v30 }
0x15a9   :  { %4021 = vmatprep.subr.bf16.mxu0 %v4118_v49  ;;  %3068 = vmatprep.subr.bf16.mxu1 %v4130_v26 }
0x15ac   :  { %4022 = vmatpush3.bf16.msra.mxu0 %v4118_v49  ;;  %3069 = vmatpush1.bf16.msra.mxu1 %v4128_v40 }
0x1672   :  { %v4013_v7 = vpop.f32.mrb[36].mxu0 }
0x1673   :  { %v2775_v25 = vpop.f32.mrb[37].mxu0 }
0x1674   :  { %2794 = vrot.lane.b32.xlu0 %v2775_v25, %s4358_s21  ;;  %v4014_v34 = vpop.f32.mrb[38].mxu0 }
0x1675   :  { %v2778_v6 = vpop.f32.mrb[39].mxu0 }
0x1676   :  { %2796 = vrot.lane.b32.xlu1 %v2778_v6, %s4358_s21 }
0x1678   :  { %2798 = vrot.lane.b32.xlu0 %v4013_v7, %s4358_s21 }
0x167a   :  { %2800 = vrot.lane.b32.xlu1 %v4014_v34, %s4358_s21 }
0x16e6   :  { %v2795_v31 = vpop.permute.xlu0 %2794 }
0x16e7   :  { %2806 = vst.msk [vmem:[#allocation2] sm:$0xff] %vm1249_vm5, %v2795_v31 }
0x16e8   :  { %v2797_v36 = vpop.permute.xlu1 %2796 }
0x16e9   :  { %2807 = vst.msk [vmem:[#allocation2 + $0x8] sm:$0xff] %vm1249_vm5, %v2797_v36 }
0x16ea   :  { %v2799_v37 = vpop.permute.xlu0 %2798 }
0x16eb   :  { %2808 = vst.msk [vmem:[#allocation2 + $0x10] sm:$0xff] %vm1249_vm5, %v2799_v37 }
0x16ec   :  { %v2801_v39 = vpop.permute.xlu1 %2800 }
0x16ed   :  { %2809 = vst.msk [vmem:[#allocation2 + $0x18] sm:$0xff] %vm1249_vm5, %v2801_v39 }
0x16ee   :  { %v2810_v45 = vld [vmem:[#allocation2] sm:$0xff] }
0x16f0   :  { %v2811_v46 = vld [vmem:[#allocation2 + $0x8] sm:$0xff] }
0x16f1   :  { %v2814_v21 = vpack.c.bf16 %v2811_v46, %v2810_v45 }
0x16f2   :  { %v2812_v52 = vld [vmem:[#allocation2 + $0x10] sm:$0xff] }
0x16f3   :  { %4023 = vmatprep.mubr.msk.bf16.mxu0 %vm261_vm0, %v2814_v21 }
0x16f4   :  { %v2813_v23 = vld [vmem:[#allocation2 + $0x18] sm:$0xff] }
0x16f5   :  { %v2815_v53 = vpack.c.bf16 %v2813_v23, %v2812_v52  ;;  %v3640_v52 = vld [vmem:[%s5649_s12 + $0x1] ss:$0 sm:$0xff] }
0x16f7   :  { %4024 = vmatmul.mubr.msk.bf16.vlgmr.msra.gmra.mrb[40].mxu0 %vm261_vm0, %v2815_v53 }
0x17ca   :  { %v4025_v3 = vpop.f32.mrb[40].mxu0 }
0x17cb   :  { %v2897_v60 = vpop.f32.mrb[41].mxu0  ;;  %v2906_v8 = vadd.f32 %v4025_v3, %v3631_v24 }
0x17cc   :  { %v2898_v9 = vadd.f32 %v3631_v24, %v2897_v60  ;;  %v4026_v42 = vpop.f32.mrb[42].mxu0 }
0x17cd   :  { %v2900_v54 = vpop.f32.mrb[43].mxu0  ;;  %v5447_v50 = vadd.f32 %v2906_v8, %v5100_v62  ;;  %v2909_v51 = vadd.f32 %v4026_v42, %v3631_v24  ;;  %v3641_v8 = vld [vmem:[%s5650_s13 + $0x1] ss:$0 sm:$0xff] }
0x17ce   :  { %v5444_v35 = vadd.f32 %v2898_v9, %v5090_v5  ;;  %v2901_v19 = vadd.f32 %v3631_v24, %v2900_v54 }
0x17cf   :  { %v5457_v56 = vadd.f32 %v2909_v51, %v5103_v17  ;;  %v2926_v5 = vsel %vm261_vm0, %v5447_v50, 0.0 }
0x17d0   :  { %v5450_v63 = vadd.f32 %v2901_v19, %v5093_v10  ;;  %v2920_v41 = vsel %vm261_vm0, %v5444_v35, 0.0 }
0x17d1   :  { %2921 = vadd.xlane.f32.xlu0 %v2920_v41  ;;  %v2929_v62 = vsel %vm261_vm0, %v5457_v56, 0.0 }
0x17d2   :  { %v2923_v11 = vsel %vm261_vm0, %v5450_v63, 0.0 }
0x17d3   :  { %2924 = vadd.xlane.f32.xlu1 %v2923_v11 }
0x17d5   :  { %2927 = vadd.xlane.f32.xlu0 %v2926_v5 }
0x17d9   :  { %2930 = vadd.xlane.f32.xlu0 %v2929_v62 }
0x185e   :  { %v2922_v10 = vpop.xlane.xlu0 %2921 }
0x185f   :  { %v2932_v58 = vmul.f32 0.015625, %v2922_v10 }
0x1860   :  { %v2925_v61 = vpop.xlane.xlu1 %2924 }
0x1861   :  { %v2936_v13 = vsub.f32 %v5444_v35, %v2932_v58  ;;  %v2933_v32 = vmul.f32 0.015625, %v2925_v61 }
0x1862   :  { %v2928_v15 = vpop.xlane.xlu0 %2927 }
0x1863   :  { %v2937_v1 = vsub.f32 %v5450_v63, %v2933_v32  ;;  %v2934_v43 = vmul.f32 0.015625, %v2928_v15  ;;  %v2940_v17 = vmul.f32 %v2936_v13, %v2936_v13  ;;  %v4132_v32 = vld [vmem:[%s5651_s16 + $0x80] sm:$0xff]   ;;  %v4133_v15 = vld [vmem:[%s5651_s16 + $0xc8] sm:$0xff]  }
0x1865   :  { %v2938_v27 = vsub.f32 %v5447_v50, %v2934_v43  ;;  %v2944_v57 = vsel %vm261_vm0, %v2940_v17, 0.0  ;;  %v2941_v44 = vmul.f32 %v2937_v1, %v2937_v1  ;;  %v4136_v43 = vld [vmem:[%s5651_s16 + $0x90] sm:$0xff]   ;;  %v4137_v17 = vld [vmem:[%s5651_s16 + $0xd8] sm:$0xff]  }
0x1866   :  { %2945 = vadd.xlane.f32.xlu0 %v2944_v57  ;;  %v2931_v18 = vpop.xlane.xlu0 %2930  ;;  %v4139_v57 = vld [vmem:[%s5651_s16 + $0xe0] sm:$0xff]  }
0x1867   :  { %v2935_v55 = vmul.f32 0.015625, %v2931_v18  ;;  %v2947_v2 = vsel %vm261_vm0, %v2941_v44, 0.0  ;;  %v2942_v0 = vmul.f32 %v2938_v27, %v2938_v27  ;;  %v4140_v44 = vld [vmem:[%s5651_s16 + $0xa0] sm:$0xff]   ;;  %v4141_v18 = vld [vmem:[%s5651_s16 + $0xe8] sm:$0xff]  }
0x1868   :  { %2948 = vadd.xlane.f32.xlu1 %v2947_v2  ;;  %v4143_v2 = vld [vmem:[%s5651_s16 + $0xf0] sm:$0xff]  }
0x1869   :  { %v2939_v29 = vsub.f32 %v5457_v56, %v2935_v55  ;;  %v2950_v20 = vsel %vm261_vm0, %v2942_v0, 0.0  ;;  %v4142_v55 = vld [vmem:[%s5651_s16 + $0xa8] sm:$0xff]   ;;  %v4144_v0 = vld [vmem:[%s5651_s16 + $0xb0] sm:$0xff]  }
0x186a   :  { %2951 = vadd.xlane.f32.xlu0 %v2950_v20  ;;  %v4146_v20 = vld [vmem:[%s5651_s16 + $0xb8] sm:$0xff]  }
0x186b   :  { %v2943_v47 = vmul.f32 %v2939_v29, %v2939_v29 }
0x186d   :  { %v2953_v48 = vsel %vm261_vm0, %v2943_v47, 0.0  ;;  %v3650_v47 = vld [vmem:[%s5652_s15 + $0x2] sm:$0x3] }
0x186e   :  { %2954 = vadd.xlane.f32.xlu1 %v2953_v48  ;;  %v3009_v48 = vrot.slane %v3650_v47, %v4576_v12  ;;  %v3013_v22 = vrot.slane %v3650_v47, %v4581_v14 }
0x18f3   :  { %v2946_v4 = vpop.xlane.xlu0 %2945 }
0x18f4   :  { %v2956_v49 = vmul.f32 0.015625, %v2946_v4 }
0x18f5   :  { %v2949_v7 = vpop.xlane.xlu1 %2948 }
0x18f6   :  { %v2960_v25 = vadd.f32 1e-05, %v2956_v49  ;;  %v2957_v34 = vmul.f32 0.015625, %v2949_v7 }
0x18f7   :  { %v2952_v6 = vpop.xlane.xlu0 %2951 }
0x18f8   :  { %4323 = vrsqrt.f32 %v2960_v25  ;;  %v2961_v31 = vadd.f32 1e-05, %v2957_v34  ;;  %v2958_v36 = vmul.f32 0.015625, %v2952_v6 }
0x18fa   :  { %4325 = vrsqrt.f32 %v2961_v31  ;;  %v2962_v37 = vadd.f32 1e-05, %v2958_v36 }
0x18fb   :  { %v2955_v39 = vpop.xlane.xlu1 %2954 }
0x18fc   :  { %4327 = vrsqrt.f32 %v2962_v37  ;;  %v2959_v45 = vmul.f32 0.015625, %v2955_v39 }
0x18fe   :  { %v2963_v46 = vadd.f32 1e-05, %v2959_v45 }
0x1900   :  { %4329 = vrsqrt.f32 %v2963_v46 }
0x1902   :  { %v4324_v21 = vpop.eup %4323 }
0x1903   :  { %v2968_v23 = vmul.f32 %v4324_v21, %v2936_v13  ;;  %v4131_v13 = vld [vmem:[%s5651_s16 + $0xc0] sm:$0xff]  }
0x1904   :  { %v4326_v53 = vpop.eup %4325  ;;  %3827 = vmatprep.subr.bf16.mxu0 %v4131_v13 }
0x1905   :  { %v2978_v24 = vmul.f32 %v3640_v52, %v2968_v23  ;;  %v2969_v3 = vmul.f32 %v4326_v53, %v2937_v1  ;;  %3828 = vmatpush3.bf16.msra.mxu0 %v4132_v32  ;;  %v4135_v1 = vld [vmem:[%s5651_s16 + $0xd0] sm:$0xff]  }
0x1906   :  { %v4328_v60 = vpop.eup %4327  ;;  %3829 = vmatprep.subr.bf16.mxu0 %v4133_v15 }
0x1907   :  { %v2979_v9 = vmul.f32 %v3640_v52, %v2969_v3  ;;  %v2970_v42 = vmul.f32 %v4328_v60, %v2938_v27  ;;  %v2988_v54 = vadd.f32 %v3641_v8, %v2978_v24  ;;  %v4138_v27 = vld [vmem:[%s5651_s16 + $0x98] sm:$0xff]  }
0x1909   :  { %v2989_v19 = vadd.f32 %v3641_v8, %v2979_v9  ;;  %v2980_v5 = vmul.f32 %v3640_v52, %v2970_v42 }
0x190a   :  { %v4330_v51 = vpop.eup %4329 }
0x190b   :  { %v2971_v41 = vmul.f32 %v4330_v51, %v2939_v29  ;;  %v2992_v11 = vpack.c.bf16 %v2989_v19, %v2988_v54  ;;  %v2990_v58 = vadd.f32 %v3641_v8, %v2980_v5  ;;  %v4145_v29 = vld [vmem:[%s5651_s16 + $0xf8] sm:$0xff]  }
0x190d   :  { %3659 = vmatmul.mubr.msk.bf16.vlgmr.msra.gmra.mrb[64].mxu1 %vm261_vm0, %v2992_v11  ;;  %v2981_v62 = vmul.f32 %v3640_v52, %v2971_v41 }
0x190e   :  { %3104 = vmatprep.mubr.bf16.mxu1 %v4355_v33  ;;  %v4134_v33 = vld [vmem:[%s5651_s16 + $0x88] sm:$0xff]  }
0x190f   :  { %v2991_v10 = vadd.f32 %v3641_v8, %v2981_v62  ;;  %3830 = vmatpush3.bf16.msra.mxu0 %v4134_v33 }
0x1910   :  { %3831 = vmatprep.subr.bf16.mxu0 %v4135_v1 }
0x1911   :  { %v2993_v61 = vpack.c.bf16 %v2991_v10, %v2990_v58 }
0x1913   :  { %3832 = vmatpush3.bf16.msra.mxu0 %v4136_v43 }
0x1914   :  { %3833 = vmatprep.subr.bf16.mxu0 %v4137_v17 }
0x1915   :  { %3660 = vmatmul.mubr.msk.bf16.gmra.mrb[68].mxu1 %vm261_vm0, %v2993_v61 }
0x1917   :  { %3834 = vmatpush3.bf16.msra.mxu0 %v4138_v27 }
0x1918   :  { %3835 = vmatprep.subr.bf16.mxu0 %v4139_v57 }
0x191b   :  { %3836 = vmatpush3.bf16.msra.mxu0 %v4140_v44 }
0x191c   :  { %3837 = vmatprep.subr.bf16.mxu0 %v4141_v18 }
0x191f   :  { %3838 = vmatpush3.bf16.msra.mxu0 %v4142_v55 }
0x1920   :  { %3839 = vmatprep.subr.bf16.mxu0 %v4143_v2 }
0x1923   :  { %3840 = vmatpush3.bf16.msra.mxu0 %v4144_v0 }
0x1924   :  { %3841 = vmatprep.subr.bf16.mxu0 %v4145_v29 }
0x1927   :  { %3842 = vmatpush3.bf16.msra.mxu0 %v4146_v20 }
0x19e0   :  { %v3096_v28 = vpop.f32.mrb[64].mxu1 }
0x19e1   :  { %v5557_v16 = vadd.f32 %v3096_v28, %v3009_v48  ;;  %v3098_v59 = vpop.f32.mrb[65].mxu1 }
0x19e2   :  { %v5559_v38 = vadd.f32 %v3098_v59, %v3013_v22  ;;  %v3100_v30 = vpop.f32.mrb[66].mxu1 }
0x19e3   :  { %v3123_v40 = vmul.f32 0.044715, %v5557_v16  ;;  %v5562_v26 = vadd.f32 %v3100_v30, %v3009_v48  ;;  %v3102_v4 = vpop.f32.mrb[67].mxu1  ;;  %v3115_v30 = vmul.f32 0.5, %v5557_v16 }
0x19e4   :  { %v3124_v49 = vmul.f32 0.044715, %v5559_v38  ;;  %v5565_v7 = vadd.f32 %v3102_v4, %v3013_v22 }
0x19e5   :  { %v3131_v12 = vmul.f32 %v3123_v40, %v5557_v16  ;;  %v3125_v14 = vmul.f32 0.044715, %v5562_v26  ;;  %v3117_v40 = vmul.f32 0.5, %v5562_v26 }
0x19e6   :  { %v3132_v25 = vmul.f32 %v3124_v49, %v5559_v38  ;;  %v3126_v34 = vmul.f32 0.044715, %v5565_v7  ;;  %v3116_v49 = vmul.f32 0.5, %v5559_v38 }
0x19e7   :  { %v3139_v6 = vmul.f32 %v3131_v12, %v5557_v16  ;;  %v3133_v31 = vmul.f32 %v3125_v14, %v5562_v26  ;;  %v3118_v12 = vmul.f32 0.5, %v5565_v7 }
0x19e8   :  { %v3140_v36 = vmul.f32 %v3132_v25, %v5559_v38  ;;  %v3134_v37 = vmul.f32 %v3126_v34, %v5565_v7  ;;  %v3106_v39 = vpop.f32.mrb[68].mxu1 }
0x19e9   :  { %v3147_v45 = vadd.f32 %v3139_v6, %v5557_v16  ;;  %v3141_v46 = vmul.f32 %v3133_v31, %v5562_v26  ;;  %v5577_v21 = vadd.f32 %v3106_v39, %v3009_v48  ;;  %v3108_v52 = vpop.f32.mrb[69].mxu1 }
0x19ea   :  { %v3142_v23 = vmul.f32 %v3134_v37, %v5565_v7  ;;  %v5580_v53 = vadd.f32 %v3108_v52, %v3013_v22  ;;  %v3110_v24 = vpop.f32.mrb[70].mxu1  ;;  %v3148_v3 = vadd.f32 %v3140_v36, %v5559_v38 }
0x19eb   :  { %v3155_v60 = vmul.f32 0.7978846, %v3147_v45  ;;  %v3149_v8 = vadd.f32 %v3141_v46, %v5562_v26  ;;  %v3127_v9 = vmul.f32 0.044715, %v5577_v21  ;;  %v3111_v42 = vadd.f32 %v3110_v24, %v3009_v48  ;;  %v3112_v54 = vpop.f32.mrb[71].mxu1 }
0x19ec   :  { %v3128_v19 = vmul.f32 0.044715, %v5580_v53  ;;  %v3113_v51 = vadd.f32 %v3112_v54, %v3013_v22  ;;  %v3150_v41 = vadd.f32 %v3142_v23, %v5565_v7  ;;  %v3156_v11 = vmul.f32 0.7978846, %v3148_v3 }
0x19ed   :  { %4331 = vtanh.f32 %v3155_v60  ;;  %v3157_v5 = vmul.f32 0.7978846, %v3149_v8  ;;  %v3135_v62 = vmul.f32 %v3127_v9, %v5577_v21  ;;  %v3129_v10 = vmul.f32 0.044715, %v3111_v42 }
0x19ee   :  { %v3136_v58 = vmul.f32 %v3128_v19, %v5580_v53  ;;  %v3130_v61 = vmul.f32 0.044715, %v3113_v51  ;;  %v3158_v13 = vmul.f32 0.7978846, %v3150_v41  ;;  %4333 = vtanh.f32 %v3156_v11 }
0x19ef   :  { %4335 = vtanh.f32 %v3157_v5  ;;  %v3143_v32 = vmul.f32 %v3135_v62, %v5577_v21  ;;  %v3137_v15 = vmul.f32 %v3129_v10, %v3111_v42  ;;  %v3119_v26 = vmul.f32 0.5, %v5577_v21  ;;  %v3694_v62 = vld [vmem:[%s5653_s17 + $0x1] ss:$0 sm:$0xff] }
0x19f0   :  { %v3144_v33 = vmul.f32 %v3136_v58, %v5580_v53  ;;  %v3138_v1 = vmul.f32 %v3130_v61, %v3113_v51  ;;  %4337 = vtanh.f32 %v3158_v13  ;;  %v3121_v38 = vmul.f32 0.5, %v3111_v42 }
0x19f1   :  { %v3145_v43 = vmul.f32 %v3137_v15, %v3111_v42  ;;  %v3151_v17 = vadd.f32 %v3143_v32, %v5577_v21  ;;  %v3120_v7 = vmul.f32 0.5, %v5580_v53  ;;  %v3122_v3 = vmul.f32 0.5, %v3113_v51 }
0x19f2   :  { %v3146_v27 = vmul.f32 %v3138_v1, %v3113_v51  ;;  %v3152_v57 = vadd.f32 %v3144_v33, %v5580_v53 }
0x19f3   :  { %v3153_v44 = vadd.f32 %v3145_v43, %v3111_v42  ;;  %v3159_v18 = vmul.f32 0.7978846, %v3151_v17 }
0x19f4   :  { %v3154_v55 = vadd.f32 %v3146_v27, %v3113_v51  ;;  %v3160_v2 = vmul.f32 0.7978846, %v3152_v57 }
0x19f5   :  { %v3161_v0 = vmul.f32 0.7978846, %v3153_v44  ;;  %4339 = vtanh.f32 %v3159_v18 }
0x19f6   :  { %v3162_v29 = vmul.f32 0.7978846, %v3154_v55  ;;  %4341 = vtanh.f32 %v3160_v2 }
0x19f7   :  { %v4332_v20 = vpop.eup %4331  ;;  %4343 = vtanh.f32 %v3161_v0 }
0x19f8   :  { %v4334_v47 = vpop.eup %4333  ;;  %v3171_v48 = vadd.f32 1.0, %v4332_v20  ;;  %4345 = vtanh.f32 %v3162_v29 }
0x19f9   :  { %v4336_v22 = vpop.eup %4335  ;;  %v3172_v28 = vadd.f32 1.0, %v4334_v47 }
0x19fa   :  { %v4338_v59 = vpop.eup %4337  ;;  %v3173_v4 = vadd.f32 1.0, %v4336_v22  ;;  %v3179_v25 = vmul.f32 %v3171_v48, %v3115_v30 }
0x19fb   :  { %v3174_v14 = vadd.f32 1.0, %v4338_v59  ;;  %v3180_v6 = vmul.f32 %v3172_v28, %v3116_v49 }
0x19fc   :  { %v3181_v34 = vmul.f32 %v3173_v4, %v3117_v40 }
0x19fd   :  { %v3182_v31 = vmul.f32 %v3174_v14, %v3118_v12 }
0x19fe   :  { %v3187_v36 = vpack.c.bf16 %v3181_v34, %v3179_v25 }
0x19ff   :  { %v4340_v37 = vpop.eup %4339  ;;  %v3188_v39 = vpack.c.bf16 %v3182_v31, %v3180_v6 }
0x1a00   :  { %v4342_v45 = vpop.eup %4341  ;;  %v3175_v46 = vadd.f32 1.0, %v4340_v37 }
0x1a01   :  { %v4344_v52 = vpop.eup %4343  ;;  %3360 = vmatprep.mubr.bf16.mxu0 %v3188_v39  ;;  %v3176_v16 = vadd.f32 1.0, %v4342_v45 }
0x1a02   :  { %v4346_v23 = vpop.eup %4345  ;;  %3361 = vmatmul.mubr.bf16.vlgmr.msra.gmra.mrb[44].mxu0 %v3187_v36  ;;  %v3177_v24 = vadd.f32 1.0, %v4344_v52  ;;  %v3183_v8 = vmul.f32 %v3175_v46, %v3119_v26 }
0x1a03   :  { %v3178_v60 = vadd.f32 1.0, %v4346_v23  ;;  %v3184_v54 = vmul.f32 %v3176_v16, %v3120_v7 }
0x1a04   :  { %v3185_v9 = vmul.f32 %v3177_v24, %v3121_v38 }
0x1a05   :  { %v3186_v19 = vmul.f32 %v3178_v60, %v3122_v3 }
0x1a06   :  { %v3189_v41 = vpack.c.bf16 %v3185_v9, %v3183_v8  ;;  %v3711_v8 = vld [vmem:[%s5654_s18] ss:$0 sm:$0xff] }
0x1a07   :  { %v3190_v11 = vpack.c.bf16 %v3186_v19, %v3184_v54  ;;  %v3712_v19 = vld [vmem:[%s5655_s19] ss:$0 sm:$0xff] }
0x1a09   :  { %3368 = vmatprep.mubr.bf16.mxu0 %v3190_v11 }
0x1a0a   :  { %3369 = vmatmul.mubr.bf16.gmra.mrb[48].mxu0 %v3189_v41 }
0x1ad5   :  { %v3843_v5 = vpop.f32.mrb[44].mxu0 }
0x1ad6   :  { %v3844_v21 = vpop.f32.mrb[45].mxu0 }
0x1ad7   :  { %v3845_v42 = vadd.f32 %v3844_v21, %v3843_v5  ;;  %v3846_v10 = vpop.f32.mrb[46].mxu0 }
0x1ad8   :  { %v3847_v58 = vpop.f32.mrb[47].mxu0 }
0x1ad9   :  { %v3363_v53 = vadd.f32 %v3845_v42, %v3694_v62  ;;  %v3848_v51 = vadd.f32 %v3847_v58, %v3846_v10 }
0x1adb   :  { %v3366_v61 = vadd.f32 %v3848_v51, %v3694_v62  ;;  %v3377_v13 = vadd.f32 %v3363_v53, %v5444_v35 }
0x1add   :  { %v3849_v32 = vpop.f32.mrb[48].mxu0  ;;  %v3383_v15 = vsel %vm261_vm0, %v3377_v13, 0.0  ;;  %v3378_v33 = vadd.f32 %v3366_v61, %v5450_v63 }
0x1ade   :  { %3384 = vadd.xlane.f32.xlu0 %v3383_v15  ;;  %v3850_v1 = vpop.f32.mrb[49].mxu0 }
0x1adf   :  { %v3851_v43 = vadd.f32 %v3850_v1, %v3849_v32  ;;  %v3852_v17 = vpop.f32.mrb[50].mxu0  ;;  %v3386_v27 = vsel %vm261_vm0, %v3378_v33, 0.0 }
0x1ae0   :  { %3387 = vadd.xlane.f32.xlu1 %v3386_v27  ;;  %v3853_v57 = vpop.f32.mrb[51].mxu0 }
0x1ae1   :  { %v3371_v44 = vadd.f32 %v3851_v43, %v3694_v62  ;;  %v3854_v18 = vadd.f32 %v3853_v57, %v3852_v17 }
0x1ae3   :  { %v3374_v55 = vadd.f32 %v3854_v18, %v3694_v62  ;;  %v3379_v2 = vadd.f32 %v3371_v44, %v5447_v50 }
0x1ae5   :  { %v3389_v35 = vsel %vm261_vm0, %v3379_v2, 0.0  ;;  %v3380_v0 = vadd.f32 %v3374_v55, %v5457_v56 }
0x1ae6   :  { %3390 = vadd.xlane.f32.xlu0 %v3389_v35 }
0x1ae7   :  { %v3392_v63 = vsel %vm261_vm0, %v3380_v0, 0.0 }
0x1ae8   :  { %3393 = vadd.xlane.f32.xlu1 %v3392_v63 }
0x1b6b   :  { %v3385_v29 = vpop.xlane.xlu0 %3384 }
0x1b6c   :  { %v3395_v20 = vmul.f32 0.015625, %v3385_v29 }
0x1b6d   :  { %v3388_v47 = vpop.xlane.xlu1 %3387 }
0x1b6e   :  { %v3399_v48 = vsub.f32 %v3377_v13, %v3395_v20  ;;  %v3396_v22 = vmul.f32 0.015625, %v3388_v47 }
0x1b70   :  { %v3400_v28 = vsub.f32 %v3378_v33, %v3396_v22  ;;  %v3403_v59 = vmul.f32 %v3399_v48, %v3399_v48 }
0x1b72   :  { %v3407_v30 = vsel %vm261_vm0, %v3403_v59, 0.0  ;;  %v3404_v40 = vmul.f32 %v3400_v28, %v3400_v28 }
0x1b73   :  { %3408 = vadd.xlane.f32.xlu0 %v3407_v30  ;;  %v3391_v50 = vpop.xlane.xlu0 %3390 }
0x1b74   :  { %v3397_v4 = vmul.f32 0.015625, %v3391_v50  ;;  %v3410_v49 = vsel %vm261_vm0, %v3404_v40, 0.0 }
0x1b75   :  { %3411 = vadd.xlane.f32.xlu1 %v3410_v49  ;;  %v3394_v56 = vpop.xlane.xlu1 %3393 }
0x1b76   :  { %v3401_v12 = vsub.f32 %v3379_v2, %v3397_v4  ;;  %v3398_v14 = vmul.f32 0.015625, %v3394_v56 }
0x1b78   :  { %v3402_v25 = vsub.f32 %v3380_v0, %v3398_v14  ;;  %v3405_v34 = vmul.f32 %v3401_v12, %v3401_v12 }
0x1b7a   :  { %v3413_v6 = vsel %vm261_vm0, %v3405_v34, 0.0  ;;  %v3406_v31 = vmul.f32 %v3402_v25, %v3402_v25 }
0x1b7b   :  { %3414 = vadd.xlane.f32.xlu0 %v3413_v6 }
0x1b7c   :  { %v3416_v36 = vsel %vm261_vm0, %v3406_v31, 0.0 }
0x1b7d   :  { %3417 = vadd.xlane.f32.xlu1 %v3416_v36 }
0x1c00   :  { %v3409_v37 = vpop.xlane.xlu0 %3408 }
0x1c01   :  { %v3419_v39 = vmul.f32 0.015625, %v3409_v37 }
0x1c02   :  { %v3412_v45 = vpop.xlane.xlu1 %3411 }
0x1c03   :  { %v3423_v46 = vadd.f32 1e-05, %v3419_v39  ;;  %v3420_v52 = vmul.f32 0.015625, %v3412_v45 }
0x1c05   :  { %4347 = vrsqrt.f32 %v3423_v46  ;;  %v3424_v16 = vadd.f32 1e-05, %v3420_v52 }
0x1c07   :  { %4349 = vrsqrt.f32 %v3424_v16 }
0x1c08   :  { %v3415_v23 = vpop.xlane.xlu0 %3414 }
0x1c09   :  { %v3421_v26 = vmul.f32 0.015625, %v3415_v23 }
0x1c0a   :  { %v3418_v38 = vpop.xlane.xlu1 %3417 }
0x1c0b   :  { %v3425_v24 = vadd.f32 1e-05, %v3421_v26  ;;  %v3422_v7 = vmul.f32 0.015625, %v3418_v38 }
0x1c0d   :  { %4351 = vrsqrt.f32 %v3425_v24  ;;  %v3426_v3 = vadd.f32 1e-05, %v3422_v7 }
0x1c0f   :  { %v4348_v60 = vpop.eup %4347  ;;  %4353 = vrsqrt.f32 %v3426_v3 }
0x1c10   :  { %v3431_v9 = vmul.f32 %v4348_v60, %v3399_v48 }
0x1c11   :  { %v4350_v54 = vpop.eup %4349 }
0x1c12   :  { %v3441_v41 = vmul.f32 %v3711_v8, %v3431_v9  ;;  %v3432_v11 = vmul.f32 %v4350_v54, %v3400_v28 }
0x1c14   :  { %v3451_v5 = vadd.f32 %v3712_v19, %v3441_v41  ;;  %v3442_v62 = vmul.f32 %v3711_v8, %v3432_v11 }
0x1c16   :  { %v3455_v21 = vsel %vm261_vm0, %v3451_v5, 0.0  ;;  %v3452_v42 = vadd.f32 %v3712_v19, %v3442_v62 }
0x1c17   :  { %v4352_v10 = vpop.eup %4351  ;;  %3456 = vadd.xlane.f32.xlu0 %v3455_v21 }
0x1c18   :  { %v3458_v58 = vsel %vm261_vm0, %v3452_v42, 0.0  ;;  %v3433_v53 = vmul.f32 %v4352_v10, %v3401_v12 }
0x1c19   :  { %v4354_v51 = vpop.eup %4353  ;;  %3459 = vadd.xlane.f32.xlu1 %v3458_v58 }
0x1c1a   :  { %v3443_v61 = vmul.f32 %v3711_v8, %v3433_v53  ;;  %v3434_v13 = vmul.f32 %v4354_v51, %v3402_v25 }
0x1c1c   :  { %v3453_v32 = vadd.f32 %v3712_v19, %v3443_v61  ;;  %v3444_v15 = vmul.f32 %v3711_v8, %v3434_v13 }
0x1c1e   :  { %v3461_v33 = vsel %vm261_vm0, %v3453_v32, 0.0  ;;  %v3454_v1 = vadd.f32 %v3712_v19, %v3444_v15 }
0x1c1f   :  { %3462 = vadd.xlane.f32.xlu0 %v3461_v33 }
0x1c20   :  { %v3464_v43 = vsel %vm261_vm0, %v3454_v1, 0.0 }
0x1c21   :  { %3465 = vadd.xlane.f32.xlu1 %v3464_v43 }
0x1ca4   :  { %v3457_v17 = vpop.xlane.xlu0 %3456 }
0x1ca5   :  { %v3467_v27 = vmul.f32 0.015625, %v3457_v17 }
0x1ca6   :  { %v3460_v57 = vpop.xlane.xlu1 %3459 }
0x1ca7   :  { %3472 = vst.msk [vmem:[%s5656_s20] sm:$0xff] %vm3471_vm6, %v3467_v27  ;;  %v3468_v44 = vmul.f32 0.015625, %v3460_v57 }
0x1ca9   :  { %3473 = vst.msk [vmem:[%s5656_s20 + $0x8] sm:$0xff] %vm3471_vm6, %v3468_v44 }
0x1cac   :  { %v3463_v18 = vpop.xlane.xlu0 %3462 }
0x1cad   :  { %v3469_v55 = vmul.f32 0.015625, %v3463_v18 }
0x1cae   :  { %v3466_v2 = vpop.xlane.xlu1 %3465 }
0x1caf   :  { %3474 = vst.msk [vmem:[%s5656_s20 + $0x10] sm:$0xff] %vm3471_vm6, %v3469_v55  ;;  %v3470_v35 = vmul.f32 0.015625, %v3466_v2 }
0x1cb1   :  { %3475 = vst.msk [vmem:[%s5656_s20 + $0x18] sm:$0xff] %vm3471_vm6, %v3470_v35 }

</bundles_post_ra>
